<compile_context>
chip_gen: v7x
topology: tpu7x:2x2x1
jax: 0.10.0
libtpu: 0.0.40
codegen_flags: <defaults>
</compile_context>

<pallas_src>
import functools

import jax
import jax.numpy as jnp
from jax.experimental import pallas as pl
from jax.experimental.pallas import tpu as pltpu

NZ = 100
NGF = 64
EPS = 1e-5
VMEM_LIMIT = 32 << 20          # 32 MiB: plenty here, and safe on v7x (64 MiB)


# ---------------------------------------------------------------------------
# Pallas kernels
# ---------------------------------------------------------------------------
def _matmul_bn_relu_kernel(x_ref, w_ref, b_ref, g_ref, bt_ref, o_ref, acc_ref,
                           *, phases):
    """acc += x @ w over the K grid axis; at the last K step apply bias,
    train-mode BatchNorm (per-channel stats pooled over rows AND the `phases`
    lane-aligned column groups), affine, ReLU, and store (bf16)."""
    k = pl.program_id(1)

    @pl.when(k == 0)
    def _():
        acc_ref[...] = jnp.zeros_like(acc_ref)

    acc_ref[...] += jnp.dot(x_ref[...], w_ref[...],
                            preferred_element_type=jnp.float32)

    @pl.when(k == pl.num_programs(1) - 1)
    def _():
        y = acc_ref[...] + b_ref[...]                    # (M, F) f32
        m, f = y.shape
        c = f // phases
        n_elems = m * phases

        # per-channel mean: sum over rows, then over lane-aligned phase groups
        col_sum = jnp.sum(y, axis=0, keepdims=True)      # (1, F)
        ch_sum = col_sum[:, 0:c]
        for p in range(1, phases):
            ch_sum = ch_sum + col_sum[:, p * c:(p + 1) * c]
        mean_c = ch_sum / n_elems                        # (1, C)
        mean_f = (jnp.concatenate([mean_c] * phases, axis=1)
                  if phases > 1 else mean_c)             # (1, F)

        d = y - mean_f
        col_ss = jnp.sum(d * d, axis=0, keepdims=True)   # (1, F)
        ch_ss = col_ss[:, 0:c]
        for p in range(1, phases):
            ch_ss = ch_ss + col_ss[:, p * c:(p + 1) * c]
        var_c = ch_ss / n_elems                          # biased variance
        inv_c = jax.lax.rsqrt(var_c + EPS)
        inv_f = (jnp.concatenate([inv_c] * phases, axis=1)
                 if phases > 1 else inv_c)

        y_hat = d * inv_f * g_ref[...] + bt_ref[...]
        o_ref[...] = jnp.maximum(y_hat, 0.0).astype(o_ref.dtype)


def _matmul_tanh_kernel(x_ref, w_ref, o_ref):
    y = jnp.dot(x_ref[...], w_ref[...], preferred_element_type=jnp.float32)
    o_ref[...] = jnp.tanh(y)


# ---------------------------------------------------------------------------
# pallas_call wrappers
# ---------------------------------------------------------------------------
def matmul_bn_relu(x, w, b, gamma, beta, *, phases=1, tf=None, tk=None,
                   out_dtype=jnp.bfloat16):
    """Fused (x @ w + b) -> BatchNorm(train) -> ReLU.

    x:(M,K) bf16, w:(K,F) bf16, b/gamma/beta:(1,F) f32.
    BN channels = F // phases, columns packed phase-major; stats pooled over
    all M rows and all `phases` column groups (== PyTorch BN1d/BN2d).
    Grid = (F//tf parallel, K//tk arbitrary) with an f32 VMEM accumulator.
    """
    M, K = x.shape
    F = w.shape[1]
    tf = F if tf is None else tf
    tk = K if tk is None else tk
    assert F % tf == 0 and K % tk == 0
    # BN stats need all rows + all phase groups inside one feature tile.
    assert phases == 1 or tf == F

    kernel = functools.partial(_matmul_bn_relu_kernel, phases=phases)
    return pl.pallas_call(
        kernel,
        out_shape=jax.ShapeDtypeStruct((M, F), out_dtype),
        grid=(F // tf, K // tk),
        in_specs=[
            pl.BlockSpec((M, tk), lambda j, k: (0, k)),
            pl.BlockSpec((tk, tf), lambda j, k: (k, j)),
            pl.BlockSpec((1, tf), lambda j, k: (0, j)),
            pl.BlockSpec((1, tf), lambda j, k: (0, j)),
            pl.BlockSpec((1, tf), lambda j, k: (0, j)),
        ],
        out_specs=pl.BlockSpec((M, tf), lambda j, k: (0, j)),
        scratch_shapes=[pltpu.VMEM((M, tf), jnp.float32)],
        compiler_params=pltpu.CompilerParams(
            dimension_semantics=("parallel", "arbitrary"),
            vmem_limit_bytes=VMEM_LIMIT,
        ),
    )(x, w, b, gamma, beta)


def matmul_tanh(x, w):
    """tanh(x @ w); tiny final layer (Cout packed phase-major, padded lanes)."""
    M, K = x.shape
    F = w.shape[1]
    return pl.pallas_call(
        _matmul_tanh_kernel,
        out_shape=jax.ShapeDtypeStruct((M, F), jnp.float32),
        grid=(1,),
        in_specs=[
            pl.BlockSpec((M, K), lambda i: (0, 0)),
            pl.BlockSpec((K, F), lambda i: (0, 0)),
        ],
        out_specs=pl.BlockSpec((M, F), lambda i: (0, 0)),
        compiler_params=pltpu.CompilerParams(
            dimension_semantics=("arbitrary",),
            vmem_limit_bytes=VMEM_LIMIT,
        ),
    )(x, w)


# ---------------------------------------------------------------------------
# ConvTranspose2d(k=4, s=2, p=1) as phase-packed matmul (no dilation zeros)
# ---------------------------------------------------------------------------
# For output row oh = 2a + r (r = parity), the contributing input rows are
# ih = a-1+dh with dh in {0,1,2}; the kernel tap used is:
#   r=0: dh=0 -> kh=3, dh=1 -> kh=1, dh=2 -> (none)
#   r=1: dh=0 -> (none), dh=1 -> kh=2, dh=2 -> kh=0
# (same mapping for columns).  So each parity phase is a 2x2 sub-conv; all 4
# phases read from the same dense 3x3 patch of the un-dilated input.
_KH = ((3, 1, -1), (-1, 2, 0))


def pack_convt_weight(w_t):
    """PyTorch ConvTranspose2d weight (Cin,Cout,4,4) -> (9*Cin, 4*Cout).
    Row = tap*Cin + ci with tap = 3*dh + dw; col = (2*r + c)*Cout + co."""
    cin, cout = w_t.shape[0], w_t.shape[1]
    zeros = jnp.zeros((cin, cout), w_t.dtype)
    cols = []
    for r in (0, 1):
        for c in (0, 1):
            taps = []
            for dh in range(3):
                for dw in range(3):
                    kh, kw = _KH[r][dh], _KH[c][dw]
                    taps.append(zeros if (kh < 0 or kw < 0)
                                else w_t[:, :, kh, kw])
            cols.append(jnp.concatenate(taps, axis=0))       # (9*Cin, Cout)
    return jnp.concatenate(cols, axis=1)                     # (9*Cin, 4*Cout)


def extract_patches_3x3(x_nhwc):
    """(N,H,W,C) -> (N*H*W, 9*C) dense 3x3 same-padded patches, tap-major.
    Static slices + concat only — no gather, no zero-dilation."""
    n, h, w, c = x_nhwc.shape
    xp = jnp.pad(x_nhwc, ((0, 0), (1, 1), (1, 1), (0, 0)))
    taps = [xp[:, dh:dh + h, dw:dw + w, :]
            for dh in range(3) for dw in range(3)]
    return jnp.concatenate(taps, axis=-1).reshape(n * h * w, 9 * c)


# ---------------------------------------------------------------------------
# Parameters
# ---------------------------------------------------------------------------
def init_params(key):
    k1, k2, k3, k4 = jax.random.split(key, 4)
    feat = NGF * 4 * 7 * 7                                   # 12544
    return {
        "w_lin": 0.02 * jax.random.normal(k1, (NZ, feat), jnp.float32),
        "b_lin": 0.02 * jax.random.normal(k2, (feat,), jnp.float32),
        "g1": jnp.ones((feat,), jnp.float32),
        "beta1": jnp.zeros((feat,), jnp.float32),
        "w_ct1": 0.02 * jax.random.normal(k3, (NGF * 4, NGF * 2, 4, 4),
                                          jnp.float32),
        "g2": jnp.ones((NGF * 2,), jnp.float32),
        "beta2": jnp.zeros((NGF * 2,), jnp.float32),
        "w_ct2": 0.02 * jax.random.normal(k4, (NGF * 2, 1, 4, 4), jnp.float32),
    }


def prepare_params(params):
    """Hoisted, one-time weight packing / padding / casting (out of the
    per-forward path)."""
    feat = NGF * 4 * 7 * 7
    c2 = NGF * 2
    w_lin = jnp.pad(params["w_lin"], ((0, 128 - NZ), (0, 0)))    # K 100 -> 128
    w1 = pack_convt_weight(params["w_ct1"])                      # (2304, 512)
    w2 = pack_convt_weight(params["w_ct2"])                      # (1152, 4)
    w2 = jnp.pad(w2, ((0, 0), (0, 128 - 4)))                     # lane-dense
    return {
        "w_lin": w_lin.astype(jnp.bfloat16),
        "b_lin": params["b_lin"].reshape(1, feat).astype(jnp.float32),
        "g1": params["g1"].reshape(1, feat).astype(jnp.float32),
        "beta1": params["beta1"].reshape(1, feat).astype(jnp.float32),
        "w1": w1.astype(jnp.bfloat16),
        "zero2": jnp.zeros((1, 4 * c2), jnp.float32),            # bias=False
        "g2": jnp.tile(params["g2"], 4).reshape(1, 4 * c2).astype(jnp.float32),
        "beta2": jnp.tile(params["beta2"], 4).reshape(1, 4 * c2)
                    .astype(jnp.float32),
        "w2": w2.astype(jnp.bfloat16),
    }


# ---------------------------------------------------------------------------
# Generator forward
# ---------------------------------------------------------------------------
@jax.jit
def generator_forward(prep, z):
    N = z.shape[0]
    c1, c2 = NGF * 4, NGF * 2

    # --- Linear(100->12544) + BatchNorm1d + ReLU ---------------------------
    z_p = jnp.pad(z, ((0, 0), (0, 128 - NZ))).astype(jnp.bfloat16)
    h = matmul_bn_relu(z_p, prep["w_lin"], prep["b_lin"], prep["g1"],
                       prep["beta1"], phases=1, tf=6272)         # (N,12544) bf16

    # --- Unflatten -> NHWC --------------------------------------------------
    h = h.reshape(N, c1, 7, 7).transpose(0, 2, 3, 1)             # (N,7,7,256)

    # --- ConvTranspose2d(256->128) + BatchNorm2d + ReLU ---------------------
    p1 = extract_patches_3x3(h)                                  # (N*49, 2304)
    y1 = matmul_bn_relu(p1, prep["w1"], prep["zero2"], prep["g2"],
                        prep["beta2"], phases=4, tk=1152)        # (N*49, 512)
    # unpack phases: col = (2r + c)*128 + co  ->  (N,14,14,128) NHWC
    h = y1.reshape(N, 7, 7, 2, 2, c2).transpose(0, 1, 3, 2, 4, 5)
    h = h.reshape(N, 14, 14, c2)

    # --- ConvTranspose2d(128->1) + Tanh --------------------------------------
    p2 = extract_patches_3x3(h)                                  # (N*196, 1152)
    y2 = matmul_tanh(p2, prep["w2"])                             # (N*196, 128)
    img = y2[:, :4].reshape(N, 14, 14, 2, 2).transpose(0, 1, 3, 2, 4)
    return img.reshape(N, 28, 28)[:, None, :, :]                 # (N,1,28,28)


if __name__ == "__main__":
    key = jax.random.PRNGKey(0)
    pkey, zkey = jax.random.split(key)
    params = init_params(pkey)
    prep = prepare_params(params)

    batch = 2
    z = jax.random.normal(zkey, (batch, NZ), jnp.float32)        # input: (2, 100)

    out = generator_forward(prep, z)
    out = jax.block_until_ready(out)
    assert out.shape == (batch, 1, 28, 28), out.shape
    assert bool(jnp.all(jnp.isfinite(out)))
    assert bool(jnp.all(jnp.abs(out) <= 1.0))                    # tanh range
    print("KERNEL_OK")
</pallas_src>

<mosaic_0001>
module attributes {stable_mosaic.version = 11 : i64} {
  func.func @_matmul_bn_relu_kernel(%arg0: i32, %arg1: i32, %arg2: memref<2x128xbf16, #tpu.memory_space<vmem>>, %arg3: memref<128x6272xbf16, #tpu.memory_space<vmem>>, %arg4: memref<1x6272xf32, #tpu.memory_space<vmem>>, %arg5: memref<1x6272xf32, #tpu.memory_space<vmem>>, %arg6: memref<1x6272xf32, #tpu.memory_space<vmem>>, %arg7: memref<2x6272xbf16, #tpu.memory_space<vmem>>, %arg8: memref<2x6272xf32, #tpu.memory_space<vmem>>) attributes {dimension_semantics = [#tpu.dimension_semantics<parallel>, #tpu.dimension_semantics<arbitrary>], iteration_bounds = array<i64: 2, 1>, scalar_prefetch = 0 : i64, scratch_operands = 1 : i64, tpu.core_type = #tpu.core_type<tc>, window_params = [{transform_indices = @transform_0, window_bounds = array<i64: 2, 128>}, {transform_indices = @transform_1, window_bounds = array<i64: 128, 6272>}, {transform_indices = @transform_2, window_bounds = array<i64: 1, 6272>}, {transform_indices = @transform_3, window_bounds = array<i64: 1, 6272>}, {transform_indices = @transform_4, window_bounds = array<i64: 1, 6272>}, {transform_indices = @transform_5, window_bounds = array<i64: 2, 6272>}]} {
    %c0_i32 = arith.constant 0 : i32
    %0 = arith.cmpi eq, %arg1, %c0_i32 : i32
    %1 = arith.extui %0 : i1 to i32
    %c0_i32_0 = arith.constant 0 : i32
    %2 = arith.cmpi ne, %1, %c0_i32_0 : i32
    scf.if %2 {
      %cst_10 = arith.constant 0.000000e+00 : f32
      %12 = vector.broadcast %cst_10 : f32 to vector<2x6272xf32>
      %c0_11 = arith.constant 0 : index
      %c0_12 = arith.constant 0 : index
      %13 = vector.load %arg8[%c0_11, %c0_12] : memref<2x6272xf32, #tpu.memory_space<vmem>>, vector<2x6272xf32>
      tpu.vector_store %arg8[%c0_11, %c0_12], %12 {strides = array<i32>} : memref<2x6272xf32, #tpu.memory_space<vmem>>, vector<2x6272xf32>,
    } else {
    }
    %c0 = arith.constant 0 : index
    %c0_1 = arith.constant 0 : index
    %3 = vector.load %arg8[%c0, %c0_1] : memref<2x6272xf32, #tpu.memory_space<vmem>>, vector<2x6272xf32>
    %c0_2 = arith.constant 0 : index
    %c0_3 = arith.constant 0 : index
    %4 = vector.load %arg2[%c0_2, %c0_3] : memref<2x128xbf16, #tpu.memory_space<vmem>>, vector<2x128xbf16>
    %c0_4 = arith.constant 0 : index
    %c0_5 = arith.constant 0 : index
    %5 = vector.load %arg3[%c0_4, %c0_5] : memref<128x6272xbf16, #tpu.memory_space<vmem>>, vector<128x6272xbf16>
    %cst = arith.constant dense<0.000000e+00> : vector<2x6272xf32>
    %6 = tpu.matmul %4, %5, %cst {dimension_numbers = #tpu.dot_dimension_numbers<[1], [0], [0], [1], [0, 0, 1, 1], [], []>} : vector<2x128xbf16>, vector<128x6272xbf16>, vector<2x6272xf32> -> vector<2x6272xf32>
    %7 = arith.addf %3, %6 : vector<2x6272xf32>
    %c0_6 = arith.constant 0 : index
    %c0_7 = arith.constant 0 : index
    %8 = vector.load %arg8[%c0_6, %c0_7] : memref<2x6272xf32, #tpu.memory_space<vmem>>, vector<2x6272xf32>
    tpu.vector_store %arg8[%c0_6, %c0_7], %7 {strides = array<i32>} : memref<2x6272xf32, #tpu.memory_space<vmem>>, vector<2x6272xf32>,
    %c0_i32_8 = arith.constant 0 : i32
    %9 = arith.cmpi eq, %arg1, %c0_i32_8 : i32
    %10 = arith.extui %9 : i1 to i32
    %c0_i32_9 = arith.constant 0 : i32
    %11 = arith.cmpi ne, %10, %c0_i32_9 : i32
    scf.if %11 {
      %c0_10 = arith.constant 0 : index
      %c0_11 = arith.constant 0 : index
      %12 = vector.load %arg8[%c0_10, %c0_11] : memref<2x6272xf32, #tpu.memory_space<vmem>>, vector<2x6272xf32>
      %c0_12 = arith.constant 0 : index
      %c0_13 = arith.constant 0 : index
      %13 = vector.load %arg4[%c0_12, %c0_13] : memref<1x6272xf32, #tpu.memory_space<vmem>>, vector<1x6272xf32>
      %14 = vector.broadcast %13 : vector<1x6272xf32> to vector<2x6272xf32>
      %15 = arith.addf %12, %14 : vector<2x6272xf32>
      %cst_14 = arith.constant dense<0.000000e+00> : vector<6272xf32>
      %16 = vector.multi_reduction <add>, %15, %cst_14 [0] : vector<2x6272xf32> to vector<6272xf32>
      %17 = vector.shape_cast %16 : vector<6272xf32> to vector<1x6272xf32>
      %cst_15 = arith.constant 2.000000e+00 : f32
      %18 = vector.broadcast %cst_15 : f32 to vector<1x6272xf32>
      %19 = arith.divf %17, %18 : vector<1x6272xf32>
      %20 = vector.broadcast %19 : vector<1x6272xf32> to vector<2x6272xf32>
      %21 = arith.subf %15, %20 : vector<2x6272xf32>
      %22 = arith.mulf %21, %21 : vector<2x6272xf32>
      %cst_16 = arith.constant dense<0.000000e+00> : vector<6272xf32>
      %23 = vector.multi_reduction <add>, %22, %cst_16 [0] : vector<2x6272xf32> to vector<6272xf32>
      %24 = vector.shape_cast %23 : vector<6272xf32> to vector<1x6272xf32>
      %cst_17 = arith.constant 2.000000e+00 : f32
      %25 = vector.broadcast %cst_17 : f32 to vector<1x6272xf32>
      %26 = arith.divf %24, %25 : vector<1x6272xf32>
      %cst_18 = arith.constant 9.99999974E-6 : f32
      %27 = vector.broadcast %cst_18 : f32 to vector<1x6272xf32>
      %28 = arith.addf %26, %27 : vector<1x6272xf32>
      %29 = math.rsqrt %28 : vector<1x6272xf32>
      %30 = vector.broadcast %29 : vector<1x6272xf32> to vector<2x6272xf32>
      %31 = arith.mulf %21, %30 : vector<2x6272xf32>
      %c0_19 = arith.constant 0 : index
      %c0_20 = arith.constant 0 : index
      %32 = vector.load %arg5[%c0_19, %c0_20] : memref<1x6272xf32, #tpu.memory_space<vmem>>, vector<1x6272xf32>
      %33 = vector.broadcast %32 : vector<1x6272xf32> to vector<2x6272xf32>
      %34 = arith.mulf %31, %33 : vector<2x6272xf32>
      %c0_21 = arith.constant 0 : index
      %c0_22 = arith.constant 0 : index
      %35 = vector.load %arg6[%c0_21, %c0_22] : memref<1x6272xf32, #tpu.memory_space<vmem>>, vector<1x6272xf32>
      %36 = vector.broadcast %35 : vector<1x6272xf32> to vector<2x6272xf32>
      %37 = arith.addf %34, %36 : vector<2x6272xf32>
      %cst_23 = arith.constant 0.000000e+00 : f32
      %38 = vector.broadcast %cst_23 : f32 to vector<2x6272xf32>
      %39 = arith.maximumf %37, %38 : vector<2x6272xf32>
      %40 = arith.truncf %39 : vector<2x6272xf32> to vector<2x6272xbf16>
      %c0_24 = arith.constant 0 : index
      %c0_25 = arith.constant 0 : index
      %41 = vector.load %arg7[%c0_24, %c0_25] : memref<2x6272xbf16, #tpu.memory_space<vmem>>, vector<2x6272xbf16>
      tpu.vector_store %arg7[%c0_24, %c0_25], %40 {strides = array<i32>} : memref<2x6272xbf16, #tpu.memory_space<vmem>>, vector<2x6272xbf16>,
    } else {
    }
    return
  }
  func.func @transform_0(%arg0: i32, %arg1: i32) -> (i32, i32) {
    %c0_i32 = arith.constant 0 : i32
    %c0_i32_0 = arith.constant 0 : i32
    return %c0_i32, %arg1 : i32, i32
  }
  func.func @transform_1(%arg0: i32, %arg1: i32) -> (i32, i32) {
    %c0_i32 = arith.constant 0 : i32
    return %arg1, %arg0 : i32, i32
  }
  func.func @transform_2(%arg0: i32, %arg1: i32) -> (i32, i32) {
    %c0_i32 = arith.constant 0 : i32
    %c0_i32_0 = arith.constant 0 : i32
    return %c0_i32, %arg0 : i32, i32
  }
  func.func @transform_3(%arg0: i32, %arg1: i32) -> (i32, i32) {
    %c0_i32 = arith.constant 0 : i32
    %c0_i32_0 = arith.constant 0 : i32
    return %c0_i32, %arg0 : i32, i32
  }
  func.func @transform_4(%arg0: i32, %arg1: i32) -> (i32, i32) {
    %c0_i32 = arith.constant 0 : i32
    %c0_i32_0 = arith.constant 0 : i32
    return %c0_i32, %arg0 : i32, i32
  }
  func.func @transform_5(%arg0: i32, %arg1: i32) -> (i32, i32) {
    %c0_i32 = arith.constant 0 : i32
    %c0_i32_0 = arith.constant 0 : i32
    return %c0_i32, %arg0 : i32, i32
  }
}

module attributes {stable_mosaic.version = 11 : i64} {
  func.func @_matmul_bn_relu_kernel(%arg0: i32, %arg1: i32, %arg2: memref<98x1152xbf16, #tpu.memory_space<vmem>>, %arg3: memref<1152x512xbf16, #tpu.memory_space<vmem>>, %arg4: memref<1x512xf32, #tpu.memory_space<vmem>>, %arg5: memref<1x512xf32, #tpu.memory_space<vmem>>, %arg6: memref<1x512xf32, #tpu.memory_space<vmem>>, %arg7: memref<98x512xbf16, #tpu.memory_space<vmem>>, %arg8: memref<98x512xf32, #tpu.memory_space<vmem>>) attributes {dimension_semantics = [#tpu.dimension_semantics<parallel>, #tpu.dimension_semantics<arbitrary>], iteration_bounds = array<i64: 1, 2>, scalar_prefetch = 0 : i64, scratch_operands = 1 : i64, tpu.core_type = #tpu.core_type<tc>, window_params = [{transform_indices = @transform_0, window_bounds = array<i64: 98, 1152>}, {transform_indices = @transform_1, window_bounds = array<i64: 1152, 512>}, {transform_indices = @transform_2, window_bounds = array<i64: 1, 512>}, {transform_indices = @transform_3, window_bounds = array<i64: 1, 512>}, {transform_indices = @transform_4, window_bounds = array<i64: 1, 512>}, {transform_indices = @transform_5, window_bounds = array<i64: 98, 512>}]} {
    %c0_i32 = arith.constant 0 : i32
    %0 = arith.cmpi eq, %arg1, %c0_i32 : i32
    %1 = arith.extui %0 : i1 to i32
    %c0_i32_0 = arith.constant 0 : i32
    %2 = arith.cmpi ne, %1, %c0_i32_0 : i32
    scf.if %2 {
      %cst_9 = arith.constant 0.000000e+00 : f32
      %12 = vector.broadcast %cst_9 : f32 to vector<98x512xf32>
      %c0_10 = arith.constant 0 : index
      %c0_11 = arith.constant 0 : index
      %13 = vector.load %arg8[%c0_10, %c0_11] : memref<98x512xf32, #tpu.memory_space<vmem>>, vector<98x512xf32>
      tpu.vector_store %arg8[%c0_10, %c0_11], %12 {strides = array<i32>} : memref<98x512xf32, #tpu.memory_space<vmem>>, vector<98x512xf32>,
    } else {
    }
    %c0 = arith.constant 0 : index
    %c0_1 = arith.constant 0 : index
    %3 = vector.load %arg8[%c0, %c0_1] : memref<98x512xf32, #tpu.memory_space<vmem>>, vector<98x512xf32>
    %c0_2 = arith.constant 0 : index
    %c0_3 = arith.constant 0 : index
    %4 = vector.load %arg2[%c0_2, %c0_3] : memref<98x1152xbf16, #tpu.memory_space<vmem>>, vector<98x1152xbf16>
    %c0_4 = arith.constant 0 : index
    %c0_5 = arith.constant 0 : index
    %5 = vector.load %arg3[%c0_4, %c0_5] : memref<1152x512xbf16, #tpu.memory_space<vmem>>, vector<1152x512xbf16>
    %cst = arith.constant dense<0.000000e+00> : vector<98x512xf32>
    %6 = tpu.matmul %4, %5, %cst {dimension_numbers = #tpu.dot_dimension_numbers<[1], [0], [0], [1], [0, 0, 1, 1], [], []>} : vector<98x1152xbf16>, vector<1152x512xbf16>, vector<98x512xf32> -> vector<98x512xf32>
    %7 = arith.addf %3, %6 : vector<98x512xf32>
    %c0_6 = arith.constant 0 : index
    %c0_7 = arith.constant 0 : index
    %8 = vector.load %arg8[%c0_6, %c0_7] : memref<98x512xf32, #tpu.memory_space<vmem>>, vector<98x512xf32>
    tpu.vector_store %arg8[%c0_6, %c0_7], %7 {strides = array<i32>} : memref<98x512xf32, #tpu.memory_space<vmem>>, vector<98x512xf32>,
    %c1_i32 = arith.constant 1 : i32
    %9 = arith.cmpi eq, %arg1, %c1_i32 : i32
    %10 = arith.extui %9 : i1 to i32
    %c0_i32_8 = arith.constant 0 : i32
    %11 = arith.cmpi ne, %10, %c0_i32_8 : i32
    scf.if %11 {
      %c0_9 = arith.constant 0 : index
      %c0_10 = arith.constant 0 : index
      %12 = vector.load %arg8[%c0_9, %c0_10] : memref<98x512xf32, #tpu.memory_space<vmem>>, vector<98x512xf32>
      %c0_11 = arith.constant 0 : index
      %c0_12 = arith.constant 0 : index
      %13 = vector.load %arg4[%c0_11, %c0_12] : memref<1x512xf32, #tpu.memory_space<vmem>>, vector<1x512xf32>
      %14 = vector.broadcast %13 : vector<1x512xf32> to vector<98x512xf32>
      %15 = arith.addf %12, %14 : vector<98x512xf32>
      %cst_13 = arith.constant dense<0.000000e+00> : vector<512xf32>
      %16 = vector.multi_reduction <add>, %15, %cst_13 [0] : vector<98x512xf32> to vector<512xf32>
      %17 = vector.shape_cast %16 : vector<512xf32> to vector<1x512xf32>
      %18 = vector.extract_strided_slice %17 {offsets = [0, 0], sizes = [1, 128], strides = [1, 1]} : vector<1x512xf32> to vector<1x128xf32>
      %19 = vector.extract_strided_slice %17 {offsets = [0, 128], sizes = [1, 128], strides = [1, 1]} : vector<1x512xf32> to vector<1x128xf32>
      %20 = arith.addf %18, %19 : vector<1x128xf32>
      %21 = vector.extract_strided_slice %17 {offsets = [0, 256], sizes = [1, 128], strides = [1, 1]} : vector<1x512xf32> to vector<1x128xf32>
      %22 = arith.addf %20, %21 : vector<1x128xf32>
      %23 = vector.extract_strided_slice %17 {offsets = [0, 384], sizes = [1, 128], strides = [1, 1]} : vector<1x512xf32> to vector<1x128xf32>
      %24 = arith.addf %22, %23 : vector<1x128xf32>
      %cst_14 = arith.constant 3.920000e+02 : f32
      %25 = vector.broadcast %cst_14 : f32 to vector<1x128xf32>
      %26 = arith.divf %24, %25 : vector<1x128xf32>
      %27 = tpu.concatenate %26, %26, %26, %26 in 1 : vector<1x128xf32>, vector<1x128xf32>, vector<1x128xf32>, vector<1x128xf32> -> vector<1x512xf32>
      %28 = vector.broadcast %27 : vector<1x512xf32> to vector<98x512xf32>
      %29 = arith.subf %15, %28 : vector<98x512xf32>
      %30 = arith.mulf %29, %29 : vector<98x512xf32>
      %cst_15 = arith.constant dense<0.000000e+00> : vector<512xf32>
      %31 = vector.multi_reduction <add>, %30, %cst_15 [0] : vector<98x512xf32> to vector<512xf32>
      %32 = vector.shape_cast %31 : vector<512xf32> to vector<1x512xf32>
      %33 = vector.extract_strided_slice %32 {offsets = [0, 0], sizes = [1, 128], strides = [1, 1]} : vector<1x512xf32> to vector<1x128xf32>
      %34 = vector.extract_strided_slice %32 {offsets = [0, 128], sizes = [1, 128], strides = [1, 1]} : vector<1x512xf32> to vector<1x128xf32>
      %35 = arith.addf %33, %34 : vector<1x128xf32>
      %36 = vector.extract_strided_slice %32 {offsets = [0, 256], sizes = [1, 128], strides = [1, 1]} : vector<1x512xf32> to vector<1x128xf32>
      %37 = arith.addf %35, %36 : vector<1x128xf32>
      %38 = vector.extract_strided_slice %32 {offsets = [0, 384], sizes = [1, 128], strides = [1, 1]} : vector<1x512xf32> to vector<1x128xf32>
      %39 = arith.addf %37, %38 : vector<1x128xf32>
      %cst_16 = arith.constant 3.920000e+02 : f32
      %40 = vector.broadcast %cst_16 : f32 to vector<1x128xf32>
      %41 = arith.divf %39, %40 : vector<1x128xf32>
      %cst_17 = arith.constant 9.99999974E-6 : f32
      %42 = vector.broadcast %cst_17 : f32 to vector<1x128xf32>
      %43 = arith.addf %41, %42 : vector<1x128xf32>
      %44 = math.rsqrt %43 : vector<1x128xf32>
      %45 = tpu.concatenate %44, %44, %44, %44 in 1 : vector<1x128xf32>, vector<1x128xf32>, vector<1x128xf32>, vector<1x128xf32> -> vector<1x512xf32>
      %46 = vector.broadcast %45 : vector<1x512xf32> to vector<98x512xf32>
      %47 = arith.mulf %29, %46 : vector<98x512xf32>
      %c0_18 = arith.constant 0 : index
      %c0_19 = arith.constant 0 : index
      %48 = vector.load %arg5[%c0_18, %c0_19] : memref<1x512xf32, #tpu.memory_space<vmem>>, vector<1x512xf32>
      %49 = vector.broadcast %48 : vector<1x512xf32> to vector<98x512xf32>
      %50 = arith.mulf %47, %49 : vector<98x512xf32>
      %c0_20 = arith.constant 0 : index
      %c0_21 = arith.constant 0 : index
      %51 = vector.load %arg6[%c0_20, %c0_21] : memref<1x512xf32, #tpu.memory_space<vmem>>, vector<1x512xf32>
      %52 = vector.broadcast %51 : vector<1x512xf32> to vector<98x512xf32>
      %53 = arith.addf %50, %52 : vector<98x512xf32>
      %cst_22 = arith.constant 0.000000e+00 : f32
      %54 = vector.broadcast %cst_22 : f32 to vector<98x512xf32>
      %55 = arith.maximumf %53, %54 : vector<98x512xf32>
      %56 = arith.truncf %55 : vector<98x512xf32> to vector<98x512xbf16>
      %c0_23 = arith.constant 0 : index
      %c0_24 = arith.constant 0 : index
      %57 = vector.load %arg7[%c0_23, %c0_24] : memref<98x512xbf16, #tpu.memory_space<vmem>>, vector<98x512xbf16>
      tpu.vector_store %arg7[%c0_23, %c0_24], %56 {strides = array<i32>} : memref<98x512xbf16, #tpu.memory_space<vmem>>, vector<98x512xbf16>,
    } else {
    }
    return
  }
  func.func @transform_0(%arg0: i32, %arg1: i32) -> (i32, i32) {
    %c0_i32 = arith.constant 0 : i32
    %c0_i32_0 = arith.constant 0 : i32
    return %c0_i32, %arg1 : i32, i32
  }
  func.func @transform_1(%arg0: i32, %arg1: i32) -> (i32, i32) {
    %c0_i32 = arith.constant 0 : i32
    return %arg1, %arg0 : i32, i32
  }
  func.func @transform_2(%arg0: i32, %arg1: i32) -> (i32, i32) {
    %c0_i32 = arith.constant 0 : i32
    %c0_i32_0 = arith.constant 0 : i32
    return %c0_i32, %arg0 : i32, i32
  }
  func.func @transform_3(%arg0: i32, %arg1: i32) -> (i32, i32) {
    %c0_i32 = arith.constant 0 : i32
    %c0_i32_0 = arith.constant 0 : i32
    return %c0_i32, %arg0 : i32, i32
  }
  func.func @transform_4(%arg0: i32, %arg1: i32) -> (i32, i32) {
    %c0_i32 = arith.constant 0 : i32
    %c0_i32_0 = arith.constant 0 : i32
    return %c0_i32, %arg0 : i32, i32
  }
  func.func @transform_5(%arg0: i32, %arg1: i32) -> (i32, i32) {
    %c0_i32 = arith.constant 0 : i32
    %c0_i32_0 = arith.constant 0 : i32
    return %c0_i32, %arg0 : i32, i32
  }
}

module attributes {stable_mosaic.version = 11 : i64} {
  func.func @_matmul_tanh_kernel(%arg0: i32, %arg1: memref<392x1152xbf16, #tpu.memory_space<vmem>>, %arg2: memref<1152x128xbf16, #tpu.memory_space<vmem>>, %arg3: memref<392x128xf32, #tpu.memory_space<vmem>>) attributes {dimension_semantics = [#tpu.dimension_semantics<arbitrary>], iteration_bounds = array<i64: 1>, scalar_prefetch = 0 : i64, scratch_operands = 0 : i64, tpu.core_type = #tpu.core_type<tc>, window_params = [{pipeline_mode = #tpu.pipeline_mode<synchronous>, transform_indices = @transform_0, window_bounds = array<i64: 392, 1152>}, {pipeline_mode = #tpu.pipeline_mode<synchronous>, transform_indices = @transform_1, window_bounds = array<i64: 1152, 128>}, {pipeline_mode = #tpu.pipeline_mode<synchronous>, transform_indices = @transform_2, window_bounds = array<i64: 392, 128>}]} {
    %c0 = arith.constant 0 : index
    %c0_0 = arith.constant 0 : index
    %0 = vector.load %arg1[%c0, %c0_0] : memref<392x1152xbf16, #tpu.memory_space<vmem>>, vector<392x1152xbf16>
    %c0_1 = arith.constant 0 : index
    %c0_2 = arith.constant 0 : index
    %1 = vector.load %arg2[%c0_1, %c0_2] : memref<1152x128xbf16, #tpu.memory_space<vmem>>, vector<1152x128xbf16>
    %cst = arith.constant dense<0.000000e+00> : vector<392x128xf32>
    %2 = tpu.matmul %0, %1, %cst {dimension_numbers = #tpu.dot_dimension_numbers<[1], [0], [0], [1], [0, 0, 1, 1], [], []>} : vector<392x1152xbf16>, vector<1152x128xbf16>, vector<392x128xf32> -> vector<392x128xf32>
    %3 = math.tanh %2 : vector<392x128xf32>
    %c0_3 = arith.constant 0 : index
    %c0_4 = arith.constant 0 : index
    %4 = vector.load %arg3[%c0_3, %c0_4] : memref<392x128xf32, #tpu.memory_space<vmem>>, vector<392x128xf32>
    tpu.vector_store %arg3[%c0_3, %c0_4], %3 {strides = array<i32>} : memref<392x128xf32, #tpu.memory_space<vmem>>, vector<392x128xf32>,
    return
  }
  func.func @transform_0(%arg0: i32) -> (i32, i32) {
    %c0_i32 = arith.constant 0 : i32
    %c0_i32_0 = arith.constant 0 : i32
    %c0_i32_1 = arith.constant 0 : i32
    return %c0_i32, %c0_i32_0 : i32, i32
  }
  func.func @transform_1(%arg0: i32) -> (i32, i32) {
    %c0_i32 = arith.constant 0 : i32
    %c0_i32_0 = arith.constant 0 : i32
    %c0_i32_1 = arith.constant 0 : i32
    return %c0_i32, %c0_i32_0 : i32, i32
  }
  func.func @transform_2(%arg0: i32) -> (i32, i32) {
    %c0_i32 = arith.constant 0 : i32
    %c0_i32_0 = arith.constant 0 : i32
    %c0_i32_1 = arith.constant 0 : i32
    return %c0_i32, %c0_i32_0 : i32, i32
  }
}

</mosaic_0001>

<bundles_post_ra>
// kernel: generator_forward.3
= control target key start
LH: loop header
LB: loop body
LE: loop exit
PB: predicated region body
PF: predicated region fallthrough
CT: control target
= control target key end

     0   :  { %s11842_s0 = inlined_call_operand.vmem [shape: bf16[2,128], index: 0, kind: input, shape index: {}]   ;;  %s11843_s1 = inlined_call_operand.hbm [shape: bf16[128,12544], index: 1, kind: input, shape index: {}]   ;;  %s11844_s2 = inlined_call_operand.hbm [shape: f32[1,12544], index: 2, kind: input, shape index: {}]   ;;  %s11845_s3 = inlined_call_operand.hbm [shape: f32[1,12544], index: 3, kind: input, shape index: {}]   ;;  %s11846_s4 = inlined_call_operand.hbm [shape: f32[1,12544], index: 4, kind: input, shape index: {}]   ;;  %s11847_s5 = inlined_call_operand.vmem [shape: bf16[2,12544], index: 5, kind: output, shape index: {}]  }
   0x1   :  { %11854 = sst [smem:[#allocation15_spill]] %s11843_s1 }
   0x2   :  { %11855 = sst [smem:[#allocation16_spill]] %s11844_s2 }
   0x3   :  { %10 = vsyncpa [#allocation4], 0 }
   0x4   :  { %12 = vsyncpa [#allocation4 + $0x1], 0 }
   0x5   :  { %13 = vsyncpa [#allocation6], 0 }
   0x6   :  { %15 = vsyncpa [#allocation6 + $0x1], 0 }
   0x7   :  { %16 = vsyncpa [#allocation9], 0 }
   0x8   :  { %18 = vsyncpa [#allocation9 + $0x1], 0  ;;  %s9799_s18 = smov 0   ;;  %s9801_s19 = smov 0  }
   0x9   :  { %s9803_s20 = smov 0   ;;  %s9805_s21 = smov 0  }
   0xa   :  { %s9807_s22 = smov 0   ;;  %s9809_s23 = smov 0  }
   0xb LB: > { %11856 = sst [smem:[#allocation13_spill]] %s9751_s22  ;;  %s11849_s24 = sadd.s32 4294967295, %s9755_s23   ;;  %s9755_s23 = sphi %s9809_s23, %s24_s23   ;;  %s9751_s22 = sphi %s9807_s22, %s11892_s22   ;;  %s9747_s21 = sphi %s9805_s21, %s11891_s21   ;;  %s9743_s20 = sphi %s9803_s20, %s11895_s20   ;;  %s9739_s19 = sphi %s9801_s19, %s11894_s19   ;;  %s9735_s18 = sphi %s9799_s18, %s11893_s18  }
   0xc   : > { %s36_s25 = sadd.s32 1, %s9751_s22  ;;  %s71_s26 = sadd.s32 1, %s9743_s20 }
   0xd   : > { %p38_p0 = scmp.ge.s32.totalorder %s36_s25, 2  ;;  %p78_p1 = scmp.ne.s32.totalorder %s9743_s20, %s9739_s19 }
   0xe   : > { %p79_p2 = scmp.eq.s32.totalorder %s9755_s23, 0  ;;  %p84_p4 = scmp.ne.s32.totalorder %s9739_s19, %s9735_s18 }
   0xf   : > { %s11897_s25 = smov (%p38_p0, %s36_s25), 0  ;;  %p85_p5 = scmp.eq.s32.totalorder %s11849_s24, 0 }
  0x10   : > { %11857 = sst [smem:[#allocation14_spill]] %s11897_s25  ;;  %p80_p3 = por %p79_p2, %p78_p1 }
  0x11   : > { %s67_s27 = ssub.s32 %s9751_s22, %s11897_s25  ;;  %p9840_p7 = por %p85_p5, %p84_p4 }
  0x12   : > { %p69_p6 = scmp.eq.s32.totalorder %s67_s27, 0  ;;  %p8835_p8 = scmp.lt.s32.totalorder %s9755_s23, 2 }
  0x13   : > { %s11858_s28 = scalar_select %p9840_p7, 1, 0 }
  0x14   : > { %s9846_s29 = scalar_select %p69_p6, %s9743_s20, %s71_s26  }
  0x15   : > { %s9849_s30 = sand.u32 1, %s9743_s20   ;;  %p9851_p9 = pnand %p8835_p8, %p80_p3 }
  0x16   : > { %s242_s7 = sand.u32 1, %s9755_s23   ;;  %s9857_s8 = smul.u32 49, %s9849_s30 }
  0x17   : > { %s11859_s6 = scalar_select %p9851_p9, 1, 0 }
  0x18   : > { %s9860_s9 = smul.u32 784, %s9751_s22  ;;  %s246_s10 = scalar_lea.vmem [#allocation5], %s9857_s8 }
  0x19   : > { %s254_s11 = sshll.u32 %s246_s10, 4  ;;  %s11860_s2 = sld [smem:[#allocation16_spill]]  ;;  %s9870_s11 = int_to_ptr.vmem [resolvable:$true] %s254_s11 }
  0x1a   : > { %s9872_s15 = scalar_lea.sflag [#allocation6], %s242_s7  ;;  %p9878_p12 = pneg %p9851_p9 }
  0x1f   : > { %s9868_s14 = scalar_lea.hbm %s11860_s2, %s9860_s9  ;;  %s9582_s27 = scalar_lea.hbm %s11860_s2, 1568 }
  0x20   : > { %s9577_s16 = scalar_lea.hbm %s9868_s14, 784  ;;  %p9583_p1 = scmp.lt.u32.totalorder %s9868_s14, %s11860_s2 }
  0x21   : > { %p9578_p11 = scmp.ne.s32.totalorder %s9868_s14, %s9577_s16  ;;  %p9584_p2 = scmp.lt.u32.totalorder %s9582_s27, %s9577_s16 }
  0x22   : > { %p9586_p4 = scmp.lt.u32.totalorder %s9577_s16, %s9868_s14 }
  0x23   : > { %p9580_p13 = pnand %p9878_p12, %p9578_p11  ;;  %p9585_p3 = por %p9584_p2, %p9583_p1 }
  0x25   : > { %p9581_p0 = pneg %p9580_p13  ;;  %p9587_p5 = por %p9586_p4, %p9585_p3 }
  0x27   : > { %p9588_p6 = pnand %p9587_p5, %p9581_p0 }
  0x29   : > { %9591 = shalt.err (!%p9588_p6)
}
  0x2a   : > { %s9592_s7 = scalar_lea.vmem %s9870_s11, 784  ;;  %s9757_s13 = smov [#allocation5]  }
  0x2b   : > { %p9593_p8 = scmp.ne.s32.totalorder %s9870_s11, %s9592_s7  ;;  %s9597_s18 = sshll.u32 %s9757_s13, 4  ;;  %s9598_s18 = int_to_ptr.vmem [resolvable:$false] %s9597_s18 }
  0x2c   : > { %s9599_s26 = scalar_lea.vmem %s9598_s18, 1568  ;;  %p9600_p10 = scmp.lt.s32.totalorder %s9870_s11, %s9598_s18 }
  0x2d   : > { %p9595_p11 = pnand %p9593_p8, %p9878_p12  ;;  %p9601_p7 = scmp.lt.s32.totalorder %s9599_s26, %s9592_s7 }
  0x2f   : > { %p9596_p13 = pneg %p9595_p11  ;;  %p9602_p1 = por %p9601_p7, %p9600_p10 }
  0x31   : > { %p9603_p2 = pnand %p9602_p1, %p9596_p13 }
  0x33   : > { %9606 = shalt.err (!%p9603_p2)
}
  0x34   : > { %8828 = dma.hbm_to_vmem [thread:$0]  (!%p9851_p9), %s9868_s14, 784, %s9870_s11, %s9872_s15  }
  0x35   : > { %p297_p0 = scmp.lt.s32.totalorder %s9755_s23, 3  ;;  %p11862_p3 = scmp.ge.s32.totalorder %s9755_s23, 1 }
  0x36   : > { %s8808_s27 = smul.u32 3136, %s9849_s30  ;;  %s11864_s1 = sld [smem:[#allocation15_spill]] }
  0x37   : > { %p9905_p4 = pnand %p11862_p3, %p297_p0  ;;  %s8775_s10 = smul.u32 3136, %s9751_s22 }
  0x38   : > { %s222_s18 = scalar_lea.vmem [#allocation3], %s8808_s27  ;;  %s219_s11 = scalar_lea.sflag [#allocation4], %s9849_s30 }
  0x39   : > { %s11863_s16 = scalar_select %p9905_p4, 1, 0 }
  0x3a   : > { %s232_s26 = sshll.u32 %s222_s18, 4  ;;  %s9916_s26 = int_to_ptr.vmem [resolvable:$true] %s232_s26 }
  0x3c   : > { %s9914_s13 = scalar_lea.hbm %s11864_s1, %s8775_s10  ;;  %s9612_s12 = scalar_lea.hbm %s11864_s1, 100352 }
  0x3d   : > { %s9607_s14 = scalar_lea.hbm %s9914_s13, 50176  ;;  %p9613_p6 = scmp.lt.u32.totalorder %s9914_s13, %s11864_s1 }
  0x3e   : > { %p9608_p7 = scmp.ne.s32.totalorder %s9914_s13, %s9607_s14  ;;  %p9614_p8 = scmp.lt.u32.totalorder %s9612_s12, %s9607_s14 }
  0x3f   : > { %p9616_p13 = scmp.lt.u32.totalorder %s9607_s14, %s9914_s13 }
  0x40   : > { %p9610_p10 = pnand %p9608_p7, %p9878_p12  ;;  %p9615_p11 = por %p9614_p8, %p9613_p6 }
  0x42   : > { %p9611_p5 = pneg %p9610_p10  ;;  %p9617_p1 = por %p9616_p13, %p9615_p11 }
  0x44   : > { %p9618_p2 = pnand %p9617_p1, %p9611_p5 }
  0x46   : > { %9621 = shalt.err (!%p9618_p2)
}
  0x47   : > { %s9622_s27 = scalar_lea.vmem %s9916_s26, 50176  ;;  %s9758_s2 = smov [#allocation3]  }
  0x48   : > { %p9623_p0 = scmp.ne.s32.totalorder %s9916_s26, %s9622_s27  ;;  %s9627_s24 = sshll.u32 %s9758_s2, 4  ;;  %s9628_s24 = int_to_ptr.vmem [resolvable:$false] %s9627_s24 }
  0x49   : > { %s9629_s18 = scalar_lea.vmem %s9628_s24, 100352  ;;  %p9630_p10 = scmp.lt.s32.totalorder %s9916_s26, %s9628_s24 }
  0x4a   : > { %p9625_p3 = pnand %p9623_p0, %p9878_p12  ;;  %p9631_p4 = scmp.lt.s32.totalorder %s9629_s18, %s9622_s27 }
  0x4c   : > { %p9626_p7 = pneg %p9625_p3  ;;  %p9632_p6 = por %p9631_p4, %p9630_p10 }
  0x4e   : > { %p9633_p8 = pnand %p9632_p6, %p9626_p7 }
  0x50   : > { %9636 = shalt.err (!%p9633_p8)
}
  0x51   : > { %s9759_s14 = smov 6272   ;;  %s9760_s12 = smov 3136  }
  0x52   : > { %s9761_s10 = smov 196   ;;  %s9946_s27 = scalar_lea.hbm %s11845_s3, %s9860_s9 }
  0x53   : > { %8825 = dma.hbm_to_vmem [thread:$0]  (!%p9851_p9), %s9914_s13, 50176, %s9916_s26, %s219_s11, %s9759_s14, %s9760_s12, %s9761_s10  }
  0x54   : > { %s265_s24 = scalar_lea.vmem [#allocation7], %s9857_s8  ;;  %s9637_s1 = scalar_lea.hbm %s9946_s27, 784 }
  0x55   : > { %s273_s18 = sshll.u32 %s265_s24, 4  ;;  %p9638_p4 = scmp.ne.s32.totalorder %s9946_s27, %s9637_s1  ;;  %s274_s18 = int_to_ptr.vmem [resolvable:$true] %s273_s18 }
  0x56   : > { %s9642_s13 = scalar_lea.hbm %s11845_s3, 1568  ;;  %p9643_p13 = scmp.lt.u32.totalorder %s9946_s27, %s11845_s3 }
  0x57   : > { %p9640_p5 = pnand %p9638_p4, %p9878_p12  ;;  %p9644_p1 = scmp.lt.u32.totalorder %s9642_s13, %s9637_s1 }
  0x58   : > { %p9646_p0 = scmp.lt.u32.totalorder %s9637_s1, %s9946_s27 }
  0x59   : > { %p9641_p11 = pneg %p9640_p5  ;;  %p9645_p2 = por %p9644_p1, %p9643_p13 }
  0x5b   : > { %p9647_p3 = por %p9646_p0, %p9645_p2 }
  0x5d   : > { %p9648_p7 = pnand %p9647_p3, %p9641_p11 }
  0x5f   : > { %9651 = shalt.err (!%p9648_p7)
}
  0x60   : > { %s9652_s14 = scalar_lea.vmem %s274_s18, 784  ;;  %s9762_s12 = smov [#allocation7]  }
  0x61   : > { %p9653_p10 = scmp.ne.s32.totalorder %s274_s18, %s9652_s14  ;;  %s9657_s10 = sshll.u32 %s9762_s12, 4  ;;  %s9658_s10 = int_to_ptr.vmem [resolvable:$false] %s9657_s10 }
  0x62   : > { %s9659_s22 = scalar_lea.vmem %s9658_s10, 1568  ;;  %p9660_p4 = scmp.lt.s32.totalorder %s274_s18, %s9658_s10 }
  0x63   : > { %p9655_p6 = pnand %p9653_p10, %p9878_p12  ;;  %p9661_p5 = scmp.lt.s32.totalorder %s9659_s22, %s9652_s14 }
  0x65   : > { %p9656_p8 = pneg %p9655_p6  ;;  %p9662_p9 = por %p9661_p5, %p9660_p4 }
  0x67   : > { %p9663_p1 = pnand %p9662_p9, %p9656_p8 }
  0x69   : > { %9666 = shalt.err (!%p9663_p1)
}
  0x6a   : > { %p11865_p13 = scmp.ne.s32.totalorder %s11859_s6, 0  ;;  %s9971_s7 = scalar_lea.hbm %s11846_s4, %s9860_s9 }
  0x6b   : > { %s284_s2 = scalar_lea.vmem [#allocation8], %s9857_s8  ;;  %s281_s13 = scalar_lea.sflag [#allocation9], %s9849_s30 }
  0x6c   : > { %8831 = dma.hbm_to_vmem [thread:$0]  (!%p11865_p13), %s9946_s27, 784, %s274_s18, %s9872_s15  }
  0x6d   : > { %s292_s24 = sshll.u32 %s284_s2, 4  ;;  %s9667_s26 = scalar_lea.hbm %s9971_s7, 784  ;;  %s293_s24 = int_to_ptr.vmem [resolvable:$true] %s292_s24 }
  0x6e   : > { %p9668_p9 = scmp.ne.s32.totalorder %s9971_s7, %s9667_s26  ;;  %s9672_s27 = scalar_lea.hbm %s11846_s4, 1568 }
  0x6f   : > { %p9673_p0 = scmp.lt.u32.totalorder %s9971_s7, %s11846_s4  ;;  %p9674_p3 = scmp.lt.u32.totalorder %s9672_s27, %s9667_s26 }
  0x70   : > { %p9670_p11 = pnand %p9668_p9, %p9878_p12  ;;  %p9676_p10 = scmp.lt.u32.totalorder %s9667_s26, %s9971_s7 }
  0x71   : > { %p9675_p7 = por %p9674_p3, %p9673_p0 }
  0x72   : > { %p9671_p2 = pneg %p9670_p11 }
  0x73   : > { %p9677_p6 = por %p9676_p10, %p9675_p7 }
  0x75   : > { %p9678_p8 = pnand %p9677_p6, %p9671_p2 }
  0x77   : > { %9681 = shalt.err (!%p9678_p8)
}
  0x78   : > { %s9682_s30 = scalar_lea.vmem %s293_s24, 784  ;;  %s9763_s8 = smov [#allocation8]  }
  0x79   : > { %p9683_p4 = scmp.ne.s32.totalorder %s293_s24, %s9682_s30  ;;  %s9687_s14 = sshll.u32 %s9763_s8, 4  ;;  %s9688_s14 = int_to_ptr.vmem [resolvable:$false] %s9687_s14 }
  0x7a   : > { %s9689_s12 = scalar_lea.vmem %s9688_s14, 1568  ;;  %p9690_p9 = scmp.lt.s32.totalorder %s293_s24, %s9688_s14 }
  0x7b   : > { %p9685_p5 = pnand %p9683_p4, %p9878_p12  ;;  %p9691_p11 = scmp.lt.s32.totalorder %s9689_s12, %s9682_s30 }
  0x7d   : > { %p9686_p1 = pneg %p9685_p5  ;;  %p9692_p13 = por %p9691_p11, %p9690_p9 }
  0x7f   : > { %p9693_p0 = pnand %p9692_p13, %p9686_p1 }
  0x81   : > { %9696 = shalt.err (!%p9693_p0)
}
  0x82   : > { %p11866_p3 = scmp.ne.s32.totalorder %s11859_s6, 0  ;;  %p11867_p2 = scmp.ne.s32.totalorder %s11863_s16, 0 }
  0x83   : > { %s303_s17 = sand.u32 (!%p11867_p2), 1, %s9739_s19   ;;  %p11868_p12 = scmp.ne.s32.totalorder (!%p11867_p2), %s11858_s28, 0 }
  0x84   : > { %8834 = dma.hbm_to_vmem [thread:$0]  (!%p11866_p3), %s9971_s7, 784, %s293_s24, %s281_s13  }
  0x85   : > { %301 = sbr.rel (%p11867_p2) target bundleno = 887 (0x377), region = 40  ;;  %s304_s22 = scalar_lea.sflag (!%p11867_p2), [#allocation4], %s303_s17 }
  0x86   : > { %s8812_s10 = smul.u32 (!%p11867_p2), 3136, %s303_s17 }
  0x88   : > { %s9995_s1 = scalar_lea.vmem (!%p11867_p2), [#allocation3], %s8812_s10 }
  0x8c   : > { %9722 = dma.done.wait (%p11868_p12), %s304_s22, 50176  }
  0x8d   : > { %9724 = vsyncadd (%p11868_p12), %s304_s22, 4294917120  ;;  %s11869_s25 = sadd.s32 4294967295, %s9755_s23   ;;  %s8813_s7 = smul.u32 49, %s303_s17 }
  0x8e   : > { %s312_s6 = sand.u32 1, %s11869_s25  }
  0x8f   : > { %s313_s2 = scalar_lea.sflag [#allocation6], %s312_s6  ;;  %s10003_s16 = scalar_lea.vmem [#allocation5], %s8813_s7 }
  0x90   : > { %9726 = dma.done.wait (%p11868_p12), %s313_s2, 1568  }
  0x91   : > { %9728 = vsyncadd (%p11868_p12), %s313_s2, 4294965728  ;;  %s10009_s24 = scalar_lea.vmem [#allocation7], %s8813_s7  ;;  %s331_s13 = scalar_lea.sflag [#allocation9], %s303_s17 }
  0x92   : > { %s10011_s26 = scalar_lea.vmem [#allocation8], %s8813_s7 }
  0x93   : > { %9730 = dma.done.wait (%p11868_p12), %s331_s13, 784  }
  0x94   : > { %9732 = vsyncadd (%p11868_p12), %s331_s13, 4294966512  ;;  %v9764_v0 = vmov 0   ;;  %v8892_v1 = vld [vmem:[%s9995_s1 + $0x4] ss:$196 sps:$4 sm:$0xff]   ;;  %v8894_v2 = vld [vmem:[%s9995_s1 + $0xc] ss:$196 sps:$4 sm:$0xff]  }
  0x95   : > { %2823 = vmatprep.mubr.bf16.mxu0 %v9764_v0  ;;  %2864 = vmatprep.mubr.bf16.mxu1 %v9764_v0  ;;  %v8896_v3 = vld [vmem:[%s9995_s1] ss:$196 sps:$4 sm:$0xff]   ;;  %v8897_v4 = vld [vmem:[%s9995_s1 + $0x8] ss:$196 sps:$4 sm:$0xff]   ;;  %v8900_v6 = vld [vmem:[%s9995_s1 + $0x194] ss:$196 sps:$4 sm:$0xff]  }
  0x96   : > { %2791 = vmatprep.subr.bf16.mxu0 %v8892_v1  ;;  %2832 = vmatprep.subr.bf16.mxu1 %v8894_v2  ;;  %v8898_v5 = vld [vmem:[%s9995_s1 + $0x18c] ss:$196 sps:$4 sm:$0xff]   ;;  %v8904_v9 = vld [vmem:[%s9995_s1 + $0x314] ss:$196 sps:$4 sm:$0xff]   ;;  %v8906_v10 = vld [vmem:[%s9995_s1 + $0x31c] ss:$196 sps:$4 sm:$0xff]  }
  0x97   : > { %2792 = vmatpush1.bf16.msra.mxu0 %v8896_v3  ;;  %2833 = vmatpush1.bf16.msra.mxu1 %v8897_v4  ;;  %v8902_v7 = vld [vmem:[%s9995_s1 + $0x188] ss:$196 sps:$4 sm:$0xff]   ;;  %v8903_v8 = vld [vmem:[%s9995_s1 + $0x190] ss:$196 sps:$4 sm:$0xff]   ;;  %v8909_v12 = vld [vmem:[%s9995_s1 + $0x318] ss:$196 sps:$4 sm:$0xff]  }
  0x98   : > { %2793 = vmatprep.subr.bf16.mxu0 %v8898_v5  ;;  %2834 = vmatprep.subr.bf16.mxu1 %v8900_v6  ;;  %v8908_v11 = vld [vmem:[%s9995_s1 + $0x310] ss:$196 sps:$4 sm:$0xff]   ;;  %v8910_v13 = vld [vmem:[%s9995_s1 + $0x49c] ss:$196 sps:$4 sm:$0xff]   ;;  %v8912_v14 = vld [vmem:[%s9995_s1 + $0x4a4] ss:$196 sps:$4 sm:$0xff]  }
  0x99   : > { %v8914_v15 = vld [vmem:[%s9995_s1 + $0x498] ss:$196 sps:$4 sm:$0xff]   ;;  %v8915_v16 = vld [vmem:[%s9995_s1 + $0x4a0] ss:$196 sps:$4 sm:$0xff]   ;;  %v8918_v18 = vld [vmem:[%s9995_s1 + $0x62c] ss:$196 sps:$4 sm:$0xff]  }
  0x9a   : > { %v8916_v17 = vld [vmem:[%s9995_s1 + $0x624] ss:$196 sps:$4 sm:$0xff]   ;;  %v8922_v21 = vld [vmem:[%s9995_s1 + $0x7ac] ss:$196 sps:$4 sm:$0xff]   ;;  %v8924_v22 = vld [vmem:[%s9995_s1 + $0x7b4] ss:$196 sps:$4 sm:$0xff]  }
  0x9b   : > { %2794 = vmatpush1.bf16.msra.mxu0 %v8902_v7  ;;  %2835 = vmatpush1.bf16.msra.mxu1 %v8903_v8  ;;  %v8920_v19 = vld [vmem:[%s9995_s1 + $0x620] ss:$196 sps:$4 sm:$0xff]   ;;  %v8921_v20 = vld [vmem:[%s9995_s1 + $0x628] ss:$196 sps:$4 sm:$0xff]   ;;  %v8927_v24 = vld [vmem:[%s9995_s1 + $0x7b0] ss:$196 sps:$4 sm:$0xff]  }
  0x9c   : > { %2795 = vmatprep.subr.bf16.mxu0 %v8904_v9  ;;  %2836 = vmatprep.subr.bf16.mxu1 %v8906_v10  ;;  %v8926_v23 = vld [vmem:[%s9995_s1 + $0x7a8] ss:$196 sps:$4 sm:$0xff]   ;;  %v8928_v25 = vld [vmem:[%s9995_s1 + $0x934] ss:$196 sps:$4 sm:$0xff]   ;;  %v8930_v26 = vld [vmem:[%s9995_s1 + $0x93c] ss:$196 sps:$4 sm:$0xff]  }
  0x9d   : > { %v8932_v27 = vld [vmem:[%s9995_s1 + $0x930] ss:$196 sps:$4 sm:$0xff]   ;;  %v8933_v28 = vld [vmem:[%s9995_s1 + $0x938] ss:$196 sps:$4 sm:$0xff]   ;;  %v8936_v30 = vld [vmem:[%s9995_s1 + $0xac4] ss:$196 sps:$4 sm:$0xff]  }
  0x9e   : > { %v8934_v29 = vld [vmem:[%s9995_s1 + $0xabc] ss:$196 sps:$4 sm:$0xff]   ;;  %v8942_v33 = vld [vmem:[%s9995_s1 + $0x14] ss:$196 sps:$4 sm:$0xff]   ;;  %v8951_v39 = vld [vmem:[%s9995_s1 + $0x1a4] ss:$196 sps:$4 sm:$0xff]  }
  0x9f   : > { %2796 = vmatpush1.bf16.msra.mxu0 %v8908_v11  ;;  %2837 = vmatpush1.bf16.msra.mxu1 %v8909_v12  ;;  %v8938_v31 = vld [vmem:[%s9995_s1 + $0xab8] ss:$196 sps:$4 sm:$0xff]   ;;  %v8939_v32 = vld [vmem:[%s9995_s1 + $0xac0] ss:$196 sps:$4 sm:$0xff]   ;;  %v8940_v36 = vld [vmem:[%s9995_s1 + $0x10] ss:$196 sps:$4 sm:$0xff]  }
  0xa0   : > { %2797 = vmatprep.subr.bf16.mxu0 %v8910_v13  ;;  %2838 = vmatprep.subr.bf16.mxu1 %v8912_v14  ;;  %v8945_v34 = vld [vmem:[%s9995_s1 + $0x1c] ss:$196 sps:$4 sm:$0xff]   ;;  %v8954_v42 = vld [vmem:[%s9995_s1 + $0x324] ss:$196 sps:$4 sm:$0xff]   ;;  %v8957_v43 = vld [vmem:[%s9995_s1 + $0x32c] ss:$196 sps:$4 sm:$0xff]  }
  0xa1   : > { %v10056_v35 = vld [vmem:[%s11842_s0] sm:$0x1]  ;;  %v8949_v41 = vld [vmem:[%s9995_s1 + $0x1a0] ss:$196 sps:$4 sm:$0xff]   ;;  %v8955_v45 = vld [vmem:[%s9995_s1 + $0x328] ss:$196 sps:$4 sm:$0xff]  }
  0xa2   : > { %v8943_v37 = vld [vmem:[%s9995_s1 + $0x18] ss:$196 sps:$4 sm:$0xff]   ;;  %v8952_v44 = vld [vmem:[%s9995_s1 + $0x320] ss:$196 sps:$4 sm:$0xff]   ;;  %v8960_v46 = vld [vmem:[%s9995_s1 + $0x4ac] ss:$196 sps:$4 sm:$0xff]  }
  0xa3   : > { %2798 = vmatpush1.bf16.msra.mxu0 %v8914_v15  ;;  %2839 = vmatpush1.bf16.msra.mxu1 %v8915_v16  ;;  %v8948_v38 = vld [vmem:[%s9995_s1 + $0x19c] ss:$196 sps:$4 sm:$0xff]   ;;  %v8963_v47 = vld [vmem:[%s9995_s1 + $0x4b4] ss:$196 sps:$4 sm:$0xff]   ;;  %v8958_v48 = vld [vmem:[%s9995_s1 + $0x4a8] ss:$196 sps:$4 sm:$0xff]  }
  0xa4   : > { %2799 = vmatprep.subr.bf16.mxu0 %v8916_v17  ;;  %2840 = vmatprep.subr.bf16.mxu1 %v8918_v18  ;;  %v8946_v40 = vld [vmem:[%s9995_s1 + $0x198] ss:$196 sps:$4 sm:$0xff]   ;;  %v8961_v49 = vld [vmem:[%s9995_s1 + $0x4b0] ss:$196 sps:$4 sm:$0xff]   ;;  %v8975_v55 = vld [vmem:[%s9995_s1 + $0x7c4] ss:$196 sps:$4 sm:$0xff]  }
  0xa5   : > { %v8966_v50 = vld [vmem:[%s9995_s1 + $0x634] ss:$196 sps:$4 sm:$0xff]   ;;  %v8969_v51 = vld [vmem:[%s9995_s1 + $0x63c] ss:$196 sps:$4 sm:$0xff]   ;;  %v8978_v58 = vld [vmem:[%s9995_s1 + $0x944] ss:$196 sps:$4 sm:$0xff]  }
  0xa6   : > { %v8964_v52 = vld [vmem:[%s9995_s1 + $0x630] ss:$196 sps:$4 sm:$0xff]   ;;  %v8967_v53 = vld [vmem:[%s9995_s1 + $0x638] ss:$196 sps:$4 sm:$0xff]   ;;  %v8973_v57 = vld [vmem:[%s9995_s1 + $0x7c0] ss:$196 sps:$4 sm:$0xff]  }
  0xa7   : > { %2800 = vmatpush1.bf16.msra.mxu0 %v8920_v19  ;;  %2841 = vmatpush1.bf16.msra.mxu1 %v8921_v20  ;;  %v8972_v54 = vld [vmem:[%s9995_s1 + $0x7bc] ss:$196 sps:$4 sm:$0xff]   ;;  %v8981_v59 = vld [vmem:[%s9995_s1 + $0x94c] ss:$196 sps:$4 sm:$0xff]   ;;  %v8987_v63 = vld [vmem:[%s9995_s1 + $0xad4] ss:$196 sps:$4 sm:$0xff]  }
  0xa8   : > { %2801 = vmatprep.subr.bf16.mxu0 %v8922_v21  ;;  %2842 = vmatprep.subr.bf16.mxu1 %v8924_v22  ;;  %v8970_v56 = vld [vmem:[%s9995_s1 + $0x7b8] ss:$196 sps:$4 sm:$0xff]   ;;  %v8976_v60 = vld [vmem:[%s9995_s1 + $0x940] ss:$196 sps:$4 sm:$0xff]   ;;  %v8979_v61 = vld [vmem:[%s9995_s1 + $0x948] ss:$196 sps:$4 sm:$0xff]  }
  0xa9   : > { %v8984_v62 = vld [vmem:[%s9995_s1 + $0xacc] ss:$196 sps:$4 sm:$0xff]   ;;  %v8990_v3 = vld [vmem:[%s9995_s1 + $0x24] ss:$196 sps:$4 sm:$0xff]   ;;  %v8999_v8 = vld [vmem:[%s9995_s1 + $0x1b4] ss:$196 sps:$4 sm:$0xff]  }
  0xaa   : > { %v8982_v1 = vld [vmem:[%s9995_s1 + $0xac8] ss:$196 sps:$4 sm:$0xff]   ;;  %v8985_v2 = vld [vmem:[%s9995_s1 + $0xad0] ss:$196 sps:$4 sm:$0xff]   ;;  %v8988_v5 = vld [vmem:[%s9995_s1 + $0x20] ss:$196 sps:$4 sm:$0xff]  }
  0xab   : > { %2802 = vmatpush1.bf16.msra.mxu0 %v8926_v23  ;;  %2843 = vmatpush1.bf16.msra.mxu1 %v8927_v24  ;;  %v8993_v4 = vld [vmem:[%s9995_s1 + $0x2c] ss:$196 sps:$4 sm:$0xff]   ;;  %v9002_v11 = vld [vmem:[%s9995_s1 + $0x334] ss:$196 sps:$4 sm:$0xff]   ;;  %v9005_v12 = vld [vmem:[%s9995_s1 + $0x33c] ss:$196 sps:$4 sm:$0xff]  }
  0xac   : > { %2803 = vmatprep.subr.bf16.mxu0 %v8928_v25  ;;  %2844 = vmatprep.subr.bf16.mxu1 %v8930_v26  ;;  %v8991_v6 = vld [vmem:[%s9995_s1 + $0x28] ss:$196 sps:$4 sm:$0xff]   ;;  %v8997_v10 = vld [vmem:[%s9995_s1 + $0x1b0] ss:$196 sps:$4 sm:$0xff]   ;;  %v9003_v14 = vld [vmem:[%s9995_s1 + $0x338] ss:$196 sps:$4 sm:$0xff]  }
  0xad   : > { %v8996_v7 = vld [vmem:[%s9995_s1 + $0x1ac] ss:$196 sps:$4 sm:$0xff]   ;;  %v9008_v15 = vld [vmem:[%s9995_s1 + $0x4bc] ss:$196 sps:$4 sm:$0xff]   ;;  %v9011_v16 = vld [vmem:[%s9995_s1 + $0x4c4] ss:$196 sps:$4 sm:$0xff]  }
  0xae   : > { %v8994_v9 = vld [vmem:[%s9995_s1 + $0x1a8] ss:$196 sps:$4 sm:$0xff]   ;;  %v9000_v13 = vld [vmem:[%s9995_s1 + $0x330] ss:$196 sps:$4 sm:$0xff]   ;;  %v9006_v17 = vld [vmem:[%s9995_s1 + $0x4b8] ss:$196 sps:$4 sm:$0xff]  }
  0xaf   : > { %2804 = vmatpush1.bf16.msra.mxu0 %v8932_v27  ;;  %2845 = vmatpush1.bf16.msra.mxu1 %v8933_v28  ;;  %v9009_v18 = vld [vmem:[%s9995_s1 + $0x4c0] ss:$196 sps:$4 sm:$0xff]   ;;  %v9017_v20 = vld [vmem:[%s9995_s1 + $0x64c] ss:$196 sps:$4 sm:$0xff]   ;;  %v9023_v24 = vld [vmem:[%s9995_s1 + $0x7d4] ss:$196 sps:$4 sm:$0xff]  }
  0xb0   : > { %2805 = vmatprep.subr.bf16.mxu0 %v8934_v29  ;;  %2846 = vmatprep.subr.bf16.mxu1 %v8936_v30  ;;  %v9014_v19 = vld [vmem:[%s9995_s1 + $0x644] ss:$196 sps:$4 sm:$0xff]   ;;  %v9020_v23 = vld [vmem:[%s9995_s1 + $0x7cc] ss:$196 sps:$4 sm:$0xff]   ;;  %v9026_v27 = vld [vmem:[%s9995_s1 + $0x954] ss:$196 sps:$4 sm:$0xff]  }
  0xb1   : > { %v9012_v21 = vld [vmem:[%s9995_s1 + $0x640] ss:$196 sps:$4 sm:$0xff]   ;;  %v9015_v22 = vld [vmem:[%s9995_s1 + $0x648] ss:$196 sps:$4 sm:$0xff]   ;;  %v9021_v26 = vld [vmem:[%s9995_s1 + $0x7d0] ss:$196 sps:$4 sm:$0xff]  }
  0xb2   : > { %v9018_v25 = vld [vmem:[%s9995_s1 + $0x7c8] ss:$196 sps:$4 sm:$0xff]   ;;  %v9029_v28 = vld [vmem:[%s9995_s1 + $0x95c] ss:$196 sps:$4 sm:$0xff]   ;;  %v9024_v29 = vld [vmem:[%s9995_s1 + $0x950] ss:$196 sps:$4 sm:$0xff]  }
  0xb3   : > { %2806 = vmatpush1.bf16.msra.mxu0 %v8938_v31  ;;  %2847 = vmatpush1.bf16.msra.mxu1 %v8939_v32  ;;  %v9027_v30 = vld [vmem:[%s9995_s1 + $0x958] ss:$196 sps:$4 sm:$0xff]   ;;  %v9035_v32 = vld [vmem:[%s9995_s1 + $0xae4] ss:$196 sps:$4 sm:$0xff]   ;;  %vm4850_vm0 = vcmask 1041408   ;;  %s386_s30 = smul.u32 49, %s9747_s21 }
  0xb4   : > { %2873 = vmatprep.subr.bf16.mxu0 %v8942_v33  ;;  %2914 = vmatprep.subr.bf16.mxu1 %v8945_v34  ;;  %v9032_v31 = vld [vmem:[%s9995_s1 + $0xadc] ss:$196 sps:$4 sm:$0xff]   ;;  %vm9768_vm1 = vmmov 0  }
  0xb5   : > { %v9030_v33 = vld [vmem:[%s9995_s1 + $0xad8] ss:$196 sps:$4 sm:$0xff]   ;;  %v9033_v34 = vld [vmem:[%s9995_s1 + $0xae0] ss:$196 sps:$4 sm:$0xff]   ;;  %p10870_p13 = scmp.lt.s32.totalorder %s386_s30, 97 }
  0xb6   : > { %2824 = vmatmul.mubr.bf16.vlgmr.msra.gmra.mrb[0].mxu0 %v10056_v35  ;;  %2865 = vmatmul.mubr.bf16.vlgmr.msra.gmra.mrb[0].mxu1 %v10056_v35 }
  0xb7   : > { %2874 = vmatpush1.bf16.msra.mxu0 %v8940_v36  ;;  %2915 = vmatpush1.bf16.msra.mxu1 %v8943_v37  ;;  %v9038_v36 = vld [vmem:[%s9995_s1 + $0x34] ss:$196 sps:$4 sm:$0xff]   ;;  %v9041_v37 = vld [vmem:[%s9995_s1 + $0x3c] ss:$196 sps:$4 sm:$0xff]   ;;  %s11899_s30 = smov (!%p10870_p13, %s386_s30), 97 }
  0xb8   : > { %2875 = vmatprep.subr.bf16.mxu0 %v8948_v38  ;;  %2916 = vmatprep.subr.bf16.mxu1 %v8951_v39  ;;  %v9036_v38 = vld [vmem:[%s9995_s1 + $0x30] ss:$196 sps:$4 sm:$0xff]   ;;  %v9039_v39 = vld [vmem:[%s9995_s1 + $0x38] ss:$196 sps:$4 sm:$0xff]   ;;  %s10894_s12 = scalar_lea.vmem %s11847_s5, %s11899_s30 }
  0xb9   : > { %2905 = vmatprep.mubr.bf16.mxu0 %v9764_v0  ;;  %2946 = vmatprep.mubr.bf16.mxu1 %v9764_v0 }
  0xbb   : > { %2876 = vmatpush1.bf16.msra.mxu0 %v8946_v40  ;;  %2917 = vmatpush1.bf16.msra.mxu1 %v8949_v41  ;;  %v9044_v40 = vld [vmem:[%s9995_s1 + $0x1bc] ss:$196 sps:$4 sm:$0xff]   ;;  %v9047_v41 = vld [vmem:[%s9995_s1 + $0x1c4] ss:$196 sps:$4 sm:$0xff]  }
  0xbc   : > { %2877 = vmatprep.subr.bf16.mxu0 %v8954_v42  ;;  %2918 = vmatprep.subr.bf16.mxu1 %v8957_v43  ;;  %v9042_v42 = vld [vmem:[%s9995_s1 + $0x1b8] ss:$196 sps:$4 sm:$0xff]   ;;  %v9045_v43 = vld [vmem:[%s9995_s1 + $0x1c0] ss:$196 sps:$4 sm:$0xff]  }
  0xbf   : > { %2878 = vmatpush1.bf16.msra.mxu0 %v8952_v44  ;;  %2919 = vmatpush1.bf16.msra.mxu1 %v8955_v45  ;;  %v9050_v44 = vld [vmem:[%s9995_s1 + $0x344] ss:$196 sps:$4 sm:$0xff]   ;;  %v9053_v45 = vld [vmem:[%s9995_s1 + $0x34c] ss:$196 sps:$4 sm:$0xff]  }
  0xc0   : > { %2879 = vmatprep.subr.bf16.mxu0 %v8960_v46  ;;  %2920 = vmatprep.subr.bf16.mxu1 %v8963_v47  ;;  %v9048_v46 = vld [vmem:[%s9995_s1 + $0x340] ss:$196 sps:$4 sm:$0xff]   ;;  %v9051_v47 = vld [vmem:[%s9995_s1 + $0x348] ss:$196 sps:$4 sm:$0xff]  }
  0xc3   : > { %2880 = vmatpush1.bf16.msra.mxu0 %v8958_v48  ;;  %2921 = vmatpush1.bf16.msra.mxu1 %v8961_v49  ;;  %v9056_v48 = vld [vmem:[%s9995_s1 + $0x4cc] ss:$196 sps:$4 sm:$0xff]   ;;  %v9059_v49 = vld [vmem:[%s9995_s1 + $0x4d4] ss:$196 sps:$4 sm:$0xff]  }
  0xc4   : > { %2881 = vmatprep.subr.bf16.mxu0 %v8966_v50  ;;  %2922 = vmatprep.subr.bf16.mxu1 %v8969_v51  ;;  %v9054_v50 = vld [vmem:[%s9995_s1 + $0x4c8] ss:$196 sps:$4 sm:$0xff]   ;;  %v9057_v51 = vld [vmem:[%s9995_s1 + $0x4d0] ss:$196 sps:$4 sm:$0xff]  }
  0xc7   : > { %2882 = vmatpush1.bf16.msra.mxu0 %v8964_v52  ;;  %2923 = vmatpush1.bf16.msra.mxu1 %v8967_v53  ;;  %v9062_v52 = vld [vmem:[%s9995_s1 + $0x654] ss:$196 sps:$4 sm:$0xff]   ;;  %v9065_v53 = vld [vmem:[%s9995_s1 + $0x65c] ss:$196 sps:$4 sm:$0xff]  }
  0xc8   : > { %2883 = vmatprep.subr.bf16.mxu0 %v8972_v54  ;;  %2924 = vmatprep.subr.bf16.mxu1 %v8975_v55  ;;  %v9060_v54 = vld [vmem:[%s9995_s1 + $0x650] ss:$196 sps:$4 sm:$0xff]   ;;  %v9063_v55 = vld [vmem:[%s9995_s1 + $0x658] ss:$196 sps:$4 sm:$0xff]  }
  0xcb   : > { %2884 = vmatpush1.bf16.msra.mxu0 %v8970_v56  ;;  %2925 = vmatpush1.bf16.msra.mxu1 %v8973_v57  ;;  %v9068_v56 = vld [vmem:[%s9995_s1 + $0x7dc] ss:$196 sps:$4 sm:$0xff]   ;;  %v9071_v57 = vld [vmem:[%s9995_s1 + $0x7e4] ss:$196 sps:$4 sm:$0xff]  }
  0xcc   : > { %2885 = vmatprep.subr.bf16.mxu0 %v8978_v58  ;;  %2926 = vmatprep.subr.bf16.mxu1 %v8981_v59  ;;  %v9066_v58 = vld [vmem:[%s9995_s1 + $0x7d8] ss:$196 sps:$4 sm:$0xff]   ;;  %v9069_v59 = vld [vmem:[%s9995_s1 + $0x7e0] ss:$196 sps:$4 sm:$0xff]  }
  0xcf   : > { %2886 = vmatpush1.bf16.msra.mxu0 %v8976_v60  ;;  %2927 = vmatpush1.bf16.msra.mxu1 %v8979_v61  ;;  %v9074_v60 = vld [vmem:[%s9995_s1 + $0x964] ss:$196 sps:$4 sm:$0xff]   ;;  %v9077_v61 = vld [vmem:[%s9995_s1 + $0x96c] ss:$196 sps:$4 sm:$0xff]  }
  0xd0   : > { %2887 = vmatprep.subr.bf16.mxu0 %v8984_v62  ;;  %2928 = vmatprep.subr.bf16.mxu1 %v8987_v63  ;;  %v9072_v62 = vld [vmem:[%s9995_s1 + $0x960] ss:$196 sps:$4 sm:$0xff]   ;;  %v9075_v63 = vld [vmem:[%s9995_s1 + $0x968] ss:$196 sps:$4 sm:$0xff]  }
  0xd3   : > { %2888 = vmatpush1.bf16.msra.mxu0 %v8982_v1  ;;  %2929 = vmatpush1.bf16.msra.mxu1 %v8985_v2  ;;  %v9080_v1 = vld [vmem:[%s9995_s1 + $0xaec] ss:$196 sps:$4 sm:$0xff]   ;;  %v9083_v2 = vld [vmem:[%s9995_s1 + $0xaf4] ss:$196 sps:$4 sm:$0xff]  }
  0xd4   : > { %2955 = vmatprep.subr.bf16.mxu0 %v8990_v3  ;;  %2996 = vmatprep.subr.bf16.mxu1 %v8993_v4  ;;  %v9078_v3 = vld [vmem:[%s9995_s1 + $0xae8] ss:$196 sps:$4 sm:$0xff]   ;;  %v9765_v4 = vmov 0.0  }
  0xd5   : > { %408 = vst [vmem:[#allocation2 + $0x60] sm:$0x3] %v9765_v4 }
  0xd6   : > { %2906 = vmatmul.mubr.bf16.vlgmr.msra.gmra.mrb[4].mxu0 %v10056_v35  ;;  %2947 = vmatmul.mubr.bf16.vlgmr.msra.gmra.mrb[4].mxu1 %v10056_v35 }
  0xd7   : > { %2956 = vmatpush1.bf16.msra.mxu0 %v8988_v5  ;;  %2997 = vmatpush1.bf16.msra.mxu1 %v8991_v6  ;;  %v9081_v5 = vld [vmem:[%s9995_s1 + $0xaf0] ss:$196 sps:$4 sm:$0xff]   ;;  %v9086_v6 = vld [vmem:[%s9995_s1 + $0x44] ss:$196 sps:$4 sm:$0xff]  }
  0xd8   : > { %2957 = vmatprep.subr.bf16.mxu0 %v8996_v7  ;;  %2998 = vmatprep.subr.bf16.mxu1 %v8999_v8  ;;  %v9089_v7 = vld [vmem:[%s9995_s1 + $0x4c] ss:$196 sps:$4 sm:$0xff]   ;;  %v9084_v8 = vld [vmem:[%s9995_s1 + $0x40] ss:$196 sps:$4 sm:$0xff]  }
  0xd9   : > { %2987 = vmatprep.mubr.bf16.mxu0 %v9764_v0  ;;  %3028 = vmatprep.mubr.bf16.mxu1 %v9764_v0 }
  0xdb   : > { %2958 = vmatpush1.bf16.msra.mxu0 %v8994_v9  ;;  %2999 = vmatpush1.bf16.msra.mxu1 %v8997_v10  ;;  %v9087_v9 = vld [vmem:[%s9995_s1 + $0x48] ss:$196 sps:$4 sm:$0xff]  }
  0xdc   : > { %2959 = vmatprep.subr.bf16.mxu0 %v9002_v11  ;;  %3000 = vmatprep.subr.bf16.mxu1 %v9005_v12  ;;  %v9092_v10 = vld [vmem:[%s9995_s1 + $0x1cc] ss:$196 sps:$4 sm:$0xff]   ;;  %v9095_v11 = vld [vmem:[%s9995_s1 + $0x1d4] ss:$196 sps:$4 sm:$0xff]  }
  0xdd   : > { %v9090_v12 = vld [vmem:[%s9995_s1 + $0x1c8] ss:$196 sps:$4 sm:$0xff]  }
  0xdf   : > { %2960 = vmatpush1.bf16.msra.mxu0 %v9000_v13  ;;  %3001 = vmatpush1.bf16.msra.mxu1 %v9003_v14  ;;  %v9093_v13 = vld [vmem:[%s9995_s1 + $0x1d0] ss:$196 sps:$4 sm:$0xff]  }
  0xe0   : > { %2961 = vmatprep.subr.bf16.mxu0 %v9008_v15  ;;  %3002 = vmatprep.subr.bf16.mxu1 %v9011_v16  ;;  %v9098_v14 = vld [vmem:[%s9995_s1 + $0x354] ss:$196 sps:$4 sm:$0xff]   ;;  %v9101_v15 = vld [vmem:[%s9995_s1 + $0x35c] ss:$196 sps:$4 sm:$0xff]  }
  0xe1   : > { %v9096_v16 = vld [vmem:[%s9995_s1 + $0x350] ss:$196 sps:$4 sm:$0xff]  }
  0xe3   : > { %2962 = vmatpush1.bf16.msra.mxu0 %v9006_v17  ;;  %3003 = vmatpush1.bf16.msra.mxu1 %v9009_v18  ;;  %v9099_v17 = vld [vmem:[%s9995_s1 + $0x358] ss:$196 sps:$4 sm:$0xff]  }
  0xe4   : > { %2963 = vmatprep.subr.bf16.mxu0 %v9014_v19  ;;  %3004 = vmatprep.subr.bf16.mxu1 %v9017_v20  ;;  %v9104_v18 = vld [vmem:[%s9995_s1 + $0x4dc] ss:$196 sps:$4 sm:$0xff]   ;;  %v9107_v19 = vld [vmem:[%s9995_s1 + $0x4e4] ss:$196 sps:$4 sm:$0xff]  }
  0xe5   : > { %v9102_v20 = vld [vmem:[%s9995_s1 + $0x4d8] ss:$196 sps:$4 sm:$0xff]  }
  0xe7   : > { %2964 = vmatpush1.bf16.msra.mxu0 %v9012_v21  ;;  %3005 = vmatpush1.bf16.msra.mxu1 %v9015_v22  ;;  %v9105_v21 = vld [vmem:[%s9995_s1 + $0x4e0] ss:$196 sps:$4 sm:$0xff]  }
  0xe8   : > { %2965 = vmatprep.subr.bf16.mxu0 %v9020_v23  ;;  %3006 = vmatprep.subr.bf16.mxu1 %v9023_v24  ;;  %v9110_v22 = vld [vmem:[%s9995_s1 + $0x664] ss:$196 sps:$4 sm:$0xff]   ;;  %v9113_v23 = vld [vmem:[%s9995_s1 + $0x66c] ss:$196 sps:$4 sm:$0xff]  }
  0xe9   : > { %v9108_v24 = vld [vmem:[%s9995_s1 + $0x660] ss:$196 sps:$4 sm:$0xff]  }
  0xeb   : > { %2966 = vmatpush1.bf16.msra.mxu0 %v9018_v25  ;;  %3007 = vmatpush1.bf16.msra.mxu1 %v9021_v26  ;;  %v9111_v25 = vld [vmem:[%s9995_s1 + $0x668] ss:$196 sps:$4 sm:$0xff]  }
  0xec   : > { %2967 = vmatprep.subr.bf16.mxu0 %v9026_v27  ;;  %3008 = vmatprep.subr.bf16.mxu1 %v9029_v28  ;;  %v9116_v26 = vld [vmem:[%s9995_s1 + $0x7ec] ss:$196 sps:$4 sm:$0xff]   ;;  %v9119_v27 = vld [vmem:[%s9995_s1 + $0x7f4] ss:$196 sps:$4 sm:$0xff]  }
  0xed   : > { %v9114_v28 = vld [vmem:[%s9995_s1 + $0x7e8] ss:$196 sps:$4 sm:$0xff]  }
  0xef   : > { %2968 = vmatpush1.bf16.msra.mxu0 %v9024_v29  ;;  %3009 = vmatpush1.bf16.msra.mxu1 %v9027_v30  ;;  %v9117_v29 = vld [vmem:[%s9995_s1 + $0x7f0] ss:$196 sps:$4 sm:$0xff]  }
  0xf0   : > { %2969 = vmatprep.subr.bf16.mxu0 %v9032_v31  ;;  %3010 = vmatprep.subr.bf16.mxu1 %v9035_v32  ;;  %v9122_v30 = vld [vmem:[%s9995_s1 + $0x974] ss:$196 sps:$4 sm:$0xff]   ;;  %v9125_v31 = vld [vmem:[%s9995_s1 + $0x97c] ss:$196 sps:$4 sm:$0xff]  }
  0xf1   : > { %v9120_v32 = vld [vmem:[%s9995_s1 + $0x970] ss:$196 sps:$4 sm:$0xff]  }
  0xf3   : > { %2970 = vmatpush1.bf16.msra.mxu0 %v9030_v33  ;;  %3011 = vmatpush1.bf16.msra.mxu1 %v9033_v34  ;;  %v9123_v33 = vld [vmem:[%s9995_s1 + $0x978] ss:$196 sps:$4 sm:$0xff]  }
  0xf4   : > { %3037 = vmatprep.subr.bf16.mxu0 %v9038_v36  ;;  %3078 = vmatprep.subr.bf16.mxu1 %v9041_v37  ;;  %v9128_v34 = vld [vmem:[%s9995_s1 + $0xafc] ss:$196 sps:$4 sm:$0xff]   ;;  %v9131_v36 = vld [vmem:[%s9995_s1 + $0xb04] ss:$196 sps:$4 sm:$0xff]  }
  0xf5   : > { %v9126_v37 = vld [vmem:[%s9995_s1 + $0xaf8] ss:$196 sps:$4 sm:$0xff]  }
  0xf6   : > { %2988 = vmatmul.mubr.bf16.vlgmr.msra.gmra.mrb[8].mxu0 %v10056_v35  ;;  %3029 = vmatmul.mubr.bf16.vlgmr.msra.gmra.mrb[8].mxu1 %v10056_v35 }
  0xf7   : > { %3038 = vmatpush1.bf16.msra.mxu0 %v9036_v38  ;;  %3079 = vmatpush1.bf16.msra.mxu1 %v9039_v39  ;;  %v9129_v38 = vld [vmem:[%s9995_s1 + $0xb00] ss:$196 sps:$4 sm:$0xff]   ;;  %v9134_v39 = vld [vmem:[%s9995_s1 + $0x54] ss:$196 sps:$4 sm:$0xff]  }
  0xf8   : > { %3039 = vmatprep.subr.bf16.mxu0 %v9044_v40  ;;  %3080 = vmatprep.subr.bf16.mxu1 %v9047_v41  ;;  %v9137_v40 = vld [vmem:[%s9995_s1 + $0x5c] ss:$196 sps:$4 sm:$0xff]   ;;  %v9132_v41 = vld [vmem:[%s9995_s1 + $0x50] ss:$196 sps:$4 sm:$0xff]  }
  0xf9   : > { %3069 = vmatprep.mubr.bf16.mxu0 %v9764_v0  ;;  %3110 = vmatprep.mubr.bf16.mxu1 %v9764_v0 }
  0xfb   : > { %3040 = vmatpush1.bf16.msra.mxu0 %v9042_v42  ;;  %3081 = vmatpush1.bf16.msra.mxu1 %v9045_v43  ;;  %v9135_v42 = vld [vmem:[%s9995_s1 + $0x58] ss:$196 sps:$4 sm:$0xff]  }
  0xfc   : > { %3041 = vmatprep.subr.bf16.mxu0 %v9050_v44  ;;  %3082 = vmatprep.subr.bf16.mxu1 %v9053_v45  ;;  %v9140_v43 = vld [vmem:[%s9995_s1 + $0x1dc] ss:$196 sps:$4 sm:$0xff]   ;;  %v9143_v44 = vld [vmem:[%s9995_s1 + $0x1e4] ss:$196 sps:$4 sm:$0xff]  }
  0xfd   : > { %v9138_v45 = vld [vmem:[%s9995_s1 + $0x1d8] ss:$196 sps:$4 sm:$0xff]  }
  0xff   : > { %3042 = vmatpush1.bf16.msra.mxu0 %v9048_v46  ;;  %3083 = vmatpush1.bf16.msra.mxu1 %v9051_v47  ;;  %v9141_v46 = vld [vmem:[%s9995_s1 + $0x1e0] ss:$196 sps:$4 sm:$0xff]  }
 0x100   : > { %3043 = vmatprep.subr.bf16.mxu0 %v9056_v48  ;;  %3084 = vmatprep.subr.bf16.mxu1 %v9059_v49  ;;  %v9146_v47 = vld [vmem:[%s9995_s1 + $0x364] ss:$196 sps:$4 sm:$0xff]   ;;  %v9149_v48 = vld [vmem:[%s9995_s1 + $0x36c] ss:$196 sps:$4 sm:$0xff]  }
 0x101   : > { %v9147_v49 = vld [vmem:[%s9995_s1 + $0x368] ss:$196 sps:$4 sm:$0xff]  }
 0x103   : > { %3044 = vmatpush1.bf16.msra.mxu0 %v9054_v50  ;;  %3085 = vmatpush1.bf16.msra.mxu1 %v9057_v51  ;;  %v9152_v50 = vld [vmem:[%s9995_s1 + $0x4ec] ss:$196 sps:$4 sm:$0xff]   ;;  %v9155_v51 = vld [vmem:[%s9995_s1 + $0x4f4] ss:$196 sps:$4 sm:$0xff]  }
 0x104   : > { %3045 = vmatprep.subr.bf16.mxu0 %v9062_v52  ;;  %3086 = vmatprep.subr.bf16.mxu1 %v9065_v53  ;;  %v9150_v52 = vld [vmem:[%s9995_s1 + $0x4e8] ss:$196 sps:$4 sm:$0xff]   ;;  %v9153_v53 = vld [vmem:[%s9995_s1 + $0x4f0] ss:$196 sps:$4 sm:$0xff]  }
 0x107   : > { %3046 = vmatpush1.bf16.msra.mxu0 %v9060_v54  ;;  %3087 = vmatpush1.bf16.msra.mxu1 %v9063_v55  ;;  %v9158_v54 = vld [vmem:[%s9995_s1 + $0x674] ss:$196 sps:$4 sm:$0xff]   ;;  %v9161_v55 = vld [vmem:[%s9995_s1 + $0x67c] ss:$196 sps:$4 sm:$0xff]  }
 0x108   : > { %3047 = vmatprep.subr.bf16.mxu0 %v9068_v56  ;;  %3088 = vmatprep.subr.bf16.mxu1 %v9071_v57  ;;  %v9156_v56 = vld [vmem:[%s9995_s1 + $0x670] ss:$196 sps:$4 sm:$0xff]   ;;  %v9159_v57 = vld [vmem:[%s9995_s1 + $0x678] ss:$196 sps:$4 sm:$0xff]  }
 0x10b   : > { %3048 = vmatpush1.bf16.msra.mxu0 %v9066_v58  ;;  %3089 = vmatpush1.bf16.msra.mxu1 %v9069_v59  ;;  %v9164_v58 = vld [vmem:[%s9995_s1 + $0x7fc] ss:$196 sps:$4 sm:$0xff]   ;;  %v9167_v59 = vld [vmem:[%s9995_s1 + $0x804] ss:$196 sps:$4 sm:$0xff]  }
 0x10c   : > { %3049 = vmatprep.subr.bf16.mxu0 %v9074_v60  ;;  %3090 = vmatprep.subr.bf16.mxu1 %v9077_v61  ;;  %v9162_v60 = vld [vmem:[%s9995_s1 + $0x7f8] ss:$196 sps:$4 sm:$0xff]   ;;  %v9165_v61 = vld [vmem:[%s9995_s1 + $0x800] ss:$196 sps:$4 sm:$0xff]  }
 0x10f   : > { %3050 = vmatpush1.bf16.msra.mxu0 %v9072_v62  ;;  %3091 = vmatpush1.bf16.msra.mxu1 %v9075_v63  ;;  %v9170_v62 = vld [vmem:[%s9995_s1 + $0x984] ss:$196 sps:$4 sm:$0xff]   ;;  %v9173_v63 = vld [vmem:[%s9995_s1 + $0x98c] ss:$196 sps:$4 sm:$0xff]  }
 0x110   : > { %3051 = vmatprep.subr.bf16.mxu0 %v9080_v1  ;;  %3092 = vmatprep.subr.bf16.mxu1 %v9083_v2  ;;  %v9168_v1 = vld [vmem:[%s9995_s1 + $0x980] ss:$196 sps:$4 sm:$0xff]   ;;  %v9171_v2 = vld [vmem:[%s9995_s1 + $0x988] ss:$196 sps:$4 sm:$0xff]  }
 0x113   : > { %3052 = vmatpush1.bf16.msra.mxu0 %v9078_v3  ;;  %3093 = vmatpush1.bf16.msra.mxu1 %v9081_v5  ;;  %v9176_v3 = vld [vmem:[%s9995_s1 + $0xb0c] ss:$196 sps:$4 sm:$0xff]   ;;  %v9179_v5 = vld [vmem:[%s9995_s1 + $0xb14] ss:$196 sps:$4 sm:$0xff]  }
 0x114   : > { %3119 = vmatprep.subr.bf16.mxu0 %v9086_v6  ;;  %3160 = vmatprep.subr.bf16.mxu1 %v9089_v7  ;;  %v9174_v6 = vld [vmem:[%s9995_s1 + $0xb08] ss:$196 sps:$4 sm:$0xff]   ;;  %v9177_v7 = vld [vmem:[%s9995_s1 + $0xb10] ss:$196 sps:$4 sm:$0xff]  }
 0x116   : > { %3070 = vmatmul.mubr.bf16.vlgmr.msra.gmra.mrb[12].mxu0 %v10056_v35  ;;  %3111 = vmatmul.mubr.bf16.vlgmr.msra.gmra.mrb[12].mxu1 %v10056_v35 }
 0x117   : > { %3120 = vmatpush1.bf16.msra.mxu0 %v9084_v8  ;;  %3161 = vmatpush1.bf16.msra.mxu1 %v9087_v9  ;;  %v9182_v8 = vld [vmem:[%s9995_s1 + $0x64] ss:$196 sps:$4 sm:$0xff]   ;;  %v9185_v9 = vld [vmem:[%s9995_s1 + $0x6c] ss:$196 sps:$4 sm:$0xff]  }
 0x118   : > { %3121 = vmatprep.subr.bf16.mxu0 %v9092_v10  ;;  %3162 = vmatprep.subr.bf16.mxu1 %v9095_v11  ;;  %v9180_v10 = vld [vmem:[%s9995_s1 + $0x60] ss:$196 sps:$4 sm:$0xff]   ;;  %v9183_v11 = vld [vmem:[%s9995_s1 + $0x68] ss:$196 sps:$4 sm:$0xff]  }
 0x119   : > { %3151 = vmatprep.mubr.bf16.mxu0 %v9764_v0  ;;  %3192 = vmatprep.mubr.bf16.mxu1 %v9764_v0 }
 0x11b   : > { %3122 = vmatpush1.bf16.msra.mxu0 %v9090_v12  ;;  %3163 = vmatpush1.bf16.msra.mxu1 %v9093_v13  ;;  %v9188_v12 = vld [vmem:[%s9995_s1 + $0x1ec] ss:$196 sps:$4 sm:$0xff]   ;;  %v9191_v13 = vld [vmem:[%s9995_s1 + $0x1f4] ss:$196 sps:$4 sm:$0xff]  }
 0x11c   : > { %3123 = vmatprep.subr.bf16.mxu0 %v9098_v14  ;;  %3164 = vmatprep.subr.bf16.mxu1 %v9101_v15  ;;  %v10246_v14 = vld [vmem:[%s11842_s0] sm:$0x1]  ;;  %v9186_v15 = vld [vmem:[%s9995_s1 + $0x1e8] ss:$196 sps:$4 sm:$0xff]  }
 0x11f   : > { %3124 = vmatpush1.bf16.msra.mxu0 %v9096_v16  ;;  %3165 = vmatpush1.bf16.msra.mxu1 %v9099_v17  ;;  %v9189_v16 = vld [vmem:[%s9995_s1 + $0x1f0] ss:$196 sps:$4 sm:$0xff]  }
 0x120   : > { %3125 = vmatprep.subr.bf16.mxu0 %v9104_v18  ;;  %3166 = vmatprep.subr.bf16.mxu1 %v9107_v19  ;;  %v9194_v17 = vld [vmem:[%s9995_s1 + $0x374] ss:$196 sps:$4 sm:$0xff]   ;;  %v9197_v18 = vld [vmem:[%s9995_s1 + $0x37c] ss:$196 sps:$4 sm:$0xff]  }
 0x121   : > { %v9192_v19 = vld [vmem:[%s9995_s1 + $0x370] ss:$196 sps:$4 sm:$0xff]  }
 0x123   : > { %3126 = vmatpush1.bf16.msra.mxu0 %v9102_v20  ;;  %3167 = vmatpush1.bf16.msra.mxu1 %v9105_v21  ;;  %v9195_v20 = vld [vmem:[%s9995_s1 + $0x378] ss:$196 sps:$4 sm:$0xff]  }
 0x124   : > { %3127 = vmatprep.subr.bf16.mxu0 %v9110_v22  ;;  %3168 = vmatprep.subr.bf16.mxu1 %v9113_v23  ;;  %v9200_v21 = vld [vmem:[%s9995_s1 + $0x4fc] ss:$196 sps:$4 sm:$0xff]   ;;  %v9203_v22 = vld [vmem:[%s9995_s1 + $0x504] ss:$196 sps:$4 sm:$0xff]  }
 0x125   : > { %v9198_v23 = vld [vmem:[%s9995_s1 + $0x4f8] ss:$196 sps:$4 sm:$0xff]  }
 0x127   : > { %3128 = vmatpush1.bf16.msra.mxu0 %v9108_v24  ;;  %3169 = vmatpush1.bf16.msra.mxu1 %v9111_v25  ;;  %v9201_v24 = vld [vmem:[%s9995_s1 + $0x500] ss:$196 sps:$4 sm:$0xff]  }
 0x128   : > { %3129 = vmatprep.subr.bf16.mxu0 %v9116_v26  ;;  %3170 = vmatprep.subr.bf16.mxu1 %v9119_v27  ;;  %v9206_v25 = vld [vmem:[%s9995_s1 + $0x684] ss:$196 sps:$4 sm:$0xff]   ;;  %v9209_v26 = vld [vmem:[%s9995_s1 + $0x68c] ss:$196 sps:$4 sm:$0xff]  }
 0x129   : > { %v9204_v27 = vld [vmem:[%s9995_s1 + $0x680] ss:$196 sps:$4 sm:$0xff]  }
 0x12b   : > { %3130 = vmatpush1.bf16.msra.mxu0 %v9114_v28  ;;  %3171 = vmatpush1.bf16.msra.mxu1 %v9117_v29  ;;  %v9207_v28 = vld [vmem:[%s9995_s1 + $0x688] ss:$196 sps:$4 sm:$0xff]  }
 0x12c   : > { %3131 = vmatprep.subr.bf16.mxu0 %v9122_v30  ;;  %3172 = vmatprep.subr.bf16.mxu1 %v9125_v31  ;;  %v9212_v29 = vld [vmem:[%s9995_s1 + $0x80c] ss:$196 sps:$4 sm:$0xff]   ;;  %v9215_v30 = vld [vmem:[%s9995_s1 + $0x814] ss:$196 sps:$4 sm:$0xff]  }
 0x12d   : > { %v9210_v31 = vld [vmem:[%s9995_s1 + $0x808] ss:$196 sps:$4 sm:$0xff]  }
 0x12f   : > { %3132 = vmatpush1.bf16.msra.mxu0 %v9120_v32  ;;  %3173 = vmatpush1.bf16.msra.mxu1 %v9123_v33  ;;  %v9213_v32 = vld [vmem:[%s9995_s1 + $0x810] ss:$196 sps:$4 sm:$0xff]  }
 0x130   : > { %3133 = vmatprep.subr.bf16.mxu0 %v9128_v34  ;;  %3174 = vmatprep.subr.bf16.mxu1 %v9131_v36  ;;  %v9218_v33 = vld [vmem:[%s9995_s1 + $0x994] ss:$196 sps:$4 sm:$0xff]   ;;  %v9221_v34 = vld [vmem:[%s9995_s1 + $0x99c] ss:$196 sps:$4 sm:$0xff]  }
 0x131   : > { %v9216_v36 = vld [vmem:[%s9995_s1 + $0x990] ss:$196 sps:$4 sm:$0xff]  }
 0x133   : > { %3134 = vmatpush1.bf16.msra.mxu0 %v9126_v37  ;;  %3175 = vmatpush1.bf16.msra.mxu1 %v9129_v38  ;;  %v9219_v37 = vld [vmem:[%s9995_s1 + $0x998] ss:$196 sps:$4 sm:$0xff]  }
 0x134   : > { %3201 = vmatprep.subr.bf16.mxu0 %v9134_v39  ;;  %3242 = vmatprep.subr.bf16.mxu1 %v9137_v40  ;;  %v9224_v38 = vld [vmem:[%s9995_s1 + $0xb1c] ss:$196 sps:$4 sm:$0xff]   ;;  %v9227_v39 = vld [vmem:[%s9995_s1 + $0xb24] ss:$196 sps:$4 sm:$0xff]  }
 0x135   : > { %v9222_v40 = vld [vmem:[%s9995_s1 + $0xb18] ss:$196 sps:$4 sm:$0xff]  }
 0x136   : > { %3152 = vmatmul.mubr.bf16.vlgmr.msra.gmra.mrb[16].mxu0 %v10056_v35  ;;  %3193 = vmatmul.mubr.bf16.vlgmr.msra.gmra.mrb[16].mxu1 %v10056_v35  ;;  %v9144_v35 = vld [vmem:[%s9995_s1 + $0x360] ss:$196 sps:$4 sm:$0xff]  }
 0x137   : > { %3202 = vmatpush1.bf16.msra.mxu0 %v9132_v41  ;;  %3243 = vmatpush1.bf16.msra.mxu1 %v9135_v42  ;;  %v9225_v41 = vld [vmem:[%s9995_s1 + $0xb20] ss:$196 sps:$4 sm:$0xff]   ;;  %v9230_v42 = vld [vmem:[%s9995_s1 + $0x74] ss:$196 sps:$4 sm:$0xff]  }
 0x138   : > { %3203 = vmatprep.subr.bf16.mxu0 %v9140_v43  ;;  %3244 = vmatprep.subr.bf16.mxu1 %v9143_v44  ;;  %v9233_v43 = vld [vmem:[%s9995_s1 + $0x7c] ss:$196 sps:$4 sm:$0xff]   ;;  %v9228_v44 = vld [vmem:[%s9995_s1 + $0x70] ss:$196 sps:$4 sm:$0xff]  }
 0x139   : > { %3233 = vmatprep.mubr.bf16.mxu0 %v9764_v0  ;;  %3274 = vmatprep.mubr.bf16.mxu1 %v9764_v0 }
 0x13b   : > { %3204 = vmatpush1.bf16.msra.mxu0 %v9138_v45  ;;  %3245 = vmatpush1.bf16.msra.mxu1 %v9141_v46  ;;  %v9231_v45 = vld [vmem:[%s9995_s1 + $0x78] ss:$196 sps:$4 sm:$0xff]  }
 0x13c   : > { %3205 = vmatprep.subr.bf16.mxu0 %v9146_v47  ;;  %3246 = vmatprep.subr.bf16.mxu1 %v9149_v48  ;;  %v9236_v46 = vld [vmem:[%s9995_s1 + $0x1fc] ss:$196 sps:$4 sm:$0xff]   ;;  %v9239_v47 = vld [vmem:[%s9995_s1 + $0x204] ss:$196 sps:$4 sm:$0xff]   ;;  %v3869_v48 = vlaneseq }
 0x13f   : > { %3206 = vmatpush1.bf16.msra.mxu0 %v9144_v35  ;;  %3247 = vmatpush1.bf16.msra.mxu1 %v9147_v49  ;;  %v9234_v35 = vld [vmem:[%s9995_s1 + $0x1f8] ss:$196 sps:$4 sm:$0xff]   ;;  %v9237_v49 = vld [vmem:[%s9995_s1 + $0x200] ss:$196 sps:$4 sm:$0xff]  }
 0x140   : > { %3207 = vmatprep.subr.bf16.mxu0 %v9152_v50  ;;  %3248 = vmatprep.subr.bf16.mxu1 %v9155_v51  ;;  %v9242_v50 = vld [vmem:[%s9995_s1 + $0x384] ss:$196 sps:$4 sm:$0xff]   ;;  %v9245_v51 = vld [vmem:[%s9995_s1 + $0x38c] ss:$196 sps:$4 sm:$0xff]  }
 0x143   : > { %3208 = vmatpush1.bf16.msra.mxu0 %v9150_v52  ;;  %3249 = vmatpush1.bf16.msra.mxu1 %v9153_v53  ;;  %v9240_v52 = vld [vmem:[%s9995_s1 + $0x380] ss:$196 sps:$4 sm:$0xff]   ;;  %v10293_v53 = vshrl.u32 %v3869_v48, 7  ;;  %v9281_v48 = vld [vmem:[%s9995_s1 + $0x8c] ss:$196 sps:$4 sm:$0xff]  }
 0x144   : > { %3209 = vmatprep.subr.bf16.mxu0 %v9158_v54  ;;  %3250 = vmatprep.subr.bf16.mxu1 %v9161_v55  ;;  %v9243_v54 = vld [vmem:[%s9995_s1 + $0x388] ss:$196 sps:$4 sm:$0xff]  }
 0x145   : > { %v9248_v55 = vld [vmem:[%s9995_s1 + $0x50c] ss:$196 sps:$4 sm:$0xff]  }
 0x147   : > { %3210 = vmatpush1.bf16.msra.mxu0 %v9156_v56  ;;  %3251 = vmatpush1.bf16.msra.mxu1 %v9159_v57  ;;  %v9251_v56 = vld [vmem:[%s9995_s1 + $0x514] ss:$196 sps:$4 sm:$0xff]   ;;  %v9246_v57 = vld [vmem:[%s9995_s1 + $0x508] ss:$196 sps:$4 sm:$0xff]  }
 0x148   : > { %3211 = vmatprep.subr.bf16.mxu0 %v9164_v58  ;;  %3252 = vmatprep.subr.bf16.mxu1 %v9167_v59  ;;  %v10300_v58 = vsub.s32 0, %v10293_v53  ;;  %v10303_v59 = vsub.s32 1, %v10293_v53 }
 0x14b   : > { %3212 = vmatpush1.bf16.msra.mxu0 %v9162_v60  ;;  %3253 = vmatpush1.bf16.msra.mxu1 %v9165_v61  ;;  %v9249_v60 = vld [vmem:[%s9995_s1 + $0x510] ss:$196 sps:$4 sm:$0xff]  }
 0x14c   : > { %3213 = vmatprep.subr.bf16.mxu0 %v9170_v62  ;;  %3254 = vmatprep.subr.bf16.mxu1 %v9173_v63  ;;  %v10307_v61 = vld [vmem:[%s10003_s16] sm:$0xff]  ;;  %v10310_v62 = vsub.s32 2, %v10293_v53  ;;  %v10313_v63 = vsub.s32 3, %v10293_v53 }
 0x14f   : > { %3214 = vmatpush1.bf16.msra.mxu0 %v9168_v1  ;;  %3255 = vmatpush1.bf16.msra.mxu1 %v9171_v2  ;;  %v9254_v1 = vld [vmem:[%s9995_s1 + $0x694] ss:$196 sps:$4 sm:$0xff]   ;;  %v9257_v2 = vld [vmem:[%s9995_s1 + $0x69c] ss:$196 sps:$4 sm:$0xff]  }
 0x150   : > { %3215 = vmatprep.subr.bf16.mxu0 %v9176_v3  ;;  %3256 = vmatprep.subr.bf16.mxu1 %v9179_v5  ;;  %v9766_v3 = vmov 1983009808  }
 0x151   : > { %v3867_v5 = vunpack.c.l.s4 %v9766_v3  ;;  %v10368_v3 = vsub.s32 5, %v10293_v53 }
 0x153   : > { %3216 = vmatpush1.bf16.msra.mxu0 %v9174_v6  ;;  %3257 = vmatpush1.bf16.msra.mxu1 %v9177_v7  ;;  %v4147_v6 = vrot.slane %v10307_v61, %v10300_v58  ;;  %v4151_v7 = vrot.slane %v10307_v61, %v10303_v59 }
 0x154   : > { %3283 = vmatprep.subr.bf16.mxu0 %v9182_v8  ;;  %3324 = vmatprep.subr.bf16.mxu1 %v9185_v9  ;;  %v9252_v8 = vld [vmem:[%s9995_s1 + $0x690] ss:$196 sps:$4 sm:$0xff]   ;;  %v9255_v9 = vld [vmem:[%s9995_s1 + $0x698] ss:$196 sps:$4 sm:$0xff]  }
 0x156   : > { %3234 = vmatmul.mubr.bf16.vlgmr.msra.gmra.mrb[20].mxu0 %v10246_v14  ;;  %3275 = vmatmul.mubr.bf16.vlgmr.msra.gmra.mrb[20].mxu1 %v10246_v14 }
 0x157   : > { %3284 = vmatpush1.bf16.msra.mxu0 %v9180_v10  ;;  %3325 = vmatpush1.bf16.msra.mxu1 %v9183_v11  ;;  %v4155_v10 = vrot.slane %v10307_v61, %v10310_v62  ;;  %v4159_v11 = vrot.slane %v10307_v61, %v10313_v63 }
 0x158   : > { %3285 = vmatprep.subr.bf16.mxu0 %v9188_v12  ;;  %3326 = vmatprep.subr.bf16.mxu1 %v9191_v13  ;;  %v3868_v12 = vunpack.c.0.s8 %v3867_v5  ;;  %v9260_v13 = vld [vmem:[%s9995_s1 + $0x81c] ss:$196 sps:$4 sm:$0xff]  }
 0x159   : > { %3315 = vmatprep.mubr.bf16.mxu0 %v9764_v0  ;;  %3356 = vmatprep.mubr.bf16.mxu1 %v9764_v0 }
 0x15b   : > { %3286 = vmatpush1.bf16.msra.mxu0 %v9186_v15  ;;  %3327 = vmatpush1.bf16.msra.mxu1 %v9189_v16  ;;  %v9263_v15 = vld [vmem:[%s9995_s1 + $0x824] ss:$196 sps:$4 sm:$0xff]   ;;  %v4340_v16 = vcombine.low %v4147_v6, %v4151_v7  ;;  %v9290_v6 = vld [vmem:[%s9995_s1 + $0x394] ss:$196 sps:$4 sm:$0xff]   ;;  %v9293_v7 = vld [vmem:[%s9995_s1 + $0x39c] ss:$196 sps:$4 sm:$0xff]  }
 0x15c   : > { %3287 = vmatprep.subr.bf16.mxu0 %v9194_v17  ;;  %3328 = vmatprep.subr.bf16.mxu1 %v9197_v18  ;;  %v4341_v17 = vcombine.low %v4155_v10, %v4159_v11  ;;  %v9258_v18 = vld [vmem:[%s9995_s1 + $0x818] ss:$196 sps:$4 sm:$0xff]  }
 0x15f   : > { %3288 = vmatpush1.bf16.msra.mxu0 %v9192_v19  ;;  %3329 = vmatpush1.bf16.msra.mxu1 %v9195_v20  ;;  %v9261_v19 = vld [vmem:[%s9995_s1 + $0x820] ss:$196 sps:$4 sm:$0xff]   ;;  %v10332_v20 = vsub.s32 %v3868_v12, %v10293_v53  ;;  %v10378_v12 = vsub.s32 7, %v10293_v53 }
 0x160   : > { %3289 = vmatprep.subr.bf16.mxu0 %v9200_v21  ;;  %3330 = vmatprep.subr.bf16.mxu1 %v9203_v22  ;;  %v9266_v21 = vld [vmem:[%s9995_s1 + $0x9a4] ss:$196 sps:$4 sm:$0xff]   ;;  %v9269_v22 = vld [vmem:[%s9995_s1 + $0x9ac] ss:$196 sps:$4 sm:$0xff]  }
 0x163   : > { %3290 = vmatpush1.bf16.msra.mxu0 %v9198_v23  ;;  %3331 = vmatpush1.bf16.msra.mxu1 %v9201_v24 }
 0x164   : > { %3291 = vmatprep.subr.bf16.mxu0 %v9206_v25  ;;  %3332 = vmatprep.subr.bf16.mxu1 %v9209_v26 }
 0x167   : > { %3292 = vmatpush1.bf16.msra.mxu0 %v9204_v27  ;;  %3333 = vmatpush1.bf16.msra.mxu1 %v9207_v28  ;;  %v4348_v27 = vrot.slane %v4340_v16, %v10332_v20 }
 0x168   : > { %3293 = vmatprep.subr.bf16.mxu0 %v9212_v29  ;;  %3334 = vmatprep.subr.bf16.mxu1 %v9215_v30  ;;  %v4355_v30 = vrot.slane %v4341_v17, %v10332_v20  ;;  %v10383_v17 = vld [vmem:[%s10009_s24] sm:$0xff] }
 0x16b   : > { %3294 = vmatpush1.bf16.msra.mxu0 %v9210_v31  ;;  %3335 = vmatpush1.bf16.msra.mxu1 %v9213_v32 }
 0x16c   : > { %3295 = vmatprep.subr.bf16.mxu0 %v9218_v33  ;;  %3336 = vmatprep.subr.bf16.mxu1 %v9221_v34  ;;  %v9264_v33 = vld [vmem:[%s9995_s1 + $0x9a0] ss:$196 sps:$4 sm:$0xff]   ;;  %v9267_v34 = vld [vmem:[%s9995_s1 + $0x9a8] ss:$196 sps:$4 sm:$0xff]  }
 0x16f   : > { %3296 = vmatpush1.bf16.msra.mxu0 %v9216_v36  ;;  %3337 = vmatpush1.bf16.msra.mxu1 %v9219_v37 }
 0x170   : > { %3297 = vmatprep.subr.bf16.mxu0 %v9224_v38  ;;  %3338 = vmatprep.subr.bf16.mxu1 %v9227_v39  ;;  %v9272_v38 = vld [vmem:[%s9995_s1 + $0xb2c] ss:$196 sps:$4 sm:$0xff]   ;;  %v9275_v39 = vld [vmem:[%s9995_s1 + $0xb34] ss:$196 sps:$4 sm:$0xff]  }
 0x173   : > { %3298 = vmatpush1.bf16.msra.mxu0 %v9222_v40  ;;  %3339 = vmatpush1.bf16.msra.mxu1 %v9225_v41 }
 0x174   : > { %3365 = vmatprep.subr.bf16.mxu0 %v9230_v42  ;;  %3406 = vmatprep.subr.bf16.mxu1 %v9233_v43  ;;  %v10345_v42 = vsub.s32 4, %v10293_v53 }
 0x176   : > { %3316 = vmatmul.mubr.bf16.vlgmr.msra.gmra.mrb[24].mxu0 %v10246_v14  ;;  %3357 = vmatmul.mubr.bf16.vlgmr.msra.gmra.mrb[24].mxu1 %v10246_v14 }
 0x177   : > { %3366 = vmatpush1.bf16.msra.mxu0 %v9228_v44  ;;  %3407 = vmatpush1.bf16.msra.mxu1 %v9231_v45  ;;  %v4356_v44 = vcombine.low %v4348_v27, %v4355_v30  ;;  %v9270_v45 = vld [vmem:[%s9995_s1 + $0xb28] ss:$196 sps:$4 sm:$0xff]   ;;  %v6609_v30 = vrot.slane %v10383_v17, %v10300_v58 }
 0x178   : > { %3367 = vmatprep.subr.bf16.mxu0 %v9236_v46  ;;  %3408 = vmatprep.subr.bf16.mxu1 %v9239_v47  ;;  %v9273_v46 = vld [vmem:[%s9995_s1 + $0xb30] ss:$196 sps:$4 sm:$0xff]   ;;  %v9278_v47 = vld [vmem:[%s9995_s1 + $0x84] ss:$196 sps:$4 sm:$0xff]  }
 0x179   : > { %3397 = vmatprep.mubr.bf16.mxu0 %v9764_v0  ;;  %3438 = vmatprep.mubr.bf16.mxu1 %v9764_v0 }
 0x17b   : > { %3368 = vmatpush1.bf16.msra.mxu0 %v9234_v35  ;;  %3409 = vmatpush1.bf16.msra.mxu1 %v9237_v49  ;;  %v9276_v49 = vld [vmem:[%s9995_s1 + $0x80] ss:$196 sps:$4 sm:$0xff]  }
 0x17c   : > { %3369 = vmatprep.subr.bf16.mxu0 %v9242_v50  ;;  %3410 = vmatprep.subr.bf16.mxu1 %v9245_v51  ;;  %v9279_v50 = vld [vmem:[%s9995_s1 + $0x88] ss:$196 sps:$4 sm:$0xff]  }
 0x17d   : > { %v9284_v51 = vld [vmem:[%s9995_s1 + $0x20c] ss:$196 sps:$4 sm:$0xff]  }
 0x17f   : > { %3370 = vmatpush1.bf16.msra.mxu0 %v9240_v52  ;;  %3411 = vmatpush1.bf16.msra.mxu1 %v9243_v54  ;;  %v9287_v52 = vld [vmem:[%s9995_s1 + $0x214] ss:$196 sps:$4 sm:$0xff]  }
 0x180   : > { %3371 = vmatprep.subr.bf16.mxu0 %v9248_v55  ;;  %3412 = vmatprep.subr.bf16.mxu1 %v9251_v56 }
 0x183   : > { %3372 = vmatpush1.bf16.msra.mxu0 %v9246_v57  ;;  %3413 = vmatpush1.bf16.msra.mxu1 %v9249_v60 }
 0x184   : > { %3373 = vmatprep.subr.bf16.mxu0 %v9254_v1  ;;  %3414 = vmatprep.subr.bf16.mxu1 %v9257_v2  ;;  %v9282_v1 = vld [vmem:[%s9995_s1 + $0x208] ss:$196 sps:$4 sm:$0xff]   ;;  %v9285_v2 = vld [vmem:[%s9995_s1 + $0x210] ss:$196 sps:$4 sm:$0xff]  }
 0x187   : > { %3374 = vmatpush1.bf16.msra.mxu0 %v9252_v8  ;;  %3415 = vmatpush1.bf16.msra.mxu1 %v9255_v9  ;;  %v10373_v8 = vsub.s32 6, %v10293_v53 }
 0x188   : > { %3375 = vmatprep.subr.bf16.mxu0 %v9260_v13  ;;  %3416 = vmatprep.subr.bf16.mxu1 %v9263_v15 }
 0x189   : > { %v2825_v23 = vpop.f32.mrb[0].mxu0  ;;  %v2866_v24 = vpop.f32.mrb[0].mxu1 }
 0x18a   : > { %v2827_v25 = vpop.f32.mrb[1].mxu0  ;;  %v2868_v26 = vpop.f32.mrb[1].mxu1 }
 0x18b   : > { %v3864_v28 = vcombine.low %v2825_v23, %v2827_v25  ;;  %v3865_v29 = vcombine.low %v2866_v24, %v2868_v26  ;;  %v2829_v31 = vpop.f32.mrb[2].mxu0  ;;  %v2870_v32 = vpop.f32.mrb[2].mxu1  ;;  %3376 = vmatpush1.bf16.msra.mxu0 %v9258_v18  ;;  %3417 = vmatpush1.bf16.msra.mxu1 %v9261_v19  ;;  %v9288_v19 = vld [vmem:[%s9995_s1 + $0x390] ss:$196 sps:$4 sm:$0xff]   ;;  %v4167_v23 = vrot.slane %v10307_v61, %v10368_v3 }
 0x18c   : > { %v2830_v36 = vpop.f32.mrb[3].mxu0  ;;  %v2871_v37 = vpop.f32.mrb[3].mxu1  ;;  %3377 = vmatprep.subr.bf16.mxu0 %v9266_v21  ;;  %3418 = vmatprep.subr.bf16.mxu1 %v9269_v22  ;;  %v9291_v21 = vld [vmem:[%s9995_s1 + $0x398] ss:$196 sps:$4 sm:$0xff]   ;;  %v4163_v22 = vrot.slane %v10307_v61, %v10345_v42  ;;  %v6613_v31 = vrot.slane %v10383_v17, %v10303_v59  ;;  %v4171_v32 = vrot.slane %v10307_v61, %v10373_v8 }
 0x18d   : > { %v3872_v40 = vrot.slane %v3864_v28, %v10332_v20  ;;  %v3879_v41 = vrot.slane %v3865_v29, %v10332_v20  ;;  %v9296_v28 = vld [vmem:[%s9995_s1 + $0x51c] ss:$196 sps:$4 sm:$0xff]   ;;  %v9299_v29 = vld [vmem:[%s9995_s1 + $0x524] ss:$196 sps:$4 sm:$0xff]  }
 0x18f   : > { %v3880_v43 = vcombine.low %v3872_v40, %v3879_v41  ;;  %3378 = vmatpush1.bf16.msra.mxu0 %v9264_v33  ;;  %3419 = vmatpush1.bf16.msra.mxu1 %v9267_v34  ;;  %v4175_v33 = vrot.slane %v10307_v61, %v10378_v12  ;;  %v9297_v40 = vld [vmem:[%s9995_s1 + $0x520] ss:$196 sps:$4 sm:$0xff]   ;;  %v9305_v61 = vld [vmem:[%s9995_s1 + $0x6ac] ss:$196 sps:$4 sm:$0xff]  }
 0x190   : > { %3379 = vmatprep.subr.bf16.mxu0 %v9272_v38  ;;  %3420 = vmatprep.subr.bf16.mxu1 %v9275_v39  ;;  %v9294_v39 = vld [vmem:[%s9995_s1 + $0x518] ss:$196 sps:$4 sm:$0xff]   ;;  %v9302_v41 = vld [vmem:[%s9995_s1 + $0x6a4] ss:$196 sps:$4 sm:$0xff]  }
 0x191   : > { %v10351_v35 = vadd.f32 %v4356_v44, %v3880_v43  ;;  %v10405_v43 = vcombine.low %v4163_v22, %v4167_v23 }
 0x193   : > { %3380 = vmatpush1.bf16.msra.mxu0 %v9270_v45  ;;  %3421 = vmatpush1.bf16.msra.mxu1 %v9273_v46  ;;  %v4590_v54 = vcombine.high %v10351_v35, %v10351_v35  ;;  %v4597_v55 = vrot.slane %v10351_v35, %v10332_v20 }
 0x194   : > { %3447 = vmatprep.subr.bf16.mxu0 %v9278_v47  ;;  %3488 = vmatprep.subr.bf16.mxu1 %v9281_v48  ;;  %v10408_v48 = vld [vmem:[%s10011_s26] sm:$0xff] }
 0x195   : > { %v4604_v56 = vrot.slane %v4590_v54, %v10332_v20  ;;  %v4605_v57 = vcombine.high %v4597_v55, %v4597_v55  ;;  %v4851_v60 = vsel %vm4850_vm0, %v4597_v55, 0.0 }
 0x196   : > { %3398 = vmatmul.mubr.bf16.vlgmr.msra.gmra.mrb[28].mxu0 %v10246_v14  ;;  %3439 = vmatmul.mubr.bf16.vlgmr.msra.gmra.mrb[28].mxu1 %v10246_v14  ;;  %v4852_v5 = vrot.slane %v4851_v60, 4 }
 0x197   : > { %3448 = vmatpush1.bf16.msra.mxu0 %v9276_v49  ;;  %3489 = vmatpush1.bf16.msra.mxu1 %v9279_v50  ;;  %v4606_v9 = vcombine.high %v4604_v56, %v4604_v56  ;;  %v4858_v10 = vsel %vm4850_vm0, %v4605_v57, 0.0  ;;  %v4865_v11 = vsel %vm4850_vm0, %v4604_v56, 0.0  ;;  %v6617_v49 = vrot.slane %v10383_v17, %v10310_v62 }
 0x198   : > { %3449 = vmatprep.subr.bf16.mxu0 %v9284_v51  ;;  %3490 = vmatprep.subr.bf16.mxu1 %v9287_v52  ;;  %v4853_v13 = vadd.f32 %v4852_v5, %v4851_v60  ;;  %v4859_v15 = vrot.slane %v4858_v10, 4  ;;  %v4866_v16 = vrot.slane %v4865_v11, 4  ;;  %v6621_v50 = vrot.slane %v10383_v17, %v10313_v63  ;;  %v10420_v60 = vld [vmem:[%s10003_s16 + $0x8] sm:$0xff] }
 0x199   : > { %3479 = vmatprep.mubr.bf16.mxu0 %v9764_v0  ;;  %3520 = vmatprep.mubr.bf16.mxu1 %v9764_v0  ;;  %v4872_v18 = vsel %vm4850_vm0, %v4606_v9, 0.0  ;;  %v10415_v51 = vcombine.low %v6609_v30, %v6613_v31  ;;  %v10417_v52 = vcombine.low %v4171_v32, %v4175_v33  ;;  %v7064_v5 = vrot.slane %v10408_v48, %v10310_v62 }
 0x19a   : > { %v4854_v24 = vrot.slane %v4853_v13, 2  ;;  %v4860_v25 = vadd.f32 %v4859_v15, %v4858_v10  ;;  %v4867_v26 = vadd.f32 %v4866_v16, %v4865_v11  ;;  %v4873_v27 = vrot.slane %v4872_v18, 4  ;;  %v9308_v15 = vld [vmem:[%s9995_s1 + $0x82c] ss:$196 sps:$4 sm:$0xff]   ;;  %v9311_v16 = vld [vmem:[%s9995_s1 + $0x834] ss:$196 sps:$4 sm:$0xff]  }
 0x19b   : > { %3450 = vmatpush1.bf16.msra.mxu0 %v9282_v1  ;;  %3491 = vmatpush1.bf16.msra.mxu1 %v9285_v2  ;;  %v7056_v1 = vrot.slane %v10408_v48, %v10300_v58  ;;  %v7060_v2 = vrot.slane %v10408_v48, %v10303_v59  ;;  %v4191_v22 = vrot.slane %v10420_v60, %v10313_v63 }
 0x19c   : > { %3451 = vmatprep.subr.bf16.mxu0 %v9290_v6  ;;  %3492 = vmatprep.subr.bf16.mxu1 %v9293_v7  ;;  %v4855_v34 = vadd.f32 %v4854_v24, %v4853_v13  ;;  %v4861_v36 = vrot.slane %v4860_v25, 2  ;;  %v4868_v37 = vrot.slane %v4867_v26, 2  ;;  %v4874_v38 = vadd.f32 %v4873_v27, %v4872_v18  ;;  %v9300_v6 = vld [vmem:[%s9995_s1 + $0x6a0] ss:$196 sps:$4 sm:$0xff]   ;;  %v9303_v7 = vld [vmem:[%s9995_s1 + $0x6a8] ss:$196 sps:$4 sm:$0xff]  }
 0x19d   : > { %v7068_v13 = vrot.slane %v10408_v48, %v10313_v63  ;;  %v4179_v18 = vrot.slane %v10420_v60, %v10300_v58  ;;  %v7249_v27 = vcombine.low %v7056_v1, %v7060_v2  ;;  %v9315_v1 = vld [vmem:[%s9995_s1 + $0x9b8] ss:$196 sps:$4 sm:$0xff]  }
 0x19e   : > { %v4856_v44 = vrot.slane %v4855_v34, 1  ;;  %v4862_v45 = vadd.f32 %v4861_v36, %v4860_v25  ;;  %v4869_v46 = vadd.f32 %v4868_v37, %v4867_v26  ;;  %v4875_v47 = vrot.slane %v4874_v38, 2  ;;  %v9317_v36 = vld [vmem:[%s9995_s1 + $0x9bc] ss:$196 sps:$4 sm:$0xff]  }
 0x19f   : > { %3452 = vmatpush1.bf16.msra.mxu0 %v9288_v19  ;;  %3493 = vmatpush1.bf16.msra.mxu1 %v9291_v21  ;;  %v4183_v19 = vrot.slane %v10420_v60, %v10303_v59  ;;  %v4187_v21 = vrot.slane %v10420_v60, %v10310_v62  ;;  %v6803_v26 = vcombine.low %v6617_v49, %v6621_v50 }
 0x1a0   : > { %3453 = vmatprep.subr.bf16.mxu0 %v9296_v28  ;;  %3494 = vmatprep.subr.bf16.mxu1 %v9299_v29  ;;  %v4857_v54 = vadd.f32 %v4856_v44, %v4855_v34  ;;  %v4863_v55 = vrot.slane %v4862_v45, 1  ;;  %v4870_v56 = vrot.slane %v4869_v46, 1  ;;  %v4876_v57 = vadd.f32 %v4875_v47, %v4874_v38  ;;  %v9306_v28 = vld [vmem:[%s9995_s1 + $0x828] ss:$196 sps:$4 sm:$0xff]   ;;  %v9309_v29 = vld [vmem:[%s9995_s1 + $0x830] ss:$196 sps:$4 sm:$0xff]  }
 0x1a1   : > { %v7250_v33 = vcombine.low %v7064_v5, %v7068_v13  ;;  %v9314_v34 = vld [vmem:[%s9995_s1 + $0x9b4] ss:$196 sps:$4 sm:$0xff]   ;;  %v4372_v49 = vrot.slane %v10417_v52, %v10332_v20  ;;  %v7257_v50 = vrot.slane %v7249_v27, %v10332_v20 }
 0x1a2   : > { %v4864_v9 = vadd.f32 %v4863_v55, %v4862_v45  ;;  %v4871_v10 = vadd.f32 %v4870_v56, %v4869_v46  ;;  %v4877_v11 = vrot.slane %v4876_v57, 1  ;;  %v5195_v24 = vmul.f32 0.5, %v4857_v54 }
 0x1a3   : > { %3454 = vmatpush1.bf16.msra.mxu0 %v9294_v39  ;;  %3495 = vmatpush1.bf16.msra.mxu1 %v9297_v40  ;;  %v4365_v39 = vrot.slane %v10405_v43, %v10332_v20  ;;  %v4374_v40 = vcombine.low %v4179_v18, %v4183_v19  ;;  %v6810_v45 = vrot.slane %v10415_v51, %v10332_v20 }
 0x1a4   : > { %3455 = vmatprep.subr.bf16.mxu0 %v9302_v41  ;;  %3496 = vmatprep.subr.bf16.mxu1 %v9305_v61  ;;  %v4878_v23 = vadd.f32 %v4877_v11, %v4876_v57  ;;  %v5196_v25 = vmul.f32 0.5, %v4864_v9  ;;  %v5197_v30 = vmul.f32 0.5, %v4871_v10  ;;  %v4375_v41 = vcombine.low %v4187_v21, %v4191_v22  ;;  %v9312_v57 = vld [vmem:[%s9995_s1 + $0x9b0] ss:$196 sps:$4 sm:$0xff]   ;;  %v9323_v9 = vld [vmem:[%s9995_s1 + $0xb44] ss:$196 sps:$4 sm:$0xff]  }
 0x1a5   : > { %v6817_v46 = vrot.slane %v6803_v26, %v10332_v20  ;;  %v7264_v5 = vrot.slane %v7250_v33, %v10332_v20  ;;  %v4382_v13 = vrot.slane %v4374_v40, %v10332_v20  ;;  %v4373_v18 = vcombine.low %v4365_v39, %v4372_v49  ;;  %v9321_v26 = vld [vmem:[%s9995_s1 + $0xb40] ss:$196 sps:$4 sm:$0xff]  }
 0x1a6   : > { %v5198_v31 = vmul.f32 0.5, %v4878_v23  ;;  %v5293_v32 = vcombine.low %v5195_v24, %v5196_v25  ;;  %v6625_v19 = vrot.slane %v10383_v17, %v10345_v42  ;;  %v6629_v21 = vrot.slane %v10383_v17, %v10368_v3  ;;  %v9318_v25 = vld [vmem:[%s9995_s1 + $0xb38] ss:$196 sps:$4 sm:$0xff]  }
 0x1a7   : > { %3456 = vmatpush1.bf16.msra.mxu0 %v9300_v6  ;;  %3497 = vmatpush1.bf16.msra.mxu1 %v9303_v7  ;;  %v9320_v7 = vld [vmem:[%s9995_s1 + $0xb3c] ss:$196 sps:$4 sm:$0xff]   ;;  %v6633_v23 = vrot.slane %v10383_v17, %v10373_v8  ;;  %v6637_v24 = vrot.slane %v10383_v17, %v10378_v12  ;;  %v7072_v17 = vrot.slane %v10408_v48, %v10345_v42 }
 0x1a8   : > { %3457 = vmatprep.subr.bf16.mxu0 %v9308_v15  ;;  %3498 = vmatprep.subr.bf16.mxu1 %v9311_v16  ;;  %v5294_v44 = vcombine.low %v5197_v30, %v5198_v31  ;;  %v5301_v51 = vrot.slane %v5293_v32, %v10332_v20  ;;  %v4389_v15 = vrot.slane %v4375_v41, %v10332_v20  ;;  %v9326_v30 = vld [vmem:[%s9995_s1 + $0x94] ss:$196 sps:$4 sm:$0xff]   ;;  %v9329_v31 = vld [vmem:[%s9995_s1 + $0x9c] ss:$196 sps:$4 sm:$0xff]  }
 0x1a9   : > { %v2907_v37 = vpop.f32.mrb[4].mxu0  ;;  %v2948_v38 = vpop.f32.mrb[4].mxu1  ;;  %v7076_v32 = vrot.slane %v10408_v48, %v10368_v3  ;;  %v10500_v39 = vcombine.low %v6625_v19, %v6629_v21  ;;  %v10502_v40 = vcombine.low %v6633_v23, %v6637_v24  ;;  %v9324_v41 = vld [vmem:[%s9995_s1 + $0x90] ss:$196 sps:$4 sm:$0xff]   ;;  %v7080_v49 = vrot.slane %v10408_v48, %v10373_v8 }
 0x1aa   : > { %v2909_v47 = vpop.f32.mrb[5].mxu0  ;;  %v2950_v61 = vpop.f32.mrb[5].mxu1  ;;  %v5308_v2 = vrot.slane %v5294_v44, %v10332_v20  ;;  %v10488_v33 = vcombine.low %v4382_v13, %v4389_v15  ;;  %v9327_v44 = vld [vmem:[%s9995_s1 + $0x98] ss:$196 sps:$4 sm:$0xff]   ;;  %v9338_v13 = vld [vmem:[%s9995_s1 + $0x3a4] ss:$196 sps:$4 sm:$0xff]  }
 0x1ab   : > { %v3881_v54 = vcombine.low %v2907_v37, %v2909_v47  ;;  %v3882_v43 = vcombine.low %v2948_v38, %v2950_v61  ;;  %v2911_v55 = vpop.f32.mrb[6].mxu0  ;;  %v2952_v56 = vpop.f32.mrb[6].mxu1  ;;  %3458 = vmatpush1.bf16.msra.mxu0 %v9306_v28  ;;  %3499 = vmatpush1.bf16.msra.mxu1 %v9309_v29  ;;  %v10478_v28 = vcombine.low %v6810_v45, %v6817_v46  ;;  %v9767_v47 = vmov 1966171168   ;;  %v9341_v19 = vld [vmem:[%s9995_s1 + $0x3ac] ss:$196 sps:$4 sm:$0xff]  }
 0x1ac   : > { %v2912_v6 = vpop.f32.mrb[7].mxu0  ;;  %v2953_v52 = vpop.f32.mrb[7].mxu1  ;;  %3459 = vmatprep.subr.bf16.mxu0 %v9314_v34  ;;  %3500 = vmatprep.subr.bf16.mxu1 %v9317_v36  ;;  %v5309_v16 = vcombine.low %v5301_v51, %v5308_v2  ;;  %v10480_v29 = vcombine.low %v7257_v50, %v7264_v5  ;;  %v4195_v34 = vrot.slane %v10420_v60, %v10345_v42  ;;  %v10507_v61 = vunpack.c.l.s4 %v9767_v47  ;;  %v9332_v50 = vld [vmem:[%s9995_s1 + $0x21c] ss:$196 sps:$4 sm:$0xff]  }
 0x1ad   : > { %v3889_v10 = vrot.slane %v3881_v54, %v10332_v20  ;;  %v3896_v11 = vrot.slane %v3882_v43, %v10332_v20  ;;  %v4199_v36 = vrot.slane %v10420_v60, %v10368_v3  ;;  %v4203_v37 = vrot.slane %v10420_v60, %v10373_v8  ;;  %v9335_v54 = vld [vmem:[%s9995_s1 + $0x224] ss:$196 sps:$4 sm:$0xff]   ;;  %v9330_v5 = vld [vmem:[%s9995_s1 + $0x218] ss:$196 sps:$4 sm:$0xff]  }
 0x1ae   : > { %v10476_v27 = vsub.f32 %v10351_v35, %v5309_v16  ;;  %v7084_v56 = vrot.slane %v10408_v48, %v10378_v12  ;;  %v4207_v6 = vrot.slane %v10420_v60, %v10378_v12  ;;  %v9368_v48 = vld [vmem:[%s9995_s1 + $0xb4c] ss:$196 sps:$4 sm:$0xff]   ;;  %v6834_v60 = vrot.slane %v10502_v40, %v10332_v20 }
 0x1af   : > { %v3897_v22 = vcombine.low %v3889_v10, %v3896_v11  ;;  %3460 = vmatpush1.bf16.msra.mxu0 %v9312_v57  ;;  %3501 = vmatpush1.bf16.msra.mxu1 %v9315_v1  ;;  %v10519_v57 = vcombine.low %v7072_v17, %v7076_v32  ;;  %v9333_v11 = vld [vmem:[%s9995_s1 + $0x220] ss:$196 sps:$4 sm:$0xff]   ;;  %v9377_v40 = vld [vmem:[%s9995_s1 + $0xac] ss:$196 sps:$4 sm:$0xff]  }
 0x1b0   : > { %3461 = vmatprep.subr.bf16.mxu0 %v9320_v7  ;;  %3502 = vmatprep.subr.bf16.mxu1 %v9323_v9  ;;  %v5530_v35 = vmul.f32 %v10476_v27, %v10476_v27  ;;  %v9336_v17 = vld [vmem:[%s9995_s1 + $0x3a0] ss:$196 sps:$4 sm:$0xff]  }
 0x1b1   : > { %v10498_v38 = vadd.f32 %v4373_v18, %v3897_v22 }
 0x1b2   : > { %v5556_v45 = vcombine.high %v5530_v35, %v5530_v35  ;;  %v5563_v46 = vrot.slane %v5530_v35, %v10332_v20 }
 0x1b3   : > { %3462 = vmatpush1.bf16.msra.mxu0 %v9318_v25  ;;  %3503 = vmatpush1.bf16.msra.mxu1 %v9321_v26  ;;  %v4607_v43 = vcombine.high %v10498_v38, %v10498_v38  ;;  %v4614_v55 = vrot.slane %v10498_v38, %v10332_v20 }
 0x1b4   : > { %3529 = vmatprep.subr.bf16.mxu0 %v9326_v30  ;;  %3570 = vmatprep.subr.bf16.mxu1 %v9329_v31  ;;  %v5570_v1 = vrot.slane %v5556_v45, %v10332_v20  ;;  %v5571_v51 = vcombine.high %v5563_v46, %v5563_v46  ;;  %v5816_v2 = vsel %vm4850_vm0, %v5563_v46, 0.0  ;;  %v9339_v45 = vld [vmem:[%s9995_s1 + $0x3a8] ss:$196 sps:$4 sm:$0xff]  }
 0x1b5   : > { %v5817_v52 = vrot.slane %v5816_v2, 4  ;;  %v4621_v7 = vrot.slane %v4607_v43, %v10332_v20  ;;  %v4622_v9 = vcombine.high %v4614_v55, %v4614_v55  ;;  %v4879_v10 = vsel %vm4850_vm0, %v4614_v55, 0.0  ;;  %v9344_v46 = vld [vmem:[%s9995_s1 + $0x52c] ss:$196 sps:$4 sm:$0xff]   ;;  %v9347_v55 = vld [vmem:[%s9995_s1 + $0x534] ss:$196 sps:$4 sm:$0xff]  }
 0x1b6   : > { %3480 = vmatmul.mubr.bf16.vlgmr.msra.gmra.mrb[32].mxu0 %v10246_v14  ;;  %3521 = vmatmul.mubr.bf16.vlgmr.msra.gmra.mrb[32].mxu1 %v10246_v14  ;;  %v5572_v15 = vcombine.high %v5570_v1, %v5570_v1  ;;  %v5823_v16 = vsel %vm4850_vm0, %v5571_v51, 0.0  ;;  %v5830_v14 = vsel %vm4850_vm0, %v5570_v1, 0.0  ;;  %v4880_v18 = vrot.slane %v4879_v10, 4 }
 0x1b7   : > { %3530 = vmatpush1.bf16.msra.mxu0 %v9324_v41  ;;  %3571 = vmatpush1.bf16.msra.mxu1 %v9327_v44  ;;  %v5818_v21 = vadd.f32 %v5817_v52, %v5816_v2  ;;  %v5824_v22 = vrot.slane %v5823_v16, 4  ;;  %v5831_v23 = vrot.slane %v5830_v14, 4  ;;  %v4623_v24 = vcombine.high %v4621_v7, %v4621_v7 }
 0x1b8   : > { %3531 = vmatprep.subr.bf16.mxu0 %v9332_v50  ;;  %3572 = vmatprep.subr.bf16.mxu1 %v9335_v54  ;;  %v5837_v25 = vsel %vm4850_vm0, %v5572_v15, 0.0  ;;  %v4881_v26 = vadd.f32 %v4880_v18, %v4879_v10  ;;  %v4886_v30 = vsel %vm4850_vm0, %v4622_v9, 0.0  ;;  %v4893_v31 = vsel %vm4850_vm0, %v4621_v7, 0.0 }
 0x1b9   : > { %3561 = vmatprep.mubr.bf16.mxu0 %v9764_v0  ;;  %3602 = vmatprep.mubr.bf16.mxu1 %v9764_v0  ;;  %v5819_v32 = vrot.slane %v5818_v21, 2  ;;  %v5825_v35 = vadd.f32 %v5824_v22, %v5823_v16  ;;  %v5832_v41 = vadd.f32 %v5831_v23, %v5830_v14  ;;  %v5838_v44 = vrot.slane %v5837_v25, 4 }
 0x1ba   : > { %v4882_v47 = vrot.slane %v4881_v26, 2  ;;  %v4887_v50 = vrot.slane %v4886_v30, 4  ;;  %v4894_v54 = vrot.slane %v4893_v31, 4  ;;  %v4900_v43 = vsel %vm4850_vm0, %v4623_v24, 0.0 }
 0x1bb   : > { %3532 = vmatpush1.bf16.msra.mxu0 %v9330_v5  ;;  %3573 = vmatpush1.bf16.msra.mxu1 %v9333_v11  ;;  %v5820_v1 = vadd.f32 %v5819_v32, %v5818_v21  ;;  %v5826_v51 = vrot.slane %v5825_v35, 2  ;;  %v5833_v2 = vrot.slane %v5832_v41, 2  ;;  %v5839_v52 = vadd.f32 %v5838_v44, %v5837_v25  ;;  %v9342_v11 = vld [vmem:[%s9995_s1 + $0x528] ss:$196 sps:$4 sm:$0xff]   ;;  %v9353_v25 = vld [vmem:[%s9995_s1 + $0x6bc] ss:$196 sps:$4 sm:$0xff]  }
 0x1bc   : > { %3533 = vmatprep.subr.bf16.mxu0 %v9338_v13  ;;  %3574 = vmatprep.subr.bf16.mxu1 %v9341_v19  ;;  %v4883_v7 = vadd.f32 %v4882_v47, %v4881_v26  ;;  %v4888_v5 = vadd.f32 %v4887_v50, %v4886_v30  ;;  %v4895_v9 = vadd.f32 %v4894_v54, %v4893_v31  ;;  %v4901_v10 = vrot.slane %v4900_v43, 4  ;;  %v9345_v13 = vld [vmem:[%s9995_s1 + $0x530] ss:$196 sps:$4 sm:$0xff]  }
 0x1bd   : > { %v5821_v15 = vrot.slane %v5820_v1, 1  ;;  %v5827_v16 = vadd.f32 %v5826_v51, %v5825_v35  ;;  %v5834_v14 = vadd.f32 %v5833_v2, %v5832_v41  ;;  %v5840_v18 = vrot.slane %v5839_v52, 2  ;;  %v9350_v19 = vld [vmem:[%s9995_s1 + $0x6b4] ss:$196 sps:$4 sm:$0xff]  }
 0x1be   : > { %v4884_v21 = vrot.slane %v4883_v7, 1  ;;  %v4889_v22 = vrot.slane %v4888_v5, 2  ;;  %v4896_v23 = vrot.slane %v4895_v9, 2  ;;  %v4902_v24 = vadd.f32 %v4901_v10, %v4900_v43  ;;  %v9348_v44 = vld [vmem:[%s9995_s1 + $0x6b0] ss:$196 sps:$4 sm:$0xff]  }
 0x1bf   : > { %3534 = vmatpush1.bf16.msra.mxu0 %v9336_v17  ;;  %3575 = vmatpush1.bf16.msra.mxu1 %v9339_v45  ;;  %v5822_v26 = vadd.f32 %v5821_v15, %v5820_v1  ;;  %v5828_v30 = vrot.slane %v5827_v16, 1  ;;  %v5835_v31 = vrot.slane %v5834_v14, 1  ;;  %v5841_v32 = vadd.f32 %v5840_v18, %v5839_v52  ;;  %v9351_v43 = vld [vmem:[%s9995_s1 + $0x6b8] ss:$196 sps:$4 sm:$0xff]  }
 0x1c0   : > { %3535 = vmatprep.subr.bf16.mxu0 %v9344_v46  ;;  %3576 = vmatprep.subr.bf16.mxu1 %v9347_v55  ;;  %v4890_v35 = vadd.f32 %v4889_v22, %v4888_v5  ;;  %v4897_v41 = vadd.f32 %v4896_v23, %v4895_v9  ;;  %v4903_v17 = vrot.slane %v4902_v24, 2  ;;  %v10556_v45 = vcombine.low %v4195_v34, %v4199_v36  ;;  %v10560_v55 = vld [vmem:[%s10003_s16 + $0x10] sm:$0xff]  ;;  %v9354_v18 = vld [vmem:[%s9995_s1 + $0x838] ss:$196 sps:$4 sm:$0xff]  }
 0x1c1   : > { %v5829_v46 = vadd.f32 %v5828_v30, %v5827_v16  ;;  %v5836_v47 = vadd.f32 %v5835_v31, %v5834_v14  ;;  %v5842_v50 = vrot.slane %v5841_v32, 1  ;;  %v6159_v54 = vmul.f32 0.5, %v5822_v26  ;;  %v9356_v34 = vld [vmem:[%s9995_s1 + $0x83c] ss:$196 sps:$4 sm:$0xff]   ;;  %v9359_v36 = vld [vmem:[%s9995_s1 + $0x844] ss:$196 sps:$4 sm:$0xff]  }
 0x1c2   : > { %v4885_v1 = vadd.f32 %v4884_v21, %v4883_v7  ;;  %v4891_v51 = vrot.slane %v4890_v35, 1  ;;  %v4898_v2 = vrot.slane %v4897_v41, 1  ;;  %v4904_v52 = vadd.f32 %v4903_v17, %v4902_v24  ;;  %v9362_v30 = vld [vmem:[%s9995_s1 + $0x9c4] ss:$196 sps:$4 sm:$0xff]   ;;  %v9365_v31 = vld [vmem:[%s9995_s1 + $0x9cc] ss:$196 sps:$4 sm:$0xff]  }
 0x1c3   : > { %3536 = vmatpush1.bf16.msra.mxu0 %v9342_v11  ;;  %3577 = vmatpush1.bf16.msra.mxu1 %v9345_v13  ;;  %v5843_v5 = vadd.f32 %v5842_v50, %v5841_v32  ;;  %v6160_v9 = vmul.f32 0.5, %v5829_v46  ;;  %v6161_v10 = vmul.f32 0.5, %v5836_v47  ;;  %v6208_v15 = vadd.f32 1e-05, %v6159_v54  ;;  %v9357_v13 = vld [vmem:[%s9995_s1 + $0x840] ss:$196 sps:$4 sm:$0xff]  }
 0x1c4   : > { %3537 = vmatprep.subr.bf16.mxu0 %v9350_v19  ;;  %3578 = vmatprep.subr.bf16.mxu1 %v9353_v25  ;;  %v4892_v16 = vadd.f32 %v4891_v51, %v4890_v35  ;;  %v4899_v11 = vadd.f32 %v4898_v2, %v4897_v41  ;;  %v4905_v14 = vrot.slane %v4904_v52, 1  ;;  %v4211_v7 = vrot.slane %v10560_v55, %v10300_v58 }
 0x1c5   : > { %v6162_v21 = vmul.f32 0.5, %v5843_v5  ;;  %v6209_v22 = vadd.f32 1e-05, %v6160_v9  ;;  %v6210_v19 = vadd.f32 1e-05, %v6161_v10  ;;  %v4215_v23 = vrot.slane %v10560_v55, %v10303_v59 }
 0x1c6   : > { %9476 = vrsqrt.f32 %v6208_v15  ;;  %v4906_v24 = vadd.f32 %v4905_v14, %v4904_v52  ;;  %v5199_v25 = vmul.f32 0.5, %v4885_v1  ;;  %v5200_v26 = vmul.f32 0.5, %v4892_v16  ;;  %v9363_v5 = vld [vmem:[%s9995_s1 + $0x9c8] ss:$196 sps:$4 sm:$0xff]  }
 0x1c7   : > { %3538 = vmatpush1.bf16.msra.mxu0 %v9348_v44  ;;  %3579 = vmatpush1.bf16.msra.mxu1 %v9351_v43  ;;  %v6211_v32 = vadd.f32 1e-05, %v6162_v21  ;;  %9478 = vrsqrt.f32 %v6209_v22  ;;  %v4219_v17 = vrot.slane %v10560_v55, %v10310_v62  ;;  %v4223_v44 = vrot.slane %v10560_v55, %v10313_v63 }
 0x1c8   : > { %3539 = vmatprep.subr.bf16.mxu0 %v9356_v34  ;;  %3580 = vmatprep.subr.bf16.mxu1 %v9359_v36  ;;  %9480 = vrsqrt.f32 %v6210_v19  ;;  %v5201_v46 = vmul.f32 0.5, %v4899_v11  ;;  %v5202_v47 = vmul.f32 0.5, %v4906_v24  ;;  %v5310_v50 = vcombine.low %v5199_v25, %v5200_v26  ;;  %v9360_v36 = vld [vmem:[%s9995_s1 + $0x9c0] ss:$196 sps:$4 sm:$0xff]   ;;  %v9371_v11 = vld [vmem:[%s9995_s1 + $0xb54] ss:$196 sps:$4 sm:$0xff]  }
 0x1c9   : > { %v2989_v35 = vpop.f32.mrb[8].mxu0  ;;  %v3030_v41 = vpop.f32.mrb[8].mxu1  ;;  %9482 = vrsqrt.f32 %v6211_v32  ;;  %v7267_v1 = vcombine.low %v7080_v49, %v7084_v56  ;;  %v7876_v9 = vunpack.c.0.s8 %v10507_v61  ;;  %v4392_v49 = vcombine.low %v4203_v37, %v4207_v6  ;;  %v10604_v6 = vld [vmem:[%s10009_s24 + $0x8] sm:$0xff] }
 0x1ca   : > { %v2991_v54 = vpop.f32.mrb[9].mxu0  ;;  %v3032_v43 = vpop.f32.mrb[9].mxu1  ;;  %v5311_v10 = vcombine.low %v5201_v46, %v5202_v47  ;;  %v4408_v56 = vcombine.low %v4211_v7, %v4215_v23  ;;  %v6827_v61 = vrot.slane %v10500_v39, %v10332_v20  ;;  %v5318_v21 = vrot.slane %v5310_v50, %v10332_v20  ;;  %v9366_v19 = vld [vmem:[%s9995_s1 + $0xb48] ss:$196 sps:$4 sm:$0xff]   ;;  %v9369_v23 = vld [vmem:[%s9995_s1 + $0xb50] ss:$196 sps:$4 sm:$0xff]  }
 0x1cb   : > { %v3898_v51 = vcombine.low %v2989_v35, %v2991_v54  ;;  %v3899_v2 = vcombine.low %v3030_v41, %v3032_v43  ;;  %v2993_v52 = vpop.f32.mrb[10].mxu0  ;;  %v3034_v34 = vpop.f32.mrb[10].mxu1  ;;  %3540 = vmatpush1.bf16.msra.mxu0 %v9354_v18  ;;  %3581 = vmatpush1.bf16.msra.mxu1 %v9357_v13  ;;  %v4409_v13 = vcombine.low %v4219_v17, %v4223_v44  ;;  %v9374_v26 = vld [vmem:[%s9995_s1 + $0xa4] ss:$196 sps:$4 sm:$0xff]  }
 0x1cc   : > { %v2994_v15 = vpop.f32.mrb[11].mxu0  ;;  %v3035_v16 = vpop.f32.mrb[11].mxu1  ;;  %3541 = vmatprep.subr.bf16.mxu0 %v9362_v30  ;;  %3582 = vmatprep.subr.bf16.mxu1 %v9365_v31  ;;  %v5325_v22 = vrot.slane %v5311_v10, %v10332_v20  ;;  %v7274_v37 = vrot.slane %v10519_v57, %v10332_v20  ;;  %v7281_v39 = vrot.slane %v7267_v1, %v10332_v20  ;;  %v9380_v52 = vld [vmem:[%s9995_s1 + $0x22c] ss:$196 sps:$4 sm:$0xff]   ;;  %v9383_v10 = vld [vmem:[%s9995_s1 + $0x234] ss:$196 sps:$4 sm:$0xff]  }
 0x1cd   : > { %v3906_v14 = vrot.slane %v3898_v51, %v10332_v20  ;;  %v3913_v18 = vrot.slane %v3899_v2, %v10332_v20  ;;  %v4399_v24 = vrot.slane %v10556_v45, %v10332_v20  ;;  %v4406_v30 = vrot.slane %v4392_v49, %v10332_v20  ;;  %v9375_v2 = vld [vmem:[%s9995_s1 + $0xa8] ss:$196 sps:$4 sm:$0xff]  }
 0x1ce   : > { %v5326_v25 = vcombine.low %v5318_v21, %v5325_v22  ;;  %v4416_v57 = vrot.slane %v4408_v56, %v10332_v20  ;;  %v6641_v31 = vrot.slane %v10604_v6, %v10300_v58  ;;  %v6645_v32 = vrot.slane %v10604_v6, %v10303_v59  ;;  %v10657_v56 = vld [vmem:[%s10011_s26 + $0x8] sm:$0xff] }
 0x1cf   : > { %v3914_v7 = vcombine.low %v3906_v14, %v3913_v18  ;;  %3542 = vmatpush1.bf16.msra.mxu0 %v9360_v36  ;;  %3583 = vmatpush1.bf16.msra.mxu1 %v9363_v5  ;;  %v4423_v35 = vrot.slane %v4409_v13, %v10332_v20  ;;  %v10621_v45 = vsub.s32 %v7876_v9, %v10293_v53  ;;  %v9372_v53 = vld [vmem:[%s9995_s1 + $0xa0] ss:$196 sps:$4 sm:$0xff]   ;;  %v9378_v22 = vld [vmem:[%s9995_s1 + $0x228] ss:$196 sps:$4 sm:$0xff]  }
 0x1d0   : > { %3543 = vmatprep.subr.bf16.mxu0 %v9368_v48  ;;  %3584 = vmatprep.subr.bf16.mxu1 %v9371_v11  ;;  %v9477_v41 = vpop.eup %9476  ;;  %v10624_v17 = vsub.f32 %v10498_v38, %v5326_v25  ;;  %v6649_v44 = vrot.slane %v10604_v6, %v10310_v62  ;;  %v6653_v46 = vrot.slane %v10604_v6, %v10313_v63 }
 0x1d1   : > { %v9479_v47 = vpop.eup %9478  ;;  %v10630_v50 = vcombine.low %v6827_v61, %v6834_v60  ;;  %v10632_v54 = vcombine.low %v7274_v37, %v7281_v39  ;;  %v10635_v43 = vadd.f32 %v10488_v33, %v3914_v7  ;;  %v10642_v34 = vcombine.low %v4399_v24, %v4406_v30  ;;  %v10662_v61 = vld [vmem:[%s11842_s0] sm:$0x1] }
 0x1d2   : > { %v9481_v38 = vpop.eup %9480  ;;  %v6355_v1 = vcombine.low %v9477_v41, %v9479_v47  ;;  %v5531_v51 = vmul.f32 %v10624_v17, %v10624_v17  ;;  %v10648_v9 = vcombine.low %v6641_v31, %v6645_v32  ;;  %v10651_v15 = vcombine.low %v4416_v57, %v4423_v35  ;;  %v9389_v30 = vld [vmem:[%s9995_s1 + $0x3bc] ss:$196 sps:$4 sm:$0xff]  }
 0x1d3   : > { %3544 = vmatpush1.bf16.msra.mxu0 %v9366_v19  ;;  %3585 = vmatpush1.bf16.msra.mxu1 %v9369_v23  ;;  %v9483_v36 = vpop.eup %9482  ;;  %v4624_v33 = vcombine.high %v10635_v43, %v10635_v43  ;;  %v4631_v5 = vrot.slane %v10635_v43, %v10332_v20  ;;  %v10654_v49 = vcombine.low %v6649_v44, %v6653_v46  ;;  %v9381_v19 = vld [vmem:[%s9995_s1 + $0x230] ss:$196 sps:$4 sm:$0xff]  }
 0x1d4   : > { %3611 = vmatprep.subr.bf16.mxu0 %v9374_v26  ;;  %3652 = vmatprep.subr.bf16.mxu1 %v9377_v40  ;;  %v6356_v16 = vcombine.low %v9481_v38, %v9483_v36  ;;  %v5573_v48 = vcombine.high %v5531_v51, %v5531_v51  ;;  %v5580_v11 = vrot.slane %v5531_v51, %v10332_v20  ;;  %v9386_v23 = vld [vmem:[%s9995_s1 + $0x3b4] ss:$196 sps:$4 sm:$0xff]   ;;  %v9392_v36 = vld [vmem:[%s9995_s1 + $0x53c] ss:$196 sps:$4 sm:$0xff]  }
 0x1d5   : > { %v6363_v14 = vrot.slane %v6355_v1, %v10332_v20  ;;  %v10667_v18 = vrot.slane %v4624_v33, %v10332_v20  ;;  %v4639_v13 = vcombine.high %v4631_v5, %v4631_v5  ;;  %v4907_v21 = vsel %vm4850_vm0, %v4631_v5, 0.0  ;;  %v9387_v38 = vld [vmem:[%s9995_s1 + $0x3b8] ss:$196 sps:$4 sm:$0xff]  }
 0x1d6   : > { %3562 = vmatmul.mubr.bf16.vlgmr.msra.gmra.mrb[36].mxu0 %v10662_v61  ;;  %3603 = vmatmul.mubr.bf16.vlgmr.msra.gmra.mrb[36].mxu1 %v10662_v61  ;;  %v6370_v60 = vrot.slane %v6356_v16, %v10332_v20  ;;  %v5587_v37 = vrot.slane %v5573_v48, %v10332_v20  ;;  %v5588_v39 = vcombine.high %v5580_v11, %v5580_v11  ;;  %v5844_v7 = vsel %vm4850_vm0, %v5580_v11, 0.0  ;;  %v9395_v48 = vld [vmem:[%s9995_s1 + $0x544] ss:$196 sps:$4 sm:$0xff]  }
 0x1d7   : > { %3612 = vmatpush1.bf16.msra.mxu0 %v9372_v53  ;;  %3653 = vmatpush1.bf16.msra.mxu1 %v9375_v2  ;;  %v5845_v24 = vrot.slane %v5844_v7, 4  ;;  %v4908_v25 = vrot.slane %v4907_v21, 4  ;;  %v4914_v26 = vsel %vm4850_vm0, %v4639_v13, 0.0  ;;  %v7088_v40 = vrot.slane %v10657_v56, %v10300_v58  ;;  %v9384_v53 = vld [vmem:[%s9995_s1 + $0x3b0] ss:$196 sps:$4 sm:$0xff]  }
 0x1d8   : > { %3613 = vmatprep.subr.bf16.mxu0 %v9380_v52  ;;  %3654 = vmatprep.subr.bf16.mxu1 %v9383_v10  ;;  %v6371_v57 = vcombine.low %v6363_v14, %v6370_v60  ;;  %v5589_v31 = vcombine.high %v5587_v37, %v5587_v37  ;;  %v5851_v32 = vsel %vm4850_vm0, %v5588_v39, 0.0  ;;  %v5858_v35 = vsel %vm4850_vm0, %v5587_v37, 0.0 }
 0x1d9   : > { %3643 = vmatprep.mubr.bf16.mxu0 %v9764_v0  ;;  %3684 = vmatprep.mubr.bf16.mxu1 %v9764_v0  ;;  %v5846_v41 = vadd.f32 %v5845_v24, %v5844_v7  ;;  %v5852_v44 = vrot.slane %v5851_v32, 4  ;;  %v5859_v46 = vrot.slane %v5858_v35, 4  ;;  %v7092_v47 = vrot.slane %v10657_v56, %v10303_v59 }
 0x1da   : > { %v5865_v1 = vsel %vm4850_vm0, %v5589_v31, 0.0  ;;  %v4915_v51 = vrot.slane %v4914_v26, 4  ;;  %v4921_v2 = vsel %vm4850_vm0, %v10667_v18, 0.0  ;;  %v7096_v52 = vrot.slane %v10657_v56, %v10310_v62 }
 0x1db   : > { %3614 = vmatpush1.bf16.msra.mxu0 %v9378_v22  ;;  %3655 = vmatpush1.bf16.msra.mxu1 %v9381_v19  ;;  %v5847_v33 = vrot.slane %v5846_v41, 2  ;;  %v5853_v5 = vadd.f32 %v5852_v44, %v5851_v32  ;;  %v5860_v10 = vadd.f32 %v5859_v46, %v5858_v35  ;;  %v5866_v16 = vrot.slane %v5865_v1, 4  ;;  %v9390_v19 = vld [vmem:[%s9995_s1 + $0x538] ss:$196 sps:$4 sm:$0xff]   ;;  %v9401_v35 = vld [vmem:[%s9995_s1 + $0x6cc] ss:$196 sps:$4 sm:$0xff]  }
 0x1dc   : > { %3615 = vmatprep.subr.bf16.mxu0 %v9386_v23  ;;  %3656 = vmatprep.subr.bf16.mxu1 %v9389_v30  ;;  %v6579_v11 = vmul.f32 %v6371_v57, %v10476_v27  ;;  %v4909_v14 = vadd.f32 %v4908_v25, %v4907_v21  ;;  %v4916_v13 = vadd.f32 %v4915_v51, %v4914_v26  ;;  %v4922_v22 = vrot.slane %v4921_v2, 4  ;;  %v9393_v21 = vld [vmem:[%s9995_s1 + $0x540] ss:$196 sps:$4 sm:$0xff]  }
 0x1dd   : > { %v5848_v60 = vadd.f32 %v5847_v33, %v5846_v41  ;;  %v5854_v37 = vrot.slane %v5853_v5, 2  ;;  %v5861_v39 = vrot.slane %v5860_v10, 2  ;;  %v5867_v7 = vadd.f32 %v5866_v16, %v5865_v1  ;;  %v9398_v25 = vld [vmem:[%s9995_s1 + $0x6c4] ss:$196 sps:$4 sm:$0xff]  }
 0x1de   : > { %v4917_v23 = vrot.slane %v4916_v13, 2  ;;  %v6844_v24 = vrot.slane %v10648_v9, %v10332_v20  ;;  %v6851_v30 = vrot.slane %v10654_v49, %v10332_v20  ;;  %v7100_v27 = vrot.slane %v10657_v56, %v10313_v63  ;;  %v9396_v33 = vld [vmem:[%s9995_s1 + $0x6c0] ss:$196 sps:$4 sm:$0xff]  }
 0x1df   : > { %3616 = vmatpush1.bf16.msra.mxu0 %v9384_v53  ;;  %3657 = vmatpush1.bf16.msra.mxu1 %v9387_v38  ;;  %v5849_v26 = vrot.slane %v5848_v60, 1  ;;  %v5855_v57 = vadd.f32 %v5854_v37, %v5853_v5  ;;  %v5862_v31 = vadd.f32 %v5861_v39, %v5860_v10  ;;  %v5868_v32 = vrot.slane %v5867_v7, 2  ;;  %v9402_v39 = vld [vmem:[%s9995_s1 + $0x848] ss:$196 sps:$4 sm:$0xff]  }
 0x1e0   : > { %3617 = vmatprep.subr.bf16.mxu0 %v9392_v36  ;;  %3658 = vmatprep.subr.bf16.mxu1 %v9395_v48  ;;  %v7026_v41 = vmul.f32 %v10478_v28, %v6579_v11  ;;  %v4910_v44 = vrot.slane %v4909_v14, 2  ;;  %v4923_v46 = vadd.f32 %v4922_v22, %v4921_v2  ;;  %v10708_v53 = vcombine.low %v7088_v40, %v7092_v47  ;;  %v9399_v28 = vld [vmem:[%s9995_s1 + $0x6c8] ss:$196 sps:$4 sm:$0xff]   ;;  %v9407_v22 = vld [vmem:[%s9995_s1 + $0x854] ss:$196 sps:$4 sm:$0xff]  }
 0x1e1   : > { %v5850_v1 = vadd.f32 %v5849_v26, %v5848_v60  ;;  %v5856_v38 = vrot.slane %v5855_v57, 1  ;;  %v5863_v51 = vrot.slane %v5862_v31, 1  ;;  %v5869_v36 = vadd.f32 %v5868_v32, %v5867_v7  ;;  %v9404_v40 = vld [vmem:[%s9995_s1 + $0x84c] ss:$196 sps:$4 sm:$0xff]   ;;  %v9413_v32 = vld [vmem:[%s9995_s1 + $0x9dc] ss:$196 sps:$4 sm:$0xff]  }
 0x1e2   : > { %v4640_v5 = vcombine.high %v10667_v18, %v10667_v18  ;;  %v4918_v10 = vadd.f32 %v4917_v23, %v4916_v13  ;;  %v6657_v2 = vrot.slane %v10604_v6, %v10345_v42  ;;  %v7473_v60 = vadd.f32 %v10480_v29, %v7026_v41 }
 0x1e3   : > { %3618 = vmatpush1.bf16.msra.mxu0 %v9390_v19  ;;  %3659 = vmatpush1.bf16.msra.mxu1 %v9393_v21  ;;  %v5857_v47 = vadd.f32 %v5856_v38, %v5855_v57  ;;  %v5864_v16 = vadd.f32 %v5863_v51, %v5862_v31  ;;  %v5870_v48 = vrot.slane %v5869_v36, 1  ;;  %v6163_v11 = vmul.f32 0.5, %v5850_v1  ;;  %v9410_v31 = vld [vmem:[%s9995_s1 + $0x9d4] ss:$196 sps:$4 sm:$0xff]  }
 0x1e4   : > { %3619 = vmatprep.subr.bf16.mxu0 %v9398_v25  ;;  %3660 = vmatprep.subr.bf16.mxu1 %v9401_v35  ;;  %v4911_v37 = vadd.f32 %v4910_v44, %v4909_v14  ;;  %v4924_v18 = vrot.slane %v4923_v46, 2  ;;  %v6661_v13 = vrot.slane %v10604_v6, %v10368_v3  ;;  %v9405_v25 = vld [vmem:[%s9995_s1 + $0x850] ss:$196 sps:$4 sm:$0xff]   ;;  %v4919_v26 = vrot.slane %v4918_v10, 1 }
 0x1e5   : > { %v5871_v7 = vadd.f32 %v5870_v48, %v5869_v36  ;;  %v6164_v19 = vmul.f32 0.5, %v5857_v47  ;;  %v6165_v23 = vmul.f32 0.5, %v5864_v16  ;;  %v6212_v21 = vadd.f32 1e-05, %v6163_v11 }
 0x1e6   : > { %v4928_v57 = vsel %vm4850_vm0, %v4640_v5, 0.0  ;;  %v6665_v29 = vrot.slane %v10604_v6, %v10373_v8  ;;  %v6669_v14 = vrot.slane %v10604_v6, %v10378_v12  ;;  %v10733_v1 = vcombine.low %v7096_v52, %v7100_v27 }
 0x1e7   : > { %3620 = vmatpush1.bf16.msra.mxu0 %v9396_v33  ;;  %3661 = vmatpush1.bf16.msra.mxu1 %v9399_v28  ;;  %v6166_v35 = vmul.f32 0.5, %v5871_v7  ;;  %v6213_v41 = vadd.f32 1e-05, %v6164_v19  ;;  %v6214_v44 = vadd.f32 1e-05, %v6165_v23  ;;  %9484 = vrsqrt.f32 %v6212_v21 }
 0x1e8   : > { %3621 = vmatprep.subr.bf16.mxu0 %v9404_v40  ;;  %3662 = vmatprep.subr.bf16.mxu1 %v9407_v22  ;;  %v4925_v51 = vadd.f32 %v4924_v18, %v4923_v46  ;;  %v4929_v36 = vrot.slane %v4928_v57, 4  ;;  %v9408_v28 = vld [vmem:[%s9995_s1 + $0x9d0] ss:$196 sps:$4 sm:$0xff]   ;;  %v7486_v40 = vmax.f32 %v7473_v60, 0.0  ;;  %v4912_v16 = vrot.slane %v4911_v37, 1 }
 0x1e9   : > { %v3071_v38 = vpop.f32.mrb[12].mxu0  ;;  %v3112_v33 = vpop.f32.mrb[12].mxu1  ;;  %v6215_v47 = vadd.f32 1e-05, %v6166_v35  ;;  %9486 = vrsqrt.f32 %v6213_v41  ;;  %v10738_v46 = vcombine.low %v6657_v2, %v6661_v13  ;;  %v10740_v11 = vcombine.low %v6665_v29, %v6669_v14  ;;  %v9411_v7 = vld [vmem:[%s9995_s1 + $0x9d8] ss:$196 sps:$4 sm:$0xff]  }
 0x1ea   : > { %v3073_v5 = vpop.f32.mrb[13].mxu0  ;;  %v3114_v48 = vpop.f32.mrb[13].mxu1  ;;  %9488 = vrsqrt.f32 %v6214_v44  ;;  %v4930_v27 = vadd.f32 %v4929_v36, %v4928_v57  ;;  %v9416_v60 = vld [vmem:[%s9995_s1 + $0xb5c] ss:$196 sps:$4 sm:$0xff]   ;;  %v4920_v19 = vadd.f32 %v4919_v26, %v4918_v10  ;;  %v4926_v57 = vrot.slane %v4925_v51, 1 }
 0x1eb   : > { %v3075_v52 = vpop.f32.mrb[14].mxu0  ;;  %3622 = vmatpush1.bf16.msra.mxu0 %v9402_v39  ;;  %v3116_v22 = vpop.f32.mrb[14].mxu1  ;;  %3663 = vmatpush1.bf16.msra.mxu1 %v9405_v25  ;;  %9490 = vrsqrt.f32 %v6215_v47  ;;  %v3915_v23 = vcombine.low %v3071_v38, %v3073_v5  ;;  %v3916_v21 = vcombine.low %v3112_v33, %v3114_v48  ;;  %v9419_v39 = vld [vmem:[%s9995_s1 + $0xb64] ss:$196 sps:$4 sm:$0xff]   ;;  %v7104_v13 = vrot.slane %v10657_v56, %v10345_v42  ;;  %v9414_v26 = vld [vmem:[%s9995_s1 + $0xb58] ss:$196 sps:$4 sm:$0xff]  }
 0x1ec   : > { %v3076_v18 = vpop.f32.mrb[15].mxu0  ;;  %3623 = vmatprep.subr.bf16.mxu0 %v9410_v31  ;;  %v3117_v35 = vpop.f32.mrb[15].mxu1  ;;  %3664 = vmatprep.subr.bf16.mxu1 %v9413_v32  ;;  %v4931_v2 = vrot.slane %v4930_v27, 2  ;;  %v7108_v25 = vrot.slane %v10657_v56, %v10368_v3  ;;  %v7512_v29 = vcombine.high %v7486_v40, %v7486_v40  ;;  %v4913_v14 = vadd.f32 %v4912_v16, %v4911_v37  ;;  %v9417_v38 = vld [vmem:[%s9995_s1 + $0xb60] ss:$196 sps:$4 sm:$0xff]  }
 0x1ed   : > { %v3923_v31 = vrot.slane %v3915_v23, %v10332_v20  ;;  %v3930_v10 = vrot.slane %v3916_v21, %v10332_v20  ;;  %v7112_v41 = vrot.slane %v10657_v56, %v10373_v8  ;;  %v7116_v44 = vrot.slane %v10657_v56, %v10378_v12  ;;  %v9422_v36 = vld [vmem:[%s9995_s1 + $0xb4] ss:$196 sps:$4 sm:$0xff]   ;;  %v9425_v47 = vld [vmem:[%s9995_s1 + $0xbc] ss:$196 sps:$4 sm:$0xff]  }
 0x1ee   : > { %v4932_v32 = vadd.f32 %v4931_v2, %v4930_v27  ;;  %v5204_v37 = vmul.f32 0.5, %v4920_v19  ;;  %v4927_v16 = vadd.f32 %v4926_v57, %v4925_v51  ;;  %v4227_v52 = vrot.slane %v10560_v55, %v10345_v42  ;;  %v9423_v21 = vld [vmem:[%s9995_s1 + $0xb8] ss:$196 sps:$4 sm:$0xff]  }
 0x1ef   : > { %3624 = vmatpush1.bf16.msra.mxu0 %v9408_v28  ;;  %3665 = vmatpush1.bf16.msra.mxu1 %v9411_v7  ;;  %v3931_v5 = vcombine.low %v3923_v31, %v3930_v10  ;;  %v7526_v27 = vrot.slane %v7512_v29, %v10332_v20  ;;  %v5203_v22 = vmul.f32 0.5, %v4913_v14  ;;  %v10768_v18 = vcombine.low %v7104_v13, %v7108_v25  ;;  %v9420_v7 = vld [vmem:[%s9995_s1 + $0xb0] ss:$196 sps:$4 sm:$0xff]   ;;  %v9428_v35 = vld [vmem:[%s9995_s1 + $0x23c] ss:$196 sps:$4 sm:$0xff]  }
 0x1f0   : > { %3625 = vmatprep.subr.bf16.mxu0 %v9416_v60  ;;  %3666 = vmatprep.subr.bf16.mxu1 %v9419_v39  ;;  %v4933_v48 = vrot.slane %v4932_v32, 1  ;;  %v7519_v19 = vrot.slane %v7486_v40, %v10332_v20  ;;  %v10772_v23 = vcombine.low %v7112_v41, %v7116_v44  ;;  %v9431_v13 = vld [vmem:[%s9995_s1 + $0x244] ss:$196 sps:$4 sm:$0xff]   ;;  %v4231_v25 = vrot.slane %v10560_v55, %v10368_v3  ;;  %v9440_v28 = vld [vmem:[%s9995_s1 + $0x54c] ss:$196 sps:$4 sm:$0xff]  }
 0x1f1   : > { %v9485_v60 = vpop.eup %9484  ;;  %v5327_v57 = vcombine.low %v5203_v22, %v5204_v37  ;;  %v10777_v2 = vadd.f32 %v10642_v34, %v3931_v5  ;;  %v4235_v40 = vrot.slane %v10560_v55, %v10373_v8  ;;  %v5205_v31 = vmul.f32 0.5, %v4927_v16  ;;  %v9434_v16 = vld [vmem:[%s9995_s1 + $0x3c4] ss:$196 sps:$4 sm:$0xff]  }
 0x1f2   : > { %v4934_v51 = vadd.f32 %v4933_v48, %v4932_v32  ;;  %v4239_v34 = vrot.slane %v10560_v55, %v10378_v12  ;;  %v7528_v32 = vcombine.high %v7526_v27, %v7526_v27  ;;  %v11874_v49 = vrot.slane %v10738_v46, %v10332_v20 }
 0x1f3   : > { %3626 = vmatpush1.bf16.msra.mxu0 %v9414_v26  ;;  %3667 = vmatpush1.bf16.msra.mxu1 %v9417_v38  ;;  %v9487_v39 = vpop.eup %9486  ;;  %v4641_v41 = vcombine.high %v10777_v2, %v10777_v2  ;;  %v4648_v44 = vrot.slane %v10777_v2, %v10332_v20  ;;  %v9426_v38 = vld [vmem:[%s9995_s1 + $0x238] ss:$196 sps:$4 sm:$0xff]   ;;  %v5335_v48 = vrot.slane %v5327_v57, %v10332_v20 }
 0x1f4   : > { %3693 = vmatprep.subr.bf16.mxu0 %v9422_v36  ;;  %3734 = vmatprep.subr.bf16.mxu1 %v9425_v47  ;;  %v9489_v29 = vpop.eup %9488  ;;  %v6372_v14 = vcombine.low %v9485_v60, %v9487_v39  ;;  %v5206_v10 = vmul.f32 0.5, %v4934_v51  ;;  %v7527_v36 = vcombine.high %v7519_v19, %v7519_v19  ;;  %v9429_v47 = vld [vmem:[%s9995_s1 + $0x240] ss:$196 sps:$4 sm:$0xff]   ;;  %v9437_v39 = vld [vmem:[%s9995_s1 + $0x3cc] ss:$196 sps:$4 sm:$0xff]   ;;  %v8749_v57 = vpack.c.bf16 %v7528_v32, %v7526_v27 }
 0x1f5   : > { %v9491_v26 = vpop.eup %9490  ;;  %v4655_v22 = vrot.slane %v4641_v41, %v10332_v20  ;;  %v4656_v60 = vcombine.high %v4648_v44, %v4648_v44  ;;  %v4935_v51 = vsel %vm4850_vm0, %v4648_v44, 0.0  ;;  %v9459_v32 = vld [vmem:[%s9995_s1 + $0x9e8] ss:$196 sps:$4 sm:$0xff]  }
 0x1f6   : > { %3644 = vmatmul.mubr.bf16.vlgmr.msra.gmra.mrb[40].mxu0 %v10662_v61  ;;  %3685 = vmatmul.mubr.bf16.vlgmr.msra.gmra.mrb[40].mxu1 %v10662_v61  ;;  %v6373_v37 = vcombine.low %v9489_v29, %v9491_v26  ;;  %v5328_v5 = vcombine.low %v5205_v31, %v5206_v10  ;;  %v9432_v26 = vld [vmem:[%s9995_s1 + $0x3c0] ss:$196 sps:$4 sm:$0xff]   ;;  %v8748_v56 = vpack.c.bf16 %v7527_v36, %v7519_v19 }
 0x1f7   : > { %3694 = vmatpush1.bf16.msra.mxu0 %v9420_v7  ;;  %3735 = vmatpush1.bf16.msra.mxu1 %v9423_v21  ;;  %v6380_v7 = vrot.slane %v6372_v14, %v10332_v20  ;;  %v4657_v31 = vcombine.high %v4655_v22, %v4655_v22  ;;  %v4942_v10 = vsel %vm4850_vm0, %v4656_v60, 0.0  ;;  %v7887_v60 = vrot.slane %v8749_v57, %v10621_v45 }
 0x1f8   : > { %3695 = vmatprep.subr.bf16.mxu0 %v9428_v35  ;;  %3736 = vmatprep.subr.bf16.mxu1 %v9431_v13  ;;  %v6387_v29 = vrot.slane %v6373_v37, %v10332_v20  ;;  %v5342_v21 = vrot.slane %v5328_v5, %v10332_v20  ;;  %v4936_v35 = vrot.slane %v4935_v51, 4  ;;  %v4949_v13 = vsel %vm4850_vm0, %v4655_v22, 0.0  ;;  %v9435_v5 = vld [vmem:[%s9995_s1 + $0x3c8] ss:$196 sps:$4 sm:$0xff]   ;;  %v9443_v22 = vld [vmem:[%s9995_s1 + $0x554] ss:$196 sps:$4 sm:$0xff]  }
 0x1f9   : > { %3725 = vmatprep.mubr.bf16.mxu0 %v9764_v0  ;;  %3766 = vmatprep.mubr.bf16.mxu1 %v9764_v0  ;;  %v4943_v37 = vrot.slane %v4942_v10, 4  ;;  %v4950_v0 = vrot.slane %v4949_v13, 4  ;;  %v4956_v27 = vsel %vm4850_vm0, %v4657_v31, 0.0  ;;  %v7880_v57 = vrot.slane %v8748_v56, %v10621_v45 }
 0x1fa   : > { %v6388_v41 = vcombine.low %v6380_v7, %v6387_v29  ;;  %v5343_v14 = vcombine.low %v5335_v48, %v5342_v21  ;;  %v4937_v44 = vadd.f32 %v4936_v35, %v4935_v51  ;;  %v4957_v36 = vrot.slane %v4956_v27, 4  ;;  %v9438_v51 = vld [vmem:[%s9995_s1 + $0x548] ss:$196 sps:$4 sm:$0xff]   ;;  %v9441_v21 = vld [vmem:[%s9995_s1 + $0x550] ss:$196 sps:$4 sm:$0xff]  }
 0x1fb   : > { %3696 = vmatpush1.bf16.msra.mxu0 %v9426_v38  ;;  %3737 = vmatpush1.bf16.msra.mxu1 %v9429_v47  ;;  %v4951_v19 = vadd.f32 %v4950_v0, %v4949_v13  ;;  %v9446_v35 = vld [vmem:[%s9995_s1 + $0x6d4] ss:$196 sps:$4 sm:$0xff]   ;;  %v9449_v13 = vld [vmem:[%s9995_s1 + $0x6dc] ss:$196 sps:$4 sm:$0xff]  }
 0x1fc   : > { %3697 = vmatprep.subr.bf16.mxu0 %v9434_v16  ;;  %3738 = vmatprep.subr.bf16.mxu1 %v9437_v39  ;;  %v6580_v38 = vmul.f32 %v6388_v41, %v10624_v17  ;;  %v10815_v48 = vsub.f32 %v10635_v43, %v5343_v14  ;;  %v4938_v47 = vrot.slane %v4937_v44, 2  ;;  %v4944_v16 = vadd.f32 %v4943_v37, %v4942_v10  ;;  %v9444_v37 = vld [vmem:[%s9995_s1 + $0x6d0] ss:$196 sps:$4 sm:$0xff]   ;;  %v9452_v0 = vld [vmem:[%s9995_s1 + $0x85c] ss:$196 sps:$4 sm:$0xff]  }
 0x1fd   : > { %v10825_v17 = vcombine.low %v4227_v52, %v4231_v25  ;;  %v4952_v31 = vrot.slane %v4951_v19, 2  ;;  %v4958_v10 = vadd.f32 %v4957_v36, %v4956_v27 }
 0x1fe   : > { %v7027_v43 = vmul.f32 %v10630_v50, %v6580_v38  ;;  %v5532_v39 = vmul.f32 %v10815_v48, %v10815_v48  ;;  %v4939_v7 = vadd.f32 %v4938_v47, %v4937_v44  ;;  %v4945_v29 = vrot.slane %v4944_v16, 2 }
 0x1ff   : > { %3698 = vmatpush1.bf16.msra.mxu0 %v9432_v26  ;;  %3739 = vmatpush1.bf16.msra.mxu1 %v9435_v5  ;;  %v10840_v50 = vcombine.low %v4235_v40, %v4239_v34  ;;  %v10844_v26 = vcombine.low %v7880_v57, %v7887_v60  ;;  %v4953_v14 = vadd.f32 %v4952_v31, %v4951_v19  ;;  %v4959_v44 = vrot.slane %v4958_v10, 2  ;;  %v9447_v34 = vld [vmem:[%s9995_s1 + $0x6d8] ss:$196 sps:$4 sm:$0xff]  }
 0x200   : > { %3699 = vmatprep.subr.bf16.mxu0 %v9440_v28  ;;  %3740 = vmatprep.subr.bf16.mxu1 %v9443_v22  ;;  %v7474_v52 = vadd.f32 %v10632_v54, %v7027_v43  ;;  %v5590_v28 = vcombine.high %v5532_v39, %v5532_v39  ;;  %v5597_v25 = vrot.slane %v5532_v39, %v10332_v20  ;;  %v4940_v56 = vrot.slane %v4939_v7, 1 }
 0x201   : > { %v4946_v41 = vadd.f32 %v4945_v29, %v4944_v16  ;;  %v4954_v47 = vrot.slane %v4953_v14, 1  ;;  %v9455_v16 = vld [vmem:[%s9995_s1 + $0x864] ss:$196 sps:$4 sm:$0xff]  }
 0x202   : > { %v7487_v5 = vmax.f32 %v7474_v52, 0.0  ;;  %v5604_v55 = vrot.slane %v5590_v28, %v10332_v20  ;;  %v5605_v40 = vcombine.high %v5597_v25, %v5597_v25  ;;  %v5872_v54 = vsel %vm4850_vm0, %v5597_v25, 0.0  ;;  %v9453_v52 = vld [vmem:[%s9995_s1 + $0x860] ss:$196 sps:$4 sm:$0xff]  }
 0x203   : > { %3700 = vmatpush1.bf16.msra.mxu0 %v9438_v51  ;;  %3741 = vmatpush1.bf16.msra.mxu1 %v9441_v21  ;;  %v5873_v27 = vrot.slane %v5872_v54, 4  ;;  %v4941_v22 = vadd.f32 %v4940_v56, %v4939_v7  ;;  %v4947_v38 = vrot.slane %v4946_v41, 1  ;;  %v9458_v28 = vld [vmem:[%s9995_s1 + $0x9e4] ss:$196 sps:$4 sm:$0xff]  }
 0x204   : > { %3701 = vmatprep.subr.bf16.mxu0 %v9446_v35  ;;  %3742 = vmatprep.subr.bf16.mxu1 %v9449_v13  ;;  %v7529_v60 = vcombine.high %v7487_v5, %v7487_v5  ;;  %v7536_v19 = vrot.slane %v7487_v5, %v10332_v20  ;;  %v5606_v36 = vcombine.high %v5604_v55, %v5604_v55  ;;  %v5879_v51 = vsel %vm4850_vm0, %v5605_v40, 0.0  ;;  %v9450_v35 = vld [vmem:[%s9995_s1 + $0x858] ss:$196 sps:$4 sm:$0xff]   ;;  %v9461_v40 = vld [vmem:[%s9995_s1 + $0x9ec] ss:$196 sps:$4 sm:$0xff]  }
 0x205   : > { %v5874_v43 = vadd.f32 %v5873_v27, %v5872_v54  ;;  %v5880_v39 = vrot.slane %v5879_v51, 4  ;;  %v5886_v29 = vsel %vm4850_vm0, %v5604_v55, 0.0  ;;  %v4948_v21 = vadd.f32 %v4947_v38, %v4946_v41 }
 0x206   : > { %v7543_v7 = vrot.slane %v7529_v60, %v10332_v20  ;;  %v7544_v57 = vcombine.high %v7536_v19, %v7536_v19  ;;  %v5887_v31 = vrot.slane %v5886_v29, 4  ;;  %v5893_v13 = vsel %vm4850_vm0, %v5606_v36, 0.0  ;;  %v9456_v36 = vld [vmem:[%s9995_s1 + $0x9e0] ss:$196 sps:$4 sm:$0xff]  }
 0x207   : > { %3702 = vmatpush1.bf16.msra.mxu0 %v9444_v37  ;;  %3743 = vmatpush1.bf16.msra.mxu1 %v9447_v34  ;;  %v5875_v25 = vrot.slane %v5874_v43, 2  ;;  %v5881_v56 = vadd.f32 %v5880_v39, %v5879_v51  ;;  %v5894_v5 = vrot.slane %v5893_v13, 4  ;;  %v4955_v41 = vadd.f32 %v4954_v47, %v4953_v14 }
 0x208   : > { %3703 = vmatprep.subr.bf16.mxu0 %v9452_v0  ;;  %3744 = vmatprep.subr.bf16.mxu1 %v9455_v16  ;;  %v7545_v54 = vcombine.high %v7543_v7, %v7543_v7  ;;  %v8750_v27 = vpack.c.bf16 %v7544_v57, %v7536_v19  ;;  %v5888_v38 = vadd.f32 %v5887_v31, %v5886_v29  ;;  %v5207_v14 = vmul.f32 0.5, %v4941_v22  ;;  %v9464_v57 = vld [vmem:[%s9995_s1 + $0xb6c] ss:$196 sps:$4 sm:$0xff]  }
 0x209   : > { %v3153_v37 = vpop.f32.mrb[16].mxu0  ;;  %v10861_v55 = vpop.f32.mrb[16].mxu1  ;;  %v4960_v60 = vadd.f32 %v4959_v44, %v4958_v10  ;;  %v5876_v6 = vadd.f32 %v5875_v25, %v5874_v43  ;;  %v5882_v51 = vrot.slane %v5881_v56, 2  ;;  %v5895_v39 = vadd.f32 %v5894_v5, %v5893_v13  ;;  %v9467_v13 = vld [vmem:[%s9995_s1 + $0xb74] ss:$196 sps:$4 sm:$0xff]  }
 0x20a   : > { %v3155_v34 = vpop.f32.mrb[17].mxu0  ;;  %v10864_v0 = vpop.f32.mrb[17].mxu1  ;;  %v8751_v10 = vpack.c.bf16 %v7545_v54, %v7543_v7  ;;  %v7894_v44 = vrot.slane %v8750_v27, %v10621_v45  ;;  %v5889_v16 = vrot.slane %v5888_v38, 2  ;;  %v5208_v31 = vmul.f32 0.5, %v4948_v21 }
 0x20b   : > { %v3157_v47 = vpop.f32.mrb[18].mxu0  ;;  %v3198_v33 = vpop.f32.mrb[18].mxu1  ;;  %3704 = vmatpush1.bf16.msra.mxu0 %v9450_v35  ;;  %v4961_v19 = vrot.slane %v4960_v60, 1  ;;  %3745 = vmatpush1.bf16.msra.mxu1 %v9453_v52  ;;  %v5877_v22 = vrot.slane %v5876_v6, 1  ;;  %v5896_v35 = vrot.slane %v5895_v39, 2  ;;  %v5209_v54 = vmul.f32 0.5, %v4955_v41 }
 0x20c   : > { %v3158_v43 = vpop.f32.mrb[19].mxu0  ;;  %v3199_v29 = vpop.f32.mrb[19].mxu1  ;;  %3705 = vmatprep.subr.bf16.mxu0 %v9458_v28  ;;  %v5883_v33 = vadd.f32 %v5882_v51, %v5881_v56  ;;  %3746 = vmatprep.subr.bf16.mxu1 %v9461_v40  ;;  %v7901_v7 = vrot.slane %v8751_v10, %v10621_v45  ;;  %v5890_v25 = vadd.f32 %v5889_v16, %v5888_v38  ;;  %v9465_v38 = vld [vmem:[%s9995_s1 + $0xb70] ss:$196 sps:$4 sm:$0xff]  }
 0x20d   : > { %v4962_v5 = vadd.f32 %v4961_v19, %v4960_v60  ;;  %v5878_v52 = vadd.f32 %v5877_v22, %v5876_v6  ;;  %v5897_v47 = vadd.f32 %v5896_v35, %v5895_v39  ;;  %v5344_v28 = vcombine.low %v5207_v14, %v5208_v31  ;;  %v9462_v43 = vld [vmem:[%s9995_s1 + $0xb68] ss:$196 sps:$4 sm:$0xff]  }
 0x20e   : > { %v5884_v27 = vrot.slane %v5883_v33, 1  ;;  %v7903_v56 = vcombine.low %v7894_v44, %v7901_v7  ;;  %v5891_v51 = vrot.slane %v5890_v25, 1  ;;  %v3932_v40 = vcombine.low %v3153_v37, %v3155_v34  ;;  %v9468_v34 = vld [vmem:[%s9995_s1 + $0xc0] ss:$196 sps:$4 sm:$0xff]  }
 0x20f   : > { %3706 = vmatpush1.bf16.msra.mxu0 %v9456_v36  ;;  %v5210_v21 = vmul.f32 0.5, %v4962_v5  ;;  %3747 = vmatpush1.bf16.msra.mxu1 %v9459_v32  ;;  %v7910_v41 = vrot.slane %v10844_v26, %v10621_v45  ;;  %v5898_v60 = vrot.slane %v5897_v47, 1  ;;  %v6167_v39 = vmul.f32 0.5, %v5878_v52  ;;  %v10903_v31 = vld [vmem:[%s10009_s24 + $0x10] sm:$0xff] }
 0x210   : > { %3707 = vmatprep.subr.bf16.mxu0 %v9464_v57  ;;  %v5885_v6 = vadd.f32 %v5884_v27, %v5883_v33  ;;  %3748 = vmatprep.subr.bf16.mxu1 %v9467_v13  ;;  %v7917_v36 = vrot.slane %v7903_v56, %v10621_v45  ;;  %v5892_v14 = vadd.f32 %v5891_v51, %v5890_v25 }
 0x211   : > { %v5345_v10 = vcombine.low %v5209_v54, %v5210_v21  ;;  %v3940_v44 = vrot.slane %v3932_v40, %v10332_v20  ;;  %v5899_v16 = vadd.f32 %v5898_v60, %v5897_v47  ;;  %v6216_v32 = vadd.f32 1e-05, %v6167_v39 }
 0x212   : > { %v6168_v19 = vmul.f32 0.5, %v5885_v6  ;;  %v3933_v37 = vcombine.low %v10861_v55, %v10864_v0  ;;  %v7918_v26 = vcombine.low %v7910_v41, %v7917_v36  ;;  %v6169_v29 = vmul.f32 0.5, %v5892_v14 }
 0x213   : > { %3708 = vmatpush1.bf16.msra.mxu0 %v9462_v43  ;;  %v5352_v57 = vrot.slane %v5344_v28, %v10332_v20  ;;  %v5359_v22 = vrot.slane %v5345_v10, %v10332_v20  ;;  %3749 = vmatpush1.bf16.msra.mxu1 %v9465_v38  ;;  %v6170_v33 = vmul.f32 0.5, %v5899_v16  ;;  %v7315_v0 = vrot.slane %v10772_v23, %v10332_v20  ;;  %v9469_v23 = vld [vmem:[%s9995_s1 + $0x248] ss:$196 sps:$4 sm:$0xff]  }
 0x214   : > { %8788 = vmatprep.subr.bf16.mxu0 %v9765_v4  ;;  %v6217_v55 = vadd.f32 1e-05, %v6168_v19  ;;  %v3947_v35 = vrot.slane %v3933_v37, %v10332_v20  ;;  %v6218_v13 = vadd.f32 1e-05, %v6169_v29  ;;  %9492 = vrsqrt.f32 %v6216_v32  ;;  %8185 = vst [vmem:[%s10894_s12] sm:$0xff] %v7918_v26  ;;  %v10985_v16 = vld [vmem:[%s10003_s16 + $0x18] sm:$0xff] }
 0x215   : > { %v5360_v7 = vcombine.low %v5352_v57, %v5359_v22  ;;  %v4433_v25 = vrot.slane %v10825_v17, %v10332_v20  ;;  %v6219_v5 = vadd.f32 1e-05, %v6170_v33  ;;  %v4440_v52 = vrot.slane %v10840_v50, %v10332_v20  ;;  %v10927_v50 = vld [vmem:[%s10011_s26 + $0x10] sm:$0xff] }
 0x216   : > { %3726 = vmatmul.mubr.bf16.vlgmr.msra.gmra.mrb[44].mxu0 %v10662_v61  ;;  %9494 = vrsqrt.f32 %v6217_v55  ;;  %v3948_v54 = vcombine.low %v3940_v44, %v3947_v35  ;;  %3767 = vmatmul.mubr.bf16.vlgmr.msra.gmra.mrb[44].mxu1 %v10662_v61  ;;  %v6673_v47 = vrot.slane %v10903_v31, %v10300_v58  ;;  %v6677_v17 = vrot.slane %v10903_v31, %v10303_v59  ;;  %v9471_v26 = vld [vmem:[%s9995_s1 + $0x558] ss:$196 sps:$4 sm:$0xff]  }
 0x217   : > { %8789 = vmatpush3.bf16.msra.mxu0 %v9468_v34  ;;  %9496 = vrsqrt.f32 %v6218_v13  ;;  %v10914_v27 = vsub.f32 %v10777_v2, %v5360_v7  ;;  %8804 = vmatprep.mubr.msk.bf16.mxu0 %vm9768_vm1, %v9765_v4  ;;  %v6681_v61 = vrot.slane %v10903_v31, %v10310_v62  ;;  %v6685_v2 = vrot.slane %v10903_v31, %v10313_v63 }
 0x218   : > { %8790 = vmatprep.subr.bf16.mxu0 %v9765_v4  ;;  %9498 = vrsqrt.f32 %v6219_v5  ;;  %v10935_v28 = vcombine.low %v6844_v24, %v6851_v30  ;;  %v11871_v43 = vrot.slane %v10733_v1, %v10332_v20  ;;  %v11872_v56 = vrot.slane %v10708_v53, %v10332_v20  ;;  %v9470_v1 = vld [vmem:[%s9995_s1 + $0x3d0] ss:$196 sps:$4 sm:$0xff]  }
 0x219   : > { %v5533_v21 = vmul.f32 %v10914_v27, %v10914_v27  ;;  %v11873_v40 = vrot.slane %v10740_v11, %v10332_v20  ;;  %v11875_v24 = vrot.slane %v10768_v18, %v10332_v20  ;;  %v10961_v53 = vadd.f32 %v10651_v15, %v3948_v54 }
 0x21a   : > { %v10943_v51 = vcombine.low %v11872_v56, %v11871_v43  ;;  %v10964_v38 = vcombine.low %v4433_v25, %v4440_v52  ;;  %v10967_v6 = vcombine.low %v6673_v47, %v6677_v17  ;;  %v7120_v46 = vrot.slane %v10927_v50, %v10300_v58 }
 0x21b   : > { %v10953_v9 = vcombine.low %v11874_v49, %v11873_v40  ;;  %v10958_v30 = vcombine.low %v11875_v24, %v7315_v0  ;;  %8791 = vmatpush3.bf16.msra.mxu0 %v9469_v23  ;;  %v5607_v41 = vcombine.high %v5533_v21, %v5533_v21  ;;  %v5614_v11 = vrot.slane %v5533_v21, %v10332_v20  ;;  %v9472_v21 = vld [vmem:[%s9995_s1 + $0x6e0] ss:$196 sps:$4 sm:$0xff]  }
 0x21c   : > { %8792 = vmatprep.subr.bf16.mxu0 %v9765_v4  ;;  %v4658_v15 = vcombine.high %v10961_v53, %v10961_v53  ;;  %v4665_v18 = vrot.slane %v10961_v53, %v10332_v20  ;;  %v10976_v60 = vcombine.low %v6681_v61, %v6685_v2  ;;  %v7124_v39 = vrot.slane %v10927_v50, %v10303_v59 }
 0x21d   : > { %v5621_v36 = vrot.slane %v5607_v41, %v10332_v20  ;;  %v5622_v14 = vcombine.high %v5614_v11, %v5614_v11  ;;  %v5900_v10 = vsel %vm4850_vm0, %v5614_v11, 0.0  ;;  %v7128_v44 = vrot.slane %v10927_v50, %v10310_v62 }
 0x21e   : > { %v5901_v19 = vrot.slane %v5900_v10, 4  ;;  %v10988_v32 = vrot.slane %v4658_v15, %v10332_v20  ;;  %v4673_v37 = vcombine.high %v4665_v18, %v4665_v18  ;;  %v4963_v34 = vsel %vm4850_vm0, %v4665_v18, 0.0  ;;  %v9493_v29 = vpop.eup %9492 }
 0x21f   : > { %8793 = vmatpush3.bf16.msra.mxu0 %v9470_v1  ;;  %v5623_v57 = vcombine.high %v5621_v36, %v5621_v36  ;;  %v5907_v22 = vsel %vm4850_vm0, %v5622_v14, 0.0  ;;  %v5914_v33 = vsel %vm4850_vm0, %v5621_v36, 0.0  ;;  %v4964_v55 = vrot.slane %v4963_v34, 4 }
 0x220   : > { %8794 = vmatprep.subr.bf16.mxu0 %v9765_v4  ;;  %v9495_v0 = vpop.eup %9494  ;;  %v5902_v35 = vadd.f32 %v5901_v19, %v5900_v10  ;;  %v5908_v13 = vrot.slane %v5907_v22, 4  ;;  %v5915_v7 = vrot.slane %v5914_v33, 4  ;;  %v4243_v25 = vrot.slane %v10985_v16, %v10300_v58 }
 0x221   : > { %v9497_v5 = vpop.eup %9496  ;;  %v6389_v54 = vcombine.low %v9493_v29, %v9495_v0  ;;  %v5921_v23 = vsel %vm4850_vm0, %v5623_v57, 0.0  ;;  %v4970_v52 = vsel %vm4850_vm0, %v4673_v37, 0.0  ;;  %v4247_v47 = vrot.slane %v10985_v16, %v10303_v59  ;;  %v9473_v57 = vld [vmem:[%s9995_s1 + $0x868] ss:$196 sps:$4 sm:$0xff]  }
 0x222   : > { %v9499_v17 = vpop.eup %9498  ;;  %v5903_v61 = vrot.slane %v5902_v35, 2  ;;  %v5909_v2 = vadd.f32 %v5908_v13, %v5907_v22  ;;  %v5916_v43 = vadd.f32 %v5915_v7, %v5914_v33  ;;  %v5922_v56 = vrot.slane %v5921_v23, 4 }
 0x223   : > { %8795 = vmatpush3.bf16.msra.mxu0 %v9471_v26  ;;  %v6390_v40 = vcombine.low %v9497_v5, %v9499_v17  ;;  %v4674_v49 = vcombine.high %v10988_v32, %v10988_v32  ;;  %v4965_v24 = vadd.f32 %v4964_v55, %v4963_v34  ;;  %v4971_v1 = vrot.slane %v4970_v52, 4 }
 0x224   : > { %8796 = vmatprep.subr.bf16.mxu0 %v9765_v4  ;;  %v5904_v41 = vadd.f32 %v5903_v61, %v5902_v35  ;;  %v5910_v11 = vrot.slane %v5909_v2, 2  ;;  %v5917_v15 = vrot.slane %v5916_v43, 2  ;;  %v5923_v18 = vadd.f32 %v5922_v56, %v5921_v23 }
 0x225   : > { %v6397_v36 = vrot.slane %v6389_v54, %v10332_v20  ;;  %v6404_v14 = vrot.slane %v6390_v40, %v10332_v20  ;;  %v4972_v10 = vadd.f32 %v4971_v1, %v4970_v52  ;;  %v4977_v19 = vsel %vm4850_vm0, %v10988_v32, 0.0 }
 0x226   : > { %v5905_v37 = vrot.slane %v5904_v41, 1  ;;  %v5911_v26 = vadd.f32 %v5910_v11, %v5909_v2  ;;  %v5918_v29 = vadd.f32 %v5917_v15, %v5916_v43  ;;  %v5924_v34 = vrot.slane %v5923_v18, 2  ;;  %v9474_v15 = vld [vmem:[%s9995_s1 + $0x9f0] ss:$196 sps:$4 sm:$0xff]  }
 0x227   : > { %8797 = vmatpush3.bf16.msra.mxu0 %v9472_v21  ;;  %v6405_v22 = vcombine.low %v6397_v36, %v6404_v14  ;;  %v4966_v33 = vrot.slane %v4965_v24, 2  ;;  %v4973_v55 = vrot.slane %v4972_v10, 2  ;;  %v4978_v0 = vrot.slane %v4977_v19, 4 }
 0x228   : > { %8798 = vmatprep.subr.bf16.mxu0 %v9765_v4  ;;  %v5906_v35 = vadd.f32 %v5905_v37, %v5904_v41  ;;  %v5912_v13 = vrot.slane %v5911_v26, 1  ;;  %v5919_v7 = vrot.slane %v5918_v29, 1  ;;  %v5925_v5 = vadd.f32 %v5924_v34, %v5923_v18 }
 0x229   : > { %v3235_v54 = vpop.f32.mrb[20].mxu0  ;;  %v11011_v23 = vpop.f32.mrb[20].mxu1  ;;  %v6581_v32 = vmul.f32 %v6405_v22, %v10815_v48  ;;  %v4974_v52 = vadd.f32 %v4973_v55, %v4972_v10  ;;  %v4979_v17 = vadd.f32 %v4978_v0, %v4977_v19  ;;  %v4251_v43 = vrot.slane %v10985_v16, %v10310_v62  ;;  %v9475_v0 = vld [vmem:[%s9995_s1 + $0xb78] ss:$196 sps:$4 sm:$0xff]  }
 0x22a   : > { %v3237_v61 = vpop.f32.mrb[21].mxu0  ;;  %v3278_v2 = vpop.f32.mrb[21].mxu1  ;;  %v5913_v56 = vadd.f32 %v5912_v13, %v5911_v26  ;;  %v5920_v21 = vadd.f32 %v5919_v7, %v5918_v29  ;;  %v5926_v40 = vrot.slane %v5925_v5, 1  ;;  %v6171_v1 = vmul.f32 0.5, %v5906_v35 }
 0x22b   : > { %v3239_v41 = vpop.f32.mrb[22].mxu0  ;;  %v3280_v11 = vpop.f32.mrb[22].mxu1  ;;  %8799 = vmatpush3.bf16.msra.mxu0 %v9473_v57  ;;  %v7028_v18 = vmul.f32 %v10935_v28, %v6581_v32  ;;  %v4967_v36 = vadd.f32 %v4966_v33, %v4965_v24  ;;  %v4980_v48 = vrot.slane %v4979_v17, 2  ;;  %v4984_v14 = vsel %vm4850_vm0, %v4674_v49, 0.0 }
 0x22c   : > { %v3240_v10 = vpop.f32.mrb[23].mxu0  ;;  %v3281_v19 = vpop.f32.mrb[23].mxu1  ;;  %8800 = vmatprep.subr.bf16.mxu0 %v9765_v4  ;;  %v5927_v37 = vadd.f32 %v5926_v40, %v5925_v5  ;;  %v6172_v26 = vmul.f32 0.5, %v5913_v56  ;;  %v6173_v29 = vmul.f32 0.5, %v5920_v21  ;;  %v6220_v34 = vadd.f32 1e-05, %v6171_v1 }
 0x22d   : > { %v7475_v22 = vadd.f32 %v10943_v51, %v7028_v18  ;;  %v4975_v55 = vrot.slane %v4974_v52, 1  ;;  %v4985_v57 = vrot.slane %v4984_v14, 4  ;;  %v4255_v28 = vrot.slane %v10985_v16, %v10313_v63 }
 0x22e   : > { %v6174_v24 = vmul.f32 0.5, %v5927_v37  ;;  %v6221_v33 = vadd.f32 1e-05, %v6172_v26  ;;  %v6222_v35 = vadd.f32 1e-05, %v6173_v29  ;;  %v4981_v49 = vadd.f32 %v4980_v48, %v4979_v17 }
 0x22f   : > { %8801 = vmatpush3.bf16.msra.mxu0 %v9474_v15  ;;  %v7488_v13 = vmax.f32 %v7475_v22, 0.0  ;;  %9500 = vrsqrt.f32 %v6220_v34  ;;  %v4986_v7 = vadd.f32 %v4985_v57, %v4984_v14  ;;  %v7132_v5 = vrot.slane %v10927_v50, %v10313_v63 }
 0x230   : > { %8802 = vmatprep.subr.bf16.mxu0 %v9765_v4  ;;  %v6223_v51 = vadd.f32 1e-05, %v6174_v24  ;;  %9502 = vrsqrt.f32 %v6221_v33  ;;  %v4968_v32 = vrot.slane %v4967_v36, 1  ;;  %v3949_v56 = vcombine.low %v3235_v54, %v3237_v61 }
 0x231   : > { %9504 = vrsqrt.f32 %v6222_v35  ;;  %v4976_v21 = vadd.f32 %v4975_v55, %v4974_v52  ;;  %v4442_v17 = vcombine.low %v4243_v25, %v4247_v47  ;;  %v4443_v40 = vcombine.low %v4251_v43, %v4255_v28 }
 0x232   : > { %v7546_v1 = vcombine.high %v7488_v13, %v7488_v13  ;;  %9506 = vrsqrt.f32 %v6223_v51  ;;  %v4982_v41 = vrot.slane %v4981_v49, 1  ;;  %v4987_v11 = vrot.slane %v4986_v7, 2 }
 0x233   : > { %8803 = vmatpush3.bf16.msra.mxu0 %v9475_v0  ;;  %v11041_v54 = vcombine.low %v7120_v46, %v7124_v39  ;;  %v3957_v52 = vrot.slane %v3949_v56, %v10332_v20  ;;  %v3950_v25 = vcombine.low %v11011_v23, %v3278_v2  ;;  %v4969_v47 = vadd.f32 %v4968_v32, %v4967_v36  ;;  %v9576_v39 = vld [vmem:[%s11842_s0] sm:$0x1] }
 0x234   : > { %v4988_v61 = vadd.f32 %v4987_v11, %v4986_v7  ;;  %v6689_v43 = vrot.slane %v10903_v31, %v10345_v42  ;;  %v6693_v15 = vrot.slane %v10903_v31, %v10368_v3  ;;  %v11052_v18 = vcombine.low %v7128_v44, %v7132_v5 }
 0x235   : > { %v3964_v46 = vrot.slane %v3950_v25, %v10332_v20  ;;  %v4450_v23 = vrot.slane %v4442_v17, %v10332_v20  ;;  %v4457_v2 = vrot.slane %v4443_v40, %v10332_v20  ;;  %v7560_v36 = vrot.slane %v7546_v1, %v10332_v20 }
 0x236   : > { %8805 = vmatmul.mubr.bf16.vlgmr.msra.gmra.mrb[48].mxu0 %v9576_v39  ;;  %v4983_v48 = vadd.f32 %v4982_v41, %v4981_v49  ;;  %v4989_v14 = vrot.slane %v4988_v61, 1  ;;  %v5212_v10 = vmul.f32 0.5, %v4976_v21  ;;  %v6697_v37 = vrot.slane %v10903_v31, %v10373_v8 }
 0x237   : > { %v3965_v19 = vcombine.low %v3957_v52, %v3964_v46  ;;  %v6701_v26 = vrot.slane %v10903_v31, %v10378_v12  ;;  %v7553_v29 = vrot.slane %v7488_v13, %v10332_v20  ;;  %v5211_v22 = vmul.f32 0.5, %v4969_v47 }
 0x238   : > { %v4990_v34 = vadd.f32 %v4989_v14, %v4988_v61  ;;  %v11068_v55 = vcombine.low %v6689_v43, %v6693_v15  ;;  %v11074_v24 = vcombine.low %v4450_v23, %v4457_v2  ;;  %v7562_v35 = vcombine.high %v7560_v36, %v7560_v36 }
 0x239   : > { %v9501_v57 = vpop.eup %9500  ;;  %v5213_v49 = vmul.f32 0.5, %v4983_v48  ;;  %v5361_v31 = vcombine.low %v5211_v22, %v5212_v10  ;;  %v11077_v51 = vadd.f32 %v10964_v38, %v3965_v19  ;;  %v11079_v32 = vcombine.low %v6697_v37, %v6701_v26 }
 0x23a   : > { %v9503_v33 = vpop.eup %9502  ;;  %v5214_v7 = vmul.f32 0.5, %v4990_v34  ;;  %v7136_v56 = vrot.slane %v10927_v50, %v10345_v42  ;;  %v7561_v17 = vcombine.high %v7553_v29, %v7553_v29  ;;  %v7140_v41 = vrot.slane %v10927_v50, %v10368_v3 }
 0x23b   : > { %v9505_v5 = vpop.eup %9504  ;;  %v6406_v13 = vcombine.low %v9501_v57, %v9503_v33  ;;  %v4675_v52 = vcombine.high %v11077_v51, %v11077_v51  ;;  %v8753_v47 = vpack.c.bf16 %v7562_v35, %v7560_v36  ;;  %v5369_v61 = vrot.slane %v5361_v31, %v10332_v20 }
 0x23c   : > { %v9507_v21 = vpop.eup %9506  ;;  %v5362_v40 = vcombine.low %v5213_v49, %v5214_v7  ;;  %v4682_v15 = vrot.slane %v11077_v51, %v10332_v20  ;;  %v8752_v48 = vpack.c.bf16 %v7561_v17, %v7553_v29  ;;  %v11110_v49 = vld [vmem:[%s10009_s24 + $0x18] sm:$0xff] }
 0x23d   : > { %v6407_v11 = vcombine.low %v9505_v5, %v9507_v21  ;;  %v6414_v46 = vrot.slane %v6406_v13, %v10332_v20  ;;  %v4689_v23 = vrot.slane %v4675_v52, %v10332_v20  ;;  %v7936_v22 = vrot.slane %v8753_v47, %v10621_v45 }
 0x23e   : > { %v5376_v43 = vrot.slane %v5362_v40, %v10332_v20  ;;  %v4690_v36 = vcombine.high %v4682_v15, %v4682_v15  ;;  %v4991_v10 = vsel %vm4850_vm0, %v4682_v15, 0.0  ;;  %v7929_v13 = vrot.slane %v8752_v48, %v10621_v45 }
 0x23f   : > { %v6421_v39 = vrot.slane %v6407_v11, %v10332_v20  ;;  %v4691_v37 = vcombine.high %v4689_v23, %v4689_v23  ;;  %v4992_v26 = vrot.slane %v4991_v10, 4  ;;  %v5005_v34 = vsel %vm4850_vm0, %v4689_v23, 0.0 }
 0x240   : > { %v5377_v14 = vcombine.low %v5369_v61, %v5376_v43  ;;  %v4998_v33 = vsel %vm4850_vm0, %v4690_v36, 0.0  ;;  %v5006_v35 = vrot.slane %v5005_v34, 4  ;;  %v11120_v61 = vcombine.low %v7929_v13, %v7936_v22 }
 0x241   : > { %v6422_v19 = vcombine.low %v6414_v46, %v6421_v39  ;;  %v4993_v7 = vadd.f32 %v4992_v26, %v4991_v10  ;;  %v4999_v31 = vrot.slane %v4998_v33, 4  ;;  %v5012_v5 = vsel %vm4850_vm0, %v4691_v37, 0.0 }
 0x242   : > { %v11106_v57 = vsub.f32 %v10961_v53, %v5377_v14  ;;  %v5007_v17 = vadd.f32 %v5006_v35, %v5005_v34  ;;  %v5013_v40 = vrot.slane %v5012_v5, 4 }
 0x243   : > { %v6582_v29 = vmul.f32 %v6422_v19, %v10914_v27  ;;  %v4994_v11 = vrot.slane %v4993_v7, 2  ;;  %v5000_v52 = vadd.f32 %v4999_v31, %v4998_v33 }
 0x244   : > { %v5534_v21 = vmul.f32 %v11106_v57, %v11106_v57  ;;  %v5008_v15 = vrot.slane %v5007_v17, 2  ;;  %v5014_v48 = vadd.f32 %v5013_v40, %v5012_v5 }
 0x245   : > { %v7029_v53 = vmul.f32 %v10953_v9, %v6582_v29  ;;  %v4995_v39 = vadd.f32 %v4994_v11, %v4993_v7  ;;  %v5001_v23 = vrot.slane %v5000_v52, 2 }
 0x246   : > { %v5624_v27 = vcombine.high %v5534_v21, %v5534_v21  ;;  %v5631_v43 = vrot.slane %v5534_v21, %v10332_v20  ;;  %v5009_v10 = vadd.f32 %v5008_v15, %v5007_v17 }
 0x247   : > { %v7476_v46 = vadd.f32 %v10958_v30, %v7029_v53  ;;  %v4996_v22 = vrot.slane %v4995_v39, 1  ;;  %v5002_v33 = vadd.f32 %v5001_v23, %v5000_v52 }
 0x248   : > { %v5638_v14 = vrot.slane %v5624_v27, %v10332_v20  ;;  %v5639_v36 = vcombine.high %v5631_v43, %v5631_v43  ;;  %v5928_v9 = vsel %vm4850_vm0, %v5631_v43, 0.0  ;;  %v5010_v5 = vrot.slane %v5009_v10, 1 }
 0x249   : > { %v11126_v19 = vpop.f32.mrb[24].mxu0  ;;  %v11128_v37 = vpop.f32.mrb[24].mxu1  ;;  %v7489_v26 = vmax.f32 %v7476_v46, 0.0  ;;  %v5929_v34 = vrot.slane %v5928_v9, 4  ;;  %v4997_v46 = vadd.f32 %v4996_v22, %v4995_v39  ;;  %v5003_v23 = vrot.slane %v5002_v33, 1 }
 0x24a   : > { %v3319_v35 = vpop.f32.mrb[25].mxu0  ;;  %v11130_v29 = vpop.f32.mrb[25].mxu1  ;;  %v5640_v30 = vcombine.high %v5638_v14, %v5638_v14  ;;  %v5935_v7 = vsel %vm4850_vm0, %v5639_v36, 0.0  ;;  %v5942_v31 = vsel %vm4850_vm0, %v5638_v14, 0.0  ;;  %v5015_v39 = vrot.slane %v5014_v48, 2 }
 0x24b   : > { %v3321_v13 = vpop.f32.mrb[26].mxu0  ;;  %v3362_v21 = vpop.f32.mrb[26].mxu1  ;;  %v7563_v17 = vcombine.high %v7489_v26, %v7489_v26  ;;  %v7570_v40 = vrot.slane %v7489_v26, %v10332_v20  ;;  %v5930_v53 = vadd.f32 %v5929_v34, %v5928_v9  ;;  %v5936_v11 = vrot.slane %v5935_v7, 4 }
 0x24c   : > { %v3322_v27 = vpop.f32.mrb[27].mxu0  ;;  %v3363_v43 = vpop.f32.mrb[27].mxu1  ;;  %v5943_v15 = vrot.slane %v5942_v31, 4  ;;  %v5949_v52 = vsel %vm4850_vm0, %v5640_v30, 0.0  ;;  %v7959_v13 = vrot.slane %v11120_v61, %v10621_v45  ;;  %v5004_v26 = vadd.f32 %v5003_v23, %v5002_v33 }
 0x24d   : > { %v7577_v1 = vrot.slane %v7563_v17, %v10332_v20  ;;  %v7578_v36 = vcombine.high %v7570_v40, %v7570_v40  ;;  %v5931_v2 = vrot.slane %v5930_v53, 2  ;;  %v5937_v14 = vadd.f32 %v5936_v11, %v5935_v7 }
 0x24e   : > { %v5944_v21 = vadd.f32 %v5943_v15, %v5942_v31  ;;  %v5950_v47 = vrot.slane %v5949_v52, 4  ;;  %v5011_v30 = vadd.f32 %v5010_v5, %v5009_v10  ;;  %v5215_v28 = vmul.f32 0.5, %v4997_v46 }
 0x24f   : > { %v7579_v9 = vcombine.high %v7577_v1, %v7577_v1  ;;  %v8754_v34 = vpack.c.bf16 %v7578_v36, %v7570_v40  ;;  %v5932_v27 = vadd.f32 %v5931_v2, %v5930_v53  ;;  %v5938_v43 = vrot.slane %v5937_v14, 2 }
 0x250   : > { %v5945_v38 = vrot.slane %v5944_v21, 2  ;;  %v5951_v25 = vadd.f32 %v5950_v47, %v5949_v52  ;;  %v5016_v11 = vadd.f32 %v5015_v39, %v5014_v48  ;;  %v5216_v44 = vmul.f32 0.5, %v5004_v26 }
 0x251   : > { %v8755_v22 = vpack.c.bf16 %v7579_v9, %v7577_v1  ;;  %v5933_v0 = vrot.slane %v5932_v27, 1  ;;  %v5939_v17 = vadd.f32 %v5938_v43, %v5937_v14  ;;  %v7943_v61 = vrot.slane %v8754_v34, %v10621_v45 }
 0x252   : > { %v5946_v4 = vadd.f32 %v5945_v38, %v5944_v21  ;;  %v5952_v7 = vrot.slane %v5951_v25, 2  ;;  %v5017_v15 = vrot.slane %v5016_v11, 1  ;;  %v5217_v47 = vmul.f32 0.5, %v5011_v30 }
 0x253   : > { %v7950_v33 = vrot.slane %v8755_v22, %v10621_v45  ;;  %v5934_v31 = vadd.f32 %v5933_v0, %v5932_v27  ;;  %v5940_v40 = vrot.slane %v5939_v17, 1  ;;  %v3966_v52 = vcombine.low %v11126_v19, %v3319_v35  ;;  %v11147_v27 = vld [vmem:[%s10011_s26 + $0x18] sm:$0xff] }
 0x254   : > { %v5947_v2 = vrot.slane %v5946_v4, 1  ;;  %v5953_v53 = vadd.f32 %v5952_v7, %v5951_v25  ;;  %v5018_v48 = vadd.f32 %v5017_v15, %v5016_v11  ;;  %v5378_v23 = vcombine.low %v5215_v28, %v5216_v44 }
 0x255   : > { %v7952_v10 = vcombine.low %v7943_v61, %v7950_v33  ;;  %v5941_v1 = vadd.f32 %v5940_v40, %v5939_v17  ;;  %v6175_v5 = vmul.f32 0.5, %v5934_v31  ;;  %v3974_v0 = vrot.slane %v3966_v52, %v10332_v20 }
 0x256   : > { %v5948_v38 = vadd.f32 %v5947_v2, %v5946_v4  ;;  %v5954_v46 = vrot.slane %v5953_v53, 1  ;;  %v5218_v9 = vmul.f32 0.5, %v5018_v48  ;;  %v3967_v34 = vcombine.low %v11128_v37, %v11130_v29 }
 0x257   : > { %v7966_v36 = vrot.slane %v7952_v10, %v10621_v45  ;;  %v6176_v14 = vmul.f32 0.5, %v5941_v1  ;;  %v6224_v21 = vadd.f32 1e-05, %v6175_v5  ;;  %v6709_v44 = vrot.slane %v11110_v49, %v10303_v59 }
 0x258   : > { %v5955_v26 = vadd.f32 %v5954_v46, %v5953_v53  ;;  %v6177_v25 = vmul.f32 0.5, %v5948_v38  ;;  %v5379_v43 = vcombine.low %v5217_v47, %v5218_v9  ;;  %v3981_v30 = vrot.slane %v3967_v34, %v10332_v20 }
 0x259   : > { %v7967_v19 = vcombine.low %v7959_v13, %v7966_v36  ;;  %v6225_v4 = vadd.f32 1e-05, %v6176_v14  ;;  %9508 = vrsqrt.f32 %v6224_v21  ;;  %v6713_v39 = vrot.slane %v11110_v49, %v10310_v62 }
 0x25a   : > { %v6178_v28 = vmul.f32 0.5, %v5955_v26  ;;  %v6226_v35 = vadd.f32 1e-05, %v6177_v25  ;;  %v6717_v37 = vrot.slane %v11110_v49, %v10313_v63  ;;  %v7152_v29 = vrot.slane %v11147_v27, %v10300_v58 }
 0x25b   : > { %9510 = vrsqrt.f32 %v6225_v4  ;;  %8186 = vst [vmem:[%s10894_s12 + $0x8] sm:$0xff] %v7967_v19  ;;  %v5386_v22 = vrot.slane %v5378_v23, %v10332_v20  ;;  %v5393_v17 = vrot.slane %v5379_v43, %v10332_v20  ;;  %v3982_v7 = vcombine.low %v3974_v0, %v3981_v30 }
 0x25c   : > { %v6227_v13 = vadd.f32 1e-05, %v6178_v28  ;;  %9512 = vrsqrt.f32 %v6226_v35  ;;  %v7156_v11 = vrot.slane %v11147_v27, %v10303_v59  ;;  %v7160_v61 = vrot.slane %v11147_v27, %v10310_v62 }
 0x25d   : > { %v7164_v33 = vrot.slane %v11147_v27, %v10313_v63  ;;  %v5394_v31 = vcombine.low %v5386_v22, %v5393_v17  ;;  %v11173_v40 = vcombine.low %v7136_v56, %v7140_v41  ;;  %v11876_v2 = vrot.slane %v10976_v60, %v10332_v20 }
 0x25e   : > { %9514 = vrsqrt.f32 %v6227_v13  ;;  %v11877_v53 = vrot.slane %v10967_v6, %v10332_v20  ;;  %v11878_v47 = vrot.slane %v11052_v18, %v10332_v20  ;;  %v11879_v10 = vrot.slane %v11041_v54, %v10332_v20 }
 0x25f   : > { %v11880_v56 = vrot.slane %v10927_v50, %v10378_v12  ;;  %v11881_v41 = vrot.slane %v10927_v50, %v10373_v8  ;;  %v11882_v6 = vrot.slane %v11110_v49, %v10300_v58  ;;  %v11205_v18 = vsub.f32 %v11077_v51, %v5394_v31 }
 0x260   : > { %v11181_v15 = vcombine.low %v11877_v53, %v11876_v2  ;;  %v11189_v1 = vcombine.low %v11879_v10, %v11878_v47  ;;  %v11208_v54 = vadd.f32 %v11074_v24, %v3982_v7  ;;  %v11210_v52 = vcombine.low %v6713_v39, %v6717_v37 }
 0x261   : > { %v11197_v60 = vcombine.low %v11881_v41, %v11880_v56  ;;  %v11202_v5 = vcombine.low %v11882_v6, %v6709_v44  ;;  %v4259_v38 = vrot.slane %v10985_v16, %v10345_v42  ;;  %v11883_v50 = vrot.slane %v11079_v32, %v10332_v20 }
 0x262   : > { %v11884_v46 = vrot.slane %v11068_v55, %v10332_v20  ;;  %v11222_v23 = vcombine.low %v7152_v29, %v7156_v11  ;;  %v11224_v51 = vcombine.low %v7160_v61, %v7164_v33  ;;  %v4263_v24 = vrot.slane %v10985_v16, %v10368_v3 }
 0x263   : > { %v5535_v36 = vmul.f32 %v11205_v18, %v11205_v18  ;;  %v7342_v14 = vrot.slane %v11173_v40, %v10332_v20  ;;  %v4692_v32 = vcombine.high %v11208_v54, %v11208_v54  ;;  %v4699_v55 = vrot.slane %v11208_v54, %v10332_v20  ;;  %v9509_v21 = vpop.eup %9508 }
 0x264   : > { %v11220_v48 = vcombine.low %v11884_v46, %v11883_v50  ;;  %v7349_v0 = vrot.slane %v11197_v60, %v10332_v20  ;;  %v4267_v25 = vrot.slane %v10985_v16, %v10373_v8  ;;  %v4271_v9 = vrot.slane %v10985_v16, %v10378_v12 }
 0x265   : > { %v5641_v34 = vcombine.high %v5535_v36, %v5535_v36  ;;  %v5648_v19 = vrot.slane %v5535_v36, %v10332_v20  ;;  %v4707_v4 = vcombine.high %v4699_v55, %v4699_v55  ;;  %v9511_v28 = vpop.eup %9510  ;;  %v11248_v35 = vrot.slane %v4692_v32, %v10332_v20 }
 0x266   : > { %v5019_v43 = vsel %vm4850_vm0, %v4699_v55, 0.0  ;;  %v6423_v16 = vcombine.low %v9509_v21, %v9511_v28  ;;  %v9513_v22 = vpop.eup %9512  ;;  %v11258_v11 = vcombine.low %v4259_v38, %v4263_v24  ;;  %v11260_v61 = vcombine.low %v4267_v25, %v4271_v9 }
 0x267   : > { %v5655_v37 = vrot.slane %v5641_v34, %v10332_v20  ;;  %v5656_v29 = vcombine.high %v5648_v19, %v5648_v19  ;;  %v5956_v13 = vsel %vm4850_vm0, %v5648_v19, 0.0  ;;  %v5026_v7 = vsel %vm4850_vm0, %v4707_v4, 0.0 }
 0x268   : > { %v5957_v17 = vrot.slane %v5956_v13, 4  ;;  %v9515_v33 = vpop.eup %9514  ;;  %v5020_v47 = vrot.slane %v5019_v43, 4  ;;  %v6431_v36 = vrot.slane %v6423_v16, %v10332_v20  ;;  %v5027_v55 = vrot.slane %v5026_v7, 4 }
 0x269   : > { %v5657_v31 = vcombine.high %v5655_v37, %v5655_v37  ;;  %v5963_v2 = vsel %vm4850_vm0, %v5656_v29, 0.0  ;;  %v5970_v53 = vsel %vm4850_vm0, %v5655_v37, 0.0  ;;  %v11264_v10 = vpop.f32.mrb[28].mxu0  ;;  %v11266_v56 = vpop.f32.mrb[28].mxu1  ;;  %v6424_v41 = vcombine.low %v9513_v22, %v9515_v33 }
 0x26a   : > { %v5958_v6 = vadd.f32 %v5957_v17, %v5956_v13  ;;  %v5964_v50 = vrot.slane %v5963_v2, 4  ;;  %v5971_v46 = vrot.slane %v5970_v53, 4  ;;  %v11268_v38 = vpop.f32.mrb[29].mxu0  ;;  %v11270_v24 = vpop.f32.mrb[29].mxu1  ;;  %v5033_v21 = vsel %vm4850_vm0, %v11248_v35, 0.0  ;;  %v11278_v13 = vld [vmem:[%s10003_s16 + $0x20] sm:$0xff] }
 0x26b   : > { %v5977_v32 = vsel %vm4850_vm0, %v5657_v31, 0.0  ;;  %v3403_v25 = vpop.f32.mrb[30].mxu0  ;;  %v3444_v9 = vpop.f32.mrb[30].mxu1  ;;  %v6438_v34 = vrot.slane %v6424_v41, %v10332_v20  ;;  %v5021_v17 = vadd.f32 %v5020_v47, %v5019_v43  ;;  %v5028_v16 = vadd.f32 %v5027_v55, %v5026_v7 }
 0x26c   : > { %v5959_v19 = vrot.slane %v5958_v6, 2  ;;  %v5965_v4 = vadd.f32 %v5964_v50, %v5963_v2  ;;  %v5972_v28 = vadd.f32 %v5971_v46, %v5970_v53  ;;  %v3404_v37 = vpop.f32.mrb[31].mxu0  ;;  %v3445_v29 = vpop.f32.mrb[31].mxu1  ;;  %v5978_v22 = vrot.slane %v5977_v32, 4 }
 0x26d   : > { %v5034_v33 = vrot.slane %v5033_v21, 4  ;;  %v6439_v31 = vcombine.low %v6431_v36, %v6438_v34  ;;  %v5029_v25 = vrot.slane %v5028_v16, 2  ;;  %v4275_v41 = vrot.slane %v11278_v13, %v10300_v58 }
 0x26e   : > { %v5960_v30 = vadd.f32 %v5959_v19, %v5958_v6  ;;  %v5966_v39 = vrot.slane %v5965_v4, 2  ;;  %v5973_v26 = vrot.slane %v5972_v28, 2  ;;  %v5979_v44 = vadd.f32 %v5978_v22, %v5977_v32 }
 0x26f   : > { %v5035_v9 = vadd.f32 %v5034_v33, %v5033_v21  ;;  %v6583_v2 = vmul.f32 %v6439_v31, %v11106_v57  ;;  %v4708_v43 = vcombine.high %v11248_v35, %v11248_v35  ;;  %v5022_v7 = vrot.slane %v5021_v17, 2 }
 0x270   : > { %v5961_v53 = vrot.slane %v5960_v30, 1  ;;  %v5967_v50 = vadd.f32 %v5966_v39, %v5965_v4  ;;  %v5974_v46 = vadd.f32 %v5973_v26, %v5972_v28  ;;  %v5980_v37 = vrot.slane %v5979_v44, 2 }
 0x271   : > { %v5030_v47 = vadd.f32 %v5029_v25, %v5028_v16  ;;  %v7030_v6 = vmul.f32 %v11181_v15, %v6583_v2  ;;  %v5036_v34 = vrot.slane %v5035_v9, 2  ;;  %v4467_v19 = vrot.slane %v11258_v11, %v10332_v20 }
 0x272   : > { %v5962_v36 = vadd.f32 %v5961_v53, %v5960_v30  ;;  %v5968_v32 = vrot.slane %v5967_v50, 1  ;;  %v5975_v55 = vrot.slane %v5974_v46, 1  ;;  %v5981_v21 = vadd.f32 %v5980_v37, %v5979_v44 }
 0x273   : > { %v4474_v57 = vrot.slane %v11260_v61, %v10332_v20  ;;  %v7477_v26 = vadd.f32 %v11189_v1, %v7030_v6  ;;  %v5023_v29 = vadd.f32 %v5022_v7, %v5021_v17  ;;  %v5031_v22 = vrot.slane %v5030_v47, 1 }
 0x274   : > { %v5969_v39 = vadd.f32 %v5968_v32, %v5967_v50  ;;  %v5976_v4 = vadd.f32 %v5975_v55, %v5974_v46  ;;  %v6179_v35 = vmul.f32 0.5, %v5962_v36  ;;  %v5982_v28 = vrot.slane %v5981_v21, 1 }
 0x275   : > { %v5040_v15 = vsel %vm4850_vm0, %v4708_v43, 0.0  ;;  %v7490_v30 = vmax.f32 %v7477_v26, 0.0  ;;  %v5037_v25 = vadd.f32 %v5036_v34, %v5035_v9  ;;  %v4279_v61 = vrot.slane %v11278_v13, %v10303_v59 }
 0x276   : > { %v6180_v16 = vmul.f32 0.5, %v5969_v39  ;;  %v6181_v44 = vmul.f32 0.5, %v5976_v4  ;;  %v6228_v33 = vadd.f32 1e-05, %v6179_v35  ;;  %v5983_v31 = vadd.f32 %v5982_v28, %v5981_v21 }
 0x277   : > { %v5041_v11 = vrot.slane %v5040_v15, 4  ;;  %v7580_v2 = vcombine.high %v7490_v30, %v7490_v30  ;;  %v4283_v50 = vrot.slane %v11278_v13, %v10310_v62  ;;  %v5024_v46 = vrot.slane %v5023_v29, 1 }
 0x278   : > { %v6229_v1 = vadd.f32 1e-05, %v6180_v16  ;;  %v6230_v53 = vadd.f32 1e-05, %v6181_v44  ;;  %v6182_v17 = vmul.f32 0.5, %v5983_v31  ;;  %9516 = vrsqrt.f32 %v6228_v33 }
 0x279   : > { %v5042_v37 = vadd.f32 %v5041_v11, %v5040_v15  ;;  %v7594_v43 = vrot.slane %v7580_v2, %v10332_v20  ;;  %v5032_v7 = vadd.f32 %v5031_v22, %v5030_v47  ;;  %v4287_v9 = vrot.slane %v11278_v13, %v10313_v63 }
 0x27a   : > { %9518 = vrsqrt.f32 %v6229_v1  ;;  %v7587_v6 = vrot.slane %v7490_v30, %v10332_v20  ;;  %v6231_v36 = vadd.f32 1e-05, %v6182_v17  ;;  %v5038_v32 = vrot.slane %v5037_v25, 1 }
 0x27b   : > { %v5043_v55 = vrot.slane %v5042_v37, 2  ;;  %9520 = vrsqrt.f32 %v6230_v53  ;;  %v3983_v21 = vcombine.low %v11264_v10, %v11268_v38  ;;  %v3984_v34 = vcombine.low %v11266_v56, %v11270_v24 }
 0x27c   : > { %v4475_v26 = vcombine.low %v4467_v19, %v4474_v57  ;;  %v7596_v39 = vcombine.high %v7594_v43, %v7594_v43  ;;  %9522 = vrsqrt.f32 %v6231_v36  ;;  %v5025_v4 = vadd.f32 %v5024_v46, %v5023_v29 }
 0x27d   : > { %v5044_v47 = vadd.f32 %v5043_v55, %v5042_v37  ;;  %v3991_v35 = vrot.slane %v3983_v21, %v10332_v20  ;;  %v3998_v28 = vrot.slane %v3984_v34, %v10332_v20  ;;  %v4476_v22 = vcombine.low %v4275_v41, %v4279_v61 }
 0x27e   : > { %v4477_v15 = vcombine.low %v4283_v50, %v4287_v9  ;;  %v7595_v30 = vcombine.high %v7587_v6, %v7587_v6  ;;  %v5039_v16 = vadd.f32 %v5038_v32, %v5037_v25  ;;  %v5220_v33 = vmul.f32 0.5, %v5032_v7 }
 0x27f   : > { %v5045_v44 = vrot.slane %v5044_v47, 1  ;;  %v3999_v31 = vcombine.low %v3991_v35, %v3998_v28  ;;  %v6721_v10 = vrot.slane %v11110_v49, %v10345_v42  ;;  %v6725_v56 = vrot.slane %v11110_v49, %v10368_v3 }
 0x280   : > { %v6729_v38 = vrot.slane %v11110_v49, %v10373_v8  ;;  %v8757_v24 = vpack.c.bf16 %v7596_v39, %v7594_v43  ;;  %v5219_v57 = vmul.f32 0.5, %v5025_v4  ;;  %v6733_v41 = vrot.slane %v11110_v49, %v10378_v12 }
 0x281   : > { %v5046_v19 = vadd.f32 %v5045_v44, %v5044_v47  ;;  %v11320_v29 = vcombine.low %v7342_v14, %v7349_v0  ;;  %v4484_v25 = vrot.slane %v4476_v22, %v10332_v20  ;;  %v4491_v11 = vrot.slane %v4477_v15, %v10332_v20 }
 0x282   : > { %v9517_v61 = vpop.eup %9516  ;;  %v8756_v2 = vpack.c.bf16 %v7595_v30, %v7587_v6  ;;  %v5221_v1 = vmul.f32 0.5, %v5039_v16  ;;  %v5395_v50 = vcombine.low %v5219_v57, %v5220_v33  ;;  %v11885_v49 = vrot.slane %v11210_v52, %v10332_v20 }
 0x283   : > { %v5222_v53 = vmul.f32 0.5, %v5046_v19  ;;  %v11886_v60 = vrot.slane %v11202_v5, %v10332_v20  ;;  %v11887_v40 = vrot.slane %v11224_v51, %v10332_v20  ;;  %v11888_v14 = vrot.slane %v11222_v23, %v10332_v20 }
 0x284   : > { %v9519_v17 = vpop.eup %9518  ;;  %v11340_v37 = vadd.f32 %v4475_v26, %v3999_v31  ;;  %v11342_v43 = vcombine.low %v6721_v10, %v6725_v56  ;;  %v7985_v7 = vrot.slane %v8757_v24, %v10621_v45  ;;  %v11345_v6 = vcombine.low %v6729_v38, %v6733_v41 }
 0x285   : > { %v11330_v46 = vcombine.low %v11886_v60, %v11885_v49  ;;  %v11338_v0 = vcombine.low %v11888_v14, %v11887_v40  ;;  %v6440_v52 = vcombine.low %v9517_v61, %v9519_v17  ;;  %v5396_v9 = vcombine.low %v5221_v1, %v5222_v53  ;;  %v9521_v5 = vpop.eup %9520 }
 0x286   : > { %v4709_v36 = vcombine.high %v11340_v37, %v11340_v37  ;;  %v4716_v51 = vrot.slane %v11340_v37, %v10332_v20  ;;  %v7168_v23 = vrot.slane %v11147_v27, %v10345_v42  ;;  %v4291_v32 = vrot.slane %v11278_v13, %v10345_v42  ;;  %v9523_v55 = vpop.eup %9522 }
 0x287   : > { %v7978_v21 = vrot.slane %v8756_v2, %v10621_v45  ;;  %v5403_v34 = vrot.slane %v5395_v50, %v10332_v20  ;;  %v5410_v26 = vrot.slane %v5396_v9, %v10332_v20  ;;  %v11358_v39 = vcombine.low %v4484_v25, %v4491_v11 }
 0x288   : > { %v6441_v4 = vcombine.low %v9521_v5, %v9523_v55  ;;  %v4723_v47 = vrot.slane %v4709_v36, %v10332_v20  ;;  %v4724_v35 = vcombine.high %v4716_v51, %v4716_v51  ;;  %v5047_v28 = vsel %vm4850_vm0, %v4716_v51, 0.0 }
 0x289   : > { %v11362_v22 = vcombine.low %v7978_v21, %v7985_v7  ;;  %v6448_v15 = vrot.slane %v6440_v52, %v10332_v20  ;;  %v5411_v30 = vcombine.low %v5403_v34, %v5410_v26  ;;  %v5048_v16 = vrot.slane %v5047_v28, 4  ;;  %v3481_v44 = vpop.f32.mrb[32].mxu0  ;;  %v3522_v33 = vpop.f32.mrb[32].mxu1 }
 0x28a   : > { %v6455_v31 = vrot.slane %v6441_v4, %v10332_v20  ;;  %v4725_v10 = vcombine.high %v4723_v47, %v4723_v47  ;;  %v5054_v56 = vsel %vm4850_vm0, %v4724_v35, 0.0  ;;  %v5061_v38 = vsel %vm4850_vm0, %v4723_v47, 0.0  ;;  %v3483_v24 = vpop.f32.mrb[33].mxu0  ;;  %v3524_v19 = vpop.f32.mrb[33].mxu1 }
 0x28b   : > { %v11369_v57 = vsub.f32 %v11208_v54, %v5411_v30  ;;  %v5049_v41 = vadd.f32 %v5048_v16, %v5047_v28  ;;  %v5055_v25 = vrot.slane %v5054_v56, 4  ;;  %v5062_v11 = vrot.slane %v5061_v38, 4  ;;  %v3485_v61 = vpop.f32.mrb[34].mxu0  ;;  %v3526_v2 = vpop.f32.mrb[34].mxu1 }
 0x28c   : > { %v6456_v1 = vcombine.low %v6448_v15, %v6455_v31  ;;  %v5068_v53 = vsel %vm4850_vm0, %v4725_v10, 0.0  ;;  %v4000_v50 = vcombine.low %v3481_v44, %v3483_v24  ;;  %v4001_v17 = vcombine.low %v3522_v33, %v3524_v19  ;;  %v3486_v49 = vpop.f32.mrb[35].mxu0  ;;  %v3527_v60 = vpop.f32.mrb[35].mxu1 }
 0x28d   : > { %v5536_v40 = vmul.f32 %v11369_v57, %v11369_v57  ;;  %v5050_v14 = vrot.slane %v5049_v41, 2  ;;  %v5056_v7 = vadd.f32 %v5055_v25, %v5054_v56  ;;  %v5063_v52 = vadd.f32 %v5062_v11, %v5061_v38 }
 0x28e   : > { %v6584_v54 = vmul.f32 %v6456_v1, %v11205_v18  ;;  %v5069_v9 = vrot.slane %v5068_v53, 4  ;;  %v11376_v5 = vrot.slane %v4000_v50, %v10332_v20  ;;  %v11379_v36 = vrot.slane %v4001_v17, %v10332_v20 }
 0x28f   : > { %v5658_v51 = vcombine.high %v5536_v40, %v5536_v40  ;;  %v5665_v55 = vrot.slane %v5536_v40, %v10332_v20  ;;  %v5051_v21 = vadd.f32 %v5050_v14, %v5049_v41  ;;  %v5057_v34 = vrot.slane %v5056_v7, 2 }
 0x290   : > { %v7031_v26 = vmul.f32 %v11220_v48, %v6584_v54  ;;  %v5064_v4 = vrot.slane %v5063_v52, 2  ;;  %v5070_v47 = vadd.f32 %v5069_v9, %v5068_v53  ;;  %v4016_v35 = vcombine.low %v11376_v5, %v11379_v36 }
 0x291   : > { %v5672_v18 = vrot.slane %v5658_v51, %v10332_v20  ;;  %v5673_v28 = vcombine.high %v5665_v55, %v5665_v55  ;;  %v5984_v15 = vsel %vm4850_vm0, %v5665_v55, 0.0  ;;  %v5052_v30 = vrot.slane %v5051_v21, 1 }
 0x292   : > { %v7478_v16 = vadd.f32 %v11320_v29, %v7031_v26  ;;  %v5985_v44 = vrot.slane %v5984_v15, 4  ;;  %v5058_v33 = vadd.f32 %v5057_v34, %v5056_v7  ;;  %v5065_v31 = vadd.f32 %v5064_v4, %v5063_v52 }
 0x293   : > { %v5674_v10 = vcombine.high %v5672_v18, %v5672_v18  ;;  %v5991_v56 = vsel %vm4850_vm0, %v5673_v28, 0.0  ;;  %v5998_v48 = vsel %vm4850_vm0, %v5672_v18, 0.0  ;;  %v5053_v38 = vadd.f32 %v5052_v30, %v5051_v21 }
 0x294   : > { %v7491_v24 = vmax.f32 %v7478_v16, 0.0  ;;  %v5986_v19 = vadd.f32 %v5985_v44, %v5984_v15  ;;  %v5992_v41 = vrot.slane %v5991_v56, 4  ;;  %v5999_v25 = vrot.slane %v5998_v48, 4 }
 0x295   : > { %v6005_v11 = vsel %vm4850_vm0, %v5674_v10, 0.0  ;;  %v5059_v61 = vrot.slane %v5058_v33, 1  ;;  %v5066_v2 = vrot.slane %v5065_v31, 1  ;;  %v5071_v1 = vrot.slane %v5070_v47, 2 }
 0x296   : > { %v7597_v53 = vcombine.high %v7491_v24, %v7491_v24  ;;  %v7604_v29 = vrot.slane %v7491_v24, %v10332_v20  ;;  %v5987_v50 = vrot.slane %v5986_v19, 2  ;;  %v5993_v17 = vadd.f32 %v5992_v41, %v5991_v56 }
 0x297   : > { %v6000_v49 = vadd.f32 %v5999_v25, %v5998_v48  ;;  %v6006_v60 = vrot.slane %v6005_v11, 4  ;;  %v5060_v40 = vadd.f32 %v5059_v61, %v5058_v33  ;;  %v5067_v14 = vadd.f32 %v5066_v2, %v5065_v31 }
 0x298   : > { %v7611_v7 = vrot.slane %v7597_v53, %v10332_v20  ;;  %v7612_v52 = vcombine.high %v7604_v29, %v7604_v29  ;;  %v5988_v54 = vadd.f32 %v5987_v50, %v5986_v19  ;;  %v5994_v9 = vrot.slane %v5993_v17, 2 }
 0x299   : > { %v6001_v51 = vrot.slane %v6000_v49, 2  ;;  %v6007_v55 = vadd.f32 %v6006_v60, %v6005_v11  ;;  %v5072_v21 = vadd.f32 %v5071_v1, %v5070_v47  ;;  %v5223_v34 = vmul.f32 0.5, %v5053_v38 }
 0x29a   : > { %v7613_v26 = vcombine.high %v7611_v7, %v7611_v7  ;;  %v8758_v4 = vpack.c.bf16 %v7612_v52, %v7604_v29  ;;  %v5989_v18 = vrot.slane %v5988_v54, 1  ;;  %v5995_v28 = vadd.f32 %v5994_v9, %v5993_v17 }
 0x29b   : > { %v6002_v15 = vadd.f32 %v6001_v51, %v6000_v49  ;;  %v6008_v30 = vrot.slane %v6007_v55, 2  ;;  %v5073_v16 = vrot.slane %v5072_v21, 1  ;;  %v5224_v44 = vmul.f32 0.5, %v5060_v40 }
 0x29c   : > { %v8759_v10 = vpack.c.bf16 %v7613_v26, %v7611_v7  ;;  %v7992_v33 = vrot.slane %v8758_v4, %v10621_v45  ;;  %v5990_v31 = vadd.f32 %v5989_v18, %v5988_v54  ;;  %v5996_v56 = vrot.slane %v5995_v28, 1 }
 0x29d   : > { %v6003_v48 = vrot.slane %v6002_v15, 1  ;;  %v6009_v24 = vadd.f32 %v6008_v30, %v6007_v55  ;;  %v5074_v19 = vadd.f32 %v5073_v16, %v5072_v21  ;;  %v5225_v41 = vmul.f32 0.5, %v5067_v14 }
 0x29e   : > { %v7999_v47 = vrot.slane %v8759_v10, %v10621_v45  ;;  %v5997_v38 = vadd.f32 %v5996_v56, %v5995_v28  ;;  %v6183_v25 = vmul.f32 0.5, %v5990_v31  ;;  %v5412_v11 = vcombine.low %v5223_v34, %v5224_v44 }
 0x29f   : > { %v6004_v61 = vadd.f32 %v6003_v48, %v6002_v15  ;;  %v6010_v2 = vrot.slane %v6009_v24, 1  ;;  %v5226_v1 = vmul.f32 0.5, %v5074_v19  ;;  %v8008_v53 = vrot.slane %v11362_v22, %v10621_v45 }
 0x2a0   : > { %v8001_v29 = vcombine.low %v7992_v33, %v7999_v47  ;;  %v6184_v50 = vmul.f32 0.5, %v5997_v38  ;;  %v6232_v17 = vadd.f32 1e-05, %v6183_v25  ;;  %v11401_v14 = vadd.f32 %v11358_v39, %v4016_v35 }
 0x2a1   : > { %v6011_v49 = vadd.f32 %v6010_v2, %v6009_v24  ;;  %v6185_v60 = vmul.f32 0.5, %v6004_v61  ;;  %v5413_v40 = vcombine.low %v5225_v41, %v5226_v1  ;;  %v5420_v54 = vrot.slane %v5412_v11, %v10332_v20 }
 0x2a2   : > { %v8015_v7 = vrot.slane %v8001_v29, %v10621_v45  ;;  %v6233_v52 = vadd.f32 1e-05, %v6184_v50  ;;  %9524 = vrsqrt.f32 %v6232_v17  ;;  %v4726_v55 = vcombine.high %v11401_v14, %v11401_v14 }
 0x2a3   : > { %v6186_v9 = vmul.f32 0.5, %v6011_v49  ;;  %v6234_v22 = vadd.f32 1e-05, %v6185_v60  ;;  %v5427_v51 = vrot.slane %v5413_v40, %v10332_v20  ;;  %v4733_v39 = vrot.slane %v11401_v14, %v10332_v20 }
 0x2a4   : > { %v8016_v21 = vcombine.low %v8008_v53, %v8015_v7  ;;  %9526 = vrsqrt.f32 %v6233_v52  ;;  %v4295_v5 = vrot.slane %v11278_v13, %v10368_v3  ;;  %v4740_v34 = vrot.slane %v4726_v55, %v10332_v20 }
 0x2a5   : > { %v6235_v36 = vadd.f32 1e-05, %v6186_v9  ;;  %v5428_v35 = vcombine.low %v5420_v54, %v5427_v51  ;;  %v4299_v26 = vrot.slane %v11278_v13, %v10373_v8  ;;  %9528 = vrsqrt.f32 %v6234_v22 }
 0x2a6   : > { %v4741_v4 = vcombine.high %v4733_v39, %v4733_v39  ;;  %v5075_v18 = vsel %vm4850_vm0, %v4733_v39, 0.0  ;;  %v4303_v28 = vrot.slane %v11278_v13, %v10378_v12  ;;  %8187 = vst [vmem:[%s10894_s12 + $0x10] sm:$0xff] %v8016_v21  ;;  %v4742_v30 = vcombine.high %v4740_v34, %v4740_v34 }
 0x2a7   : > { %9530 = vrsqrt.f32 %v6235_v36  ;;  %v11420_v15 = vsub.f32 %v11340_v37, %v5428_v35  ;;  %v5076_v16 = vrot.slane %v5075_v18, 4  ;;  %v7172_v44 = vrot.slane %v11147_v27, %v10368_v3 }
 0x2a8   : > { %v5082_v33 = vsel %vm4850_vm0, %v4741_v4, 0.0  ;;  %v5089_v31 = vsel %vm4850_vm0, %v4740_v34, 0.0  ;;  %v5096_v47 = vsel %vm4850_vm0, %v4742_v30, 0.0  ;;  %v11442_v11 = vcombine.low %v4291_v32, %v4295_v5 }
 0x2a9   : > { %v5537_v56 = vmul.f32 %v11420_v15, %v11420_v15  ;;  %v5077_v48 = vadd.f32 %v5076_v16, %v5075_v18  ;;  %v5083_v24 = vrot.slane %v5082_v33, 4  ;;  %v5090_v19 = vrot.slane %v5089_v31, 4  ;;  %v11430_v37 = vpop.f32.mrb[36].mxu0  ;;  %v11435_v38 = vpop.f32.mrb[36].mxu1 }
 0x2aa   : > { %v11437_v25 = vpop.f32.mrb[37].mxu0  ;;  %v11444_v61 = vcombine.low %v4299_v26, %v4303_v28  ;;  %v11447_v50 = vpop.f32.mrb[37].mxu1  ;;  %v5097_v40 = vrot.slane %v5096_v47, 4  ;;  %v4501_v35 = vrot.slane %v11442_v11, %v10332_v20 }
 0x2ab   : > { %v5675_v2 = vcombine.high %v5537_v56, %v5537_v56  ;;  %v5682_v1 = vrot.slane %v5537_v56, %v10332_v20  ;;  %v5078_v53 = vrot.slane %v5077_v48, 2  ;;  %v5084_v29 = vadd.f32 %v5083_v24, %v5082_v33  ;;  %v3567_v17 = vpop.f32.mrb[38].mxu0  ;;  %v3608_v32 = vpop.f32.mrb[38].mxu1 }
 0x2ac   : > { %v9525_v49 = vpop.eup %9524  ;;  %v5091_v60 = vadd.f32 %v5090_v19, %v5089_v31  ;;  %v4017_v7 = vcombine.low %v11430_v37, %v11437_v25  ;;  %v4018_v13 = vcombine.low %v11435_v38, %v11447_v50  ;;  %v3568_v52 = vpop.f32.mrb[39].mxu0  ;;  %v7368_v38 = vcombine.low %v7168_v23, %v7172_v44 }
 0x2ad   : > { %v5689_v54 = vrot.slane %v5675_v2, %v10332_v20  ;;  %v5690_v9 = vcombine.high %v5682_v1, %v5682_v1  ;;  %v6012_v22 = vsel %vm4850_vm0, %v5682_v1, 0.0  ;;  %v5079_v51 = vadd.f32 %v5078_v53, %v5077_v48  ;;  %v3609_v55 = vpop.f32.mrb[39].mxu1 }
 0x2ae   : > { %v9527_v21 = vpop.eup %9526  ;;  %v6013_v39 = vrot.slane %v6012_v22, 4  ;;  %v5085_v5 = vrot.slane %v5084_v29, 2  ;;  %v5092_v36 = vrot.slane %v5091_v60, 2  ;;  %v5098_v2 = vadd.f32 %v5097_v40, %v5096_v47 }
 0x2af   : > { %v6457_v34 = vcombine.low %v9525_v49, %v9527_v21  ;;  %v5691_v26 = vcombine.high %v5689_v54, %v5689_v54  ;;  %v6019_v4 = vsel %vm4850_vm0, %v5690_v9, 0.0  ;;  %v6026_v18 = vsel %vm4850_vm0, %v5689_v54, 0.0  ;;  %v9529_v28 = vpop.eup %9528 }
 0x2b0   : > { %v6014_v30 = vadd.f32 %v6013_v39, %v6012_v22  ;;  %v6020_v16 = vrot.slane %v6019_v4, 4  ;;  %v6027_v33 = vrot.slane %v6026_v18, 4  ;;  %v5080_v31 = vrot.slane %v5079_v51, 1 }
 0x2b1   : > { %v9531_v56 = vpop.eup %9530  ;;  %v6033_v48 = vsel %vm4850_vm0, %v5691_v26, 0.0  ;;  %v5086_v24 = vadd.f32 %v5085_v5, %v5084_v29  ;;  %v5093_v19 = vadd.f32 %v5092_v36, %v5091_v60  ;;  %v6465_v32 = vrot.slane %v6457_v34, %v10332_v20 }
 0x2b2   : > { %v6458_v1 = vcombine.low %v9529_v28, %v9531_v56  ;;  %v6015_v53 = vrot.slane %v6014_v30, 2  ;;  %v6021_v17 = vadd.f32 %v6020_v16, %v6019_v4  ;;  %v6028_v49 = vadd.f32 %v6027_v33, %v6026_v18 }
 0x2b3   : > { %v6034_v52 = vrot.slane %v6033_v48, 4  ;;  %v5081_v9 = vadd.f32 %v5080_v31, %v5079_v51  ;;  %v5087_v54 = vrot.slane %v5086_v24, 1  ;;  %v5094_v26 = vrot.slane %v5093_v19, 1 }
 0x2b4   : > { %v6472_v22 = vrot.slane %v6458_v1, %v10332_v20  ;;  %v6016_v55 = vadd.f32 %v6015_v53, %v6014_v30  ;;  %v6022_v21 = vrot.slane %v6021_v17, 2  ;;  %v6029_v39 = vrot.slane %v6028_v49, 2 }
 0x2b5   : > { %v6035_v10 = vadd.f32 %v6034_v52, %v6033_v48  ;;  %v5088_v41 = vadd.f32 %v5087_v54, %v5086_v24  ;;  %v5099_v29 = vrot.slane %v5098_v2, 2  ;;  %v4508_v51 = vrot.slane %v11444_v61, %v10332_v20 }
 0x2b6   : > { %v6473_v60 = vcombine.low %v6465_v32, %v6472_v22  ;;  %v6017_v47 = vrot.slane %v6016_v55, 1  ;;  %v6023_v40 = vadd.f32 %v6022_v21, %v6021_v17  ;;  %v6030_v5 = vadd.f32 %v6029_v39, %v6028_v49 }
 0x2b7   : > { %v6036_v36 = vrot.slane %v6035_v10, 2  ;;  %v5100_v4 = vadd.f32 %v5099_v29, %v5098_v2  ;;  %v5228_v18 = vmul.f32 0.5, %v5088_v41  ;;  %v5095_v31 = vadd.f32 %v5094_v26, %v5093_v19 }
 0x2b8   : > { %v6585_v34 = vmul.f32 %v6473_v60, %v11369_v57  ;;  %v6018_v28 = vadd.f32 %v6017_v47, %v6016_v55  ;;  %v6024_v30 = vrot.slane %v6023_v40, 1  ;;  %v6031_v16 = vrot.slane %v6030_v5, 1 }
 0x2b9   : > { %v6037_v33 = vadd.f32 %v6036_v36, %v6035_v10  ;;  %v5101_v56 = vrot.slane %v5100_v4, 1  ;;  %v5227_v48 = vmul.f32 0.5, %v5081_v9  ;;  %v4025_v57 = vrot.slane %v4017_v7, %v10332_v20 }
 0x2ba   : > { %v7032_v24 = vmul.f32 %v11330_v46, %v6585_v34  ;;  %v6025_v1 = vadd.f32 %v6024_v30, %v6023_v40  ;;  %v6032_v53 = vadd.f32 %v6031_v16, %v6030_v5  ;;  %v6187_v17 = vmul.f32 0.5, %v6018_v28  ;;  %v11515_v30 = vld [vmem:[%s10003_s16 + $0x28] sm:$0xff] }
 0x2bb   : > { %v6038_v49 = vrot.slane %v6037_v33, 1  ;;  %v5102_v2 = vadd.f32 %v5101_v56, %v5100_v4  ;;  %v5429_v41 = vcombine.low %v5227_v48, %v5228_v18  ;;  %v5229_v9 = vmul.f32 0.5, %v5095_v31 }
 0x2bc   : > { %v7479_v61 = vadd.f32 %v11338_v0, %v7032_v24  ;;  %v6188_v32 = vmul.f32 0.5, %v6025_v1  ;;  %v6189_v10 = vmul.f32 0.5, %v6032_v53  ;;  %v6236_v19 = vadd.f32 1e-05, %v6187_v17 }
 0x2bd   : > { %v6039_v52 = vadd.f32 %v6038_v49, %v6037_v33  ;;  %v5230_v54 = vmul.f32 0.5, %v5102_v2  ;;  %v4032_v46 = vrot.slane %v4018_v13, %v10332_v20  ;;  %v4509_v37 = vcombine.low %v4501_v35, %v4508_v51 }
 0x2be   : > { %v7492_v22 = vmax.f32 %v7479_v61, 0.0  ;;  %v6237_v55 = vadd.f32 1e-05, %v6188_v32  ;;  %v6238_v21 = vadd.f32 1e-05, %v6189_v10  ;;  %9532 = vrsqrt.f32 %v6236_v19 }
 0x2bf   : > { %v6190_v25 = vmul.f32 0.5, %v6039_v52  ;;  %v5430_v0 = vcombine.low %v5229_v9, %v5230_v54  ;;  %v4033_v7 = vcombine.low %v4025_v57, %v4032_v46  ;;  %v11889_v50 = vrot.slane %v11147_v27, %v10378_v12 }
 0x2c0   : > { %9534 = vrsqrt.f32 %v6237_v55  ;;  %v11890_v13 = vrot.slane %v11147_v27, %v10373_v8  ;;  %v5437_v35 = vrot.slane %v5429_v41, %v10332_v20  ;;  %v7614_v39 = vcombine.high %v7492_v22, %v7492_v22 }
 0x2c1   : > { %v6239_v26 = vadd.f32 1e-05, %v6190_v25  ;;  %v5444_v29 = vrot.slane %v5430_v0, %v10332_v20  ;;  %v7621_v60 = vrot.slane %v7492_v22, %v10332_v20  ;;  %9536 = vrsqrt.f32 %v6238_v21 }
 0x2c2   : > { %v7369_v11 = vcombine.low %v11890_v13, %v11889_v50  ;;  %v11493_v23 = vadd.f32 %v4509_v37, %v4033_v7  ;;  %v6929_v44 = vrot.slane %v11342_v43, %v10332_v20  ;;  %v6936_v27 = vrot.slane %v11345_v6, %v10332_v20 }
 0x2c3   : > { %9538 = vrsqrt.f32 %v6239_v26  ;;  %v5445_v47 = vcombine.low %v5437_v35, %v5444_v29  ;;  %v7376_v40 = vrot.slane %v7368_v38, %v10332_v20  ;;  %v11502_v36 = vrot.slane %v7614_v39, %v10332_v20 }
 0x2c4   : > { %v7383_v5 = vrot.slane %v7369_v11, %v10332_v20  ;;  %v4743_v18 = vcombine.high %v11493_v23, %v11493_v23  ;;  %v4750_v51 = vrot.slane %v11493_v23, %v10332_v20  ;;  %v7629_v43 = vcombine.high %v7621_v60, %v7621_v60 }
 0x2c5   : > { %v11505_v4 = vsub.f32 %v11401_v14, %v5445_v47  ;;  %v11517_v16 = vcombine.low %v6929_v44, %v6936_v27  ;;  %v7630_v48 = vcombine.high %v11502_v36, %v11502_v36  ;;  %v4307_v10 = vrot.slane %v11515_v30, %v10300_v58 }
 0x2c6   : > { %v4758_v34 = vcombine.high %v4750_v51, %v4750_v51  ;;  %v5103_v28 = vsel %vm4850_vm0, %v4750_v51, 0.0  ;;  %v11519_v33 = vcombine.low %v7376_v40, %v7383_v5  ;;  %v11522_v14 = vrot.slane %v4743_v18, %v10332_v20 }
 0x2c7   : > { %v5538_v6 = vmul.f32 %v11505_v4, %v11505_v4  ;;  %v5104_v31 = vrot.slane %v5103_v28, 4  ;;  %v11530_v2 = vpack.c.bf16 %v7629_v43, %v7621_v60 }
 0x2c8   : > { %v9533_v56 = vpop.eup %9532  ;;  %v5110_v53 = vsel %vm4850_vm0, %v4758_v34, 0.0  ;;  %v5117_v0 = vsel %vm4850_vm0, %v11522_v14, 0.0 }
 0x2c9   : > { %v5692_v24 = vcombine.high %v5538_v6, %v5538_v6  ;;  %v5699_v1 = vrot.slane %v5538_v6, %v10332_v20  ;;  %v11528_v17 = vpop.f32.mrb[40].mxu0  ;;  %v5105_v41 = vadd.f32 %v5104_v31, %v5103_v28  ;;  %v5111_v57 = vrot.slane %v5110_v53, 4  ;;  %v11532_v61 = vpop.f32.mrb[40].mxu1 }
 0x2ca   : > { %v9535_v49 = vpop.eup %9534  ;;  %v11534_v32 = vpop.f32.mrb[41].mxu0  ;;  %v5118_v18 = vrot.slane %v5117_v0, 4  ;;  %v4759_v31 = vcombine.high %v11522_v14, %v11522_v14 }
 0x2cb   : > { %v6474_v19 = vcombine.low %v9533_v56, %v9535_v49  ;;  %v5706_v52 = vrot.slane %v5692_v24, %v10332_v20  ;;  %v5707_v9 = vcombine.high %v5699_v1, %v5699_v1  ;;  %v6040_v54 = vsel %vm4850_vm0, %v5699_v1, 0.0  ;;  %v11540_v46 = vpop.f32.mrb[41].mxu1  ;;  %v3649_v22 = vpop.f32.mrb[42].mxu0 }
 0x2cc   : > { %v9537_v55 = vpop.eup %9536  ;;  %v6041_v21 = vrot.slane %v6040_v54, 4  ;;  %v5106_v37 = vrot.slane %v5105_v41, 2  ;;  %v5112_v25 = vadd.f32 %v5111_v57, %v5110_v53  ;;  %v3690_v7 = vpop.f32.mrb[42].mxu1  ;;  %v5119_v24 = vadd.f32 %v5118_v18, %v5117_v0 }
 0x2cd   : > { %v3650_v38 = vpop.f32.mrb[43].mxu0  ;;  %v9539_v50 = vpop.eup %9538  ;;  %v6482_v13 = vrot.slane %v6474_v19, %v10332_v20  ;;  %v5708_v11 = vcombine.high %v5706_v52, %v5706_v52  ;;  %v6047_v35 = vsel %vm4850_vm0, %v5707_v9, 0.0  ;;  %v6054_v39 = vsel %vm4850_vm0, %v5706_v52, 0.0 }
 0x2ce   : > { %v3691_v26 = vpop.f32.mrb[43].mxu1  ;;  %v6475_v29 = vcombine.low %v9537_v55, %v9539_v50  ;;  %v6042_v60 = vadd.f32 %v6041_v21, %v6040_v54  ;;  %v6048_v47 = vrot.slane %v6047_v35, 4  ;;  %v6055_v44 = vrot.slane %v6054_v39, 4 }
 0x2cf   : > { %v6061_v27 = vsel %vm4850_vm0, %v5708_v11, 0.0  ;;  %v5107_v40 = vadd.f32 %v5106_v37, %v5105_v41  ;;  %v5113_v5 = vrot.slane %v5112_v25, 2  ;;  %v8761_v19 = vpack.c.bf16 %v7630_v48, %v11502_v36 }
 0x2d0   : > { %v6489_v51 = vrot.slane %v6475_v29, %v10332_v20  ;;  %v6043_v43 = vrot.slane %v6042_v60, 2  ;;  %v6049_v6 = vadd.f32 %v6048_v47, %v6047_v35  ;;  %v6056_v34 = vadd.f32 %v6055_v44, %v6054_v39 }
 0x2d1   : > { %v6062_v28 = vrot.slane %v6061_v27, 4  ;;  %v5114_v56 = vadd.f32 %v5113_v5, %v5112_v25  ;;  %v5108_v52 = vrot.slane %v5107_v40, 1  ;;  %v5120_v9 = vrot.slane %v5119_v24, 2 }
 0x2d2   : > { %v6490_v1 = vcombine.low %v6482_v13, %v6489_v51  ;;  %v6044_v53 = vadd.f32 %v6043_v43, %v6042_v60  ;;  %v6050_v49 = vrot.slane %v6049_v6, 2  ;;  %v6057_v57 = vrot.slane %v6056_v34, 2 }
 0x2d3   : > { %v6063_v41 = vadd.f32 %v6062_v28, %v6061_v27  ;;  %v5115_v7 = vrot.slane %v5114_v56, 1  ;;  %v5121_v38 = vadd.f32 %v5120_v9, %v5119_v24  ;;  %v5124_v14 = vsel %vm4850_vm0, %v4759_v31, 0.0 }
 0x2d4   : > { %v6586_v54 = vmul.f32 %v6490_v1, %v11420_v15  ;;  %v6045_v22 = vrot.slane %v6044_v53, 1  ;;  %v6051_v55 = vadd.f32 %v6050_v49, %v6049_v6  ;;  %v6058_v21 = vadd.f32 %v6057_v57, %v6056_v34 }
 0x2d5   : > { %v6064_v37 = vrot.slane %v6063_v41, 2  ;;  %v8027_v36 = vrot.slane %v11530_v2, %v10621_v45  ;;  %v8034_v48 = vrot.slane %v8761_v19, %v10621_v45  ;;  %v5125_v15 = vrot.slane %v5124_v14, 4 }
 0x2d6   : > { %v7033_v25 = vmul.f32 %v11517_v16, %v6586_v54  ;;  %v6046_v0 = vadd.f32 %v6045_v22, %v6044_v53  ;;  %v6052_v50 = vrot.slane %v6051_v55, 1  ;;  %v6059_v13 = vrot.slane %v6058_v21, 1 }
 0x2d7   : > { %v6065_v11 = vadd.f32 %v6064_v37, %v6063_v41  ;;  %v5109_v26 = vadd.f32 %v5108_v52, %v5107_v40  ;;  %v5122_v29 = vrot.slane %v5121_v38, 1  ;;  %v5116_v44 = vadd.f32 %v5115_v7, %v5114_v56 }
 0x2d8   : > { %v7480_v35 = vadd.f32 %v11519_v33, %v7033_v25  ;;  %v6053_v39 = vadd.f32 %v6052_v50, %v6051_v55  ;;  %v6060_v60 = vadd.f32 %v6059_v13, %v6058_v21  ;;  %v5126_v27 = vadd.f32 %v5125_v15, %v5124_v14  ;;  %v11577_v50 = vld [vmem:[%s10009_s24 + $0x20] sm:$0xff] }
 0x2d9   : > { %v6066_v47 = vrot.slane %v6065_v11, 1  ;;  %v6191_v5 = vmul.f32 0.5, %v6046_v0  ;;  %v4311_v18 = vrot.slane %v11515_v30, %v10303_v59  ;;  %v4315_v2 = vrot.slane %v11515_v30, %v10310_v62 }
 0x2da   : > { %v7493_v16 = vmax.f32 %v7480_v35, 0.0  ;;  %v8049_v51 = vcombine.low %v8027_v36, %v8034_v48  ;;  %v6192_v6 = vmul.f32 0.5, %v6053_v39  ;;  %v5127_v34 = vrot.slane %v5126_v27, 2 }
 0x2db   : > { %v6067_v43 = vadd.f32 %v6066_v47, %v6065_v11  ;;  %v5123_v28 = vadd.f32 %v5122_v29, %v5121_v38  ;;  %v5231_v31 = vmul.f32 0.5, %v5109_v26  ;;  %v6193_v24 = vmul.f32 0.5, %v6060_v60 }
 0x2dc   : > { %v7631_v33 = vcombine.high %v7493_v16, %v7493_v16  ;;  %v7638_v40 = vrot.slane %v7493_v16, %v10332_v20  ;;  %v5128_v1 = vadd.f32 %v5127_v34, %v5126_v27  ;;  %v5232_v53 = vmul.f32 0.5, %v5116_v44 }
 0x2dd   : > { %v6194_v56 = vmul.f32 0.5, %v6067_v43  ;;  %v6240_v19 = vadd.f32 1e-05, %v6191_v5  ;;  %v4034_v41 = vcombine.low %v11528_v17, %v11534_v32  ;;  %v6241_v52 = vadd.f32 1e-05, %v6192_v6 }
 0x2de   : > { %v7645_v49 = vrot.slane %v7631_v33, %v10332_v20  ;;  %v7646_v57 = vcombine.high %v7638_v40, %v7638_v40  ;;  %v5129_v54 = vrot.slane %v5128_v1, 1  ;;  %v4035_v22 = vcombine.low %v11532_v61, %v11540_v46 }
 0x2df   : > { %v6243_v9 = vadd.f32 1e-05, %v6194_v56  ;;  %v4042_v37 = vrot.slane %v4034_v41, %v10332_v20  ;;  %v4319_v7 = vrot.slane %v11515_v30, %v10313_v63  ;;  %v5233_v14 = vmul.f32 0.5, %v5123_v28 }
 0x2e0   : > { %v7647_v55 = vcombine.high %v7645_v49, %v7645_v49  ;;  %v8762_v21 = vpack.c.bf16 %v7646_v57, %v7638_v40  ;;  %v5130_v38 = vadd.f32 %v5129_v54, %v5128_v1  ;;  %v4049_v25 = vrot.slane %v4035_v22, %v10332_v20 }
 0x2e1   : > { %v4510_v17 = vcombine.low %v4307_v10, %v4311_v18  ;;  %v6242_v0 = vadd.f32 1e-05, %v6193_v24  ;;  %v5446_v61 = vcombine.low %v5231_v31, %v5232_v53  ;;  %v4511_v46 = vcombine.low %v4315_v2, %v4319_v7  ;;  %v11596_v2 = vld [vmem:[%s10011_s26 + $0x20] sm:$0xff] }
 0x2e2   : > { %v8763_v32 = vpack.c.bf16 %v7647_v55, %v7645_v49  ;;  %9540 = vrsqrt.f32 %v6241_v52  ;;  %v5234_v13 = vmul.f32 0.5, %v5130_v38  ;;  %v4050_v36 = vcombine.low %v4042_v37, %v4049_v25 }
 0x2e3   : > { %v4518_v48 = vrot.slane %v4510_v17, %v10332_v20  ;;  %v8041_v11 = vrot.slane %v8762_v21, %v10621_v45  ;;  %9542 = vrsqrt.f32 %v6243_v9  ;;  %v4525_v35 = vrot.slane %v4511_v46, %v10332_v20 }
 0x2e4   : > { %v8048_v15 = vrot.slane %v8763_v32, %v10621_v45  ;;  %9544 = vrsqrt.f32 %v6240_v19  ;;  %v6737_v10 = vrot.slane %v11577_v50, %v10300_v58  ;;  %v5447_v39 = vcombine.low %v5233_v14, %v5234_v13 }
 0x2e5   : > { %9546 = vrsqrt.f32 %v6242_v0  ;;  %v6741_v29 = vrot.slane %v11577_v50, %v10303_v59  ;;  %v4526_v60 = vcombine.low %v4518_v48, %v4525_v35  ;;  %v6745_v47 = vrot.slane %v11577_v50, %v10310_v62 }
 0x2e6   : > { %v8050_v26 = vcombine.low %v8041_v11, %v8048_v15  ;;  %v5454_v44 = vrot.slane %v5446_v61, %v10332_v20  ;;  %v5461_v27 = vrot.slane %v5447_v39, %v10332_v20  ;;  %v8057_v16 = vrot.slane %v8049_v51, %v10621_v45 }
 0x2e7   : > { %v6749_v18 = vrot.slane %v11577_v50, %v10313_v63  ;;  %v11598_v43 = vadd.f32 %v4526_v60, %v4050_v36  ;;  %v11602_v40 = vcombine.low %v6737_v10, %v6741_v29  ;;  %v7184_v56 = vrot.slane %v11596_v2, %v10300_v58 }
 0x2e8   : > { %v8064_v5 = vrot.slane %v8050_v26, %v10621_v45  ;;  %v5462_v6 = vcombine.low %v5454_v44, %v5461_v27  ;;  %v7188_v1 = vrot.slane %v11596_v2, %v10303_v59  ;;  %v7192_v21 = vrot.slane %v11596_v2, %v10310_v62 }
 0x2e9   : > { %v11600_v34 = vpop.f32.mrb[44].mxu0  ;;  %v4760_v28 = vcombine.high %v11598_v43, %v11598_v43  ;;  %v4767_v51 = vrot.slane %v11598_v43, %v10332_v20  ;;  %v11608_v31 = vpop.f32.mrb[44].mxu1  ;;  %v11621_v19 = vcombine.low %v6745_v47, %v6749_v18  ;;  %v6946_v25 = vrot.slane %v11602_v40, %v10332_v20 }
 0x2ea   : > { %v8065_v33 = vcombine.low %v8057_v16, %v8064_v5  ;;  %v11610_v24 = vpop.f32.mrb[45].mxu0  ;;  %v11617_v53 = vsub.f32 %v11493_v23, %v5462_v6  ;;  %v11619_v49 = vpop.f32.mrb[45].mxu1  ;;  %v7196_v17 = vrot.slane %v11596_v2, %v10313_v63  ;;  %v7385_v10 = vcombine.low %v7184_v56, %v7188_v1 }
 0x2eb   : > { %v3731_v57 = vpop.f32.mrb[46].mxu0  ;;  %v4774_v41 = vrot.slane %v4760_v28, %v10332_v20  ;;  %v4775_v52 = vcombine.high %v4767_v51, %v4767_v51  ;;  %v5131_v9 = vsel %vm4850_vm0, %v4767_v51, 0.0  ;;  %v3772_v54 = vpop.f32.mrb[46].mxu1  ;;  %v4051_v7 = vcombine.low %v11600_v34, %v11610_v24 }
 0x2ec   : > { %v3732_v22 = vpop.f32.mrb[47].mxu0  ;;  %8188 = vst [vmem:[%s10894_s12 + $0x18] sm:$0xff] %v8065_v33  ;;  %v9541_v55 = vpop.eup %9540  ;;  %v5539_v23 = vmul.f32 %v11617_v53, %v11617_v53  ;;  %v5132_v37 = vrot.slane %v5131_v9, 4  ;;  %v6953_v35 = vrot.slane %v11621_v19, %v10332_v20  ;;  %v7386_v28 = vcombine.low %v7192_v21, %v7196_v17 }
 0x2ed   : > { %v3773_v38 = vpop.f32.mrb[47].mxu1  ;;  %v9543_v14 = vpop.eup %9542  ;;  %v5138_v32 = vsel %vm4850_vm0, %v4775_v52, 0.0  ;;  %v5145_v0 = vsel %vm4850_vm0, %v4774_v41, 0.0  ;;  %v4776_v27 = vcombine.high %v4774_v41, %v4774_v41  ;;  %v4331_v34 = vrot.slane %v11515_v30, %v10373_v8 }
 0x2ee   : > { %v9545_v61 = vpop.eup %9544  ;;  %v5709_v46 = vcombine.high %v5539_v23, %v5539_v23  ;;  %v5716_v13 = vrot.slane %v5539_v23, %v10332_v20  ;;  %v5133_v36 = vadd.f32 %v5132_v37, %v5131_v9  ;;  %v5139_v48 = vrot.slane %v5138_v32, 4 }
 0x2ef   : > { %v9547_v11 = vpop.eup %9546  ;;  %v6491_v15 = vcombine.low %v9545_v61, %v9541_v55  ;;  %v5146_v39 = vrot.slane %v5145_v0, 4  ;;  %v5152_v55 = vsel %vm4850_vm0, %v4776_v27, 0.0  ;;  %v7393_v61 = vrot.slane %v7385_v10, %v10332_v20 }
 0x2f0   : > { %v6492_v26 = vcombine.low %v9547_v11, %v9543_v14  ;;  %v5723_v29 = vrot.slane %v5709_v46, %v10332_v20  ;;  %v5724_v60 = vcombine.high %v5716_v13, %v5716_v13  ;;  %v6068_v47 = vsel %vm4850_vm0, %v5716_v13, 0.0 }
 0x2f1   : > { %v6069_v44 = vrot.slane %v6068_v47, 4  ;;  %v5140_v16 = vadd.f32 %v5139_v48, %v5138_v32  ;;  %v5147_v5 = vadd.f32 %v5146_v39, %v5145_v0  ;;  %v5134_v40 = vrot.slane %v5133_v36, 2 }
 0x2f2   : > { %v5725_v18 = vcombine.high %v5723_v29, %v5723_v29  ;;  %v6075_v6 = vsel %vm4850_vm0, %v5724_v60, 0.0  ;;  %v6082_v33 = vsel %vm4850_vm0, %v5723_v29, 0.0  ;;  %v6506_v57 = vrot.slane %v6492_v26, %v10332_v20 }
 0x2f3   : > { %v6070_v51 = vadd.f32 %v6069_v44, %v6068_v47  ;;  %v6076_v56 = vrot.slane %v6075_v6, 4  ;;  %v6083_v1 = vrot.slane %v6082_v33, 4  ;;  %v5141_v52 = vrot.slane %v5140_v16, 2 }
 0x2f4   : > { %v6089_v19 = vsel %vm4850_vm0, %v5725_v18, 0.0  ;;  %v5148_v9 = vrot.slane %v5147_v5, 2  ;;  %v6499_v23 = vrot.slane %v6491_v15, %v10332_v20  ;;  %v5135_v38 = vadd.f32 %v5134_v40, %v5133_v36 }
 0x2f5   : > { %v6071_v54 = vrot.slane %v6070_v51, 2  ;;  %v6077_v41 = vadd.f32 %v6076_v56, %v6075_v6  ;;  %v6084_v22 = vadd.f32 %v6083_v1, %v6082_v33  ;;  %v6090_v37 = vrot.slane %v6089_v19, 4 }
 0x2f6   : > { %v5142_v14 = vadd.f32 %v5141_v52, %v5140_v16  ;;  %v5149_v0 = vadd.f32 %v5148_v9, %v5147_v5  ;;  %v7400_v46 = vrot.slane %v7386_v28, %v10332_v20  ;;  %v5153_v48 = vrot.slane %v5152_v55, 4 }
 0x2f7   : > { %v6072_v21 = vadd.f32 %v6071_v54, %v6070_v51  ;;  %v6078_v17 = vrot.slane %v6077_v41, 2  ;;  %v6085_v32 = vrot.slane %v6084_v22, 2  ;;  %v6091_v13 = vadd.f32 %v6090_v37, %v6089_v19 }
 0x2f8   : > { %v6507_v11 = vcombine.low %v6499_v23, %v6506_v57  ;;  %v5143_v29 = vrot.slane %v5142_v14, 1  ;;  %v6954_v60 = vcombine.low %v6946_v25, %v6953_v35  ;;  %v5136_v27 = vrot.slane %v5135_v38, 1 }
 0x2f9   : > { %v6073_v39 = vrot.slane %v6072_v21, 1  ;;  %v6079_v26 = vadd.f32 %v6078_v17, %v6077_v41  ;;  %v6086_v47 = vadd.f32 %v6085_v32, %v6084_v22  ;;  %v6092_v15 = vrot.slane %v6091_v13, 2 }
 0x2fa   : > { %v5150_v16 = vrot.slane %v5149_v0, 1  ;;  %v7401_v18 = vcombine.low %v7393_v61, %v7400_v46  ;;  %v5154_v33 = vadd.f32 %v5153_v48, %v5152_v55  ;;  %v6587_v10 = vmul.f32 %v6507_v11, %v11505_v4 }
 0x2fb   : > { %v6074_v44 = vadd.f32 %v6073_v39, %v6072_v21  ;;  %v6080_v36 = vrot.slane %v6079_v26, 1  ;;  %v6087_v6 = vrot.slane %v6086_v47, 1  ;;  %v6093_v5 = vadd.f32 %v6092_v15, %v6091_v13 }
 0x2fc   : > { %v5144_v51 = vadd.f32 %v5143_v29, %v5142_v14  ;;  %v6753_v25 = vrot.slane %v11577_v50, %v10345_v42  ;;  %v5155_v35 = vrot.slane %v5154_v33, 2  ;;  %v5137_v19 = vadd.f32 %v5136_v27, %v5135_v38 }
 0x2fd   : > { %v6081_v40 = vadd.f32 %v6080_v36, %v6079_v26  ;;  %v6195_v28 = vmul.f32 0.5, %v6074_v44  ;;  %v6088_v56 = vadd.f32 %v6087_v6, %v6086_v47  ;;  %v6094_v1 = vrot.slane %v6093_v5, 1 }
 0x2fe   : > { %v5151_v52 = vadd.f32 %v5150_v16, %v5149_v0  ;;  %v4323_v9 = vrot.slane %v11515_v30, %v10345_v42  ;;  %v5156_v55 = vadd.f32 %v5155_v35, %v5154_v33  ;;  %v7034_v4 = vmul.f32 %v6954_v60, %v6587_v10  ;;  %v421_v33 = vld [vmem:[#allocation2 + $0x60] sm:$0x3] }
 0x2ff   : > { %v6196_v57 = vmul.f32 0.5, %v6081_v40  ;;  %v6095_v54 = vadd.f32 %v6094_v1, %v6093_v5  ;;  %v6197_v41 = vmul.f32 0.5, %v6088_v56  ;;  %v6244_v22 = vadd.f32 1e-05, %v6195_v28 }
 0x300   : > { %v5236_v37 = vmul.f32 0.5, %v5144_v51  ;;  %v4059_v14 = vrot.slane %v4051_v7, %v10332_v20  ;;  %v5157_v32 = vrot.slane %v5156_v55, 1  ;;  %v4052_v38 = vcombine.low %v11608_v31, %v11619_v49 }
 0x301   : > { %v6245_v23 = vadd.f32 1e-05, %v6196_v57  ;;  %v6198_v21 = vmul.f32 0.5, %v6095_v54  ;;  %v6246_v17 = vadd.f32 1e-05, %v6197_v41  ;;  %v5235_v0 = vmul.f32 0.5, %v5137_v19 }
 0x302   : > { %v5237_v61 = vmul.f32 0.5, %v5151_v52  ;;  %v4327_v46 = vrot.slane %v11515_v30, %v10368_v3  ;;  %v5158_v48 = vadd.f32 %v5157_v32, %v5156_v55  ;;  %v4066_v11 = vrot.slane %v4052_v38, %v10332_v20 }
 0x303   : > { %9548 = vrsqrt.f32 %v6245_v23  ;;  %v6247_v13 = vadd.f32 1e-05, %v6198_v21  ;;  %v4335_v24 = vrot.slane %v11515_v30, %v10378_v12  ;;  %v5463_v49 = vcombine.low %v5235_v0, %v5236_v37 }
 0x304   : > { %9550 = vrsqrt.f32 %v6244_v22  ;;  %v4527_v7 = vcombine.low %v4323_v9, %v4327_v46  ;;  %v5238_v31 = vmul.f32 0.5, %v5158_v48  ;;  %v4067_v39 = vcombine.low %v4059_v14, %v4066_v11 }
 0x305   : > { %9552 = vrsqrt.f32 %v6246_v17  ;;  %v6757_v26 = vrot.slane %v11577_v50, %v10368_v3  ;;  %v6761_v29 = vrot.slane %v11577_v50, %v10373_v8  ;;  %v4528_v60 = vcombine.low %v4331_v34, %v4335_v24 }
 0x306   : > { %9554 = vrsqrt.f32 %v6247_v13  ;;  %v4535_v47 = vrot.slane %v4527_v7, %v10332_v20  ;;  %v7481_v15 = vadd.f32 %v7401_v18, %v7034_v4  ;;  %v6765_v44 = vrot.slane %v11577_v50, %v10378_v12 }
 0x307   : > { %v5464_v36 = vcombine.low %v5237_v61, %v5238_v31  ;;  %v7200_v27 = vrot.slane %v11596_v2, %v10345_v42  ;;  %v7204_v16 = vrot.slane %v11596_v2, %v10368_v3  ;;  %v7208_v6 = vrot.slane %v11596_v2, %v10373_v8 }
 0x308   : > { %v4542_v5 = vrot.slane %v4528_v60, %v10332_v20  ;;  %v7212_v18 = vrot.slane %v11596_v2, %v10378_v12  ;;  %v5471_v50 = vrot.slane %v5463_v49, %v10332_v20  ;;  %v6955_v56 = vcombine.low %v6753_v25, %v6757_v26 }
 0x309   : > { %v3809_v30 = vpop.f32.mrb[48].mxu0  ;;  %v5478_v40 = vrot.slane %v5464_v36, %v10332_v20  ;;  %v7494_v57 = vmax.f32 %v7481_v15, 0.0  ;;  %v6956_v19 = vcombine.low %v6761_v29, %v6765_v44  ;;  %v7402_v55 = vcombine.low %v7200_v27, %v7204_v16 }
 0x30a   : > { %v8806_v10 = vpop.f32.mrb[49].mxu0  ;;  %v4074_v28 = vrot.slane %v3809_v30, %v10332_v20  ;;  %v4543_v1 = vcombine.low %v4535_v47, %v4542_v5  ;;  %v7403_v2 = vcombine.low %v7208_v6, %v7212_v18  ;;  %v6963_v32 = vrot.slane %v6955_v56, %v10332_v20 }
 0x30b   : > { %v3812_v51 = vpop.f32.mrb[50].mxu0  ;;  %v5479_v52 = vcombine.low %v5471_v50, %v5478_v40  ;;  %v7648_v17 = vcombine.high %v7494_v57, %v7494_v57  ;;  %v6970_v38 = vrot.slane %v6956_v19, %v10332_v20  ;;  %v7410_v48 = vrot.slane %v7402_v55, %v10332_v20 }
 0x30c   : > { %v8807_v35 = vpop.f32.mrb[51].mxu0  ;;  %v4100_v9 = vadd.f32 %v4074_v28, %v421_v33  ;;  %v11688_v41 = vadd.f32 %v4543_v1, %v4067_v39  ;;  %v7417_v11 = vrot.slane %v7403_v2, %v10332_v20  ;;  %v7655_v33 = vrot.slane %v7494_v57, %v10332_v20 }
 0x30d   : > { %v9549_v54 = vpop.eup %9548  ;;  %v11691_v4 = vsub.f32 %v11598_v43, %v5479_v52  ;;  %v6971_v26 = vcombine.low %v6963_v32, %v6970_v38  ;;  %v7662_v15 = vrot.slane %v7648_v17, %v10332_v20 }
 0x30e   : > { %v9551_v22 = vpop.eup %9550  ;;  %4113 = vst [vmem:[#allocation2 + $0x60] sm:$0x3] %v4100_v9  ;;  %v4777_v25 = vcombine.high %v11688_v41, %v11688_v41  ;;  %v4784_v14 = vrot.slane %v11688_v41, %v10332_v20  ;;  %v7418_v18 = vcombine.low %v7410_v48, %v7417_v11 }
 0x30f   : > { %v9553_v23 = vpop.eup %9552  ;;  %v6508_v37 = vcombine.low %v9551_v22, %v9549_v54  ;;  %v5540_v0 = vmul.f32 %v11691_v4, %v11691_v4  ;;  %v7664_v19 = vcombine.high %v7662_v15, %v7662_v15 }
 0x310   : > { %v9555_v21 = vpop.eup %9554  ;;  %v4791_v61 = vrot.slane %v4777_v25, %v10332_v20  ;;  %v4792_v46 = vcombine.high %v4784_v14, %v4784_v14  ;;  %v5159_v13 = vsel %vm4850_vm0, %v4784_v14, 0.0 }
 0x311   : > { %v6509_v43 = vcombine.low %v9553_v23, %v9555_v21  ;;  %v5726_v34 = vcombine.high %v5540_v0, %v5540_v0  ;;  %v5733_v24 = vrot.slane %v5540_v0, %v10332_v20  ;;  %v6516_v7 = vrot.slane %v6508_v37, %v10332_v20 }
 0x312   : > { %v5166_v49 = vsel %vm4850_vm0, %v4792_v46, 0.0  ;;  %v5173_v39 = vsel %vm4850_vm0, %v4791_v61, 0.0  ;;  %v5160_v47 = vrot.slane %v5159_v13, 4  ;;  %v4793_v2 = vcombine.high %v4791_v61, %v4791_v61 }
 0x313   : > { %v6523_v31 = vrot.slane %v6509_v43, %v10332_v20  ;;  %v5740_v29 = vrot.slane %v5726_v34, %v10332_v20  ;;  %v5741_v60 = vcombine.high %v5733_v24, %v5733_v24  ;;  %v6096_v36 = vsel %vm4850_vm0, %v5733_v24, 0.0  ;;  %v8745_v34 = vld [vmem:[%s10003_s16 + $0x30] ss:$0 sm:$0xff] }
 0x314   : > { %v5167_v30 = vrot.slane %v5166_v49, 4  ;;  %v5174_v5 = vrot.slane %v5173_v39, 4  ;;  %v5161_v51 = vadd.f32 %v5160_v47, %v5159_v13  ;;  %v6097_v35 = vrot.slane %v6096_v36, 4 }
 0x315   : > { %v6524_v44 = vcombine.low %v6516_v7, %v6523_v31  ;;  %v5742_v27 = vcombine.high %v5740_v29, %v5740_v29  ;;  %v6103_v16 = vsel %vm4850_vm0, %v5741_v60, 0.0  ;;  %v6110_v6 = vsel %vm4850_vm0, %v5740_v29, 0.0 }
 0x316   : > { %v6104_v50 = vrot.slane %v6103_v16, 4  ;;  %v6111_v40 = vrot.slane %v6110_v6, 4  ;;  %v5168_v56 = vadd.f32 %v5167_v30, %v5166_v49  ;;  %v5175_v54 = vadd.f32 %v5174_v5, %v5173_v39  ;;  %v4129_v5 = vld [vmem:[#allocation2 + $0x60] sm:$0x3] }
 0x317   : > { %v6588_v10 = vmul.f32 %v6524_v44, %v11617_v53  ;;  %v6117_v28 = vsel %vm4850_vm0, %v5742_v27, 0.0  ;;  %v7663_v23 = vcombine.high %v7655_v33, %v7655_v33  ;;  %v5162_v37 = vrot.slane %v5161_v51, 2 }
 0x318   : > { %v6118_v52 = vrot.slane %v6117_v28, 4  ;;  %v5169_v9 = vrot.slane %v5168_v56, 2  ;;  %v6105_v55 = vadd.f32 %v6104_v50, %v6103_v16  ;;  %v6112_v57 = vadd.f32 %v6111_v40, %v6110_v6 }
 0x319   : > { %v7035_v1 = vmul.f32 %v6971_v26, %v6588_v10  ;;  %v6098_v14 = vadd.f32 %v6097_v35, %v6096_v36  ;;  %v8765_v21 = vpack.c.bf16 %v7664_v19, %v7662_v15  ;;  %v5176_v38 = vrot.slane %v5175_v54, 2 }
 0x31a   : > { %v6119_v53 = vadd.f32 %v6118_v52, %v6117_v28  ;;  %v5170_v32 = vadd.f32 %v5169_v9, %v5168_v56  ;;  %v6106_v46 = vrot.slane %v6105_v55, 2  ;;  %v5180_v13 = vsel %vm4850_vm0, %v4793_v2, 0.0 }
 0x31b   : > { %v7482_v22 = vadd.f32 %v7418_v18, %v7035_v1  ;;  %v8764_v48 = vpack.c.bf16 %v7663_v23, %v7655_v33  ;;  %v6113_v11 = vrot.slane %v6112_v57, 2  ;;  %v5163_v61 = vadd.f32 %v5162_v37, %v5161_v51 }
 0x31c   : > { %v6120_v17 = vrot.slane %v6119_v53, 2  ;;  %v6099_v31 = vrot.slane %v6098_v14, 2  ;;  %v8083_v39 = vrot.slane %v8765_v21, %v10621_v45  ;;  %v5171_v26 = vrot.slane %v5170_v32, 1 }
 0x31d   : > { %v7495_v25 = vmax.f32 %v7482_v22, 0.0  ;;  %v5177_v29 = vadd.f32 %v5176_v38, %v5175_v54  ;;  %v5181_v60 = vrot.slane %v5180_v13, 4  ;;  %v6107_v44 = vadd.f32 %v6106_v46, %v6105_v55 }
 0x31e   : > { %v6121_v49 = vadd.f32 %v6120_v17, %v6119_v53  ;;  %v4550_v36 = vrot.slane %v8745_v34, %v10332_v20  ;;  %v8076_v30 = vrot.slane %v8764_v48, %v10621_v45  ;;  %v6114_v27 = vadd.f32 %v6113_v11, %v6112_v57 }
 0x31f   : > { %v7665_v0 = vcombine.high %v7495_v25, %v7495_v25  ;;  %v7672_v43 = vrot.slane %v7495_v25, %v10332_v20  ;;  %v5164_v16 = vrot.slane %v5163_v61, 1  ;;  %v5182_v6 = vadd.f32 %v5181_v60, %v5180_v13 }
 0x320   : > { %v6100_v10 = vadd.f32 %v6099_v31, %v6098_v14  ;;  %v6122_v18 = vrot.slane %v6121_v49, 1  ;;  %v8098_v50 = vcombine.low %v8076_v30, %v8083_v39  ;;  %v5172_v40 = vadd.f32 %v5171_v26, %v5170_v32 }
 0x321   : > { %v7679_v24 = vrot.slane %v7665_v0, %v10332_v20  ;;  %v7680_v7 = vcombine.high %v7672_v43, %v7672_v43  ;;  %v5178_v28 = vrot.slane %v5177_v29, 1  ;;  %v5183_v51 = vrot.slane %v5182_v6, 2 }
 0x322   : > { %v6108_v35 = vrot.slane %v6107_v44, 1  ;;  %v4576_v19 = vadd.f32 %v4550_v36, %v4129_v5  ;;  %v6115_v52 = vrot.slane %v6114_v27, 1  ;;  %v5165_v9 = vadd.f32 %v5164_v16, %v5163_v61 }
 0x323   : > { %v7681_v47 = vcombine.high %v7679_v24, %v7679_v24  ;;  %v8766_v15 = vpack.c.bf16 %v7680_v7, %v7672_v43  ;;  %v5184_v54 = vadd.f32 %v5183_v51, %v5182_v6  ;;  %v6101_v55 = vrot.slane %v6100_v10, 1 }
 0x324   : > { %v6123_v2 = vadd.f32 %v6122_v18, %v6121_v49  ;;  %v4800_v23 = vrot.slane %v4576_v19, %v10332_v20  ;;  %v5179_v57 = vadd.f32 %v5178_v28, %v5177_v29  ;;  %v5240_v37 = vmul.f32 0.5, %v5172_v40  ;;  %v11740_v18 = vld [vmem:[%s10009_s24 + $0x28] sm:$0xff] }
 0x325   : > { %v8767_v33 = vpack.c.bf16 %v7681_v47, %v7679_v24  ;;  %v8090_v56 = vrot.slane %v8766_v15, %v10621_v45  ;;  %v5185_v53 = vrot.slane %v5184_v54, 1  ;;  %v8106_v25 = vrot.slane %v8098_v50, %v10621_v45 }
 0x326   : > { %v6109_v21 = vadd.f32 %v6108_v35, %v6107_v44  ;;  %v5187_v17 = vsel %vm4850_vm0, %v4800_v23, 0.0  ;;  %v6116_v32 = vadd.f32 %v6115_v52, %v6114_v27  ;;  %v5239_v0 = vmul.f32 0.5, %v5165_v9 }
 0x327   : > { %v8097_v1 = vrot.slane %v8767_v33, %v10621_v45  ;;  %v5186_v38 = vadd.f32 %v5185_v53, %v5184_v54  ;;  %v5188_v43 = vrot.slane %v5187_v17, 4  ;;  %v6102_v13 = vadd.f32 %v6101_v55, %v6100_v10 }
 0x328   : > { %v6202_v48 = vmul.f32 0.5, %v6123_v2  ;;  %v5241_v11 = vmul.f32 0.5, %v5179_v57  ;;  %v5480_v34 = vcombine.low %v5239_v0, %v5240_v37  ;;  %v6200_v7 = vmul.f32 0.5, %v6109_v21 }
 0x329   : > { %v8099_v22 = vcombine.low %v8090_v56, %v8097_v1  ;;  %v5242_v61 = vmul.f32 0.5, %v5186_v38  ;;  %v5189_v24 = vadd.f32 %v5188_v43, %v5187_v17  ;;  %v6201_v31 = vmul.f32 0.5, %v6116_v32 }
 0x32a   : > { %v6199_v26 = vmul.f32 0.5, %v6102_v13  ;;  %v6251_v29 = vadd.f32 1e-05, %v6202_v48  ;;  %v5488_v60 = vrot.slane %v5480_v34, %v10332_v20  ;;  %v6249_v44 = vadd.f32 1e-05, %v6200_v7 }
 0x32b   : > { %v8113_v14 = vrot.slane %v8099_v22, %v10621_v45  ;;  %v5481_v49 = vcombine.low %v5241_v11, %v5242_v61  ;;  %v5190_v39 = vrot.slane %v5189_v24, 2  ;;  %v6250_v36 = vadd.f32 1e-05, %v6201_v31 }
 0x32c   : > { %v6248_v16 = vadd.f32 1e-05, %v6199_v26  ;;  %9556 = vrsqrt.f32 %v6251_v29  ;;  %v6769_v35 = vrot.slane %v11740_v18, %v10300_v58  ;;  %v6773_v52 = vrot.slane %v11740_v18, %v10303_v59 }
 0x32d   : > { %v8114_v46 = vcombine.low %v8106_v25, %v8113_v14  ;;  %v5495_v47 = vrot.slane %v5481_v49, %v10332_v20  ;;  %v5191_v15 = vadd.f32 %v5190_v39, %v5189_v24  ;;  %9558 = vrsqrt.f32 %v6249_v44  ;;  %v11761_v14 = vld [vmem:[%s10011_s26 + $0x28] sm:$0xff] }
 0x32e   : > { %9560 = vrsqrt.f32 %v6250_v36  ;;  %v6777_v37 = vrot.slane %v11740_v18, %v10310_v62  ;;  %v6781_v25 = vrot.slane %v11740_v18, %v10313_v63  ;;  %v6972_v13 = vcombine.low %v6769_v35, %v6773_v52 }
 0x32f   : > { %8189 = vst [vmem:[%s10894_s12 + $0x20] sm:$0xff] %v8114_v46  ;;  %v5496_v30 = vcombine.low %v5488_v60, %v5495_v47  ;;  %v5192_v27 = vrot.slane %v5191_v15, 1  ;;  %9562 = vrsqrt.f32 %v6248_v16  ;;  %v7216_v34 = vrot.slane %v11761_v14, %v10300_v58 }
 0x330   : > { %v6973_v49 = vcombine.low %v6777_v37, %v6781_v25  ;;  %v7220_v47 = vrot.slane %v11761_v14, %v10303_v59  ;;  %v7224_v36 = vrot.slane %v11761_v14, %v10310_v62 }
 0x331   : > { %v11735_v6 = vsub.f32 %v11688_v41, %v5496_v30  ;;  %v5193_v5 = vadd.f32 %v5192_v27, %v5191_v15 }
 0x332   : > { %v6987_v62 = vrot.slane %v6973_v49, %v10332_v20  ;;  %v7240_v49 = vrot.slane %v11761_v14, %v10373_v8 }
 0x333   : > { %v5541_v33 = vmul.f32 %v11735_v6, %v11735_v6  ;;  %v5243_v10 = vmul.f32 0.5, %v5193_v5  ;;  %v7228_v5 = vrot.slane %v11761_v14, %v10313_v63 }
 0x335   : > { %v5743_v50 = vcombine.high %v5541_v33, %v5541_v33  ;;  %v5750_v40 = vrot.slane %v5541_v33, %v10332_v20  ;;  %v5503_v28 = vrot.slane %v5243_v10, %v10332_v20 }
 0x337   : > { %v5757_v51 = vrot.slane %v5743_v50, %v10332_v20  ;;  %v5758_v56 = vcombine.high %v5750_v40, %v5750_v40  ;;  %v6124_v41 = vsel %vm4850_vm0, %v5750_v40, 0.0  ;;  %v11746_v1 = vsub.f32 %v4576_v19, %v5503_v28  ;;  %v9557_v19 = vpop.eup %9556 }
 0x338   : > { %v6125_v9 = vrot.slane %v6124_v41, 4  ;;  %v9559_v32 = vpop.eup %9558 }
 0x339   : > { %v5759_v54 = vcombine.high %v5757_v51, %v5757_v51  ;;  %v6131_v22 = vsel %vm4850_vm0, %v5758_v56, 0.0  ;;  %v6138_v55 = vsel %vm4850_vm0, %v5757_v51, 0.0  ;;  %v5542_v2 = vmul.f32 %v11746_v1, %v11746_v1  ;;  %v9561_v46 = vpop.eup %9560 }
 0x33a   : > { %v6126_v23 = vadd.f32 %v6125_v9, %v6124_v41  ;;  %v6132_v57 = vrot.slane %v6131_v22, 4  ;;  %v6139_v53 = vrot.slane %v6138_v55, 4  ;;  %v6526_v61 = vcombine.low %v9561_v46, %v9557_v19  ;;  %v9563_v31 = vpop.eup %9562 }
 0x33b   : > { %v6145_v21 = vsel %vm4850_vm0, %v5759_v54, 0.0  ;;  %v5766_v17 = vrot.slane %v5542_v2, %v10332_v20  ;;  %v6525_v60 = vcombine.low %v9563_v31, %v9559_v32  ;;  %v6980_v51 = vrot.slane %v6972_v13, %v10332_v20 }
 0x33c   : > { %v6127_v38 = vrot.slane %v6126_v23, 2  ;;  %v6133_v0 = vadd.f32 %v6132_v57, %v6131_v22  ;;  %v6140_v43 = vadd.f32 %v6139_v53, %v6138_v55  ;;  %v6146_v48 = vrot.slane %v6145_v21, 4 }
 0x33d   : > { %v6152_v11 = vsel %vm4850_vm0, %v5766_v17, 0.0  ;;  %v6540_v58 = vrot.slane %v6526_v61, %v10332_v20  ;;  %v6533_v59 = vrot.slane %v6525_v60, %v10332_v20  ;;  %v7419_v22 = vcombine.low %v7216_v34, %v7220_v47 }
 0x33e   : > { %v6128_v24 = vadd.f32 %v6127_v38, %v6126_v23  ;;  %v6134_v7 = vrot.slane %v6133_v0, 2  ;;  %v6141_v39 = vrot.slane %v6140_v43, 2  ;;  %v6147_v26 = vadd.f32 %v6146_v48, %v6145_v21 }
 0x33f   : > { %v6153_v29 = vrot.slane %v6152_v11, 4  ;;  %v6541_v54 = vcombine.low %v6533_v59, %v6540_v58  ;;  %v7420_v55 = vcombine.low %v7224_v36, %v7228_v5  ;;  %v6988_v37 = vcombine.low %v6980_v51, %v6987_v62 }
 0x340   : > { %v6129_v15 = vrot.slane %v6128_v24, 1  ;;  %v6135_v44 = vadd.f32 %v6134_v7, %v6133_v0  ;;  %v6142_v30 = vadd.f32 %v6141_v39, %v6140_v43  ;;  %v6148_v27 = vrot.slane %v6147_v26, 2 }
 0x341   : > { %v6154_v16 = vadd.f32 %v6153_v29, %v6152_v11  ;;  %v6589_v32 = vmul.f32 %v6541_v54, %v11691_v4  ;;  %v7427_v38 = vrot.slane %v7419_v22, %v10332_v20  ;;  %v7434_v0 = vrot.slane %v7420_v55, %v10332_v20 }
 0x342   : > { %v6130_v33 = vadd.f32 %v6129_v15, %v6128_v24  ;;  %v6136_v10 = vrot.slane %v6135_v44, 1  ;;  %v6143_v50 = vrot.slane %v6142_v30, 1  ;;  %v6149_v40 = vadd.f32 %v6148_v27, %v6147_v26  ;;  %v8746_v27 = vld [vmem:[%s10009_s24 + $0x30] ss:$0 sm:$0xff] }
 0x343   : > { %v6155_v28 = vrot.slane %v6154_v16, 2  ;;  %v7036_v48 = vmul.f32 %v6988_v37, %v6589_v32  ;;  %v7435_v11 = vcombine.low %v7427_v38, %v7434_v0  ;;  %v6785_v61 = vrot.slane %v11740_v18, %v10345_v42 }
 0x344   : > { %v6137_v56 = vadd.f32 %v6136_v10, %v6135_v44  ;;  %v6203_v41 = vmul.f32 0.5, %v6130_v33  ;;  %v6144_v35 = vadd.f32 %v6143_v50, %v6142_v30  ;;  %v6150_v52 = vrot.slane %v6149_v40, 1  ;;  %v8747_v10 = vld [vmem:[%s10011_s26 + $0x30] ss:$0 sm:$0xff] }
 0x345   : > { %v6156_v9 = vadd.f32 %v6155_v28, %v6154_v16  ;;  %v6789_v4 = vrot.slane %v11740_v18, %v10368_v3  ;;  %v6793_v34 = vrot.slane %v11740_v18, %v10373_v8  ;;  %v6797_v24 = vrot.slane %v11740_v18, %v10378_v12 }
 0x346   : > { %v6204_v63 = vmul.f32 0.5, %v6137_v56  ;;  %v6151_v2 = vadd.f32 %v6150_v52, %v6149_v40  ;;  %v6205_v23 = vmul.f32 0.5, %v6144_v35  ;;  %v6252_v57 = vadd.f32 1e-05, %v6203_v41 }
 0x347   : > { %v6157_v53 = vrot.slane %v6156_v9, 1  ;;  %v7232_v7 = vrot.slane %v11761_v14, %v10345_v42  ;;  %v7236_v31 = vrot.slane %v11761_v14, %v10368_v3  ;;  %v7244_v39 = vrot.slane %v11761_v14, %v10378_v12 }
 0x348   : > { %v6253_v19 = vadd.f32 1e-05, %v6204_v63  ;;  %v6206_v25 = vmul.f32 0.5, %v6151_v2  ;;  %v6254_v21 = vadd.f32 1e-05, %v6205_v23  ;;  %v7483_v26 = vadd.f32 %v7435_v11, %v7036_v48 }
 0x349   : > { %v6158_v17 = vadd.f32 %v6157_v53, %v6156_v9  ;;  %v6989_v60 = vcombine.low %v6785_v61, %v6789_v4  ;;  %v6990_v47 = vcombine.low %v6793_v34, %v6797_v24  ;;  %v7436_v44 = vcombine.low %v7232_v7, %v7236_v31 }
 0x34a   : > { %9564 = vrsqrt.f32 %v6253_v19  ;;  %v6255_v43 = vadd.f32 1e-05, %v6206_v25  ;;  %v7437_v18 = vcombine.low %v7240_v49, %v7244_v39  ;;  %v7496_v30 = vmax.f32 %v7483_v26, 0.0 }
 0x34b   : > { %9566 = vrsqrt.f32 %v6252_v57  ;;  %v6207_v46 = vmul.f32 0.5, %v6158_v17  ;;  %v6997_v58 = vrot.slane %v6989_v60, %v10332_v20  ;;  %v7004_v8 = vrot.slane %v6990_v47, %v10332_v20 }
 0x34c   : > { %9568 = vrsqrt.f32 %v6254_v21  ;;  %v7444_v12 = vrot.slane %v7436_v44, %v10332_v20  ;;  %v7451_v14 = vrot.slane %v7437_v18, %v10332_v20  ;;  %v7012_v33 = vrot.slane %v8746_v27, %v10332_v20 }
 0x34d   : > { %9570 = vrsqrt.f32 %v6255_v43  ;;  %v6256_v13 = vadd.f32 1e-05, %v6207_v46  ;;  %v7682_v50 = vcombine.high %v7496_v30, %v7496_v30  ;;  %v7005_v56 = vcombine.low %v6997_v58, %v7004_v8 }
 0x34e   : > { %v7459_v62 = vrot.slane %v8747_v10, %v10332_v20  ;;  %v7452_v9 = vcombine.low %v7444_v12, %v7451_v14  ;;  %v7689_v22 = vrot.slane %v7496_v30, %v10332_v20 }
 0x34f   : > { %9572 = vrsqrt.f32 %v6256_v13  ;;  %v7696_v35 = vrot.slane %v7682_v50, %v10332_v20 }
 0x350   : > { %v7697_v53 = vcombine.high %v7689_v22, %v7689_v22 }
 0x351   : > { %v7698_v2 = vcombine.high %v7696_v35, %v7696_v35 }
 0x353   : > { %v8769_v37 = vpack.c.bf16 %v7698_v2, %v7696_v35 }
 0x354   : > { %v9565_v29 = vpop.eup %9564 }
 0x355   : > { %v9567_v15 = vpop.eup %9566  ;;  %v8132_v43 = vrot.slane %v8769_v37, %v10621_v45 }
 0x356   : > { %v9569_v36 = vpop.eup %9568  ;;  %v6542_v42 = vcombine.low %v9567_v15, %v9565_v29 }
 0x357   : > { %v9571_v16 = vpop.eup %9570 }
 0x358   : > { %v6543_v3 = vcombine.low %v9569_v36, %v9571_v16  ;;  %v6550_v40 = vrot.slane %v6542_v42, %v10332_v20 }
 0x359   : > { %v9573_v5 = vpop.eup %9572 }
 0x35a   : > { %v6557_v28 = vrot.slane %v6543_v3, %v10332_v20  ;;  %v6565_v59 = vrot.slane %v9573_v5, %v10332_v20 }
 0x35c   : > { %v6558_v51 = vcombine.low %v6550_v40, %v6557_v28  ;;  %v6591_v41 = vmul.f32 %v6565_v59, %v11746_v1 }
 0x35e   : > { %v6590_v52 = vmul.f32 %v6558_v51, %v11735_v6  ;;  %v7038_v54 = vmul.f32 %v7012_v33, %v6591_v41  ;;  %v8768_v6 = vpack.c.bf16 %v7697_v53, %v7689_v22 }
 0x360   : > { %v7037_v55 = vmul.f32 %v7005_v56, %v6590_v52  ;;  %v7485_v63 = vadd.f32 %v7459_v62, %v7038_v54  ;;  %v8125_v48 = vrot.slane %v8768_v6, %v10621_v45 }
 0x362   : > { %v7484_v23 = vadd.f32 %v7452_v9, %v7037_v55  ;;  %v7498_v57 = vmax.f32 %v7485_v63, 0.0  ;;  %v8147_v61 = vcombine.low %v8125_v48, %v8132_v43 }
 0x364   : > { %v7497_v19 = vmax.f32 %v7484_v23, 0.0  ;;  %v7722_v1 = vrot.slane %v7498_v57, %v10332_v20 }
 0x366   : > { %v7699_v25 = vcombine.high %v7497_v19, %v7497_v19  ;;  %v7706_v21 = vrot.slane %v7497_v19, %v10332_v20  ;;  %v7820_v17 = vpack.c.bf16 %v7722_v1, %v7722_v1 }
 0x368   : > { %v7713_v32 = vrot.slane %v7699_v25, %v10332_v20  ;;  %v7714_v38 = vcombine.high %v7706_v21, %v7706_v21  ;;  %v8170_v0 = vrot.slane %v7820_v17, %v10621_v45  ;;  %v8155_v20 = vrot.slane %v8147_v61, %v10621_v45 }
 0x36a   : > { %v7715_v46 = vcombine.high %v7713_v32, %v7713_v32  ;;  %v8770_v13 = vpack.c.bf16 %v7714_v38, %v7706_v21  ;;  %8772 = vst.sshfl [vmem:[%s10894_s12 + $0x30] sm:$0x1 pattern:$0x73625140] %v8170_v0 }
 0x36c   : > { %v8771_v11 = vpack.c.bf16 %v7715_v46, %v7713_v32  ;;  %v8139_v4 = vrot.slane %v8770_v13, %v10621_v45 }
 0x36e   : > { %v8146_v34 = vrot.slane %v8771_v11, %v10621_v45 }
 0x370   : > { %v8148_v24 = vcombine.low %v8139_v4, %v8146_v34 }
 0x372   : > { %v8162_v7 = vrot.slane %v8148_v24, %v10621_v45 }
 0x374   : > { %v8163_v31 = vcombine.low %v8155_v20, %v8162_v7 }
 0x376   : > { %8190 = vst [vmem:[%s10894_s12 + $0x28] sm:$0xff] %v8163_v31 }
 0x377 PF: > { %s24_s23 = sadd.s32 1, %s9755_s23   ;;  %s11891_s21 = sld [smem:[#allocation13_spill]] }
 0x378   : > { %p21_p7 = scmp.ge.s32.totalorder %s24_s23, 4   ;;  %s11892_s22 = sld [smem:[#allocation14_spill]] }
 0x379   : > { %s11893_s18 = smov %s9739_s19  ;;  %s11894_s19 = smov %s9743_s20 }
 0x37a   : > { %s11895_s20 = smov %s9846_s29  ;;  %23 = sbr.rel (!%p21_p7) target bundleno = 11 (0xb), region = 128 }
 0x381   :  { %8212 = vsyncpa [#allocation4], 1 }
 0x382   :  { %8214 = vsyncpa [#allocation4 + $0x1], 1 }
 0x383   :  { %8215 = vsyncpa [#allocation6], 1 }
 0x384   :  { %8217 = vsyncpa [#allocation6 + $0x1], 1 }
 0x385   :  { %8218 = vsyncpa [#allocation9], 1 }
 0x386   :  { %8220 = vsyncpa [#allocation9 + $0x1], 1 }

// kernel: generator_forward.4
= control target key start
LH: loop header
LB: loop body
LE: loop exit
PB: predicated region body
PF: predicated region fallthrough
CT: control target
= control target key end

     0   :  { %s6064_s18 = smov 0   ;;  %s6066_s19 = smov 0   ;;  %s7447_s0 = inlined_call_operand.vmem [shape: bf16[98,2304], index: 0, kind: input, shape index: {}]   ;;  %s7448_s1 = inlined_call_operand.vmem [shape: bf16[2304,512], index: 1, kind: input, shape index: {}]   ;;  %s7449_s2 = inlined_call_operand.vmem [shape: f32[1,512], index: 2, kind: input, shape index: {}]   ;;  %s7450_s3 = inlined_call_operand.vmem [shape: f32[1,512], index: 3, kind: input, shape index: {}]   ;;  %s7451_s4 = inlined_call_operand.vmem [shape: f32[1,512], index: 4, kind: input, shape index: {}]   ;;  %s7452_s5 = inlined_call_operand.vmem [shape: bf16[98,512], index: 5, kind: output, shape index: {}]  }
   0x1   :  { %s6068_s20 = smov 0   ;;  %s6070_s21 = smov 0  }
   0x2   :  { %s6072_s22 = smov 0  }
   0x3 LB: > { %s24_s23 = sadd.s32 1, %s6026_s21  ;;  %p41_p1 = scmp.ne.s32.totalorder %s6018_s19, %s6014_s18  ;;  %s6030_s22 = sphi %s6072_s22, %s15_s22   ;;  %s6026_s21 = sphi %s6070_s21, %s7595_s21   ;;  %s6022_s20 = sphi %s6068_s20, %s7594_s20   ;;  %s6018_s19 = sphi %s6066_s19, %s7593_s19   ;;  %s6014_s18 = sphi %s6064_s18, %s7592_s18  }
   0x4   : > { %p25_p0 = scmp.ge.s32.totalorder %s24_s23, 2  ;;  %p42_p2 = scmp.eq.s32.totalorder %s6030_s22, 0 }
   0x5   : > { %s34_s25 = sadd.s32 1, %s6018_s19  ;;  %p4793_p5 = scmp.ge.s32.totalorder %s6030_s22, 2 }
   0x6   : > { %s7597_s23 = smov (%p25_p0, %s24_s23), 0  ;;  %p43_p3 = por %p42_p2, %p41_p1 }
   0x7   : > { %s31_s24 = ssub.s32 %s6026_s21, %s7597_s23  ;;  %223 = sbr.rel (%p4793_p5) target bundleno = 53 (0x35), region = 28 }
   0x8   : > { %p32_p4 = scmp.eq.s32.totalorder %s31_s24, 0 }
   0xa   : > { %s6099_s26 = scalar_select %p32_p4, %s6018_s19, %s34_s25  }
   0xe   : > { %226 = sbr.rel (!%p43_p3) target bundleno = 53 (0x35), region = 32  ;;  %s228_s27 = sand.u32 (%p43_p3), 1, %s6018_s19  }
   0xf   : > { %s5207_s28 = smul.u32 (%p43_p3), 36, %s6026_s21 }
  0x10   : > { %s5427_s29 = smul.u32 (%p43_p3), 468, %s228_s27 }
  0x11   : > { %s6107_s7 = scalar_lea.vmem (%p43_p3), %s7447_s0, %s5207_s28 }
  0x12   : > { %v248_v0 = vld [vmem:[%s6107_s7] sm:$0xff] (%p43_p3)  ;;  %v250_v1 = vld [vmem:[%s6107_s7 + $0x8] sm:$0xff] (%p43_p3)  ;;  %v252_v2 = vld [vmem:[%s6107_s7 + $0x10] sm:$0xff] (%p43_p3)  ;;  %s6112_s8 = scalar_lea.vmem (%p43_p3), [#allocation3], %s5427_s29 }
  0x13   : > { %249 = vst [vmem:[%s6112_s8] sm:$0xff] (%p43_p3), %v248_v0  ;;  %251 = vst [vmem:[%s6112_s8 + $0x8] sm:$0xff] (%p43_p3), %v250_v1  ;;  %v254_v3 = vld [vmem:[%s6107_s7 + $0x18] sm:$0xff] (%p43_p3)  ;;  %v256_v4 = vld [vmem:[%s6107_s7 + $0x48] sm:$0xff] (%p43_p3) }
  0x14   : > { %253 = vst [vmem:[%s6112_s8 + $0x10] sm:$0xff] (%p43_p3), %v252_v2  ;;  %v258_v5 = vld [vmem:[%s6107_s7 + $0x50] sm:$0xff] (%p43_p3)  ;;  %255 = vst [vmem:[%s6112_s8 + $0x18] sm:$0xff] (%p43_p3), %v254_v3  ;;  %v260_v6 = vld [vmem:[%s6107_s7 + $0x58] sm:$0xff] (%p43_p3) }
  0x15   : > { %257 = vst [vmem:[%s6112_s8 + $0x24] sm:$0xff] %v256_v4  ;;  %259 = vst [vmem:[%s6112_s8 + $0x2c] sm:$0xff] %v258_v5  ;;  %v262_v7 = vld [vmem:[%s6107_s7 + $0x60] sm:$0xff]  ;;  %v264_v8 = vld [vmem:[%s6107_s7 + $0x90] sm:$0xff] }
  0x16   : > { %261 = vst [vmem:[%s6112_s8 + $0x34] sm:$0xff] %v260_v6  ;;  %263 = vst [vmem:[%s6112_s8 + $0x3c] sm:$0xff] %v262_v7  ;;  %v266_v9 = vld [vmem:[%s6107_s7 + $0x98] sm:$0xff]  ;;  %v268_v10 = vld [vmem:[%s6107_s7 + $0xa0] sm:$0xff] }
  0x17   : > { %265 = vst [vmem:[%s6112_s8 + $0x48] sm:$0xff] %v264_v8  ;;  %v270_v11 = vld [vmem:[%s6107_s7 + $0xa8] sm:$0xff]  ;;  %267 = vst [vmem:[%s6112_s8 + $0x50] sm:$0xff] %v266_v9  ;;  %v272_v12 = vld [vmem:[%s6107_s7 + $0xd8] sm:$0xff] }
  0x18   : > { %269 = vst [vmem:[%s6112_s8 + $0x58] sm:$0xff] %v268_v10  ;;  %271 = vst [vmem:[%s6112_s8 + $0x60] sm:$0xff] %v270_v11  ;;  %v274_v13 = vld [vmem:[%s6107_s7 + $0xe0] sm:$0xff]  ;;  %v276_v14 = vld [vmem:[%s6107_s7 + $0xe8] sm:$0xff] }
  0x19   : > { %273 = vst [vmem:[%s6112_s8 + $0x6c] sm:$0xff] %v272_v12  ;;  %275 = vst [vmem:[%s6112_s8 + $0x74] sm:$0xff] %v274_v13  ;;  %v278_v15 = vld [vmem:[%s6107_s7 + $0xf0] sm:$0xff]  ;;  %v280_v16 = vld [vmem:[%s6107_s7 + $0x120] sm:$0xff] }
  0x1a   : > { %277 = vst [vmem:[%s6112_s8 + $0x7c] sm:$0xff] %v276_v14  ;;  %v282_v17 = vld [vmem:[%s6107_s7 + $0x128] sm:$0xff]  ;;  %279 = vst [vmem:[%s6112_s8 + $0x84] sm:$0xff] %v278_v15  ;;  %v284_v18 = vld [vmem:[%s6107_s7 + $0x130] sm:$0xff] }
  0x1b   : > { %281 = vst [vmem:[%s6112_s8 + $0x90] sm:$0xff] %v280_v16  ;;  %283 = vst [vmem:[%s6112_s8 + $0x98] sm:$0xff] %v282_v17  ;;  %v286_v19 = vld [vmem:[%s6107_s7 + $0x138] sm:$0xff]  ;;  %v288_v20 = vld [vmem:[%s6107_s7 + $0x168] sm:$0xff] }
  0x1c   : > { %285 = vst [vmem:[%s6112_s8 + $0xa0] sm:$0xff] %v284_v18  ;;  %287 = vst [vmem:[%s6112_s8 + $0xa8] sm:$0xff] %v286_v19  ;;  %v290_v21 = vld [vmem:[%s6107_s7 + $0x170] sm:$0xff]  ;;  %v292_v22 = vld [vmem:[%s6107_s7 + $0x178] sm:$0xff] }
  0x1d   : > { %289 = vst [vmem:[%s6112_s8 + $0xb4] sm:$0xff] %v288_v20  ;;  %v294_v23 = vld [vmem:[%s6107_s7 + $0x180] sm:$0xff]  ;;  %291 = vst [vmem:[%s6112_s8 + $0xbc] sm:$0xff] %v290_v21  ;;  %v296_v24 = vld [vmem:[%s6107_s7 + $0x1b0] sm:$0xff] }
  0x1e   : > { %293 = vst [vmem:[%s6112_s8 + $0xc4] sm:$0xff] %v292_v22  ;;  %295 = vst [vmem:[%s6112_s8 + $0xcc] sm:$0xff] %v294_v23  ;;  %v298_v25 = vld [vmem:[%s6107_s7 + $0x1b8] sm:$0xff]  ;;  %v300_v26 = vld [vmem:[%s6107_s7 + $0x1c0] sm:$0xff] }
  0x1f   : > { %297 = vst [vmem:[%s6112_s8 + $0xd8] sm:$0xff] %v296_v24  ;;  %299 = vst [vmem:[%s6112_s8 + $0xe0] sm:$0xff] %v298_v25  ;;  %v302_v27 = vld [vmem:[%s6107_s7 + $0x1c8] sm:$0xff]  ;;  %v304_v28 = vld [vmem:[%s6107_s7 + $0x1f8] sm:$0xff] }
  0x20   : > { %301 = vst [vmem:[%s6112_s8 + $0xe8] sm:$0xff] %v300_v26  ;;  %v306_v29 = vld [vmem:[%s6107_s7 + $0x200] sm:$0xff]  ;;  %303 = vst [vmem:[%s6112_s8 + $0xf0] sm:$0xff] %v302_v27  ;;  %v308_v30 = vld [vmem:[%s6107_s7 + $0x208] sm:$0xff] }
  0x21   : > { %305 = vst [vmem:[%s6112_s8 + $0xfc] sm:$0xff] %v304_v28  ;;  %307 = vst [vmem:[%s6112_s8 + $0x104] sm:$0xff] %v306_v29  ;;  %v310_v31 = vld [vmem:[%s6107_s7 + $0x210] sm:$0xff]  ;;  %v312_v32 = vld [vmem:[%s6107_s7 + $0x240] sm:$0xff] }
  0x22   : > { %309 = vst [vmem:[%s6112_s8 + $0x10c] sm:$0xff] %v308_v30  ;;  %311 = vst [vmem:[%s6112_s8 + $0x114] sm:$0xff] %v310_v31  ;;  %v314_v33 = vld [vmem:[%s6107_s7 + $0x248] sm:$0xff]  ;;  %v316_v34 = vld [vmem:[%s6107_s7 + $0x250] sm:$0xff] }
  0x23   : > { %313 = vst [vmem:[%s6112_s8 + $0x120] sm:$0xff] %v312_v32  ;;  %v318_v35 = vld [vmem:[%s6107_s7 + $0x258] sm:$0xff]  ;;  %315 = vst [vmem:[%s6112_s8 + $0x128] sm:$0xff] %v314_v33  ;;  %v320_v36 = vld [vmem:[%s6107_s7 + $0x288] sm:$0xff] }
  0x24   : > { %317 = vst [vmem:[%s6112_s8 + $0x130] sm:$0xff] %v316_v34  ;;  %319 = vst [vmem:[%s6112_s8 + $0x138] sm:$0xff] %v318_v35  ;;  %v322_v37 = vld [vmem:[%s6107_s7 + $0x290] sm:$0xff]  ;;  %v324_v38 = vld [vmem:[%s6107_s7 + $0x298] sm:$0xff] }
  0x25   : > { %321 = vst [vmem:[%s6112_s8 + $0x144] sm:$0xff] %v320_v36  ;;  %323 = vst [vmem:[%s6112_s8 + $0x14c] sm:$0xff] %v322_v37  ;;  %v326_v39 = vld [vmem:[%s6107_s7 + $0x2a0] sm:$0xff]  ;;  %v328_v40 = vld [vmem:[%s6107_s7 + $0x2d0] sm:$0xff] }
  0x26   : > { %325 = vst [vmem:[%s6112_s8 + $0x154] sm:$0xff] %v324_v38  ;;  %v330_v41 = vld [vmem:[%s6107_s7 + $0x2d8] sm:$0xff]  ;;  %327 = vst [vmem:[%s6112_s8 + $0x15c] sm:$0xff] %v326_v39  ;;  %v332_v42 = vld [vmem:[%s6107_s7 + $0x2e0] sm:$0xff] }
  0x27   : > { %329 = vst [vmem:[%s6112_s8 + $0x168] sm:$0xff] %v328_v40  ;;  %331 = vst [vmem:[%s6112_s8 + $0x170] sm:$0xff] %v330_v41  ;;  %v334_v43 = vld [vmem:[%s6107_s7 + $0x2e8] sm:$0xff]  ;;  %v336_v44 = vld [vmem:[%s6107_s7 + $0x318] sm:$0xff] }
  0x28   : > { %333 = vst [vmem:[%s6112_s8 + $0x178] sm:$0xff] %v332_v42  ;;  %335 = vst [vmem:[%s6112_s8 + $0x180] sm:$0xff] %v334_v43  ;;  %v338_v45 = vld [vmem:[%s6107_s7 + $0x320] sm:$0xff]  ;;  %v340_v46 = vld [vmem:[%s6107_s7 + $0x328] sm:$0xff] }
  0x29   : > { %337 = vst [vmem:[%s6112_s8 + $0x18c] sm:$0xff] %v336_v44  ;;  %v342_v47 = vld [vmem:[%s6107_s7 + $0x330] sm:$0xff]  ;;  %339 = vst [vmem:[%s6112_s8 + $0x194] sm:$0xff] %v338_v45  ;;  %v344_v48 = vld [vmem:[%s6107_s7 + $0x360] sm:$0xff] }
  0x2a   : > { %341 = vst [vmem:[%s6112_s8 + $0x19c] sm:$0xff] %v340_v46  ;;  %343 = vst [vmem:[%s6112_s8 + $0x1a4] sm:$0xff] %v342_v47  ;;  %v346_v49 = vld [vmem:[%s6107_s7 + $0x368] sm:$0xff]  ;;  %v348_v50 = vld [vmem:[%s6107_s7 + $0x370] sm:$0xff] }
  0x2b   : > { %345 = vst [vmem:[%s6112_s8 + $0x1b0] sm:$0xff] %v344_v48  ;;  %347 = vst [vmem:[%s6112_s8 + $0x1b8] sm:$0xff] %v346_v49  ;;  %v350_v51 = vld [vmem:[%s6107_s7 + $0x378] sm:$0xff]  ;;  %v4795_v52 = vld [vmem:[%s6107_s7 + $0x20] sm:$0xf] }
  0x2c   : > { %349 = vst [vmem:[%s6112_s8 + $0x1c0] sm:$0xff] %v348_v50  ;;  %v4797_v53 = vld [vmem:[%s6107_s7 + $0x68] sm:$0xf]  ;;  %351 = vst [vmem:[%s6112_s8 + $0x1c8] sm:$0xff] %v350_v51  ;;  %v4799_v54 = vld [vmem:[%s6107_s7 + $0xb0] sm:$0xf] }
  0x2d   : > { %4796 = vst [vmem:[%s6112_s8 + $0x20] sm:$0xf] %v4795_v52  ;;  %4798 = vst [vmem:[%s6112_s8 + $0x44] sm:$0xf] %v4797_v53  ;;  %v4801_v55 = vld [vmem:[%s6107_s7 + $0xf8] sm:$0xf] }
  0x2e   : > { %v4803_v56 = vld [vmem:[%s6107_s7 + $0x140] sm:$0xf]  ;;  %4800 = vst [vmem:[%s6112_s8 + $0x68] sm:$0xf] %v4799_v54  ;;  %4802 = vst [vmem:[%s6112_s8 + $0x8c] sm:$0xf] %v4801_v55 }
  0x2f   : > { %4804 = vst [vmem:[%s6112_s8 + $0xb0] sm:$0xf] %v4803_v56  ;;  %v4805_v57 = vld [vmem:[%s6107_s7 + $0x188] sm:$0xf]  ;;  %v4807_v58 = vld [vmem:[%s6107_s7 + $0x1d0] sm:$0xf] }
  0x30   : > { %v4809_v59 = vld [vmem:[%s6107_s7 + $0x218] sm:$0xf]  ;;  %4806 = vst [vmem:[%s6112_s8 + $0xd4] sm:$0xf] %v4805_v57  ;;  %4808 = vst [vmem:[%s6112_s8 + $0xf8] sm:$0xf] %v4807_v58 }
  0x31   : > { %4810 = vst [vmem:[%s6112_s8 + $0x11c] sm:$0xf] %v4809_v59  ;;  %v4811_v60 = vld [vmem:[%s6107_s7 + $0x260] sm:$0xf]  ;;  %v4813_v61 = vld [vmem:[%s6107_s7 + $0x2a8] sm:$0xf] }
  0x32   : > { %v4815_v62 = vld [vmem:[%s6107_s7 + $0x2f0] sm:$0xf]  ;;  %4812 = vst [vmem:[%s6112_s8 + $0x140] sm:$0xf] %v4811_v60  ;;  %4814 = vst [vmem:[%s6112_s8 + $0x164] sm:$0xf] %v4813_v61 }
  0x33   : > { %4816 = vst [vmem:[%s6112_s8 + $0x188] sm:$0xf] %v4815_v62  ;;  %v4817_v63 = vld [vmem:[%s6107_s7 + $0x338] sm:$0xf]  ;;  %v4819_v0 = vld [vmem:[%s6107_s7 + $0x380] sm:$0xf] }
  0x34   : > { %4818 = vst [vmem:[%s6112_s8 + $0x1ac] sm:$0xf] %v4817_v63  ;;  %4820 = vst [vmem:[%s6112_s8 + $0x1d0] sm:$0xf] %v4819_v0 }
  0x35 PF: > { %p4821_p6 = scmp.ge.s32.totalorder %s6030_s22, 1  ;;  %p404_p7 = scmp.lt.s32.totalorder %s6030_s22, 3 }
  0x37   : > { %p405_p8 = pnand %p4821_p6, %p404_p7 }
  0x38   : > { %s411_s9 = sand.u32 (!%p405_p8), 1, %s6014_s18   ;;  %s461_s10 = smul.u32 (!%p405_p8), 144, %s6022_s20 }
  0x39   : > { %408 = sbr.rel (%p405_p8) target bundleno = 877 (0x36d), region = 62  ;;  %p4824_p10 = scmp.ne.s32.totalorder (!%p405_p8), %s6022_s20, 0 }
  0x3a   : > { %s5428_s11 = smul.u32 (!%p405_p8), 468, %s411_s9  ;;  %p463_p9 = scmp.lt.s32.totalorder (!%p405_p8), %s461_s10, 287 }
  0x3c   : > { %s6250_s16 = scalar_lea.vmem (!%p405_p8), [#allocation3], %s5428_s11 }
  0x40   : > { %s7599_s10 = smov (!%p463_p9, %s461_s10), 287  ;;  %498 = sbr.rel (%p4824_p10) target bundleno = 92 (0x5c), region = 70 }
  0x41   : > { %s5208_s12 = sshll.u32 %s7599_s10, 4  ;;  %v6032_v1 = vmov (!%p4824_p10), 0.0  }
  0x42   : > { %s6248_s15 = scalar_lea.vmem %s7448_s1, %s5208_s12  ;;  %499 = vst [vmem:[#allocation2] sm:$0xff] (!%p4824_p10), %v6032_v1  ;;  %500 = vst [vmem:[#allocation2 + $0x8] sm:$0xff] (!%p4824_p10), %v6032_v1 }
  0x43   : > { %501 = vst [vmem:[#allocation2 + $0x10] sm:$0xff] (!%p4824_p10), %v6032_v1  ;;  %502 = vst [vmem:[#allocation2 + $0x18] sm:$0xff] (!%p4824_p10), %v6032_v1 }
  0x44   : > { %503 = vst [vmem:[#allocation2 + $0x20] sm:$0xff] (!%p4824_p10), %v6032_v1  ;;  %504 = vst [vmem:[#allocation2 + $0x28] sm:$0xff] (!%p4824_p10), %v6032_v1 }
  0x45   : > { %505 = vst [vmem:[#allocation2 + $0x30] sm:$0xff] (!%p4824_p10), %v6032_v1  ;;  %506 = vst [vmem:[#allocation2 + $0x38] sm:$0xff] (!%p4824_p10), %v6032_v1 }
  0x46   : > { %507 = vst [vmem:[#allocation2 + $0x40] sm:$0xff] (!%p4824_p10), %v6032_v1  ;;  %508 = vst [vmem:[#allocation2 + $0x48] sm:$0xff] (!%p4824_p10), %v6032_v1 }
  0x47   : > { %509 = vst [vmem:[#allocation2 + $0x50] sm:$0xff] %v6032_v1  ;;  %510 = vst [vmem:[#allocation2 + $0x58] sm:$0xff] %v6032_v1 }
  0x48   : > { %511 = vst [vmem:[#allocation2 + $0x60] sm:$0xff] %v6032_v1  ;;  %512 = vst [vmem:[#allocation2 + $0x68] sm:$0xff] %v6032_v1 }
  0x49   : > { %513 = vst [vmem:[#allocation2 + $0x70] sm:$0xff] %v6032_v1  ;;  %514 = vst [vmem:[#allocation2 + $0x78] sm:$0xff] %v6032_v1 }
  0x4a   : > { %515 = vst [vmem:[#allocation2 + $0x80] sm:$0xff] %v6032_v1  ;;  %516 = vst [vmem:[#allocation2 + $0x88] sm:$0xff] %v6032_v1 }
  0x4b   : > { %517 = vst [vmem:[#allocation2 + $0x90] sm:$0xff] %v6032_v1  ;;  %518 = vst [vmem:[#allocation2 + $0x98] sm:$0xff] %v6032_v1 }
  0x4c   : > { %519 = vst [vmem:[#allocation2 + $0xa0] sm:$0xff] %v6032_v1  ;;  %520 = vst [vmem:[#allocation2 + $0xa8] sm:$0xff] %v6032_v1 }
  0x4d   : > { %521 = vst [vmem:[#allocation2 + $0xb0] sm:$0xff] %v6032_v1  ;;  %522 = vst [vmem:[#allocation2 + $0xb8] sm:$0xff] %v6032_v1 }
  0x4e   : > { %523 = vst [vmem:[#allocation2 + $0xc0] sm:$0xff] %v6032_v1  ;;  %524 = vst [vmem:[#allocation2 + $0xc8] sm:$0xff] %v6032_v1 }
  0x4f   : > { %525 = vst [vmem:[#allocation2 + $0xd0] sm:$0xff] %v6032_v1  ;;  %526 = vst [vmem:[#allocation2 + $0xd8] sm:$0xff] %v6032_v1 }
  0x50   : > { %527 = vst [vmem:[#allocation2 + $0xe0] sm:$0xff] %v6032_v1  ;;  %528 = vst [vmem:[#allocation2 + $0xe8] sm:$0xff] %v6032_v1 }
  0x51   : > { %529 = vst [vmem:[#allocation2 + $0xf0] sm:$0xff] %v6032_v1  ;;  %530 = vst [vmem:[#allocation2 + $0xf8] sm:$0xff] %v6032_v1 }
  0x52   : > { %531 = vst [vmem:[#allocation2 + $0x100] sm:$0xff] %v6032_v1  ;;  %532 = vst [vmem:[#allocation2 + $0x108] sm:$0xff] %v6032_v1 }
  0x53   : > { %533 = vst [vmem:[#allocation2 + $0x110] sm:$0xff] %v6032_v1  ;;  %534 = vst [vmem:[#allocation2 + $0x118] sm:$0xff] %v6032_v1 }
  0x54   : > { %535 = vst [vmem:[#allocation2 + $0x120] sm:$0xff] %v6032_v1  ;;  %536 = vst [vmem:[#allocation2 + $0x128] sm:$0xff] %v6032_v1 }
  0x55   : > { %537 = vst [vmem:[#allocation2 + $0x130] sm:$0xff] %v6032_v1  ;;  %538 = vst [vmem:[#allocation2 + $0x138] sm:$0xff] %v6032_v1 }
  0x56   : > { %539 = vst [vmem:[#allocation2 + $0x140] sm:$0xff] %v6032_v1  ;;  %540 = vst [vmem:[#allocation2 + $0x148] sm:$0xff] %v6032_v1 }
  0x57   : > { %541 = vst [vmem:[#allocation2 + $0x150] sm:$0xff] %v6032_v1  ;;  %542 = vst [vmem:[#allocation2 + $0x158] sm:$0xff] %v6032_v1 }
  0x58   : > { %543 = vst [vmem:[#allocation2 + $0x160] sm:$0xff] %v6032_v1  ;;  %544 = vst [vmem:[#allocation2 + $0x168] sm:$0xff] %v6032_v1 }
  0x59   : > { %545 = vst [vmem:[#allocation2 + $0x170] sm:$0xff] %v6032_v1  ;;  %546 = vst [vmem:[#allocation2 + $0x178] sm:$0xff] %v6032_v1 }
  0x5a   : > { %547 = vst [vmem:[#allocation2 + $0x180] sm:$0x3] %v6032_v1  ;;  %548 = vst [vmem:[#allocation2 + $0x188] sm:$0x3] %v6032_v1 }
  0x5b   : > { %549 = vst [vmem:[#allocation2 + $0x190] sm:$0x3] %v6032_v1  ;;  %550 = vst [vmem:[#allocation2 + $0x198] sm:$0x3] %v6032_v1 }
  0x5c PF: > { %v5471_v2 = vld [vmem:[%s6248_s15 + $0x4] ss:$16 sps:$4 sm:$0xff]   ;;  %v5473_v3 = vld [vmem:[%s6248_s15 + $0xc] ss:$16 sps:$4 sm:$0xff]   ;;  %v5475_v4 = vld [vmem:[%s6248_s15] ss:$16 sps:$4 sm:$0xff]  }
  0x5d   : > { %2704 = vmatprep.subr.bf16.mxu0 %v5471_v2  ;;  %v5476_v5 = vld [vmem:[%s6248_s15 + $0x8] ss:$16 sps:$4 sm:$0xff]   ;;  %3209 = vmatprep.subr.bf16.mxu1 %v5473_v3  ;;  %v5477_v6 = vld [vmem:[%s6248_s15 + $0x24] ss:$16 sps:$4 sm:$0xff]   ;;  %v5479_v7 = vld [vmem:[%s6248_s15 + $0x2c] ss:$16 sps:$4 sm:$0xff]  }
  0x5e   : > { %2705 = vmatpush1.bf16.msra.mxu0 %v5475_v4  ;;  %3210 = vmatpush1.bf16.msra.mxu1 %v5476_v5  ;;  %v5481_v8 = vld [vmem:[%s6248_s15 + $0x20] ss:$16 sps:$4 sm:$0xff]   ;;  %v5482_v9 = vld [vmem:[%s6248_s15 + $0x28] ss:$16 sps:$4 sm:$0xff]   ;;  %v5483_v10 = vld [vmem:[%s6248_s15 + $0x44] ss:$16 sps:$4 sm:$0xff]  }
  0x5f   : > { %2706 = vmatprep.subr.bf16.mxu0 %v5477_v6  ;;  %3211 = vmatprep.subr.bf16.mxu1 %v5479_v7  ;;  %v5485_v11 = vld [vmem:[%s6248_s15 + $0x4c] ss:$16 sps:$4 sm:$0xff]   ;;  %v5487_v12 = vld [vmem:[%s6248_s15 + $0x40] ss:$16 sps:$4 sm:$0xff]   ;;  %v5488_v13 = vld [vmem:[%s6248_s15 + $0x48] ss:$16 sps:$4 sm:$0xff]  }
  0x60   : > { %v5489_v14 = vld [vmem:[%s6248_s15 + $0x64] ss:$16 sps:$4 sm:$0xff]   ;;  %v5491_v15 = vld [vmem:[%s6248_s15 + $0x6c] ss:$16 sps:$4 sm:$0xff]   ;;  %v5493_v16 = vld [vmem:[%s6248_s15 + $0x60] ss:$16 sps:$4 sm:$0xff]  }
  0x61   : > { %v5494_v17 = vld [vmem:[%s6248_s15 + $0x68] ss:$16 sps:$4 sm:$0xff]   ;;  %v5495_v18 = vld [vmem:[%s6248_s15 + $0x84] ss:$16 sps:$4 sm:$0xff]   ;;  %v5497_v19 = vld [vmem:[%s6248_s15 + $0x8c] ss:$16 sps:$4 sm:$0xff]  }
  0x62   : > { %2707 = vmatpush1.bf16.msra.mxu0 %v5481_v8  ;;  %3212 = vmatpush1.bf16.msra.mxu1 %v5482_v9  ;;  %v5499_v20 = vld [vmem:[%s6248_s15 + $0x80] ss:$16 sps:$4 sm:$0xff]   ;;  %v5500_v21 = vld [vmem:[%s6248_s15 + $0x88] ss:$16 sps:$4 sm:$0xff]   ;;  %v5501_v22 = vld [vmem:[%s6248_s15 + $0xa4] ss:$16 sps:$4 sm:$0xff]  }
  0x63   : > { %2708 = vmatprep.subr.bf16.mxu0 %v5483_v10  ;;  %3213 = vmatprep.subr.bf16.mxu1 %v5485_v11  ;;  %v5503_v23 = vld [vmem:[%s6248_s15 + $0xac] ss:$16 sps:$4 sm:$0xff]   ;;  %v5505_v24 = vld [vmem:[%s6248_s15 + $0xa0] ss:$16 sps:$4 sm:$0xff]   ;;  %v5506_v25 = vld [vmem:[%s6248_s15 + $0xa8] ss:$16 sps:$4 sm:$0xff]  }
  0x64   : > { %v5507_v26 = vld [vmem:[%s6248_s15 + $0xc4] ss:$16 sps:$4 sm:$0xff]   ;;  %v5509_v27 = vld [vmem:[%s6248_s15 + $0xcc] ss:$16 sps:$4 sm:$0xff]   ;;  %v5511_v28 = vld [vmem:[%s6248_s15 + $0xc0] ss:$16 sps:$4 sm:$0xff]  }
  0x65   : > { %v5512_v29 = vld [vmem:[%s6248_s15 + $0xc8] ss:$16 sps:$4 sm:$0xff]   ;;  %v5513_v30 = vld [vmem:[%s6248_s15 + $0xe4] ss:$16 sps:$4 sm:$0xff]   ;;  %v5515_v31 = vld [vmem:[%s6248_s15 + $0xec] ss:$16 sps:$4 sm:$0xff]  }
  0x66   : > { %2709 = vmatpush1.bf16.msra.mxu0 %v5487_v12  ;;  %3214 = vmatpush1.bf16.msra.mxu1 %v5488_v13  ;;  %v5517_v32 = vld [vmem:[%s6248_s15 + $0xe0] ss:$16 sps:$4 sm:$0xff]   ;;  %v5518_v33 = vld [vmem:[%s6248_s15 + $0xe8] ss:$16 sps:$4 sm:$0xff]   ;;  %v5519_v34 = vld [vmem:[%s6248_s15 + $0x104] ss:$16 sps:$4 sm:$0xff]  }
  0x67   : > { %2710 = vmatprep.subr.bf16.mxu0 %v5489_v14  ;;  %3215 = vmatprep.subr.bf16.mxu1 %v5491_v15  ;;  %v5521_v35 = vld [vmem:[%s6248_s15 + $0x10c] ss:$16 sps:$4 sm:$0xff]   ;;  %v5523_v36 = vld [vmem:[%s6248_s15 + $0x100] ss:$16 sps:$4 sm:$0xff]   ;;  %v5524_v37 = vld [vmem:[%s6248_s15 + $0x108] ss:$16 sps:$4 sm:$0xff]  }
  0x68   : > { %v5525_v38 = vld [vmem:[%s6248_s15 + $0x124] ss:$16 sps:$4 sm:$0xff]   ;;  %v5527_v39 = vld [vmem:[%s6248_s15 + $0x12c] ss:$16 sps:$4 sm:$0xff]   ;;  %v5529_v40 = vld [vmem:[%s6248_s15 + $0x120] ss:$16 sps:$4 sm:$0xff]  }
  0x69   : > { %v5530_v41 = vld [vmem:[%s6248_s15 + $0x128] ss:$16 sps:$4 sm:$0xff]   ;;  %v5531_v42 = vld [vmem:[%s6248_s15 + $0x144] ss:$16 sps:$4 sm:$0xff]   ;;  %v5533_v43 = vld [vmem:[%s6248_s15 + $0x14c] ss:$16 sps:$4 sm:$0xff]  }
  0x6a   : > { %2711 = vmatpush1.bf16.msra.mxu0 %v5493_v16  ;;  %3216 = vmatpush1.bf16.msra.mxu1 %v5494_v17  ;;  %v5535_v44 = vld [vmem:[%s6248_s15 + $0x140] ss:$16 sps:$4 sm:$0xff]   ;;  %v5536_v45 = vld [vmem:[%s6248_s15 + $0x148] ss:$16 sps:$4 sm:$0xff]   ;;  %v5537_v46 = vld [vmem:[%s6248_s15 + $0x164] ss:$16 sps:$4 sm:$0xff]  }
  0x6b   : > { %2712 = vmatprep.subr.bf16.mxu0 %v5495_v18  ;;  %3217 = vmatprep.subr.bf16.mxu1 %v5497_v19  ;;  %v5539_v47 = vld [vmem:[%s6248_s15 + $0x16c] ss:$16 sps:$4 sm:$0xff]   ;;  %v5541_v48 = vld [vmem:[%s6248_s15 + $0x160] ss:$16 sps:$4 sm:$0xff]   ;;  %v5542_v49 = vld [vmem:[%s6248_s15 + $0x168] ss:$16 sps:$4 sm:$0xff]  }
  0x6c   : > { %v5569_v50 = vld [vmem:[%s6250_s16 + $0x4] ss:$36 sps:$4 sm:$0xff]   ;;  %v5547_v53 = vld [vmem:[%s6248_s15 + $0x180] ss:$16 sps:$4 sm:$0xff]   ;;  %p5176_p11 = scmp.ne.s32.totalorder %s6022_s20, 1 }
  0x6d   : > { %v5543_v51 = vld [vmem:[%s6248_s15 + $0x184] ss:$16 sps:$4 sm:$0xff]   ;;  %v5545_v52 = vld [vmem:[%s6248_s15 + $0x18c] ss:$16 sps:$4 sm:$0xff]   ;;  %2736 = vmatprep.mubr.bf16.mxu0 %v5569_v50  ;;  %3241 = vmatprep.mubr.bf16.mxu1 %v5569_v50  ;;  %v5548_v54 = vld [vmem:[%s6248_s15 + $0x188] ss:$16 sps:$4 sm:$0xff]  }
  0x6e   : > { %2713 = vmatpush1.bf16.msra.mxu0 %v5499_v20  ;;  %3218 = vmatpush1.bf16.msra.mxu1 %v5500_v21  ;;  %v5549_v55 = vld [vmem:[%s6248_s15 + $0x1a4] ss:$16 sps:$4 sm:$0xff]   ;;  %v5551_v56 = vld [vmem:[%s6248_s15 + $0x1ac] ss:$16 sps:$4 sm:$0xff]   ;;  %v5553_v57 = vld [vmem:[%s6248_s15 + $0x1a0] ss:$16 sps:$4 sm:$0xff]  }
  0x6f   : > { %2714 = vmatprep.subr.bf16.mxu0 %v5501_v22  ;;  %3219 = vmatprep.subr.bf16.mxu1 %v5503_v23  ;;  %v5554_v58 = vld [vmem:[%s6248_s15 + $0x1a8] ss:$16 sps:$4 sm:$0xff]   ;;  %v5555_v59 = vld [vmem:[%s6248_s15 + $0x1c4] ss:$16 sps:$4 sm:$0xff]   ;;  %v5557_v60 = vld [vmem:[%s6248_s15 + $0x1cc] ss:$16 sps:$4 sm:$0xff]  }
  0x70   : > { %v5559_v61 = vld [vmem:[%s6248_s15 + $0x1c0] ss:$16 sps:$4 sm:$0xff]   ;;  %v5560_v62 = vld [vmem:[%s6248_s15 + $0x1c8] ss:$16 sps:$4 sm:$0xff]   ;;  %v5561_v63 = vld [vmem:[%s6248_s15 + $0x1e4] ss:$16 sps:$4 sm:$0xff]  }
  0x71   : > { %v5563_v0 = vld [vmem:[%s6248_s15 + $0x1ec] ss:$16 sps:$4 sm:$0xff]   ;;  %v5565_v1 = vld [vmem:[%s6248_s15 + $0x1e0] ss:$16 sps:$4 sm:$0xff]   ;;  %v5566_v2 = vld [vmem:[%s6248_s15 + $0x1e8] ss:$16 sps:$4 sm:$0xff]  }
  0x72   : > { %2715 = vmatpush1.bf16.msra.mxu0 %v5505_v24  ;;  %3220 = vmatpush1.bf16.msra.mxu1 %v5506_v25  ;;  %v5572_v3 = vld [vmem:[%s6248_s15 + $0x204] ss:$16 sps:$4 sm:$0xff]   ;;  %v5575_v4 = vld [vmem:[%s6248_s15 + $0x20c] ss:$16 sps:$4 sm:$0xff]   ;;  %v5570_v6 = vld [vmem:[%s6248_s15 + $0x200] ss:$16 sps:$4 sm:$0xff]  }
  0x73   : > { %2716 = vmatprep.subr.bf16.mxu0 %v5507_v26  ;;  %3221 = vmatprep.subr.bf16.mxu1 %v5509_v27  ;;  %v5567_v5 = vld [vmem:[%s6250_s16] ss:$36 sps:$4 sm:$0xff]   ;;  %v5581_v9 = vld [vmem:[%s6248_s15 + $0x22c] ss:$16 sps:$4 sm:$0xff]   ;;  %v5611_v27 = vld [vmem:[%s6250_s16 + $0x90] ss:$36 sps:$4 sm:$0xff]  }
  0x74   : > { %v5573_v7 = vld [vmem:[%s6248_s15 + $0x208] ss:$16 sps:$4 sm:$0xff]   ;;  %v5578_v8 = vld [vmem:[%s6248_s15 + $0x224] ss:$16 sps:$4 sm:$0xff]   ;;  %v5576_v11 = vld [vmem:[%s6248_s15 + $0x220] ss:$16 sps:$4 sm:$0xff]  }
  0x75   : > { %v5594_v10 = vld [vmem:[%s6250_s16 + $0x4c] ss:$36 sps:$4 sm:$0xff]   ;;  %v5579_v12 = vld [vmem:[%s6248_s15 + $0x228] ss:$16 sps:$4 sm:$0xff]  }
  0x76   : > { %2717 = vmatpush1.bf16.msra.mxu0 %v5511_v28  ;;  %3222 = vmatpush1.bf16.msra.mxu1 %v5512_v29  ;;  %v5584_v13 = vld [vmem:[%s6248_s15 + $0x244] ss:$16 sps:$4 sm:$0xff]   ;;  %v5587_v14 = vld [vmem:[%s6248_s15 + $0x24c] ss:$16 sps:$4 sm:$0xff]   ;;  %v5582_v15 = vld [vmem:[%s6248_s15 + $0x240] ss:$16 sps:$4 sm:$0xff]  }
  0x77   : > { %2718 = vmatprep.subr.bf16.mxu0 %v5513_v30  ;;  %3223 = vmatprep.subr.bf16.mxu1 %v5515_v31  ;;  %v5585_v16 = vld [vmem:[%s6248_s15 + $0x248] ss:$16 sps:$4 sm:$0xff]   ;;  %v5590_v18 = vld [vmem:[%s6248_s15 + $0x264] ss:$16 sps:$4 sm:$0xff]   ;;  %v5593_v19 = vld [vmem:[%s6248_s15 + $0x26c] ss:$16 sps:$4 sm:$0xff]  }
  0x78   : > { %v5596_v17 = vld [vmem:[%s6250_s16 + $0x48] ss:$36 sps:$4 sm:$0xff]   ;;  %v5609_v20 = vld [vmem:[%s6250_s16 + $0x94] ss:$36 sps:$4 sm:$0xff]   ;;  %v5624_v30 = vld [vmem:[%s6250_s16 + $0xdc] ss:$36 sps:$4 sm:$0xff]  }
  0x79   : > { %v5588_v21 = vld [vmem:[%s6248_s15 + $0x260] ss:$16 sps:$4 sm:$0xff]   ;;  %v5591_v22 = vld [vmem:[%s6248_s15 + $0x268] ss:$16 sps:$4 sm:$0xff]   ;;  %v5599_v23 = vld [vmem:[%s6248_s15 + $0x284] ss:$16 sps:$4 sm:$0xff]  }
  0x7a   : > { %2719 = vmatpush1.bf16.msra.mxu0 %v5517_v32  ;;  %3224 = vmatpush1.bf16.msra.mxu1 %v5518_v33  ;;  %v5602_v24 = vld [vmem:[%s6248_s15 + $0x28c] ss:$16 sps:$4 sm:$0xff]   ;;  %v5597_v25 = vld [vmem:[%s6248_s15 + $0x280] ss:$16 sps:$4 sm:$0xff]   ;;  %v5600_v26 = vld [vmem:[%s6248_s15 + $0x288] ss:$16 sps:$4 sm:$0xff]  }
  0x7b   : > { %2720 = vmatprep.subr.bf16.mxu0 %v5519_v34  ;;  %3225 = vmatprep.subr.bf16.mxu1 %v5521_v35  ;;  %v5605_v28 = vld [vmem:[%s6248_s15 + $0x2a4] ss:$16 sps:$4 sm:$0xff]   ;;  %v5608_v29 = vld [vmem:[%s6248_s15 + $0x2ac] ss:$16 sps:$4 sm:$0xff]   ;;  %v5603_v31 = vld [vmem:[%s6248_s15 + $0x2a0] ss:$16 sps:$4 sm:$0xff]  }
  0x7c   : > { %v5606_v32 = vld [vmem:[%s6248_s15 + $0x2a8] ss:$16 sps:$4 sm:$0xff]   ;;  %v5614_v33 = vld [vmem:[%s6248_s15 + $0x2c4] ss:$16 sps:$4 sm:$0xff]   ;;  %v5617_v34 = vld [vmem:[%s6248_s15 + $0x2cc] ss:$16 sps:$4 sm:$0xff]  }
  0x7d   : > { %v5612_v35 = vld [vmem:[%s6248_s15 + $0x2c0] ss:$16 sps:$4 sm:$0xff]  }
  0x7e   : > { %2721 = vmatpush1.bf16.msra.mxu0 %v5523_v36  ;;  %3226 = vmatpush1.bf16.msra.mxu1 %v5524_v37  ;;  %v5626_v36 = vld [vmem:[%s6250_s16 + $0xd8] ss:$36 sps:$4 sm:$0xff]   ;;  %v5654_v50 = vld [vmem:[%s6250_s16 + $0x16c] ss:$36 sps:$4 sm:$0xff]  }
  0x7f   : > { %2722 = vmatprep.subr.bf16.mxu0 %v5525_v38  ;;  %3227 = vmatprep.subr.bf16.mxu1 %v5527_v39  ;;  %v5615_v37 = vld [vmem:[%s6248_s15 + $0x2c8] ss:$16 sps:$4 sm:$0xff]   ;;  %v5620_v38 = vld [vmem:[%s6248_s15 + $0x2e4] ss:$16 sps:$4 sm:$0xff]   ;;  %v5623_v39 = vld [vmem:[%s6248_s15 + $0x2ec] ss:$16 sps:$4 sm:$0xff]  }
  0x82   : > { %2723 = vmatpush1.bf16.msra.mxu0 %v5529_v40  ;;  %3228 = vmatpush1.bf16.msra.mxu1 %v5530_v41  ;;  %v5639_v40 = vld [vmem:[%s6250_s16 + $0x124] ss:$36 sps:$4 sm:$0xff]   ;;  %v5618_v41 = vld [vmem:[%s6248_s15 + $0x2e0] ss:$16 sps:$4 sm:$0xff]  }
  0x83   : > { %2724 = vmatprep.subr.bf16.mxu0 %v5531_v42  ;;  %3229 = vmatprep.subr.bf16.mxu1 %v5533_v43  ;;  %v5621_v42 = vld [vmem:[%s6248_s15 + $0x2e8] ss:$16 sps:$4 sm:$0xff]   ;;  %v5629_v43 = vld [vmem:[%s6248_s15 + $0x304] ss:$16 sps:$4 sm:$0xff]  }
  0x86   : > { %2725 = vmatpush1.bf16.msra.mxu0 %v5535_v44  ;;  %3230 = vmatpush1.bf16.msra.mxu1 %v5536_v45  ;;  %v5632_v44 = vld [vmem:[%s6248_s15 + $0x30c] ss:$16 sps:$4 sm:$0xff]   ;;  %v5627_v45 = vld [vmem:[%s6248_s15 + $0x300] ss:$16 sps:$4 sm:$0xff]  }
  0x87   : > { %2726 = vmatprep.subr.bf16.mxu0 %v5537_v46  ;;  %3231 = vmatprep.subr.bf16.mxu1 %v5539_v47  ;;  %v5641_v46 = vld [vmem:[%s6250_s16 + $0x120] ss:$36 sps:$4 sm:$0xff]  }
  0x88   : > { %v5630_v47 = vld [vmem:[%s6248_s15 + $0x308] ss:$16 sps:$4 sm:$0xff]  }
  0x8a   : > { %2727 = vmatpush1.bf16.msra.mxu0 %v5541_v48  ;;  %3232 = vmatpush1.bf16.msra.mxu1 %v5542_v49  ;;  %v5635_v48 = vld [vmem:[%s6248_s15 + $0x324] ss:$16 sps:$4 sm:$0xff]   ;;  %v5638_v49 = vld [vmem:[%s6248_s15 + $0x32c] ss:$16 sps:$4 sm:$0xff]  }
  0x8b   : > { %2728 = vmatprep.subr.bf16.mxu0 %v5543_v51  ;;  %3233 = vmatprep.subr.bf16.mxu1 %v5545_v52  ;;  %v5633_v51 = vld [vmem:[%s6248_s15 + $0x320] ss:$16 sps:$4 sm:$0xff]   ;;  %v5636_v52 = vld [vmem:[%s6248_s15 + $0x328] ss:$16 sps:$4 sm:$0xff]  }
  0x8e   : > { %2729 = vmatpush1.bf16.msra.mxu0 %v5547_v53  ;;  %3234 = vmatpush1.bf16.msra.mxu1 %v5548_v54  ;;  %v5644_v53 = vld [vmem:[%s6248_s15 + $0x344] ss:$16 sps:$4 sm:$0xff]   ;;  %v5647_v54 = vld [vmem:[%s6248_s15 + $0x34c] ss:$16 sps:$4 sm:$0xff]  }
  0x8f   : > { %2730 = vmatprep.subr.bf16.mxu0 %v5549_v55  ;;  %3235 = vmatprep.subr.bf16.mxu1 %v5551_v56  ;;  %v5642_v55 = vld [vmem:[%s6248_s15 + $0x340] ss:$16 sps:$4 sm:$0xff]  }
  0x90   : > { %v5656_v56 = vld [vmem:[%s6250_s16 + $0x168] ss:$36 sps:$4 sm:$0xff]  }
  0x92   : > { %2731 = vmatpush1.bf16.msra.mxu0 %v5553_v57  ;;  %3236 = vmatpush1.bf16.msra.mxu1 %v5554_v58  ;;  %v663_v57 = vld [vmem:[%s6250_s16 + $0x1b0] sm:$0x11] }
  0x93   : > { %2732 = vmatprep.subr.bf16.mxu0 %v5555_v59  ;;  %3237 = vmatprep.subr.bf16.mxu1 %v5557_v60  ;;  %v5645_v58 = vld [vmem:[%s6248_s15 + $0x348] ss:$16 sps:$4 sm:$0xff]   ;;  %v5650_v59 = vld [vmem:[%s6248_s15 + $0x364] ss:$16 sps:$4 sm:$0xff]   ;;  %v5653_v60 = vld [vmem:[%s6248_s15 + $0x36c] ss:$16 sps:$4 sm:$0xff]  }
  0x96   : > { %2733 = vmatpush1.bf16.msra.mxu0 %v5559_v61  ;;  %3238 = vmatpush1.bf16.msra.mxu1 %v5560_v62  ;;  %v4880_v61 = vcombine.high %v663_v57, %v663_v57  ;;  %v5648_v62 = vld [vmem:[%s6248_s15 + $0x360] ss:$16 sps:$4 sm:$0xff]  }
  0x97   : > { %2734 = vmatprep.subr.bf16.mxu0 %v5561_v63  ;;  %3239 = vmatprep.subr.bf16.mxu1 %v5563_v0  ;;  %v5651_v63 = vld [vmem:[%s6248_s15 + $0x368] ss:$16 sps:$4 sm:$0xff]   ;;  %v5659_v0 = vld [vmem:[%s6248_s15 + $0x384] ss:$16 sps:$4 sm:$0xff]  }
  0x9a   : > { %2735 = vmatpush1.bf16.msra.mxu0 %v5565_v1  ;;  %3240 = vmatpush1.bf16.msra.mxu1 %v5566_v2  ;;  %v5662_v1 = vld [vmem:[%s6248_s15 + $0x38c] ss:$16 sps:$4 sm:$0xff]   ;;  %v5657_v2 = vld [vmem:[%s6248_s15 + $0x380] ss:$16 sps:$4 sm:$0xff]  }
  0x9b   : > { %2805 = vmatprep.subr.bf16.mxu0 %v5572_v3  ;;  %3310 = vmatprep.subr.bf16.mxu1 %v5575_v4  ;;  %v4879_v3 = vcombine.low %v663_v57, %v663_v57  ;;  %v5660_v4 = vld [vmem:[%s6248_s15 + $0x388] ss:$16 sps:$4 sm:$0xff]  }
  0x9c   : > { %v5740_v57 = vld [vmem:[%s6248_s15 + $0x4e8] ss:$16 sps:$4 sm:$0xff]  }
  0x9d   : > { %2737 = vmatmul.mubr.bf16.vlgmr.msra.gmra.mrb[0].mxu0 %v5567_v5  ;;  %3242 = vmatmul.mubr.bf16.vlgmr.msra.gmra.mrb[0].mxu1 %v5567_v5  ;;  %v5665_v5 = vld [vmem:[%s6248_s15 + $0x3a4] ss:$16 sps:$4 sm:$0xff]  }
  0x9e   : > { %2806 = vmatpush1.bf16.msra.mxu0 %v5570_v6  ;;  %3311 = vmatpush1.bf16.msra.mxu1 %v5573_v7  ;;  %v5668_v6 = vld [vmem:[%s6248_s15 + $0x3ac] ss:$16 sps:$4 sm:$0xff]  }
  0x9f   : > { %2807 = vmatprep.subr.bf16.mxu0 %v5578_v8  ;;  %3312 = vmatprep.subr.bf16.mxu1 %v5581_v9  ;;  %v5685_v7 = vld [vmem:[%s6250_s16 + $0xc] ss:$36 sps:$4 sm:$0xff]   ;;  %v5666_v9 = vld [vmem:[%s6248_s15 + $0x3a8] ss:$16 sps:$4 sm:$0xff]  }
  0xa0   : > { %2746 = vmatprep.mubr.bf16.mxu0 %v5594_v10  ;;  %3251 = vmatprep.mubr.bf16.mxu1 %v5594_v10  ;;  %v5663_v8 = vld [vmem:[%s6248_s15 + $0x3a0] ss:$16 sps:$4 sm:$0xff]   ;;  %v5673_v10 = vld [vmem:[%s6248_s15 + $0x3c4] ss:$16 sps:$4 sm:$0xff]  }
  0xa2   : > { %2808 = vmatpush1.bf16.msra.mxu0 %v5576_v11  ;;  %3313 = vmatpush1.bf16.msra.mxu1 %v5579_v12  ;;  %v5676_v11 = vld [vmem:[%s6248_s15 + $0x3cc] ss:$16 sps:$4 sm:$0xff]   ;;  %v5671_v12 = vld [vmem:[%s6248_s15 + $0x3c0] ss:$16 sps:$4 sm:$0xff]  }
  0xa3   : > { %2809 = vmatprep.subr.bf16.mxu0 %v5584_v13  ;;  %3314 = vmatprep.subr.bf16.mxu1 %v5587_v14  ;;  %v5674_v13 = vld [vmem:[%s6248_s15 + $0x3c8] ss:$16 sps:$4 sm:$0xff]   ;;  %v5679_v14 = vld [vmem:[%s6248_s15 + $0x3e4] ss:$16 sps:$4 sm:$0xff]  }
  0xa5   : > { %2747 = vmatmul.mubr.bf16.gmra.mrb[4].mxu0 %v5596_v17  ;;  %3252 = vmatmul.mubr.bf16.gmra.mrb[4].mxu1 %v5596_v17  ;;  %v5680_v17 = vld [vmem:[%s6248_s15 + $0x3e8] ss:$16 sps:$4 sm:$0xff]  }
  0xa6   : > { %2810 = vmatpush1.bf16.msra.mxu0 %v5582_v15  ;;  %3315 = vmatpush1.bf16.msra.mxu1 %v5585_v16  ;;  %v5682_v15 = vld [vmem:[%s6248_s15 + $0x3ec] ss:$16 sps:$4 sm:$0xff]   ;;  %v5677_v16 = vld [vmem:[%s6248_s15 + $0x3e0] ss:$16 sps:$4 sm:$0xff]  }
  0xa7   : > { %2811 = vmatprep.subr.bf16.mxu0 %v5590_v18  ;;  %3316 = vmatprep.subr.bf16.mxu1 %v5593_v19  ;;  %v5688_v18 = vld [vmem:[%s6248_s15 + $0x404] ss:$16 sps:$4 sm:$0xff]   ;;  %v5691_v19 = vld [vmem:[%s6248_s15 + $0x40c] ss:$16 sps:$4 sm:$0xff]  }
  0xa8   : > { %2756 = vmatprep.mubr.bf16.mxu0 %v5609_v20  ;;  %3261 = vmatprep.mubr.bf16.mxu1 %v5609_v20  ;;  %v5683_v20 = vld [vmem:[%s6250_s16 + $0x8] ss:$36 sps:$4 sm:$0xff]  }
  0xaa   : > { %2812 = vmatpush1.bf16.msra.mxu0 %v5588_v21  ;;  %3317 = vmatpush1.bf16.msra.mxu1 %v5591_v22  ;;  %v5686_v21 = vld [vmem:[%s6248_s15 + $0x400] ss:$16 sps:$4 sm:$0xff]   ;;  %v5689_v22 = vld [vmem:[%s6248_s15 + $0x408] ss:$16 sps:$4 sm:$0xff]  }
  0xab   : > { %2813 = vmatprep.subr.bf16.mxu0 %v5599_v23  ;;  %3318 = vmatprep.subr.bf16.mxu1 %v5602_v24  ;;  %v5694_v23 = vld [vmem:[%s6248_s15 + $0x424] ss:$16 sps:$4 sm:$0xff]   ;;  %v5697_v24 = vld [vmem:[%s6248_s15 + $0x42c] ss:$16 sps:$4 sm:$0xff]  }
  0xad   : > { %2757 = vmatmul.mubr.bf16.gmra.mrb[8].mxu0 %v5611_v27  ;;  %3262 = vmatmul.mubr.bf16.gmra.mrb[8].mxu1 %v5611_v27  ;;  %v5695_v27 = vld [vmem:[%s6248_s15 + $0x428] ss:$16 sps:$4 sm:$0xff]  }
  0xae   : > { %2814 = vmatpush1.bf16.msra.mxu0 %v5597_v25  ;;  %3319 = vmatpush1.bf16.msra.mxu1 %v5600_v26  ;;  %v5698_v25 = vld [vmem:[%s6250_s16 + $0x54] ss:$36 sps:$4 sm:$0xff]   ;;  %v5692_v26 = vld [vmem:[%s6248_s15 + $0x420] ss:$16 sps:$4 sm:$0xff]  }
  0xaf   : > { %2815 = vmatprep.subr.bf16.mxu0 %v5605_v28  ;;  %3320 = vmatprep.subr.bf16.mxu1 %v5608_v29  ;;  %v5703_v28 = vld [vmem:[%s6248_s15 + $0x444] ss:$16 sps:$4 sm:$0xff]   ;;  %v5706_v29 = vld [vmem:[%s6248_s15 + $0x44c] ss:$16 sps:$4 sm:$0xff]  }
  0xb0   : > { %2766 = vmatprep.mubr.bf16.mxu0 %v5624_v30  ;;  %3271 = vmatprep.mubr.bf16.mxu1 %v5624_v30  ;;  %v5700_v30 = vld [vmem:[%s6250_s16 + $0x50] ss:$36 sps:$4 sm:$0xff]  }
  0xb2   : > { %2816 = vmatpush1.bf16.msra.mxu0 %v5603_v31  ;;  %3321 = vmatpush1.bf16.msra.mxu1 %v5606_v32  ;;  %v5701_v31 = vld [vmem:[%s6248_s15 + $0x440] ss:$16 sps:$4 sm:$0xff]   ;;  %v5704_v32 = vld [vmem:[%s6248_s15 + $0x448] ss:$16 sps:$4 sm:$0xff]  }
  0xb3   : > { %2817 = vmatprep.subr.bf16.mxu0 %v5614_v33  ;;  %3322 = vmatprep.subr.bf16.mxu1 %v5617_v34  ;;  %v5709_v33 = vld [vmem:[%s6248_s15 + $0x464] ss:$16 sps:$4 sm:$0xff]   ;;  %v5712_v34 = vld [vmem:[%s6248_s15 + $0x46c] ss:$16 sps:$4 sm:$0xff]  }
  0xb5   : > { %2767 = vmatmul.mubr.bf16.gmra.mrb[12].mxu0 %v5626_v36  ;;  %3272 = vmatmul.mubr.bf16.gmra.mrb[12].mxu1 %v5626_v36  ;;  %v5707_v36 = vld [vmem:[%s6248_s15 + $0x460] ss:$16 sps:$4 sm:$0xff]  }
  0xb6   : > { %2818 = vmatpush1.bf16.msra.mxu0 %v5612_v35  ;;  %3323 = vmatpush1.bf16.msra.mxu1 %v5615_v37  ;;  %v5713_v35 = vld [vmem:[%s6250_s16 + $0x9c] ss:$36 sps:$4 sm:$0xff]   ;;  %v5710_v37 = vld [vmem:[%s6248_s15 + $0x468] ss:$16 sps:$4 sm:$0xff]  }
  0xb7   : > { %2819 = vmatprep.subr.bf16.mxu0 %v5620_v38  ;;  %3324 = vmatprep.subr.bf16.mxu1 %v5623_v39  ;;  %v5718_v38 = vld [vmem:[%s6248_s15 + $0x484] ss:$16 sps:$4 sm:$0xff]   ;;  %v5721_v39 = vld [vmem:[%s6248_s15 + $0x48c] ss:$16 sps:$4 sm:$0xff]  }
  0xb8   : > { %2776 = vmatprep.mubr.bf16.mxu0 %v5639_v40  ;;  %3281 = vmatprep.mubr.bf16.mxu1 %v5639_v40  ;;  %v5715_v40 = vld [vmem:[%s6250_s16 + $0x98] ss:$36 sps:$4 sm:$0xff]  }
  0xba   : > { %2820 = vmatpush1.bf16.msra.mxu0 %v5618_v41  ;;  %3325 = vmatpush1.bf16.msra.mxu1 %v5621_v42  ;;  %v5716_v41 = vld [vmem:[%s6248_s15 + $0x480] ss:$16 sps:$4 sm:$0xff]   ;;  %v5719_v42 = vld [vmem:[%s6248_s15 + $0x488] ss:$16 sps:$4 sm:$0xff]  }
  0xbb   : > { %2821 = vmatprep.subr.bf16.mxu0 %v5629_v43  ;;  %3326 = vmatprep.subr.bf16.mxu1 %v5632_v44  ;;  %v5724_v43 = vld [vmem:[%s6248_s15 + $0x4a4] ss:$16 sps:$4 sm:$0xff]   ;;  %v5727_v44 = vld [vmem:[%s6248_s15 + $0x4ac] ss:$16 sps:$4 sm:$0xff]  }
  0xbd   : > { %2777 = vmatmul.mubr.bf16.gmra.mrb[16].mxu0 %v5641_v46  ;;  %3282 = vmatmul.mubr.bf16.gmra.mrb[16].mxu1 %v5641_v46  ;;  %v5722_v46 = vld [vmem:[%s6248_s15 + $0x4a0] ss:$16 sps:$4 sm:$0xff]  }
  0xbe   : > { %2822 = vmatpush1.bf16.msra.mxu0 %v5627_v45  ;;  %3327 = vmatpush1.bf16.msra.mxu1 %v5630_v47  ;;  %v5728_v45 = vld [vmem:[%s6250_s16 + $0xe4] ss:$36 sps:$4 sm:$0xff]  }
  0xbf   : > { %2823 = vmatprep.subr.bf16.mxu0 %v5635_v48  ;;  %3328 = vmatprep.subr.bf16.mxu1 %v5638_v49  ;;  %v5725_v47 = vld [vmem:[%s6248_s15 + $0x4a8] ss:$16 sps:$4 sm:$0xff]   ;;  %v5733_v48 = vld [vmem:[%s6248_s15 + $0x4c4] ss:$16 sps:$4 sm:$0xff]   ;;  %v5736_v49 = vld [vmem:[%s6248_s15 + $0x4cc] ss:$16 sps:$4 sm:$0xff]  }
  0xc0   : > { %2786 = vmatprep.mubr.bf16.mxu0 %v5654_v50  ;;  %3291 = vmatprep.mubr.bf16.mxu1 %v5654_v50  ;;  %v5730_v50 = vld [vmem:[%s6250_s16 + $0xe0] ss:$36 sps:$4 sm:$0xff]  }
  0xc2   : > { %2824 = vmatpush1.bf16.msra.mxu0 %v5633_v51  ;;  %3329 = vmatpush1.bf16.msra.mxu1 %v5636_v52  ;;  %v5731_v51 = vld [vmem:[%s6248_s15 + $0x4c0] ss:$16 sps:$4 sm:$0xff]   ;;  %v5734_v52 = vld [vmem:[%s6248_s15 + $0x4c8] ss:$16 sps:$4 sm:$0xff]  }
  0xc3   : > { %2825 = vmatprep.subr.bf16.mxu0 %v5644_v53  ;;  %3330 = vmatprep.subr.bf16.mxu1 %v5647_v54  ;;  %v5739_v53 = vld [vmem:[%s6248_s15 + $0x4e4] ss:$16 sps:$4 sm:$0xff]   ;;  %v5742_v54 = vld [vmem:[%s6248_s15 + $0x4ec] ss:$16 sps:$4 sm:$0xff]  }
  0xc5   : > { %2787 = vmatmul.mubr.bf16.gmra.mrb[20].mxu0 %v5656_v56  ;;  %3292 = vmatmul.mubr.bf16.gmra.mrb[20].mxu1 %v5656_v56  ;;  %v5737_v56 = vld [vmem:[%s6248_s15 + $0x4e0] ss:$16 sps:$4 sm:$0xff]  }
  0xc6   : > { %2826 = vmatpush1.bf16.msra.mxu0 %v5642_v55  ;;  %3331 = vmatpush1.bf16.msra.mxu1 %v5645_v58  ;;  %v5743_v55 = vld [vmem:[%s6250_s16 + $0x12c] ss:$36 sps:$4 sm:$0xff]  }
  0xc7   : > { %2827 = vmatprep.subr.bf16.mxu0 %v5650_v59  ;;  %3332 = vmatprep.subr.bf16.mxu1 %v5653_v60  ;;  %v5748_v58 = vld [vmem:[%s6248_s15 + $0x504] ss:$16 sps:$4 sm:$0xff]   ;;  %v5751_v59 = vld [vmem:[%s6248_s15 + $0x50c] ss:$16 sps:$4 sm:$0xff]  }
  0xc8   : > { %2796 = vmatprep.mubr.bf16.mxu0 %v4880_v61  ;;  %3301 = vmatprep.mubr.bf16.mxu1 %v4880_v61  ;;  %v5745_v60 = vld [vmem:[%s6250_s16 + $0x128] ss:$36 sps:$4 sm:$0xff]  }
  0xc9   : > { %v5746_v61 = vld [vmem:[%s6248_s15 + $0x500] ss:$16 sps:$4 sm:$0xff]  }
  0xca   : > { %2828 = vmatpush1.bf16.msra.mxu0 %v5648_v62  ;;  %3333 = vmatpush1.bf16.msra.mxu1 %v5651_v63  ;;  %v5749_v62 = vld [vmem:[%s6248_s15 + $0x508] ss:$16 sps:$4 sm:$0xff]   ;;  %v5754_v63 = vld [vmem:[%s6248_s15 + $0x524] ss:$16 sps:$4 sm:$0xff]  }
  0xcb   : > { %2829 = vmatprep.subr.bf16.mxu0 %v5659_v0  ;;  %3334 = vmatprep.subr.bf16.mxu1 %v5662_v1  ;;  %v5757_v0 = vld [vmem:[%s6248_s15 + $0x52c] ss:$16 sps:$4 sm:$0xff]  }
  0xcc   : > { %v5758_v1 = vld [vmem:[%s6250_s16 + $0x174] ss:$36 sps:$4 sm:$0xff]  }
  0xcd   : > { %2797 = vmatmul.mubr.bf16.gmra.mrb[24].mxu0 %v4879_v3  ;;  %3302 = vmatmul.mubr.bf16.gmra.mrb[24].mxu1 %v4879_v3  ;;  %v5755_v3 = vld [vmem:[%s6248_s15 + $0x528] ss:$16 sps:$4 sm:$0xff]  }
  0xce   : > { %2830 = vmatpush1.bf16.msra.mxu0 %v5657_v2  ;;  %3335 = vmatpush1.bf16.msra.mxu1 %v5660_v4  ;;  %v5752_v2 = vld [vmem:[%s6248_s15 + $0x520] ss:$16 sps:$4 sm:$0xff]   ;;  %v5763_v4 = vld [vmem:[%s6248_s15 + $0x544] ss:$16 sps:$4 sm:$0xff]  }
  0xcf   : > { %2831 = vmatprep.subr.bf16.mxu0 %v5665_v5  ;;  %3336 = vmatprep.subr.bf16.mxu1 %v5668_v6  ;;  %v5766_v5 = vld [vmem:[%s6248_s15 + $0x54c] ss:$16 sps:$4 sm:$0xff]   ;;  %v5760_v6 = vld [vmem:[%s6250_s16 + $0x170] ss:$36 sps:$4 sm:$0xff]  }
  0xd0   : > { %2837 = vmatprep.mubr.bf16.mxu0 %v5685_v7  ;;  %3342 = vmatprep.mubr.bf16.mxu1 %v5685_v7  ;;  %v664_v7 = vld [vmem:[%s6250_s16 + $0x1b8] sm:$0x11] }
  0xd2   : > { %2832 = vmatpush1.bf16.msra.mxu0 %v5663_v8  ;;  %3337 = vmatpush1.bf16.msra.mxu1 %v5666_v9  ;;  %v5761_v8 = vld [vmem:[%s6248_s15 + $0x540] ss:$16 sps:$4 sm:$0xff]   ;;  %v5764_v9 = vld [vmem:[%s6248_s15 + $0x548] ss:$16 sps:$4 sm:$0xff]  }
  0xd3   : > { %2833 = vmatprep.subr.bf16.mxu0 %v5673_v10  ;;  %3338 = vmatprep.subr.bf16.mxu1 %v5676_v11  ;;  %v5769_v10 = vld [vmem:[%s6248_s15 + $0x564] ss:$16 sps:$4 sm:$0xff]   ;;  %v5772_v11 = vld [vmem:[%s6248_s15 + $0x56c] ss:$16 sps:$4 sm:$0xff]  }
  0xd6   : > { %2834 = vmatpush1.bf16.msra.mxu0 %v5671_v12  ;;  %3339 = vmatpush1.bf16.msra.mxu1 %v5674_v13  ;;  %v4882_v12 = vcombine.high %v664_v7, %v664_v7  ;;  %v5767_v13 = vld [vmem:[%s6248_s15 + $0x560] ss:$16 sps:$4 sm:$0xff]  }
  0xd7   : > { %2835 = vmatprep.subr.bf16.mxu0 %v5679_v14  ;;  %3340 = vmatprep.subr.bf16.mxu1 %v5682_v15  ;;  %v5770_v14 = vld [vmem:[%s6248_s15 + $0x568] ss:$16 sps:$4 sm:$0xff]   ;;  %v5777_v15 = vld [vmem:[%s6248_s15 + $0x584] ss:$16 sps:$4 sm:$0xff]  }
  0xda   : > { %2836 = vmatpush1.bf16.msra.mxu0 %v5677_v16  ;;  %3341 = vmatpush1.bf16.msra.mxu1 %v5680_v17  ;;  %v5780_v16 = vld [vmem:[%s6248_s15 + $0x58c] ss:$16 sps:$4 sm:$0xff]   ;;  %v4881_v17 = vcombine.low %v664_v7, %v664_v7  ;;  %v5853_v7 = vld [vmem:[%s6248_s15 + $0x6e0] ss:$16 sps:$4 sm:$0xff]  }
  0xdb   : > { %2906 = vmatprep.subr.bf16.mxu0 %v5688_v18  ;;  %3411 = vmatprep.subr.bf16.mxu1 %v5691_v19  ;;  %v5775_v18 = vld [vmem:[%s6248_s15 + $0x580] ss:$16 sps:$4 sm:$0xff]   ;;  %v5778_v19 = vld [vmem:[%s6248_s15 + $0x588] ss:$16 sps:$4 sm:$0xff]  }
  0xdd   : > { %2838 = vmatmul.mubr.bf16.vlgmr.msra.gmra.mrb[0].mxu0 %v5683_v20  ;;  %3343 = vmatmul.mubr.bf16.vlgmr.msra.gmra.mrb[0].mxu1 %v5683_v20  ;;  %v5783_v20 = vld [vmem:[%s6248_s15 + $0x5a4] ss:$16 sps:$4 sm:$0xff]  }
  0xde   : > { %2907 = vmatpush1.bf16.msra.mxu0 %v5686_v21  ;;  %3412 = vmatpush1.bf16.msra.mxu1 %v5689_v22  ;;  %v5786_v21 = vld [vmem:[%s6248_s15 + $0x5ac] ss:$16 sps:$4 sm:$0xff]  }
  0xdf   : > { %2908 = vmatprep.subr.bf16.mxu0 %v5694_v23  ;;  %3413 = vmatprep.subr.bf16.mxu1 %v5697_v24  ;;  %v5801_v22 = vld [vmem:[%s6250_s16 + $0x14] ss:$36 sps:$4 sm:$0xff]   ;;  %v5781_v23 = vld [vmem:[%s6248_s15 + $0x5a0] ss:$16 sps:$4 sm:$0xff]  }
  0xe0   : > { %2847 = vmatprep.mubr.bf16.mxu0 %v5698_v25  ;;  %3352 = vmatprep.mubr.bf16.mxu1 %v5698_v25  ;;  %v5784_v24 = vld [vmem:[%s6248_s15 + $0x5a8] ss:$16 sps:$4 sm:$0xff]   ;;  %v5789_v25 = vld [vmem:[%s6248_s15 + $0x5c4] ss:$16 sps:$4 sm:$0xff]  }
  0xe2   : > { %2909 = vmatpush1.bf16.msra.mxu0 %v5692_v26  ;;  %3414 = vmatpush1.bf16.msra.mxu1 %v5695_v27  ;;  %v5792_v26 = vld [vmem:[%s6248_s15 + $0x5cc] ss:$16 sps:$4 sm:$0xff]   ;;  %v5787_v27 = vld [vmem:[%s6248_s15 + $0x5c0] ss:$16 sps:$4 sm:$0xff]  }
  0xe3   : > { %2910 = vmatprep.subr.bf16.mxu0 %v5703_v28  ;;  %3415 = vmatprep.subr.bf16.mxu1 %v5706_v29  ;;  %v5790_v28 = vld [vmem:[%s6248_s15 + $0x5c8] ss:$16 sps:$4 sm:$0xff]   ;;  %v5795_v29 = vld [vmem:[%s6248_s15 + $0x5e4] ss:$16 sps:$4 sm:$0xff]  }
  0xe5   : > { %2848 = vmatmul.mubr.bf16.gmra.mrb[4].mxu0 %v5700_v30  ;;  %3353 = vmatmul.mubr.bf16.gmra.mrb[4].mxu1 %v5700_v30  ;;  %v5798_v30 = vld [vmem:[%s6248_s15 + $0x5ec] ss:$16 sps:$4 sm:$0xff]  }
  0xe6   : > { %2911 = vmatpush1.bf16.msra.mxu0 %v5701_v31  ;;  %3416 = vmatpush1.bf16.msra.mxu1 %v5704_v32  ;;  %v5793_v31 = vld [vmem:[%s6248_s15 + $0x5e0] ss:$16 sps:$4 sm:$0xff]   ;;  %v5796_v32 = vld [vmem:[%s6248_s15 + $0x5e8] ss:$16 sps:$4 sm:$0xff]  }
  0xe7   : > { %2912 = vmatprep.subr.bf16.mxu0 %v5709_v33  ;;  %3417 = vmatprep.subr.bf16.mxu1 %v5712_v34  ;;  %v5804_v33 = vld [vmem:[%s6248_s15 + $0x604] ss:$16 sps:$4 sm:$0xff]   ;;  %v5807_v34 = vld [vmem:[%s6248_s15 + $0x60c] ss:$16 sps:$4 sm:$0xff]  }
  0xe8   : > { %2857 = vmatprep.mubr.bf16.mxu0 %v5713_v35  ;;  %3362 = vmatprep.mubr.bf16.mxu1 %v5713_v35  ;;  %v5799_v35 = vld [vmem:[%s6250_s16 + $0x10] ss:$36 sps:$4 sm:$0xff]  }
  0xea   : > { %2913 = vmatpush1.bf16.msra.mxu0 %v5707_v36  ;;  %3418 = vmatpush1.bf16.msra.mxu1 %v5710_v37  ;;  %v5802_v36 = vld [vmem:[%s6248_s15 + $0x600] ss:$16 sps:$4 sm:$0xff]   ;;  %v5805_v37 = vld [vmem:[%s6248_s15 + $0x608] ss:$16 sps:$4 sm:$0xff]  }
  0xeb   : > { %2914 = vmatprep.subr.bf16.mxu0 %v5718_v38  ;;  %3419 = vmatprep.subr.bf16.mxu1 %v5721_v39  ;;  %v5810_v38 = vld [vmem:[%s6248_s15 + $0x624] ss:$16 sps:$4 sm:$0xff]   ;;  %v5813_v39 = vld [vmem:[%s6248_s15 + $0x62c] ss:$16 sps:$4 sm:$0xff]  }
  0xed   : > { %2858 = vmatmul.mubr.bf16.gmra.mrb[8].mxu0 %v5715_v40  ;;  %3363 = vmatmul.mubr.bf16.gmra.mrb[8].mxu1 %v5715_v40  ;;  %v5814_v40 = vld [vmem:[%s6250_s16 + $0x5c] ss:$36 sps:$4 sm:$0xff]  }
  0xee   : > { %2915 = vmatpush1.bf16.msra.mxu0 %v5716_v41  ;;  %3420 = vmatpush1.bf16.msra.mxu1 %v5719_v42  ;;  %v5808_v41 = vld [vmem:[%s6248_s15 + $0x620] ss:$16 sps:$4 sm:$0xff]   ;;  %v5811_v42 = vld [vmem:[%s6248_s15 + $0x628] ss:$16 sps:$4 sm:$0xff]  }
  0xef   : > { %2916 = vmatprep.subr.bf16.mxu0 %v5724_v43  ;;  %3421 = vmatprep.subr.bf16.mxu1 %v5727_v44  ;;  %v5819_v43 = vld [vmem:[%s6248_s15 + $0x644] ss:$16 sps:$4 sm:$0xff]   ;;  %v5822_v44 = vld [vmem:[%s6248_s15 + $0x64c] ss:$16 sps:$4 sm:$0xff]  }
  0xf0   : > { %2867 = vmatprep.mubr.bf16.mxu0 %v5728_v45  ;;  %3372 = vmatprep.mubr.bf16.mxu1 %v5728_v45  ;;  %v5816_v45 = vld [vmem:[%s6250_s16 + $0x58] ss:$36 sps:$4 sm:$0xff]  }
  0xf2   : > { %2917 = vmatpush1.bf16.msra.mxu0 %v5722_v46  ;;  %3422 = vmatpush1.bf16.msra.mxu1 %v5725_v47  ;;  %v5817_v46 = vld [vmem:[%s6248_s15 + $0x640] ss:$16 sps:$4 sm:$0xff]   ;;  %v5820_v47 = vld [vmem:[%s6248_s15 + $0x648] ss:$16 sps:$4 sm:$0xff]  }
  0xf3   : > { %2918 = vmatprep.subr.bf16.mxu0 %v5733_v48  ;;  %3423 = vmatprep.subr.bf16.mxu1 %v5736_v49  ;;  %v5825_v48 = vld [vmem:[%s6248_s15 + $0x664] ss:$16 sps:$4 sm:$0xff]   ;;  %v5828_v49 = vld [vmem:[%s6248_s15 + $0x66c] ss:$16 sps:$4 sm:$0xff]  }
  0xf5   : > { %2868 = vmatmul.mubr.bf16.gmra.mrb[12].mxu0 %v5730_v50  ;;  %3373 = vmatmul.mubr.bf16.gmra.mrb[12].mxu1 %v5730_v50  ;;  %v5829_v50 = vld [vmem:[%s6250_s16 + $0xa4] ss:$36 sps:$4 sm:$0xff]  }
  0xf6   : > { %2919 = vmatpush1.bf16.msra.mxu0 %v5731_v51  ;;  %3424 = vmatpush1.bf16.msra.mxu1 %v5734_v52  ;;  %v5823_v51 = vld [vmem:[%s6248_s15 + $0x660] ss:$16 sps:$4 sm:$0xff]   ;;  %v5826_v52 = vld [vmem:[%s6248_s15 + $0x668] ss:$16 sps:$4 sm:$0xff]  }
  0xf7   : > { %2920 = vmatprep.subr.bf16.mxu0 %v5739_v53  ;;  %3425 = vmatprep.subr.bf16.mxu1 %v5742_v54  ;;  %v5834_v53 = vld [vmem:[%s6248_s15 + $0x684] ss:$16 sps:$4 sm:$0xff]   ;;  %v5837_v54 = vld [vmem:[%s6248_s15 + $0x68c] ss:$16 sps:$4 sm:$0xff]  }
  0xf8   : > { %2877 = vmatprep.mubr.bf16.mxu0 %v5743_v55  ;;  %3382 = vmatprep.mubr.bf16.mxu1 %v5743_v55  ;;  %v5831_v55 = vld [vmem:[%s6250_s16 + $0xa0] ss:$36 sps:$4 sm:$0xff]  }
  0xfa   : > { %2921 = vmatpush1.bf16.msra.mxu0 %v5737_v56  ;;  %3426 = vmatpush1.bf16.msra.mxu1 %v5740_v57  ;;  %v5832_v56 = vld [vmem:[%s6248_s15 + $0x680] ss:$16 sps:$4 sm:$0xff]   ;;  %v5835_v57 = vld [vmem:[%s6248_s15 + $0x688] ss:$16 sps:$4 sm:$0xff]  }
  0xfb   : > { %2922 = vmatprep.subr.bf16.mxu0 %v5748_v58  ;;  %3427 = vmatprep.subr.bf16.mxu1 %v5751_v59  ;;  %v5840_v58 = vld [vmem:[%s6248_s15 + $0x6a4] ss:$16 sps:$4 sm:$0xff]   ;;  %v5843_v59 = vld [vmem:[%s6248_s15 + $0x6ac] ss:$16 sps:$4 sm:$0xff]  }
  0xfd   : > { %2878 = vmatmul.mubr.bf16.gmra.mrb[16].mxu0 %v5745_v60  ;;  %3383 = vmatmul.mubr.bf16.gmra.mrb[16].mxu1 %v5745_v60  ;;  %v5844_v60 = vld [vmem:[%s6250_s16 + $0xec] ss:$36 sps:$4 sm:$0xff]  }
  0xfe   : > { %2923 = vmatpush1.bf16.msra.mxu0 %v5746_v61  ;;  %3428 = vmatpush1.bf16.msra.mxu1 %v5749_v62  ;;  %v5838_v61 = vld [vmem:[%s6248_s15 + $0x6a0] ss:$16 sps:$4 sm:$0xff]   ;;  %v5841_v62 = vld [vmem:[%s6248_s15 + $0x6a8] ss:$16 sps:$4 sm:$0xff]  }
  0xff   : > { %2924 = vmatprep.subr.bf16.mxu0 %v5754_v63  ;;  %3429 = vmatprep.subr.bf16.mxu1 %v5757_v0  ;;  %v5849_v63 = vld [vmem:[%s6248_s15 + $0x6c4] ss:$16 sps:$4 sm:$0xff]   ;;  %v5852_v0 = vld [vmem:[%s6248_s15 + $0x6cc] ss:$16 sps:$4 sm:$0xff]  }
 0x100   : > { %2887 = vmatprep.mubr.bf16.mxu0 %v5758_v1  ;;  %3392 = vmatprep.mubr.bf16.mxu1 %v5758_v1  ;;  %v5846_v1 = vld [vmem:[%s6250_s16 + $0xe8] ss:$36 sps:$4 sm:$0xff]  }
 0x102   : > { %2925 = vmatpush1.bf16.msra.mxu0 %v5752_v2  ;;  %3430 = vmatpush1.bf16.msra.mxu1 %v5755_v3  ;;  %v5847_v2 = vld [vmem:[%s6248_s15 + $0x6c0] ss:$16 sps:$4 sm:$0xff]   ;;  %v5850_v3 = vld [vmem:[%s6248_s15 + $0x6c8] ss:$16 sps:$4 sm:$0xff]  }
 0x103   : > { %2926 = vmatprep.subr.bf16.mxu0 %v5763_v4  ;;  %3431 = vmatprep.subr.bf16.mxu1 %v5766_v5  ;;  %v5855_v4 = vld [vmem:[%s6248_s15 + $0x6e4] ss:$16 sps:$4 sm:$0xff]   ;;  %v5858_v5 = vld [vmem:[%s6248_s15 + $0x6ec] ss:$16 sps:$4 sm:$0xff]  }
 0x105   : > { %2888 = vmatmul.mubr.bf16.gmra.mrb[20].mxu0 %v5760_v6  ;;  %3393 = vmatmul.mubr.bf16.gmra.mrb[20].mxu1 %v5760_v6  ;;  %v5859_v6 = vld [vmem:[%s6250_s16 + $0x134] ss:$36 sps:$4 sm:$0xff]  }
 0x106   : > { %2927 = vmatpush1.bf16.msra.mxu0 %v5761_v8  ;;  %3432 = vmatpush1.bf16.msra.mxu1 %v5764_v9  ;;  %v5856_v8 = vld [vmem:[%s6248_s15 + $0x6e8] ss:$16 sps:$4 sm:$0xff]   ;;  %v5864_v9 = vld [vmem:[%s6248_s15 + $0x704] ss:$16 sps:$4 sm:$0xff]  }
 0x107   : > { %2928 = vmatprep.subr.bf16.mxu0 %v5769_v10  ;;  %3433 = vmatprep.subr.bf16.mxu1 %v5772_v11  ;;  %v5867_v10 = vld [vmem:[%s6248_s15 + $0x70c] ss:$16 sps:$4 sm:$0xff]   ;;  %v5861_v11 = vld [vmem:[%s6250_s16 + $0x130] ss:$36 sps:$4 sm:$0xff]  }
 0x108   : > { %2897 = vmatprep.mubr.bf16.mxu0 %v4882_v12  ;;  %3402 = vmatprep.mubr.bf16.mxu1 %v4882_v12  ;;  %v5862_v12 = vld [vmem:[%s6248_s15 + $0x700] ss:$16 sps:$4 sm:$0xff]  }
 0x10a   : > { %2929 = vmatpush1.bf16.msra.mxu0 %v5767_v13  ;;  %3434 = vmatpush1.bf16.msra.mxu1 %v5770_v14  ;;  %v5865_v13 = vld [vmem:[%s6248_s15 + $0x708] ss:$16 sps:$4 sm:$0xff]   ;;  %v5870_v14 = vld [vmem:[%s6248_s15 + $0x724] ss:$16 sps:$4 sm:$0xff]  }
 0x10b   : > { %2930 = vmatprep.subr.bf16.mxu0 %v5777_v15  ;;  %3435 = vmatprep.subr.bf16.mxu1 %v5780_v16  ;;  %v5873_v15 = vld [vmem:[%s6248_s15 + $0x72c] ss:$16 sps:$4 sm:$0xff]   ;;  %v5868_v16 = vld [vmem:[%s6248_s15 + $0x720] ss:$16 sps:$4 sm:$0xff]  }
 0x10d   : > { %2898 = vmatmul.mubr.bf16.gmra.mrb[28].mxu0 %v4881_v17  ;;  %3403 = vmatmul.mubr.bf16.gmra.mrb[28].mxu1 %v4881_v17  ;;  %v5874_v17 = vld [vmem:[%s6250_s16 + $0x17c] ss:$36 sps:$4 sm:$0xff]  }
 0x10e   : > { %2931 = vmatpush1.bf16.msra.mxu0 %v5775_v18  ;;  %3436 = vmatpush1.bf16.msra.mxu1 %v5778_v19  ;;  %v5871_v18 = vld [vmem:[%s6248_s15 + $0x728] ss:$16 sps:$4 sm:$0xff]   ;;  %v5879_v19 = vld [vmem:[%s6248_s15 + $0x744] ss:$16 sps:$4 sm:$0xff]  }
 0x10f   : > { %2932 = vmatprep.subr.bf16.mxu0 %v5783_v20  ;;  %3437 = vmatprep.subr.bf16.mxu1 %v5786_v21  ;;  %v5882_v20 = vld [vmem:[%s6248_s15 + $0x74c] ss:$16 sps:$4 sm:$0xff]  }
 0x110   : > { %2938 = vmatprep.mubr.bf16.mxu0 %v5801_v22  ;;  %3443 = vmatprep.mubr.bf16.mxu1 %v5801_v22  ;;  %v5876_v21 = vld [vmem:[%s6250_s16 + $0x178] ss:$36 sps:$4 sm:$0xff]   ;;  %v665_v22 = vld [vmem:[%s6250_s16 + $0x1c0] sm:$0x11] }
 0x112   : > { %2933 = vmatpush1.bf16.msra.mxu0 %v5781_v23  ;;  %3438 = vmatpush1.bf16.msra.mxu1 %v5784_v24  ;;  %v5877_v23 = vld [vmem:[%s6248_s15 + $0x740] ss:$16 sps:$4 sm:$0xff]   ;;  %v5880_v24 = vld [vmem:[%s6248_s15 + $0x748] ss:$16 sps:$4 sm:$0xff]  }
 0x113   : > { %2934 = vmatprep.subr.bf16.mxu0 %v5789_v25  ;;  %3439 = vmatprep.subr.bf16.mxu1 %v5792_v26  ;;  %v5885_v25 = vld [vmem:[%s6248_s15 + $0x764] ss:$16 sps:$4 sm:$0xff]   ;;  %v5888_v26 = vld [vmem:[%s6248_s15 + $0x76c] ss:$16 sps:$4 sm:$0xff]  }
 0x116   : > { %2935 = vmatpush1.bf16.msra.mxu0 %v5787_v27  ;;  %3440 = vmatpush1.bf16.msra.mxu1 %v5790_v28  ;;  %v4884_v27 = vcombine.high %v665_v22, %v665_v22  ;;  %v5883_v28 = vld [vmem:[%s6248_s15 + $0x760] ss:$16 sps:$4 sm:$0xff]  }
 0x117   : > { %2936 = vmatprep.subr.bf16.mxu0 %v5795_v29  ;;  %3441 = vmatprep.subr.bf16.mxu1 %v5798_v30  ;;  %v5886_v29 = vld [vmem:[%s6248_s15 + $0x768] ss:$16 sps:$4 sm:$0xff]   ;;  %v5893_v30 = vld [vmem:[%s6248_s15 + $0x784] ss:$16 sps:$4 sm:$0xff]  }
 0x11a   : > { %2937 = vmatpush1.bf16.msra.mxu0 %v5793_v31  ;;  %3442 = vmatpush1.bf16.msra.mxu1 %v5796_v32  ;;  %v5896_v31 = vld [vmem:[%s6248_s15 + $0x78c] ss:$16 sps:$4 sm:$0xff]   ;;  %v4883_v32 = vcombine.low %v665_v22, %v665_v22  ;;  %v5977_v22 = vld [vmem:[%s6248_s15 + $0x8e0] ss:$16 sps:$4 sm:$0xff]  }
 0x11b   : > { %3007 = vmatprep.subr.bf16.mxu0 %v5804_v33  ;;  %3512 = vmatprep.subr.bf16.mxu1 %v5807_v34  ;;  %v5891_v33 = vld [vmem:[%s6248_s15 + $0x780] ss:$16 sps:$4 sm:$0xff]   ;;  %v5894_v34 = vld [vmem:[%s6248_s15 + $0x788] ss:$16 sps:$4 sm:$0xff]  }
 0x11d   : > { %2939 = vmatmul.mubr.bf16.vlgmr.msra.gmra.mrb[0].mxu0 %v5799_v35  ;;  %3444 = vmatmul.mubr.bf16.vlgmr.msra.gmra.mrb[0].mxu1 %v5799_v35  ;;  %v5899_v35 = vld [vmem:[%s6248_s15 + $0x7a4] ss:$16 sps:$4 sm:$0xff]  }
 0x11e   : > { %3008 = vmatpush1.bf16.msra.mxu0 %v5802_v36  ;;  %3513 = vmatpush1.bf16.msra.mxu1 %v5805_v37  ;;  %v5902_v36 = vld [vmem:[%s6248_s15 + $0x7ac] ss:$16 sps:$4 sm:$0xff]  }
 0x11f   : > { %3009 = vmatprep.subr.bf16.mxu0 %v5810_v38  ;;  %3514 = vmatprep.subr.bf16.mxu1 %v5813_v39  ;;  %v5917_v37 = vld [vmem:[%s6250_s16 + $0x1c] ss:$36 sps:$4 sm:$0xff]   ;;  %v5900_v39 = vld [vmem:[%s6248_s15 + $0x7a8] ss:$16 sps:$4 sm:$0xff]  }
 0x120   : > { %2948 = vmatprep.mubr.bf16.mxu0 %v5814_v40  ;;  %3453 = vmatprep.mubr.bf16.mxu1 %v5814_v40  ;;  %v5897_v38 = vld [vmem:[%s6248_s15 + $0x7a0] ss:$16 sps:$4 sm:$0xff]   ;;  %v5905_v40 = vld [vmem:[%s6248_s15 + $0x7c4] ss:$16 sps:$4 sm:$0xff]  }
 0x122   : > { %3010 = vmatpush1.bf16.msra.mxu0 %v5808_v41  ;;  %3515 = vmatpush1.bf16.msra.mxu1 %v5811_v42  ;;  %v5908_v41 = vld [vmem:[%s6248_s15 + $0x7cc] ss:$16 sps:$4 sm:$0xff]   ;;  %v5903_v42 = vld [vmem:[%s6248_s15 + $0x7c0] ss:$16 sps:$4 sm:$0xff]  }
 0x123   : > { %3011 = vmatprep.subr.bf16.mxu0 %v5819_v43  ;;  %3516 = vmatprep.subr.bf16.mxu1 %v5822_v44  ;;  %v5906_v43 = vld [vmem:[%s6248_s15 + $0x7c8] ss:$16 sps:$4 sm:$0xff]   ;;  %v5911_v44 = vld [vmem:[%s6248_s15 + $0x7e4] ss:$16 sps:$4 sm:$0xff]  }
 0x125   : > { %2949 = vmatmul.mubr.bf16.gmra.mrb[4].mxu0 %v5816_v45  ;;  %3454 = vmatmul.mubr.bf16.gmra.mrb[4].mxu1 %v5816_v45  ;;  %v5914_v45 = vld [vmem:[%s6248_s15 + $0x7ec] ss:$16 sps:$4 sm:$0xff]  }
 0x126   : > { %3012 = vmatpush1.bf16.msra.mxu0 %v5817_v46  ;;  %3517 = vmatpush1.bf16.msra.mxu1 %v5820_v47  ;;  %v5909_v46 = vld [vmem:[%s6248_s15 + $0x7e0] ss:$16 sps:$4 sm:$0xff]   ;;  %v5912_v47 = vld [vmem:[%s6248_s15 + $0x7e8] ss:$16 sps:$4 sm:$0xff]  }
 0x127   : > { %3013 = vmatprep.subr.bf16.mxu0 %v5825_v48  ;;  %3518 = vmatprep.subr.bf16.mxu1 %v5828_v49  ;;  %v5920_v48 = vld [vmem:[%s6248_s15 + $0x804] ss:$16 sps:$4 sm:$0xff]   ;;  %v5923_v49 = vld [vmem:[%s6248_s15 + $0x80c] ss:$16 sps:$4 sm:$0xff]  }
 0x128   : > { %2958 = vmatprep.mubr.bf16.mxu0 %v5829_v50  ;;  %3463 = vmatprep.mubr.bf16.mxu1 %v5829_v50  ;;  %v5915_v50 = vld [vmem:[%s6250_s16 + $0x18] ss:$36 sps:$4 sm:$0xff]  }
 0x12a   : > { %3014 = vmatpush1.bf16.msra.mxu0 %v5823_v51  ;;  %3519 = vmatpush1.bf16.msra.mxu1 %v5826_v52  ;;  %v5918_v51 = vld [vmem:[%s6248_s15 + $0x800] ss:$16 sps:$4 sm:$0xff]   ;;  %v5921_v52 = vld [vmem:[%s6248_s15 + $0x808] ss:$16 sps:$4 sm:$0xff]  }
 0x12b   : > { %3015 = vmatprep.subr.bf16.mxu0 %v5834_v53  ;;  %3520 = vmatprep.subr.bf16.mxu1 %v5837_v54  ;;  %v5924_v53 = vld [vmem:[%s6250_s16 + $0x64] ss:$36 sps:$4 sm:$0xff]  }
 0x12c   : > { %v5928_v54 = vld [vmem:[%s6248_s15 + $0x824] ss:$16 sps:$4 sm:$0xff]  }
 0x12d   : > { %2959 = vmatmul.mubr.bf16.gmra.mrb[8].mxu0 %v5831_v55  ;;  %3464 = vmatmul.mubr.bf16.gmra.mrb[8].mxu1 %v5831_v55  ;;  %v5931_v55 = vld [vmem:[%s6248_s15 + $0x82c] ss:$16 sps:$4 sm:$0xff]  }
 0x12e   : > { %3016 = vmatpush1.bf16.msra.mxu0 %v5832_v56  ;;  %3521 = vmatpush1.bf16.msra.mxu1 %v5835_v57  ;;  %v5926_v56 = vld [vmem:[%s6248_s15 + $0x820] ss:$16 sps:$4 sm:$0xff]   ;;  %v5929_v57 = vld [vmem:[%s6248_s15 + $0x828] ss:$16 sps:$4 sm:$0xff]  }
 0x12f   : > { %3017 = vmatprep.subr.bf16.mxu0 %v5840_v58  ;;  %3522 = vmatprep.subr.bf16.mxu1 %v5843_v59  ;;  %v5935_v58 = vld [vmem:[%s6248_s15 + $0x844] ss:$16 sps:$4 sm:$0xff]   ;;  %v5938_v59 = vld [vmem:[%s6248_s15 + $0x84c] ss:$16 sps:$4 sm:$0xff]  }
 0x130   : > { %2968 = vmatprep.mubr.bf16.mxu0 %v5844_v60  ;;  %3473 = vmatprep.mubr.bf16.mxu1 %v5844_v60  ;;  %v5932_v60 = vld [vmem:[%s6250_s16 + $0x60] ss:$36 sps:$4 sm:$0xff]  }
 0x132   : > { %3018 = vmatpush1.bf16.msra.mxu0 %v5838_v61  ;;  %3523 = vmatpush1.bf16.msra.mxu1 %v5841_v62  ;;  %v5933_v61 = vld [vmem:[%s6248_s15 + $0x840] ss:$16 sps:$4 sm:$0xff]  }
 0x133   : > { %3019 = vmatprep.subr.bf16.mxu0 %v5849_v63  ;;  %3524 = vmatprep.subr.bf16.mxu1 %v5852_v0  ;;  %v5939_v62 = vld [vmem:[%s6250_s16 + $0xac] ss:$36 sps:$4 sm:$0xff]   ;;  %v5936_v63 = vld [vmem:[%s6248_s15 + $0x848] ss:$16 sps:$4 sm:$0xff]  }
 0x134   : > { %v5944_v0 = vld [vmem:[%s6248_s15 + $0x864] ss:$16 sps:$4 sm:$0xff]  }
 0x135   : > { %2969 = vmatmul.mubr.bf16.gmra.mrb[12].mxu0 %v5846_v1  ;;  %3474 = vmatmul.mubr.bf16.gmra.mrb[12].mxu1 %v5846_v1  ;;  %v5947_v1 = vld [vmem:[%s6248_s15 + $0x86c] ss:$16 sps:$4 sm:$0xff]  }
 0x136   : > { %3020 = vmatpush1.bf16.msra.mxu0 %v5847_v2  ;;  %3525 = vmatpush1.bf16.msra.mxu1 %v5850_v3  ;;  %v5942_v2 = vld [vmem:[%s6248_s15 + $0x860] ss:$16 sps:$4 sm:$0xff]   ;;  %v5945_v3 = vld [vmem:[%s6248_s15 + $0x868] ss:$16 sps:$4 sm:$0xff]  }
 0x137   : > { %3021 = vmatprep.subr.bf16.mxu0 %v5855_v4  ;;  %3526 = vmatprep.subr.bf16.mxu1 %v5858_v5  ;;  %v5953_v4 = vld [vmem:[%s6248_s15 + $0x884] ss:$16 sps:$4 sm:$0xff]   ;;  %v5956_v5 = vld [vmem:[%s6248_s15 + $0x88c] ss:$16 sps:$4 sm:$0xff]  }
 0x138   : > { %2978 = vmatprep.mubr.bf16.mxu0 %v5859_v6  ;;  %3483 = vmatprep.mubr.bf16.mxu1 %v5859_v6  ;;  %v5941_v6 = vld [vmem:[%s6250_s16 + $0xa8] ss:$36 sps:$4 sm:$0xff]  }
 0x13a   : > { %3022 = vmatpush1.bf16.msra.mxu0 %v5853_v7  ;;  %3527 = vmatpush1.bf16.msra.mxu1 %v5856_v8  ;;  %v5948_v7 = vld [vmem:[%s6250_s16 + $0xf4] ss:$36 sps:$4 sm:$0xff]   ;;  %v5951_v8 = vld [vmem:[%s6248_s15 + $0x880] ss:$16 sps:$4 sm:$0xff]  }
 0x13b   : > { %3023 = vmatprep.subr.bf16.mxu0 %v5864_v9  ;;  %3528 = vmatprep.subr.bf16.mxu1 %v5867_v10  ;;  %v5954_v9 = vld [vmem:[%s6248_s15 + $0x888] ss:$16 sps:$4 sm:$0xff]   ;;  %v5962_v10 = vld [vmem:[%s6248_s15 + $0x8a4] ss:$16 sps:$4 sm:$0xff]  }
 0x13d   : > { %2979 = vmatmul.mubr.bf16.gmra.mrb[16].mxu0 %v5861_v11  ;;  %3484 = vmatmul.mubr.bf16.gmra.mrb[16].mxu1 %v5861_v11  ;;  %v5965_v11 = vld [vmem:[%s6248_s15 + $0x8ac] ss:$16 sps:$4 sm:$0xff]  }
 0x13e   : > { %3024 = vmatpush1.bf16.msra.mxu0 %v5862_v12  ;;  %3529 = vmatpush1.bf16.msra.mxu1 %v5865_v13  ;;  %v5960_v12 = vld [vmem:[%s6248_s15 + $0x8a0] ss:$16 sps:$4 sm:$0xff]   ;;  %v5963_v13 = vld [vmem:[%s6248_s15 + $0x8a8] ss:$16 sps:$4 sm:$0xff]  }
 0x13f   : > { %3025 = vmatprep.subr.bf16.mxu0 %v5870_v14  ;;  %3530 = vmatprep.subr.bf16.mxu1 %v5873_v15  ;;  %v5971_v14 = vld [vmem:[%s6248_s15 + $0x8c4] ss:$16 sps:$4 sm:$0xff]   ;;  %v5974_v15 = vld [vmem:[%s6248_s15 + $0x8cc] ss:$16 sps:$4 sm:$0xff]  }
 0x140   : > { %2988 = vmatprep.mubr.bf16.mxu0 %v5874_v17  ;;  %3493 = vmatprep.mubr.bf16.mxu1 %v5874_v17  ;;  %v5957_v17 = vld [vmem:[%s6250_s16 + $0x13c] ss:$36 sps:$4 sm:$0xff]  }
 0x142   : > { %3026 = vmatpush1.bf16.msra.mxu0 %v5868_v16  ;;  %3531 = vmatpush1.bf16.msra.mxu1 %v5871_v18  ;;  %v5950_v16 = vld [vmem:[%s6250_s16 + $0xf0] ss:$36 sps:$4 sm:$0xff]  }
 0x143   : > { %3027 = vmatprep.subr.bf16.mxu0 %v5879_v19  ;;  %3532 = vmatprep.subr.bf16.mxu1 %v5882_v20  ;;  %v5969_v18 = vld [vmem:[%s6248_s15 + $0x8c0] ss:$16 sps:$4 sm:$0xff]   ;;  %v5972_v19 = vld [vmem:[%s6248_s15 + $0x8c8] ss:$16 sps:$4 sm:$0xff]   ;;  %v5979_v20 = vld [vmem:[%s6248_s15 + $0x8e4] ss:$16 sps:$4 sm:$0xff]  }
 0x145   : > { %2989 = vmatmul.mubr.bf16.gmra.mrb[20].mxu0 %v5876_v21  ;;  %3494 = vmatmul.mubr.bf16.gmra.mrb[20].mxu1 %v5876_v21  ;;  %v5982_v21 = vld [vmem:[%s6248_s15 + $0x8ec] ss:$16 sps:$4 sm:$0xff]  }
 0x146   : > { %3028 = vmatpush1.bf16.msra.mxu0 %v5877_v23  ;;  %3533 = vmatpush1.bf16.msra.mxu1 %v5880_v24  ;;  %v5980_v23 = vld [vmem:[%s6248_s15 + $0x8e8] ss:$16 sps:$4 sm:$0xff]  }
 0x147   : > { %3029 = vmatprep.subr.bf16.mxu0 %v5885_v25  ;;  %3534 = vmatprep.subr.bf16.mxu1 %v5888_v26  ;;  %v5959_v24 = vld [vmem:[%s6250_s16 + $0x138] ss:$36 sps:$4 sm:$0xff]   ;;  %v5966_v25 = vld [vmem:[%s6250_s16 + $0x184] ss:$36 sps:$4 sm:$0xff]  }
 0x148   : > { %2998 = vmatprep.mubr.bf16.mxu0 %v4884_v27  ;;  %3503 = vmatprep.mubr.bf16.mxu1 %v4884_v27  ;;  %v666_v26 = vld [vmem:[%s6250_s16 + $0x1c8] sm:$0x11]  ;;  %v5968_v27 = vld [vmem:[%s6250_s16 + $0x180] ss:$36 sps:$4 sm:$0xff]  }
 0x14a   : > { %3030 = vmatpush1.bf16.msra.mxu0 %v5883_v28  ;;  %3535 = vmatpush1.bf16.msra.mxu1 %v5886_v29  ;;  %v4886_v28 = vcombine.high %v666_v26, %v666_v26  ;;  %v4885_v29 = vcombine.low %v666_v26, %v666_v26 }
 0x14b   : > { %3031 = vmatprep.subr.bf16.mxu0 %v5893_v30  ;;  %3536 = vmatprep.subr.bf16.mxu1 %v5896_v31  ;;  %v6033_v30 = vmov 0   ;;  %v5983_v31 = vld [vmem:[%s6250_s16 + $0x20] ss:$36 sps:$4 sm:$0xff]  }
 0x14d   : > { %2999 = vmatmul.mubr.bf16.gmra.mrb[32].mxu0 %v4883_v32  ;;  %3504 = vmatmul.mubr.bf16.gmra.mrb[32].mxu1 %v4883_v32  ;;  %v5984_v32 = vld [vmem:[%s6250_s16 + $0x68] ss:$36 sps:$4 sm:$0xff]  }
 0x14e   : > { %3032 = vmatpush1.bf16.msra.mxu0 %v5891_v33  ;;  %3537 = vmatpush1.bf16.msra.mxu1 %v5894_v34 }
 0x14f   : > { %3033 = vmatprep.subr.bf16.mxu0 %v5899_v35  ;;  %3538 = vmatprep.subr.bf16.mxu1 %v5902_v36  ;;  %v5985_v35 = vld [vmem:[%s6250_s16 + $0xb0] ss:$36 sps:$4 sm:$0xff]  }
 0x150   : > { %3039 = vmatprep.mubr.bf16.mxu0 %v5917_v37  ;;  %3544 = vmatprep.mubr.bf16.mxu1 %v5917_v37 }
 0x152   : > { %3034 = vmatpush1.bf16.msra.mxu0 %v5897_v38  ;;  %3539 = vmatpush1.bf16.msra.mxu1 %v5900_v39 }
 0x153   : > { %3035 = vmatprep.subr.bf16.mxu0 %v5905_v40  ;;  %3540 = vmatprep.subr.bf16.mxu1 %v5908_v41 }
 0x156   : > { %3036 = vmatpush1.bf16.msra.mxu0 %v5903_v42  ;;  %3541 = vmatpush1.bf16.msra.mxu1 %v5906_v43  ;;  %v5986_v42 = vld [vmem:[%s6250_s16 + $0xf8] ss:$36 sps:$4 sm:$0xff]   ;;  %v5987_v43 = vld [vmem:[%s6250_s16 + $0x140] ss:$36 sps:$4 sm:$0xff]  }
 0x157   : > { %3037 = vmatprep.subr.bf16.mxu0 %v5911_v44  ;;  %3542 = vmatprep.subr.bf16.mxu1 %v5914_v45  ;;  %v5988_v44 = vld [vmem:[%s6250_s16 + $0x188] ss:$36 sps:$4 sm:$0xff]   ;;  %v5989_v45 = vld [vmem:[%s6250_s16 + $0x1d0] ss:$0 sps:$4 sm:$0x11]  }
 0x15a   : > { %3038 = vmatpush1.bf16.msra.mxu0 %v5909_v46  ;;  %3543 = vmatpush1.bf16.msra.mxu1 %v5912_v47 }
 0x15b   : > { %3108 = vmatprep.subr.bf16.mxu0 %v5920_v48  ;;  %3613 = vmatprep.subr.bf16.mxu1 %v5923_v49 }
 0x15d   : > { %3040 = vmatmul.mubr.bf16.vlgmr.msra.gmra.mrb[0].mxu0 %v5915_v50  ;;  %3545 = vmatmul.mubr.bf16.vlgmr.msra.gmra.mrb[0].mxu1 %v5915_v50 }
 0x15e   : > { %3109 = vmatpush1.bf16.msra.mxu0 %v5918_v51  ;;  %3614 = vmatpush1.bf16.msra.mxu1 %v5921_v52 }
 0x15f   : > { %3049 = vmatprep.mubr.bf16.mxu0 %v5924_v53  ;;  %3110 = vmatprep.subr.bf16.mxu0 %v5928_v54 }
 0x160   : > { %3554 = vmatprep.mubr.bf16.mxu1 %v5924_v53  ;;  %3615 = vmatprep.subr.bf16.mxu1 %v5931_v55 }
 0x162   : > { %3111 = vmatpush1.bf16.msra.mxu0 %v5926_v56  ;;  %3616 = vmatpush1.bf16.msra.mxu1 %v5929_v57 }
 0x163   : > { %3112 = vmatprep.subr.bf16.mxu0 %v5935_v58  ;;  %3617 = vmatprep.subr.bf16.mxu1 %v5938_v59 }
 0x165   : > { %3050 = vmatmul.mubr.bf16.gmra.mrb[4].mxu0 %v5932_v60  ;;  %3555 = vmatmul.mubr.bf16.gmra.mrb[4].mxu1 %v5932_v60 }
 0x166   : > { %3059 = vmatprep.mubr.bf16.mxu0 %v5939_v62  ;;  %3113 = vmatpush1.bf16.msra.mxu0 %v5933_v61 }
 0x167   : > { %3564 = vmatprep.mubr.bf16.mxu1 %v5939_v62  ;;  %3618 = vmatpush1.bf16.msra.mxu1 %v5936_v63 }
 0x168   : > { %3114 = vmatprep.subr.bf16.mxu0 %v5944_v0  ;;  %3619 = vmatprep.subr.bf16.mxu1 %v5947_v1 }
 0x16a   : > { %3115 = vmatpush1.bf16.msra.mxu0 %v5942_v2 }
 0x16b   : > { %3620 = vmatpush1.bf16.msra.mxu1 %v5945_v3  ;;  %3116 = vmatprep.subr.bf16.mxu0 %v5953_v4 }
 0x16c   : > { %3621 = vmatprep.subr.bf16.mxu1 %v5956_v5 }
 0x16d   : > { %3060 = vmatmul.mubr.bf16.gmra.mrb[8].mxu0 %v5941_v6  ;;  %3565 = vmatmul.mubr.bf16.gmra.mrb[8].mxu1 %v5941_v6 }
 0x16e   : > { %3069 = vmatprep.mubr.bf16.mxu0 %v5948_v7  ;;  %3574 = vmatprep.mubr.bf16.mxu1 %v5948_v7 }
 0x16f   : > { %3117 = vmatpush1.bf16.msra.mxu0 %v5951_v8  ;;  %3622 = vmatpush1.bf16.msra.mxu1 %v5954_v9 }
 0x170   : > { %3118 = vmatprep.subr.bf16.mxu0 %v5962_v10  ;;  %3623 = vmatprep.subr.bf16.mxu1 %v5965_v11 }
 0x173   : > { %3119 = vmatpush1.bf16.msra.mxu0 %v5960_v12  ;;  %3624 = vmatpush1.bf16.msra.mxu1 %v5963_v13 }
 0x174   : > { %3120 = vmatprep.subr.bf16.mxu0 %v5971_v14  ;;  %3625 = vmatprep.subr.bf16.mxu1 %v5974_v15 }
 0x175   : > { %3070 = vmatmul.mubr.bf16.gmra.mrb[12].mxu0 %v5950_v16  ;;  %3575 = vmatmul.mubr.bf16.gmra.mrb[12].mxu1 %v5950_v16 }
 0x176   : > { %3079 = vmatprep.mubr.bf16.mxu0 %v5957_v17  ;;  %3584 = vmatprep.mubr.bf16.mxu1 %v5957_v17 }
 0x177   : > { %3121 = vmatpush1.bf16.msra.mxu0 %v5969_v18  ;;  %3626 = vmatpush1.bf16.msra.mxu1 %v5972_v19  ;;  %v551_v18 = vld [vmem:[#allocation2] sm:$0xff]  ;;  %v553_v19 = vld [vmem:[#allocation2 + $0x10] sm:$0xff] }
 0x178   : > { %3122 = vmatprep.subr.bf16.mxu0 %v5979_v20  ;;  %3627 = vmatprep.subr.bf16.mxu1 %v5982_v21  ;;  %v552_v20 = vld [vmem:[#allocation2 + $0x8] sm:$0xff]  ;;  %v554_v21 = vld [vmem:[#allocation2 + $0x18] sm:$0xff] }
 0x17b   : > { %3123 = vmatpush1.bf16.msra.mxu0 %v5977_v22  ;;  %3628 = vmatpush1.bf16.msra.mxu1 %v5980_v23 }
 0x17d   : > { %3080 = vmatmul.mubr.bf16.gmra.mrb[16].mxu0 %v5959_v24  ;;  %3585 = vmatmul.mubr.bf16.gmra.mrb[16].mxu1 %v5959_v24  ;;  %v555_v24 = vld [vmem:[#allocation2 + $0x20] sm:$0xff] }
 0x17e   : > { %3089 = vmatprep.mubr.bf16.mxu0 %v5966_v25  ;;  %3594 = vmatprep.mubr.bf16.mxu1 %v5966_v25  ;;  %v557_v25 = vld [vmem:[#allocation2 + $0x30] sm:$0xff] }
 0x185   : > { %3090 = vmatmul.mubr.bf16.gmra.mrb[20].mxu0 %v5968_v27  ;;  %3595 = vmatmul.mubr.bf16.gmra.mrb[20].mxu1 %v5968_v27 }
 0x186   : > { %3099 = vmatprep.mubr.bf16.mxu0 %v4886_v28  ;;  %3604 = vmatprep.mubr.bf16.mxu1 %v4886_v28 }
 0x18d   : > { %3100 = vmatmul.mubr.bf16.gmra.mrb[36].mxu0 %v4885_v29  ;;  %3605 = vmatmul.mubr.bf16.gmra.mrb[36].mxu1 %v4885_v29 }
 0x18e   : > { %3140 = vmatprep.mubr.bf16.mxu0 %v6033_v30  ;;  %3645 = vmatprep.mubr.bf16.mxu1 %v6033_v30 }
 0x195   : > { %3141 = vmatmul.mubr.bf16.vlgmr.msra.gmra.mrb[0].mxu0 %v5983_v31  ;;  %3646 = vmatmul.mubr.bf16.vlgmr.msra.gmra.mrb[0].mxu1 %v5983_v31  ;;  %v558_v31 = vld [vmem:[#allocation2 + $0x38] sm:$0xff] }
 0x196   : > { %3150 = vmatprep.mubr.bf16.mxu0 %v6033_v30  ;;  %3655 = vmatprep.mubr.bf16.mxu1 %v6033_v30 }
 0x19d   : > { %3151 = vmatmul.mubr.bf16.gmra.mrb[4].mxu0 %v5984_v32  ;;  %3656 = vmatmul.mubr.bf16.gmra.mrb[4].mxu1 %v5984_v32 }
 0x19e   : > { %3160 = vmatprep.mubr.bf16.mxu0 %v6033_v30  ;;  %3665 = vmatprep.mubr.bf16.mxu1 %v6033_v30 }
 0x1a0   : > { %v2798_v33 = vpop.f32.mrb[24].mxu0  ;;  %v3303_v34 = vpop.f32.mrb[24].mxu1 }
 0x1a1   : > { %v2800_v36 = vpop.f32.mrb[25].mxu0  ;;  %v3305_v37 = vpop.f32.mrb[25].mxu1 }
 0x1a2   : > { %v2802_v38 = vpop.f32.mrb[26].mxu0  ;;  %v3307_v39 = vpop.f32.mrb[26].mxu1 }
 0x1a3   : > { %v2803_v40 = vpop.f32.mrb[27].mxu0  ;;  %v3308_v41 = vpop.f32.mrb[27].mxu1 }
 0x1a5   : > { %3161 = vmatmul.mubr.bf16.gmra.mrb[8].mxu0 %v5985_v35  ;;  %3666 = vmatmul.mubr.bf16.gmra.mrb[8].mxu1 %v5985_v35 }
 0x1a6   : > { %3170 = vmatprep.mubr.bf16.mxu0 %v6033_v30  ;;  %3675 = vmatprep.mubr.bf16.mxu1 %v6033_v30 }
 0x1ad   : > { %3171 = vmatmul.mubr.bf16.gmra.mrb[12].mxu0 %v5986_v42  ;;  %3676 = vmatmul.mubr.bf16.gmra.mrb[12].mxu1 %v5986_v42  ;;  %v559_v42 = vld [vmem:[#allocation2 + $0x40] sm:$0xff] }
 0x1ae   : > { %3180 = vmatprep.mubr.bf16.mxu0 %v6033_v30  ;;  %3685 = vmatprep.mubr.bf16.mxu1 %v6033_v30 }
 0x1b5   : > { %3181 = vmatmul.mubr.bf16.gmra.mrb[16].mxu0 %v5987_v43  ;;  %3686 = vmatmul.mubr.bf16.gmra.mrb[16].mxu1 %v5987_v43  ;;  %v561_v43 = vld [vmem:[#allocation2 + $0x50] sm:$0xff] }
 0x1b6   : > { %3190 = vmatprep.mubr.bf16.mxu0 %v6033_v30  ;;  %3695 = vmatprep.mubr.bf16.mxu1 %v6033_v30 }
 0x1bd   : > { %3191 = vmatmul.mubr.bf16.gmra.mrb[20].mxu0 %v5988_v44  ;;  %3696 = vmatmul.mubr.bf16.gmra.mrb[20].mxu1 %v5988_v44  ;;  %v560_v44 = vld [vmem:[#allocation2 + $0x48] sm:$0xff] }
 0x1be   : > { %3200 = vmatprep.mubr.bf16.mxu0 %v6033_v30  ;;  %3705 = vmatprep.mubr.bf16.mxu1 %v6033_v30  ;;  %v556_v30 = vld [vmem:[#allocation2 + $0x28] sm:$0xff] }
 0x1c5   : > { %3201 = vmatmul.mubr.bf16.gmra.mrb[40].mxu0 %v5989_v45  ;;  %3706 = vmatmul.mubr.bf16.gmra.mrb[40].mxu1 %v5989_v45  ;;  %v562_v45 = vld [vmem:[#allocation2 + $0x58] sm:$0xff] }
 0x1e0   : > { %v2899_v46 = vpop.f32.mrb[28].mxu0  ;;  %v3404_v47 = vpop.f32.mrb[28].mxu1 }
 0x1e1   : > { %v2900_v48 = vadd.f32 %v2899_v46, %v2798_v33  ;;  %v3405_v49 = vadd.f32 %v3404_v47, %v3303_v34  ;;  %v2901_v50 = vpop.f32.mrb[29].mxu0  ;;  %v3406_v51 = vpop.f32.mrb[29].mxu1 }
 0x1e2   : > { %v2902_v52 = vadd.f32 %v2901_v50, %v2800_v36  ;;  %v3407_v53 = vadd.f32 %v3406_v51, %v3305_v37  ;;  %v2903_v54 = vpop.f32.mrb[30].mxu0  ;;  %v3408_v55 = vpop.f32.mrb[30].mxu1 }
 0x1e3   : > { %v2904_v56 = vpop.f32.mrb[31].mxu0  ;;  %v3409_v57 = vpop.f32.mrb[31].mxu1  ;;  %v564_v54 = vld [vmem:[#allocation2 + $0x68] sm:$0xff]  ;;  %v566_v55 = vld [vmem:[#allocation2 + $0x78] sm:$0xff] }
 0x220   : > { %v3000_v58 = vpop.f32.mrb[32].mxu0  ;;  %v3505_v59 = vpop.f32.mrb[32].mxu1 }
 0x221   : > { %v3001_v60 = vadd.f32 %v3000_v58, %v2900_v48  ;;  %v3506_v61 = vadd.f32 %v3505_v59, %v3405_v49  ;;  %v3002_v62 = vpop.f32.mrb[33].mxu0  ;;  %v3507_v63 = vpop.f32.mrb[33].mxu1  ;;  %v563_v48 = vld [vmem:[#allocation2 + $0x60] sm:$0xff]  ;;  %v565_v49 = vld [vmem:[#allocation2 + $0x70] sm:$0xff] }
 0x222   : > { %v3003_v0 = vadd.f32 %v3002_v62, %v2902_v52  ;;  %v3508_v1 = vadd.f32 %v3507_v63, %v3407_v53  ;;  %v3004_v2 = vpop.f32.mrb[34].mxu0  ;;  %v3509_v3 = vpop.f32.mrb[34].mxu1 }
 0x223   : > { %v3005_v4 = vpop.f32.mrb[35].mxu0  ;;  %v3510_v5 = vpop.f32.mrb[35].mxu1  ;;  %v567_v2 = vld [vmem:[#allocation2 + $0x80] sm:$0xff]  ;;  %v569_v3 = vld [vmem:[#allocation2 + $0x90] sm:$0xff] }
 0x224   : > { %v568_v4 = vld [vmem:[#allocation2 + $0x88] sm:$0xff]  ;;  %v570_v5 = vld [vmem:[#allocation2 + $0x98] sm:$0xff] }
 0x260   : > { %v3101_v6 = vpop.f32.mrb[36].mxu0  ;;  %v3606_v7 = vpop.f32.mrb[36].mxu1 }
 0x261   : > { %v6600_v8 = vadd.f32 %v3101_v6, %v3001_v60  ;;  %v6602_v9 = vadd.f32 %v3606_v7, %v3506_v61  ;;  %v3103_v10 = vpop.f32.mrb[37].mxu0  ;;  %v3608_v11 = vpop.f32.mrb[37].mxu1 }
 0x262   : > { %v6604_v12 = vadd.f32 %v3103_v10, %v3003_v0  ;;  %v6606_v13 = vadd.f32 %v3608_v11, %v3508_v1  ;;  %v3105_v14 = vpop.f32.mrb[38].mxu0  ;;  %v3610_v15 = vpop.f32.mrb[38].mxu1  ;;  %v571_v10 = vld [vmem:[#allocation2 + $0xa0] sm:$0xff]  ;;  %v573_v11 = vld [vmem:[#allocation2 + $0xb0] sm:$0xff] }
 0x263   : > { %v3106_v16 = vpop.f32.mrb[39].mxu0  ;;  %v3611_v17 = vpop.f32.mrb[39].mxu1 }
 0x268   : > { %v3142_v22 = vpop.f32.mrb[0].mxu0  ;;  %v3647_v23 = vpop.f32.mrb[0].mxu1 }
 0x269   : > { %v3714_v26 = vadd.f32 %v3142_v22, %v551_v18  ;;  %v3716_v27 = vadd.f32 %v3647_v23, %v553_v19  ;;  %v3144_v28 = vpop.f32.mrb[1].mxu0  ;;  %v3649_v29 = vpop.f32.mrb[1].mxu1  ;;  %v572_v18 = vld [vmem:[#allocation2 + $0xa8] sm:$0xff]  ;;  %v574_v19 = vld [vmem:[#allocation2 + $0xb8] sm:$0xff] }
 0x26a   : > { %v3715_v32 = vadd.f32 %v3144_v28, %v552_v20  ;;  %v3717_v33 = vadd.f32 %v3649_v29, %v554_v21  ;;  %v3146_v34 = vpop.f32.mrb[2].mxu0  ;;  %v3651_v35 = vpop.f32.mrb[2].mxu1 }
 0x26b   : > { %3766 = vst [vmem:[#allocation2] sm:$0xff] %v3714_v26  ;;  %3768 = vst [vmem:[#allocation2 + $0x10] sm:$0xff] %v3716_v27  ;;  %v3718_v36 = vadd.f32 %v3146_v34, %v555_v24  ;;  %v3720_v37 = vadd.f32 %v3651_v35, %v557_v25  ;;  %v3148_v38 = vpop.f32.mrb[3].mxu0  ;;  %v3653_v39 = vpop.f32.mrb[3].mxu1 }
 0x26c   : > { %3767 = vst [vmem:[#allocation2 + $0x8] sm:$0xff] %v3715_v32  ;;  %3769 = vst [vmem:[#allocation2 + $0x18] sm:$0xff] %v3717_v33  ;;  %v3719_v40 = vadd.f32 %v3148_v38, %v556_v30  ;;  %v3721_v41 = vadd.f32 %v3653_v39, %v558_v31  ;;  %v575_v30 = vld [vmem:[#allocation2 + $0xc0] sm:$0xff]  ;;  %v577_v31 = vld [vmem:[#allocation2 + $0xd0] sm:$0xff] }
 0x26d   : > { %3770 = vst [vmem:[#allocation2 + $0x20] sm:$0xff] %v3718_v36  ;;  %3772 = vst [vmem:[#allocation2 + $0x30] sm:$0xff] %v3720_v37  ;;  %v576_v32 = vld [vmem:[#allocation2 + $0xc8] sm:$0xff]  ;;  %v578_v33 = vld [vmem:[#allocation2 + $0xd8] sm:$0xff] }
 0x26e   : > { %3771 = vst [vmem:[#allocation2 + $0x28] sm:$0xff] %v3719_v40  ;;  %3773 = vst [vmem:[#allocation2 + $0x38] sm:$0xff] %v3721_v41  ;;  %v579_v36 = vld [vmem:[#allocation2 + $0xe0] sm:$0xff]  ;;  %v581_v37 = vld [vmem:[#allocation2 + $0xf0] sm:$0xff] }
 0x270   : > { %v3152_v46 = vpop.f32.mrb[4].mxu0  ;;  %v3657_v47 = vpop.f32.mrb[4].mxu1 }
 0x271   : > { %v3722_v50 = vadd.f32 %v3152_v46, %v559_v42  ;;  %v3724_v51 = vadd.f32 %v3657_v47, %v561_v43  ;;  %v3154_v52 = vpop.f32.mrb[5].mxu0  ;;  %v3659_v53 = vpop.f32.mrb[5].mxu1  ;;  %v580_v42 = vld [vmem:[#allocation2 + $0xe8] sm:$0xff]  ;;  %v582_v43 = vld [vmem:[#allocation2 + $0xf8] sm:$0xff] }
 0x272   : > { %v3723_v56 = vadd.f32 %v3154_v52, %v560_v44  ;;  %v3725_v57 = vadd.f32 %v3659_v53, %v562_v45  ;;  %v3156_v58 = vpop.f32.mrb[6].mxu0  ;;  %v3661_v59 = vpop.f32.mrb[6].mxu1 }
 0x273   : > { %3774 = vst [vmem:[#allocation2 + $0x40] sm:$0xff] %v3722_v50  ;;  %3776 = vst [vmem:[#allocation2 + $0x50] sm:$0xff] %v3724_v51  ;;  %v3726_v60 = vadd.f32 %v3156_v58, %v563_v48  ;;  %v3728_v61 = vadd.f32 %v3661_v59, %v565_v49  ;;  %v3158_v62 = vpop.f32.mrb[7].mxu0  ;;  %v3663_v63 = vpop.f32.mrb[7].mxu1 }
 0x274   : > { %3775 = vst [vmem:[#allocation2 + $0x48] sm:$0xff] %v3723_v56  ;;  %3777 = vst [vmem:[#allocation2 + $0x58] sm:$0xff] %v3725_v57  ;;  %v3727_v0 = vadd.f32 %v3158_v62, %v564_v54  ;;  %v3729_v1 = vadd.f32 %v3663_v63, %v566_v55  ;;  %v583_v54 = vld [vmem:[#allocation2 + $0x100] sm:$0xff]  ;;  %v585_v55 = vld [vmem:[#allocation2 + $0x110] sm:$0xff] }
 0x275   : > { %3778 = vst [vmem:[#allocation2 + $0x60] sm:$0xff] %v3726_v60  ;;  %3780 = vst [vmem:[#allocation2 + $0x70] sm:$0xff] %v3728_v61  ;;  %v584_v56 = vld [vmem:[#allocation2 + $0x108] sm:$0xff]  ;;  %v586_v57 = vld [vmem:[#allocation2 + $0x118] sm:$0xff] }
 0x276   : > { %3779 = vst [vmem:[#allocation2 + $0x68] sm:$0xff] %v3727_v0  ;;  %3781 = vst [vmem:[#allocation2 + $0x78] sm:$0xff] %v3729_v1  ;;  %v587_v60 = vld [vmem:[#allocation2 + $0x120] sm:$0xff]  ;;  %v589_v61 = vld [vmem:[#allocation2 + $0x130] sm:$0xff] }
 0x278   : > { %v3162_v6 = vpop.f32.mrb[8].mxu0  ;;  %v3667_v7 = vpop.f32.mrb[8].mxu1 }
 0x279   : > { %v3730_v14 = vadd.f32 %v3162_v6, %v567_v2  ;;  %v3732_v15 = vadd.f32 %v3667_v7, %v569_v3  ;;  %v3164_v16 = vpop.f32.mrb[9].mxu0  ;;  %v3669_v17 = vpop.f32.mrb[9].mxu1  ;;  %v588_v2 = vld [vmem:[#allocation2 + $0x128] sm:$0xff]  ;;  %v590_v3 = vld [vmem:[#allocation2 + $0x138] sm:$0xff] }
 0x27a   : > { %v3731_v20 = vadd.f32 %v3164_v16, %v568_v4  ;;  %v3733_v21 = vadd.f32 %v3669_v17, %v570_v5  ;;  %v3166_v22 = vpop.f32.mrb[10].mxu0  ;;  %v3671_v23 = vpop.f32.mrb[10].mxu1 }
 0x27b   : > { %3782 = vst [vmem:[#allocation2 + $0x80] sm:$0xff] %v3730_v14  ;;  %3784 = vst [vmem:[#allocation2 + $0x90] sm:$0xff] %v3732_v15  ;;  %v3734_v24 = vadd.f32 %v3166_v22, %v571_v10  ;;  %v3736_v25 = vadd.f32 %v3671_v23, %v573_v11  ;;  %v3168_v26 = vpop.f32.mrb[11].mxu0  ;;  %v3673_v27 = vpop.f32.mrb[11].mxu1 }
 0x27c   : > { %3783 = vst [vmem:[#allocation2 + $0x88] sm:$0xff] %v3731_v20  ;;  %3785 = vst [vmem:[#allocation2 + $0x98] sm:$0xff] %v3733_v21  ;;  %v3735_v28 = vadd.f32 %v3168_v26, %v572_v18  ;;  %v3737_v29 = vadd.f32 %v3673_v27, %v574_v19  ;;  %v591_v18 = vld [vmem:[#allocation2 + $0x140] sm:$0xff]  ;;  %v593_v19 = vld [vmem:[#allocation2 + $0x150] sm:$0xff] }
 0x27d   : > { %3786 = vst [vmem:[#allocation2 + $0xa0] sm:$0xff] %v3734_v24  ;;  %3788 = vst [vmem:[#allocation2 + $0xb0] sm:$0xff] %v3736_v25  ;;  %v592_v20 = vld [vmem:[#allocation2 + $0x148] sm:$0xff]  ;;  %v594_v21 = vld [vmem:[#allocation2 + $0x158] sm:$0xff] }
 0x27e   : > { %3787 = vst [vmem:[#allocation2 + $0xa8] sm:$0xff] %v3735_v28  ;;  %3789 = vst [vmem:[#allocation2 + $0xb8] sm:$0xff] %v3737_v29  ;;  %v595_v24 = vld [vmem:[#allocation2 + $0x160] sm:$0xff]  ;;  %v597_v25 = vld [vmem:[#allocation2 + $0x170] sm:$0xff] }
 0x280   : > { %v3172_v34 = vpop.f32.mrb[12].mxu0  ;;  %v3677_v35 = vpop.f32.mrb[12].mxu1 }
 0x281   : > { %v3738_v38 = vadd.f32 %v3172_v34, %v575_v30  ;;  %v3740_v39 = vadd.f32 %v3677_v35, %v577_v31  ;;  %v3174_v40 = vpop.f32.mrb[13].mxu0  ;;  %v3679_v41 = vpop.f32.mrb[13].mxu1  ;;  %v596_v30 = vld [vmem:[#allocation2 + $0x168] sm:$0xff]  ;;  %v598_v31 = vld [vmem:[#allocation2 + $0x178] sm:$0xff] }
 0x282   : > { %v3739_v44 = vadd.f32 %v3174_v40, %v576_v32  ;;  %v3741_v45 = vadd.f32 %v3679_v41, %v578_v33  ;;  %v3176_v46 = vpop.f32.mrb[14].mxu0  ;;  %v3681_v47 = vpop.f32.mrb[14].mxu1 }
 0x283   : > { %3790 = vst [vmem:[#allocation2 + $0xc0] sm:$0xff] %v3738_v38  ;;  %3792 = vst [vmem:[#allocation2 + $0xd0] sm:$0xff] %v3740_v39  ;;  %v3742_v48 = vadd.f32 %v3176_v46, %v579_v36  ;;  %v3744_v49 = vadd.f32 %v3681_v47, %v581_v37  ;;  %v3178_v50 = vpop.f32.mrb[15].mxu0  ;;  %v3683_v51 = vpop.f32.mrb[15].mxu1 }
 0x284   : > { %3791 = vst [vmem:[#allocation2 + $0xc8] sm:$0xff] %v3739_v44  ;;  %3793 = vst [vmem:[#allocation2 + $0xd8] sm:$0xff] %v3741_v45  ;;  %v3743_v52 = vadd.f32 %v3178_v50, %v580_v42  ;;  %v3745_v53 = vadd.f32 %v3683_v51, %v582_v43  ;;  %v599_v42 = vld [vmem:[#allocation2 + $0x180] sm:$0x3]  ;;  %v601_v44 = vld [vmem:[#allocation2 + $0x190] sm:$0x3] }
 0x285   : > { %3794 = vst [vmem:[#allocation2 + $0xe0] sm:$0xff] %v3742_v48  ;;  %3796 = vst [vmem:[#allocation2 + $0xf0] sm:$0xff] %v3744_v49  ;;  %v600_v48 = vld [vmem:[#allocation2 + $0x188] sm:$0x3]  ;;  %v602_v50 = vld [vmem:[#allocation2 + $0x198] sm:$0x3] }
 0x286   : > { %3795 = vst [vmem:[#allocation2 + $0xe8] sm:$0xff] %v3743_v52  ;;  %3797 = vst [vmem:[#allocation2 + $0xf8] sm:$0xff] %v3745_v53 }
 0x288   : > { %v3182_v58 = vpop.f32.mrb[16].mxu0  ;;  %v3687_v59 = vpop.f32.mrb[16].mxu1 }
 0x289   : > { %v3746_v62 = vadd.f32 %v3182_v58, %v583_v54  ;;  %v3748_v63 = vadd.f32 %v3687_v59, %v585_v55  ;;  %v3184_v0 = vpop.f32.mrb[17].mxu0  ;;  %v3689_v1 = vpop.f32.mrb[17].mxu1 }
 0x28a   : > { %v3747_v4 = vadd.f32 %v3184_v0, %v584_v56  ;;  %v3749_v5 = vadd.f32 %v3689_v1, %v586_v57  ;;  %v3186_v6 = vpop.f32.mrb[18].mxu0  ;;  %v3691_v7 = vpop.f32.mrb[18].mxu1 }
 0x28b   : > { %3798 = vst [vmem:[#allocation2 + $0x100] sm:$0xff] %v3746_v62  ;;  %3800 = vst [vmem:[#allocation2 + $0x110] sm:$0xff] %v3748_v63  ;;  %v3750_v10 = vadd.f32 %v3186_v6, %v587_v60  ;;  %v3752_v11 = vadd.f32 %v3691_v7, %v589_v61  ;;  %v3188_v14 = vpop.f32.mrb[19].mxu0  ;;  %v3693_v15 = vpop.f32.mrb[19].mxu1 }
 0x28c   : > { %3799 = vst [vmem:[#allocation2 + $0x108] sm:$0xff] %v3747_v4  ;;  %3801 = vst [vmem:[#allocation2 + $0x118] sm:$0xff] %v3749_v5  ;;  %v3751_v16 = vadd.f32 %v3188_v14, %v588_v2  ;;  %v3753_v17 = vadd.f32 %v3693_v15, %v590_v3 }
 0x28d   : > { %3802 = vst [vmem:[#allocation2 + $0x120] sm:$0xff] %v3750_v10  ;;  %3804 = vst [vmem:[#allocation2 + $0x130] sm:$0xff] %v3752_v11 }
 0x28e   : > { %3803 = vst [vmem:[#allocation2 + $0x128] sm:$0xff] %v3751_v16  ;;  %3805 = vst [vmem:[#allocation2 + $0x138] sm:$0xff] %v3753_v17 }
 0x290   : > { %v3192_v22 = vpop.f32.mrb[20].mxu0  ;;  %v3697_v23 = vpop.f32.mrb[20].mxu1 }
 0x291   : > { %v3754_v26 = vadd.f32 %v3192_v22, %v591_v18  ;;  %v3756_v27 = vadd.f32 %v3697_v23, %v593_v19  ;;  %v3194_v28 = vpop.f32.mrb[21].mxu0  ;;  %v3699_v29 = vpop.f32.mrb[21].mxu1 }
 0x292   : > { %v3755_v32 = vadd.f32 %v3194_v28, %v592_v20  ;;  %v3757_v33 = vadd.f32 %v3699_v29, %v594_v21  ;;  %v3196_v34 = vpop.f32.mrb[22].mxu0  ;;  %v3701_v35 = vpop.f32.mrb[22].mxu1 }
 0x293   : > { %3806 = vst [vmem:[#allocation2 + $0x140] sm:$0xff] %v3754_v26  ;;  %3808 = vst [vmem:[#allocation2 + $0x150] sm:$0xff] %v3756_v27  ;;  %v3758_v36 = vadd.f32 %v3196_v34, %v595_v24  ;;  %v3760_v37 = vadd.f32 %v3701_v35, %v597_v25  ;;  %v3198_v38 = vpop.f32.mrb[23].mxu0  ;;  %v3703_v39 = vpop.f32.mrb[23].mxu1 }
 0x294   : > { %3807 = vst [vmem:[#allocation2 + $0x148] sm:$0xff] %v3755_v32  ;;  %3809 = vst [vmem:[#allocation2 + $0x158] sm:$0xff] %v3757_v33  ;;  %v3759_v40 = vadd.f32 %v3198_v38, %v596_v30  ;;  %v3761_v41 = vadd.f32 %v3703_v39, %v598_v31 }
 0x295   : > { %3810 = vst [vmem:[#allocation2 + $0x160] sm:$0xff] %v3758_v36  ;;  %3812 = vst [vmem:[#allocation2 + $0x170] sm:$0xff] %v3760_v37 }
 0x296   : > { %3811 = vst [vmem:[#allocation2 + $0x168] sm:$0xff] %v3759_v40  ;;  %3813 = vst [vmem:[#allocation2 + $0x178] sm:$0xff] %v3761_v41 }
 0x298   : > { %v3202_v43 = vpop.f32.mrb[40].mxu0  ;;  %v3707_v45 = vpop.f32.mrb[40].mxu1  ;;  %3821 = sbr.rel (%p5176_p11) target bundleno = 877 (0x36d), region = 74 }
 0x299   : > { %v3203_v46 = vadd.f32 %v3202_v43, %v6600_v8  ;;  %v3708_v47 = vadd.f32 %v3707_v45, %v6602_v9  ;;  %v3204_v49 = vpop.f32.mrb[41].mxu0  ;;  %v3709_v51 = vpop.f32.mrb[41].mxu1 }
 0x29a   : > { %v3205_v52 = vadd.f32 %v3204_v49, %v6604_v12  ;;  %v3710_v53 = vadd.f32 %v3709_v51, %v6606_v13  ;;  %v3206_v54 = vpop.f32.mrb[42].mxu0  ;;  %v3711_v55 = vpop.f32.mrb[42].mxu1 }
 0x29b   : > { %v3762_v56 = vadd.f32 %v3203_v46, %v599_v42  ;;  %v3764_v57 = vadd.f32 %v3708_v47, %v601_v44  ;;  %v3207_v58 = vpop.f32.mrb[43].mxu0  ;;  %v3712_v59 = vpop.f32.mrb[43].mxu1 }
 0x29c   : > { %v3763_v60 = vadd.f32 %v3205_v52, %v600_v48  ;;  %v3765_v61 = vadd.f32 %v3710_v53, %v602_v50 }
 0x29d   : > { %3814 = vst [vmem:[#allocation2 + $0x180] sm:$0x3] %v3762_v56  ;;  %3816 = vst [vmem:[#allocation2 + $0x190] sm:$0x3] %v3764_v57 }
 0x29e   : > { %3815 = vst [vmem:[#allocation2 + $0x188] sm:$0x3] %v3763_v60  ;;  %3817 = vst [vmem:[#allocation2 + $0x198] sm:$0x3] %v3765_v61 }
 0x29f   : > { %v3876_v8 = vlaneseq  ;;  %v3874_v0 = vld [vmem:[%s7449_s2] sm:$0xf]  ;;  %v3823_v2 = vld [vmem:[#allocation2 + $0x8] sm:$0xff]  ;;  %v3824_v3 = vld [vmem:[#allocation2 + $0x10] sm:$0xff]  ;;  %vm3959_vm0 = vcmask 1041408  }
 0x2a0   : > { %v3822_v1 = vld [vmem:[#allocation2] sm:$0xff]  ;;  %v3825_v4 = vld [vmem:[#allocation2 + $0x18] sm:$0xff]  ;;  %v3827_v14 = vld [vmem:[#allocation2 + $0x28] sm:$0xff] }
 0x2a1   : > { %v3877_v9 = vshrl.u32 %v3876_v8, 7  ;;  %v3826_v5 = vld [vmem:[#allocation2 + $0x20] sm:$0xff]  ;;  %v3828_v15 = vld [vmem:[#allocation2 + $0x30] sm:$0xff]  ;;  %v3829_v16 = vld [vmem:[#allocation2 + $0x38] sm:$0xff] }
 0x2a2   : > { %v3830_v17 = vld [vmem:[#allocation2 + $0x40] sm:$0xff]  ;;  %v3831_v18 = vld [vmem:[#allocation2 + $0x48] sm:$0xff]  ;;  %v3832_v19 = vld [vmem:[#allocation2 + $0x50] sm:$0xff] }
 0x2a3   : > { %v6613_v12 = vsub.s32 0, %v3877_v9  ;;  %v6615_v13 = vsub.s32 1, %v3877_v9  ;;  %v6617_v62 = vsub.s32 2, %v3877_v9  ;;  %v6619_v63 = vsub.s32 3, %v3877_v9  ;;  %v3833_v20 = vld [vmem:[#allocation2 + $0x58] sm:$0xff]  ;;  %v3834_v21 = vld [vmem:[#allocation2 + $0x60] sm:$0xff] }
 0x2a4   : > { %v3835_v22 = vld [vmem:[#allocation2 + $0x68] sm:$0xff]  ;;  %v3836_v23 = vld [vmem:[#allocation2 + $0x70] sm:$0xff]  ;;  %v3837_v24 = vld [vmem:[#allocation2 + $0x78] sm:$0xff] }
 0x2a5   : > { %7502 = vst [vmem:[#allocation4_spill] sm:$0xff] %v6613_v12  ;;  %7503 = vst [vmem:[#allocation5_spill] sm:$0xff] %v6615_v13  ;;  %v6625_v6 = vrot.slane %v3874_v0, %v6613_v12  ;;  %v6628_v7 = vrot.slane %v3874_v0, %v6615_v13  ;;  %v6631_v10 = vrot.slane %v3874_v0, %v6617_v62  ;;  %v3838_v25 = vld [vmem:[#allocation2 + $0x80] sm:$0xff]  ;;  %v3839_v30 = vld [vmem:[#allocation2 + $0x88] sm:$0xff] }
 0x2a6   : > { %7504 = vst [vmem:[#allocation6_spill] sm:$0xff] %v6617_v62  ;;  %7505 = vst [vmem:[#allocation7_spill] sm:$0xff] %v6619_v63  ;;  %v6634_v11 = vrot.slane %v3874_v0, %v6619_v63  ;;  %v3840_v31 = vld [vmem:[#allocation2 + $0x90] sm:$0xff]  ;;  %v3841_v32 = vld [vmem:[#allocation2 + $0x98] sm:$0xff] }
 0x2a7   : > { %v6637_v26 = vadd.f32 %v6625_v6, %v3822_v1  ;;  %v6640_v27 = vadd.f32 %v6628_v7, %v3823_v2  ;;  %v6643_v28 = vadd.f32 %v6631_v10, %v3824_v3  ;;  %v6649_v33 = vadd.f32 %v6625_v6, %v3826_v5  ;;  %v3842_v37 = vld [vmem:[#allocation2 + $0xa0] sm:$0xff]  ;;  %v3843_v42 = vld [vmem:[#allocation2 + $0xa8] sm:$0xff]  ;;  %v3844_v43 = vld [vmem:[#allocation2 + $0xb0] sm:$0xff] }
 0x2a8   : > { %v6646_v29 = vadd.f32 %v6634_v11, %v3825_v4  ;;  %v6652_v34 = vadd.f32 %v6628_v7, %v3827_v14  ;;  %v6655_v35 = vadd.f32 %v6631_v10, %v3828_v15  ;;  %v6658_v36 = vadd.f32 %v6634_v11, %v3829_v16  ;;  %v3845_v44 = vld [vmem:[#allocation2 + $0xb8] sm:$0xff]  ;;  %v3846_v49 = vld [vmem:[#allocation2 + $0xc0] sm:$0xff]  ;;  %v3847_v54 = vld [vmem:[#allocation2 + $0xc8] sm:$0xff] }
 0x2a9   : > { %v6661_v38 = vadd.f32 %v6625_v6, %v3830_v17  ;;  %v6664_v39 = vadd.f32 %v6628_v7, %v3831_v18  ;;  %v6667_v40 = vadd.f32 %v6631_v10, %v3832_v19  ;;  %v6670_v41 = vadd.f32 %v6634_v11, %v3833_v20  ;;  %v3848_v55 = vld [vmem:[#allocation2 + $0xd0] sm:$0xff]  ;;  %v3849_v56 = vld [vmem:[#allocation2 + $0xd8] sm:$0xff]  ;;  %v3850_v61 = vld [vmem:[#allocation2 + $0xe0] sm:$0xff] }
 0x2aa   : > { %v6673_v45 = vadd.f32 %v6625_v6, %v3834_v21  ;;  %v6676_v46 = vadd.f32 %v6628_v7, %v3835_v22  ;;  %v6679_v47 = vadd.f32 %v6631_v10, %v3836_v23  ;;  %v6682_v48 = vadd.f32 %v6634_v11, %v3837_v24  ;;  %v3851_v2 = vld [vmem:[#allocation2 + $0xe8] sm:$0xff]  ;;  %v3852_v3 = vld [vmem:[#allocation2 + $0xf0] sm:$0xff]  ;;  %v3853_v4 = vld [vmem:[#allocation2 + $0xf8] sm:$0xff] }
 0x2ab   : > { %v6685_v50 = vadd.f32 %v6625_v6, %v3838_v25  ;;  %v6688_v51 = vadd.f32 %v6628_v7, %v3839_v30  ;;  %v6691_v52 = vadd.f32 %v6631_v10, %v3840_v31  ;;  %v6694_v53 = vadd.f32 %v6634_v11, %v3841_v32  ;;  %v3854_v17 = vld [vmem:[#allocation2 + $0x100] sm:$0xff]  ;;  %v3855_v22 = vld [vmem:[#allocation2 + $0x108] sm:$0xff]  ;;  %v3856_v23 = vld [vmem:[#allocation2 + $0x110] sm:$0xff] }
 0x2ac   : > { %v3948_v57 = vadd.f32 %v6649_v33, %v6637_v26  ;;  %v3968_v58 = vadd.f32 %v6652_v34, %v6640_v27  ;;  %v3987_v59 = vadd.f32 %v6655_v35, %v6643_v28  ;;  %v4006_v60 = vadd.f32 %v6658_v36, %v6646_v29  ;;  %v3857_v24 = vld [vmem:[#allocation2 + $0x118] sm:$0xff]  ;;  %v3868_v62 = vld [vmem:[#allocation2 + $0x170] sm:$0xff] }
 0x2ad   : > { %v6705_v8 = vadd.f32 %v6625_v6, %v3842_v37  ;;  %v6708_v9 = vadd.f32 %v6628_v7, %v3843_v42  ;;  %v6711_v0 = vadd.f32 %v6631_v10, %v3844_v43  ;;  %v6714_v1 = vadd.f32 %v6634_v11, %v3845_v44  ;;  %v3858_v37 = vld [vmem:[#allocation2 + $0x120] sm:$0xff] }
 0x2ae   : > { %v3949_v5 = vadd.f32 %v3948_v57, %v6661_v38  ;;  %v3969_v14 = vadd.f32 %v3968_v58, %v6664_v39  ;;  %v3988_v15 = vadd.f32 %v3987_v59, %v6667_v40  ;;  %v4007_v16 = vadd.f32 %v4006_v60, %v6670_v41 }
 0x2af   : > { %7506 = vst [vmem:[#allocation8_spill] sm:$0xff] %v6711_v0  ;;  %7507 = vst [vmem:[#allocation9_spill] sm:$0xff] %v6714_v1  ;;  %v6721_v18 = vadd.f32 %v6625_v6, %v3846_v49  ;;  %v6724_v19 = vadd.f32 %v6628_v7, %v3847_v54  ;;  %v6727_v20 = vadd.f32 %v6631_v10, %v3848_v55  ;;  %v3859_v54 = vld [vmem:[#allocation2 + $0x128] sm:$0xff]  ;;  %v3860_v55 = vld [vmem:[#allocation2 + $0x130] sm:$0xff] }
 0x2b0   : > { %v6730_v21 = vadd.f32 %v6634_v11, %v3849_v56  ;;  %v3950_v25 = vadd.f32 %v3949_v5, %v6673_v45  ;;  %v3970_v30 = vadd.f32 %v3969_v14, %v6676_v46  ;;  %v3989_v31 = vadd.f32 %v3988_v15, %v6679_v47  ;;  %v3861_v56 = vld [vmem:[#allocation2 + $0x138] sm:$0xff]  ;;  %v3863_v14 = vld [vmem:[#allocation2 + $0x148] sm:$0xff]  ;;  %v3864_v15 = vld [vmem:[#allocation2 + $0x150] sm:$0xff] }
 0x2b1   : > { %7508 = vst [vmem:[#allocation10_spill] sm:$0xff] %v6721_v18  ;;  %7509 = vst [vmem:[#allocation11_spill] sm:$0xff] %v6727_v20  ;;  %v4008_v32 = vadd.f32 %v4007_v16, %v6682_v48  ;;  %v6737_v42 = vadd.f32 %v6625_v6, %v3850_v61  ;;  %v6740_v43 = vadd.f32 %v6628_v7, %v3851_v2  ;;  %v3862_v61 = vld [vmem:[#allocation2 + $0x140] sm:$0xff]  ;;  %v3865_v16 = vld [vmem:[#allocation2 + $0x158] sm:$0xff] }
 0x2b2   : > { %7510 = vst [vmem:[#allocation12_spill] sm:$0xff] %v6730_v21  ;;  %v6743_v44 = vadd.f32 %v6631_v10, %v3852_v3  ;;  %v6746_v49 = vadd.f32 %v6634_v11, %v3853_v4  ;;  %v3951_v57 = vadd.f32 %v3950_v25, %v6685_v50  ;;  %v3971_v58 = vadd.f32 %v3970_v30, %v6688_v51 }
 0x2b3   : > { %v3990_v59 = vadd.f32 %v3989_v31, %v6691_v52  ;;  %v4009_v60 = vadd.f32 %v4008_v32, %v6694_v53  ;;  %v6753_v2 = vadd.f32 %v6625_v6, %v3854_v17  ;;  %v6756_v3 = vadd.f32 %v6628_v7, %v3855_v22  ;;  %v3866_v22 = vld [vmem:[#allocation2 + $0x160] sm:$0xff] }
 0x2b4   : > { %v6759_v4 = vadd.f32 %v6631_v10, %v3856_v23  ;;  %v6762_v5 = vadd.f32 %v6634_v11, %v3857_v24  ;;  %v3952_v25 = vadd.f32 %v3951_v57, %v6705_v8  ;;  %v3972_v30 = vadd.f32 %v3971_v58, %v6708_v9  ;;  %v3867_v57 = vld [vmem:[#allocation2 + $0x168] sm:$0xff]  ;;  %v3869_v58 = vld [vmem:[#allocation2 + $0x178] sm:$0xff] }
 0x2b5   : > { %v3991_v17 = vadd.f32 %v3990_v59, %v6711_v0  ;;  %v4010_v31 = vadd.f32 %v4009_v60, %v6714_v1  ;;  %v6769_v32 = vadd.f32 %v6625_v6, %v3858_v37  ;;  %v6772_v23 = vadd.f32 %v6628_v7, %v3859_v54  ;;  %v3870_v1 = vld [vmem:[#allocation2 + $0x180] sm:$0x3] }
 0x2b6   : > { %v6775_v24 = vadd.f32 %v6631_v10, %v3860_v55  ;;  %v6778_v63 = vadd.f32 %v6634_v11, %v3861_v56  ;;  %v3953_v59 = vadd.f32 %v3952_v25, %v6721_v18  ;;  %v3973_v60 = vadd.f32 %v3972_v30, %v6724_v19  ;;  %v3871_v25 = vld [vmem:[#allocation2 + $0x188] sm:$0x3]  ;;  %v3872_v18 = vld [vmem:[#allocation2 + $0x190] sm:$0x3]  ;;  %v3873_v30 = vld [vmem:[#allocation2 + $0x198] sm:$0x3] }
 0x2b7   : > { %v3992_v13 = vadd.f32 %v3991_v17, %v6727_v20  ;;  %v4011_v37 = vadd.f32 %v4010_v31, %v6730_v21  ;;  %v6785_v54 = vadd.f32 %v6625_v6, %v3862_v61  ;;  %v6788_v55 = vadd.f32 %v6628_v7, %v3863_v14 }
 0x2b8   : > { %7511 = vst [vmem:[#allocation13_spill] sm:$0xff] %v6778_v63  ;;  %v6791_v56 = vadd.f32 %v6631_v10, %v3864_v15  ;;  %v6794_v0 = vadd.f32 %v6634_v11, %v3865_v16  ;;  %v3954_v17 = vadd.f32 %v3953_v59, %v6737_v42  ;;  %v3974_v31 = vadd.f32 %v3973_v60, %v6740_v43 }
 0x2b9   : > { %7512 = vst [vmem:[#allocation14_spill] sm:$0xff] %v6785_v54  ;;  %7513 = vst [vmem:[#allocation15_spill] sm:$0xff] %v6788_v55  ;;  %v3993_v21 = vadd.f32 %v3992_v13, %v6743_v44  ;;  %v4012_v61 = vadd.f32 %v4011_v37, %v6746_v49  ;;  %v6801_v14 = vadd.f32 %v6625_v6, %v3866_v22 }
 0x2ba   : > { %7514 = vst [vmem:[#allocation16_spill] sm:$0xff] %v6791_v56  ;;  %7515 = vst [vmem:[#allocation17_spill] sm:$0xff] %v6794_v0  ;;  %v6804_v15 = vadd.f32 %v6628_v7, %v3867_v57  ;;  %v6807_v16 = vadd.f32 %v6631_v10, %v3868_v62  ;;  %v6810_v20 = vadd.f32 %v6634_v11, %v3869_v58 }
 0x2bb   : > { %7516 = vst [vmem:[#allocation18_spill] sm:$0xff] %v6801_v14  ;;  %v3955_v59 = vadd.f32 %v3954_v17, %v6753_v2  ;;  %v3975_v60 = vadd.f32 %v3974_v31, %v6756_v3  ;;  %v3994_v13 = vadd.f32 %v3993_v21, %v6759_v4  ;;  %v4013_v37 = vadd.f32 %v4012_v61, %v6762_v5 }
 0x2bc   : > { %7517 = vst [vmem:[#allocation19_spill] sm:$0xff] %v6804_v15  ;;  %7518 = vst [vmem:[#allocation20_spill] sm:$0xff] %v6807_v16  ;;  %v6817_v22 = vadd.f32 %v6625_v6, %v3870_v1  ;;  %v6820_v57 = vadd.f32 %v6628_v7, %v3871_v25  ;;  %v6823_v62 = vadd.f32 %v6631_v10, %v3872_v18 }
 0x2bd   : > { %v6826_v58 = vadd.f32 %v6634_v11, %v3873_v30  ;;  %v3956_v17 = vadd.f32 %v3955_v59, %v6769_v32  ;;  %v3976_v31 = vadd.f32 %v3975_v60, %v6772_v23  ;;  %v3995_v21 = vadd.f32 %v3994_v13, %v6775_v24 }
 0x2be   : > { %7519 = vst [vmem:[#allocation21_spill] sm:$0xff] %v6817_v22  ;;  %7520 = vst [vmem:[#allocation22_spill] sm:$0xff] %v6820_v57  ;;  %v4014_v61 = vadd.f32 %v4013_v37, %v6778_v63  ;;  %v3960_v11 = vsel %vm3959_vm0, %v6817_v22, 0.0  ;;  %v3979_v18 = vsel %vm3959_vm0, %v6820_v57, 0.0  ;;  %v3998_v25 = vsel %vm3959_vm0, %v6823_v62, 0.0 }
 0x2bf   : > { %7521 = vst [vmem:[#allocation23_spill] sm:$0xff] %v6823_v62  ;;  %7522 = vst [vmem:[#allocation24_spill] sm:$0xff] %v6826_v58  ;;  %v3957_v6 = vadd.f32 %v3956_v17, %v6785_v54  ;;  %v3977_v1 = vadd.f32 %v3976_v31, %v6788_v55  ;;  %v3996_v7 = vadd.f32 %v3995_v21, %v6791_v56  ;;  %v4017_v30 = vsel %vm3959_vm0, %v6826_v58, 0.0 }
 0x2c0   : > { %v4015_v10 = vadd.f32 %v4014_v61, %v6794_v0 }
 0x2c1   : > { %v3958_v59 = vadd.f32 %v3957_v6, %v6801_v14  ;;  %v3978_v60 = vadd.f32 %v3977_v1, %v6804_v15  ;;  %v3997_v13 = vadd.f32 %v3996_v7, %v6807_v16 }
 0x2c2   : > { %v4016_v37 = vadd.f32 %v4015_v10, %v6810_v20 }
 0x2c3   : > { %v3961_v17 = vadd.f32 %v3960_v11, %v3958_v59  ;;  %v3980_v31 = vadd.f32 %v3979_v18, %v3978_v60  ;;  %v3999_v21 = vadd.f32 %v3998_v25, %v3997_v13 }
 0x2c4   : > { %v4018_v61 = vadd.f32 %v4017_v30, %v4016_v37 }
 0x2c5   : > { %v3962_v22 = vrot.slane %v3961_v17, 4  ;;  %v3981_v57 = vrot.slane %v3980_v31, 4  ;;  %v4000_v0 = vrot.slane %v3999_v21, 4 }
 0x2c6   : > { %v4019_v56 = vrot.slane %v4018_v61, 4 }
 0x2c7   : > { %v3963_v62 = vadd.f32 %v3962_v22, %v3961_v17  ;;  %v3982_v55 = vadd.f32 %v3981_v57, %v3980_v31  ;;  %v4001_v54 = vadd.f32 %v4000_v0, %v3999_v21 }
 0x2c8   : > { %v4020_v58 = vadd.f32 %v4019_v56, %v4018_v61 }
 0x2c9   : > { %v3964_v63 = vrot.slane %v3963_v62, 2  ;;  %v3983_v6 = vrot.slane %v3982_v55, 2  ;;  %v4002_v14 = vrot.slane %v4001_v54, 2 }
 0x2ca   : > { %v4021_v1 = vrot.slane %v4020_v58, 2 }
 0x2cb   : > { %v3965_v15 = vadd.f32 %v3964_v63, %v3963_v62  ;;  %v3984_v7 = vadd.f32 %v3983_v6, %v3982_v55  ;;  %v4003_v16 = vadd.f32 %v4002_v14, %v4001_v54 }
 0x2cc   : > { %v4022_v10 = vadd.f32 %v4021_v1, %v4020_v58 }
 0x2cd   : > { %v3966_v11 = vrot.slane %v3965_v15, 1  ;;  %v3985_v18 = vrot.slane %v3984_v7, 1  ;;  %v4004_v25 = vrot.slane %v4003_v16, 1 }
 0x2ce   : > { %v4023_v13 = vrot.slane %v4022_v10, 1 }
 0x2cf   : > { %v3967_v30 = vadd.f32 %v3966_v11, %v3965_v15  ;;  %v3986_v59 = vadd.f32 %v3985_v18, %v3984_v7  ;;  %v4005_v60 = vadd.f32 %v4004_v25, %v4003_v16 }
 0x2d0   : > { %v4024_v22 = vadd.f32 %v4023_v13, %v4022_v10 }
 0x2d1   : > { %v4025_v37 = vadd.f32 %v3986_v59, %v3967_v30 }
 0x2d3   : > { %v4026_v57 = vadd.f32 %v4025_v37, %v4005_v60 }
 0x2d5   : > { %v4027_v0 = vadd.f32 %v4026_v57, %v4024_v22  ;;  %v7555_v57 = vld [vmem:[#allocation20_spill] sm:$0xff] }
 0x2d7   : > { %v4029_v56 = vmul.f32 0.0025510204, %v4027_v0 }
 0x2d9   : > { %v4033_v17 = vrot.slane %v4029_v56, %v6613_v12 }
 0x2db   : > { %v6850_v31 = vsub.f32 %v6637_v26, %v4033_v17  ;;  %v6853_v63 = vsub.f32 %v6640_v27, %v4033_v17  ;;  %v6856_v54 = vsub.f32 %v6643_v28, %v4033_v17  ;;  %v6859_v55 = vsub.f32 %v6646_v29, %v4033_v17 }
 0x2dc   : > { %v6862_v14 = vsub.f32 %v6649_v33, %v4033_v17  ;;  %v6865_v15 = vsub.f32 %v6652_v34, %v4033_v17  ;;  %v6868_v16 = vsub.f32 %v6655_v35, %v4033_v17  ;;  %v6871_v26 = vsub.f32 %v6658_v36, %v4033_v17 }
 0x2dd   : > { %7523 = vst [vmem:[#allocation25_spill] sm:$0xff] %v6850_v31  ;;  %7524 = vst [vmem:[#allocation26_spill] sm:$0xff] %v6853_v63  ;;  %v6874_v27 = vsub.f32 %v6661_v38, %v4033_v17  ;;  %v6877_v28 = vsub.f32 %v6664_v39, %v4033_v17  ;;  %v6880_v29 = vsub.f32 %v6667_v40, %v4033_v17 }
 0x2de   : > { %7525 = vst [vmem:[#allocation27_spill] sm:$0xff] %v6856_v54  ;;  %7526 = vst [vmem:[#allocation28_spill] sm:$0xff] %v6859_v55  ;;  %v6883_v33 = vsub.f32 %v6670_v41, %v4033_v17  ;;  %v6886_v34 = vsub.f32 %v6673_v45, %v4033_v17  ;;  %v6889_v35 = vsub.f32 %v6676_v46, %v4033_v17 }
 0x2df   : > { %7527 = vst [vmem:[#allocation29_spill] sm:$0xff] %v6862_v14  ;;  %7528 = vst [vmem:[#allocation30_spill] sm:$0xff] %v6865_v15  ;;  %v6892_v36 = vsub.f32 %v6679_v47, %v4033_v17  ;;  %v6895_v38 = vsub.f32 %v6682_v48, %v4033_v17  ;;  %v6898_v39 = vsub.f32 %v6685_v50, %v4033_v17  ;;  %v7543_v48 = vld [vmem:[#allocation8_spill] sm:$0xff]  ;;  %v7544_v50 = vld [vmem:[#allocation9_spill] sm:$0xff] }
 0x2e0   : > { %7529 = vst [vmem:[#allocation31_spill] sm:$0xff] %v6868_v16  ;;  %7530 = vst [vmem:[#allocation32_spill] sm:$0xff] %v6871_v26  ;;  %v6901_v40 = vsub.f32 %v6688_v51, %v4033_v17  ;;  %v6904_v41 = vsub.f32 %v6691_v52, %v4033_v17  ;;  %v6907_v45 = vsub.f32 %v6694_v53, %v4033_v17  ;;  %v7545_v51 = vld [vmem:[#allocation10_spill] sm:$0xff]  ;;  %v7546_v53 = vld [vmem:[#allocation11_spill] sm:$0xff] }
 0x2e1   : > { %7531 = vst [vmem:[#allocation33_spill] sm:$0xff] %v6874_v27  ;;  %7532 = vst [vmem:[#allocation34_spill] sm:$0xff] %v6877_v28  ;;  %v6910_v46 = vsub.f32 %v6705_v8, %v4033_v17  ;;  %v6913_v47 = vsub.f32 %v6708_v9, %v4033_v17  ;;  %v6916_v62 = vsub.f32 %v7543_v48, %v4033_v17  ;;  %v7547_v8 = vld [vmem:[#allocation12_spill] sm:$0xff]  ;;  %v7556_v48 = vld [vmem:[#allocation21_spill] sm:$0xff] }
 0x2e2   : > { %7533 = vst [vmem:[#allocation35_spill] sm:$0xff] %v6880_v29  ;;  %7534 = vst [vmem:[#allocation36_spill] sm:$0xff] %v6883_v33  ;;  %v6919_v58 = vsub.f32 %v7544_v50, %v4033_v17  ;;  %v6922_v21 = vsub.f32 %v7545_v51, %v4033_v17  ;;  %v6925_v52 = vsub.f32 %v6724_v19, %v4033_v17  ;;  %v7558_v51 = vld [vmem:[#allocation22_spill] sm:$0xff] }
 0x2e3   : > { %7535 = vst [vmem:[#allocation37_spill] sm:$0xff] %v6886_v34  ;;  %7536 = vst [vmem:[#allocation38_spill] sm:$0xff] %v6889_v35  ;;  %v6928_v61 = vsub.f32 %v7546_v53, %v4033_v17  ;;  %v6931_v6 = vsub.f32 %v7547_v8, %v4033_v17  ;;  %v6934_v9 = vsub.f32 %v6737_v42, %v4033_v17  ;;  %v7560_v8 = vld [vmem:[#allocation23_spill] sm:$0xff] }
 0x2e4   : > { %7537 = vst [vmem:[#allocation39_spill] sm:$0xff] %v6892_v36  ;;  %7538 = vst [vmem:[#allocation40_spill] sm:$0xff] %v6895_v38  ;;  %v6937_v1 = vsub.f32 %v6740_v43, %v4033_v17  ;;  %v6940_v7 = vsub.f32 %v6743_v44, %v4033_v17  ;;  %v6943_v10 = vsub.f32 %v6746_v49, %v4033_v17 }
 0x2e5   : > { %7539 = vst [vmem:[#allocation41_spill] sm:$0xff] %v6898_v39  ;;  %7540 = vst [vmem:[#allocation42_spill] sm:$0xff] %v6901_v40  ;;  %v6946_v19 = vsub.f32 %v6753_v2, %v4033_v17  ;;  %v6949_v11 = vsub.f32 %v6756_v3, %v4033_v17  ;;  %v6952_v18 = vsub.f32 %v6759_v4, %v4033_v17  ;;  %v7548_v2 = vld [vmem:[#allocation13_spill] sm:$0xff]  ;;  %v7549_v3 = vld [vmem:[#allocation14_spill] sm:$0xff] }
 0x2e6   : > { %7541 = vst [vmem:[#allocation43_spill] sm:$0xff] %v6904_v41  ;;  %7542 = vst [vmem:[#allocation44_spill] sm:$0xff] %v6907_v45  ;;  %v6955_v42 = vsub.f32 %v6762_v5, %v4033_v17  ;;  %v6958_v43 = vsub.f32 %v6769_v32, %v4033_v17  ;;  %v6961_v44 = vsub.f32 %v6772_v23, %v4033_v17  ;;  %v7550_v4 = vld [vmem:[#allocation15_spill] sm:$0xff]  ;;  %v7551_v5 = vld [vmem:[#allocation16_spill] sm:$0xff] }
 0x2e7   : > { %v6964_v49 = vsub.f32 %v6775_v24, %v4033_v17  ;;  %v6967_v25 = vsub.f32 %v7548_v2, %v4033_v17  ;;  %v6970_v30 = vsub.f32 %v7549_v3, %v4033_v17  ;;  %v6973_v59 = vsub.f32 %v7550_v4, %v4033_v17  ;;  %v7552_v32 = vld [vmem:[#allocation17_spill] sm:$0xff]  ;;  %v7553_v23 = vld [vmem:[#allocation18_spill] sm:$0xff]  ;;  %v7554_v24 = vld [vmem:[#allocation19_spill] sm:$0xff] }
 0x2e8   : > { %v6976_v60 = vsub.f32 %v7551_v5, %v4033_v17  ;;  %v6979_v13 = vsub.f32 %v7552_v32, %v4033_v17  ;;  %v6982_v37 = vsub.f32 %v7553_v23, %v4033_v17  ;;  %v6985_v22 = vsub.f32 %v7554_v24, %v4033_v17  ;;  %v7562_v3 = vld [vmem:[#allocation24_spill] sm:$0xff] }
 0x2e9   : > { %v6988_v0 = vsub.f32 %v7555_v57, %v4033_v17  ;;  %v6991_v56 = vsub.f32 %v6810_v20, %v4033_v17  ;;  %v6994_v50 = vsub.f32 %v7556_v48, %v4033_v17  ;;  %v6997_v53 = vsub.f32 %v7558_v51, %v4033_v17 }
 0x2ea   : > { %v7000_v2 = vsub.f32 %v7560_v8, %v4033_v17  ;;  %v7003_v4 = vsub.f32 %v7562_v3, %v4033_v17  ;;  %v4086_v5 = vmul.f32 %v6850_v31, %v6850_v31  ;;  %v4087_v32 = vmul.f32 %v6853_v63, %v6853_v63 }
 0x2eb   : > { %7557 = vst [vmem:[#allocation8_spill] sm:$0xff] %v6994_v50  ;;  %7559 = vst [vmem:[#allocation9_spill] sm:$0xff] %v6997_v53  ;;  %v4088_v20 = vmul.f32 %v6856_v54, %v6856_v54  ;;  %v4089_v23 = vmul.f32 %v6859_v55, %v6859_v55  ;;  %v4090_v24 = vmul.f32 %v6862_v14, %v6862_v14 }
 0x2ec   : > { %7561 = vst [vmem:[#allocation10_spill] sm:$0xff] %v7000_v2  ;;  %7563 = vst [vmem:[#allocation11_spill] sm:$0xff] %v7003_v4  ;;  %v4091_v57 = vmul.f32 %v6865_v15, %v6865_v15  ;;  %v4092_v17 = vmul.f32 %v6868_v16, %v6868_v16  ;;  %v4093_v48 = vmul.f32 %v6871_v26, %v6871_v26 }
 0x2ed   : > { %v4094_v51 = vmul.f32 %v6874_v27, %v6874_v27  ;;  %v4095_v8 = vmul.f32 %v6877_v28, %v6877_v28  ;;  %v4096_v3 = vmul.f32 %v6880_v29, %v6880_v29  ;;  %v4097_v14 = vmul.f32 %v6883_v33, %v6883_v33 }
 0x2ee   : > { %v4098_v15 = vmul.f32 %v6886_v34, %v6886_v34  ;;  %v4099_v16 = vmul.f32 %v6889_v35, %v6889_v35  ;;  %v4100_v26 = vmul.f32 %v6892_v36, %v6892_v36  ;;  %v4101_v27 = vmul.f32 %v6895_v38, %v6895_v38 }
 0x2ef   : > { %v4102_v28 = vmul.f32 %v6898_v39, %v6898_v39  ;;  %v4103_v29 = vmul.f32 %v6901_v40, %v6901_v40  ;;  %v4104_v33 = vmul.f32 %v6904_v41, %v6904_v41  ;;  %v4105_v34 = vmul.f32 %v6907_v45, %v6907_v45 }
 0x2f0   : > { %v4138_v55 = vadd.f32 %v4090_v24, %v4086_v5  ;;  %v4157_v35 = vadd.f32 %v4091_v57, %v4087_v32  ;;  %v4176_v54 = vadd.f32 %v4092_v17, %v4088_v20  ;;  %v4195_v63 = vadd.f32 %v4093_v48, %v4089_v23 }
 0x2f1   : > { %v4106_v36 = vmul.f32 %v6910_v46, %v6910_v46  ;;  %v4107_v38 = vmul.f32 %v6913_v47, %v6913_v47  ;;  %v4108_v39 = vmul.f32 %v6916_v62, %v6916_v62  ;;  %v4109_v40 = vmul.f32 %v6919_v58, %v6919_v58 }
 0x2f2   : > { %v4139_v41 = vadd.f32 %v4138_v55, %v4094_v51  ;;  %v4158_v31 = vadd.f32 %v4157_v35, %v4095_v8  ;;  %v4177_v12 = vadd.f32 %v4176_v54, %v4096_v3  ;;  %v4196_v45 = vadd.f32 %v4195_v63, %v4097_v14 }
 0x2f3   : > { %v4110_v5 = vmul.f32 %v6922_v21, %v6922_v21  ;;  %v4111_v32 = vmul.f32 %v6925_v52, %v6925_v52  ;;  %v4112_v20 = vmul.f32 %v6928_v61, %v6928_v61  ;;  %v4113_v23 = vmul.f32 %v6931_v6, %v6931_v6 }
 0x2f4   : > { %v4140_v24 = vadd.f32 %v4139_v41, %v4098_v15  ;;  %v4159_v57 = vadd.f32 %v4158_v31, %v4099_v16  ;;  %v4178_v17 = vadd.f32 %v4177_v12, %v4100_v26  ;;  %v4197_v48 = vadd.f32 %v4196_v45, %v4101_v27 }
 0x2f5   : > { %v4114_v54 = vmul.f32 %v6934_v9, %v6934_v9  ;;  %v4115_v63 = vmul.f32 %v6937_v1, %v6937_v1  ;;  %v4116_v55 = vmul.f32 %v6940_v7, %v6940_v7  ;;  %v4117_v14 = vmul.f32 %v6943_v10, %v6943_v10 }
 0x2f6   : > { %v4141_v35 = vadd.f32 %v4140_v24, %v4102_v28  ;;  %v4160_v51 = vadd.f32 %v4159_v57, %v4103_v29  ;;  %v4179_v8 = vadd.f32 %v4178_v17, %v4104_v33  ;;  %v4198_v3 = vadd.f32 %v4197_v48, %v4105_v34 }
 0x2f7   : > { %v4118_v12 = vmul.f32 %v6946_v19, %v6946_v19  ;;  %v4119_v31 = vmul.f32 %v6949_v11, %v6949_v11  ;;  %v4120_v15 = vmul.f32 %v6952_v18, %v6952_v18  ;;  %v4121_v16 = vmul.f32 %v6955_v42, %v6955_v42 }
 0x2f8   : > { %v4142_v26 = vadd.f32 %v4141_v35, %v4106_v36  ;;  %v4161_v27 = vadd.f32 %v4160_v51, %v4107_v38  ;;  %v4180_v41 = vadd.f32 %v4179_v8, %v4108_v39  ;;  %v4199_v45 = vadd.f32 %v4198_v3, %v4109_v40 }
 0x2f9   : > { %v4122_v28 = vmul.f32 %v6958_v43, %v6958_v43  ;;  %v4123_v29 = vmul.f32 %v6961_v44, %v6961_v44  ;;  %v4124_v33 = vmul.f32 %v6964_v49, %v6964_v49  ;;  %v4125_v34 = vmul.f32 %v6967_v25, %v6967_v25 }
 0x2fa   : > { %v4143_v24 = vadd.f32 %v4142_v26, %v4110_v5  ;;  %v4162_v57 = vadd.f32 %v4161_v27, %v4111_v32  ;;  %v4181_v17 = vadd.f32 %v4180_v41, %v4112_v20  ;;  %v4200_v48 = vadd.f32 %v4199_v45, %v4113_v23 }
 0x2fb   : > { %v4126_v36 = vmul.f32 %v6970_v30, %v6970_v30  ;;  %v4127_v38 = vmul.f32 %v6973_v59, %v6973_v59  ;;  %v4128_v39 = vmul.f32 %v6976_v60, %v6976_v60  ;;  %v4129_v40 = vmul.f32 %v6979_v13, %v6979_v13 }
 0x2fc   : > { %v4144_v35 = vadd.f32 %v4143_v24, %v4114_v54  ;;  %v4163_v51 = vadd.f32 %v4162_v57, %v4115_v63  ;;  %v4182_v8 = vadd.f32 %v4181_v17, %v4116_v55  ;;  %v4201_v3 = vadd.f32 %v4200_v48, %v4117_v14 }
 0x2fd   : > { %v4130_v5 = vmul.f32 %v6982_v37, %v6982_v37  ;;  %v4131_v32 = vmul.f32 %v6985_v22, %v6985_v22  ;;  %v4132_v20 = vmul.f32 %v6988_v0, %v6988_v0  ;;  %v4133_v23 = vmul.f32 %v6991_v56, %v6991_v56 }
 0x2fe   : > { %v4145_v26 = vadd.f32 %v4144_v35, %v4118_v12  ;;  %v4164_v27 = vadd.f32 %v4163_v51, %v4119_v31  ;;  %v4183_v41 = vadd.f32 %v4182_v8, %v4120_v15  ;;  %v4202_v45 = vadd.f32 %v4201_v3, %v4121_v16 }
 0x2ff   : > { %v4134_v54 = vmul.f32 %v6994_v50, %v6994_v50  ;;  %v4135_v63 = vmul.f32 %v6997_v53, %v6997_v53  ;;  %v4136_v55 = vmul.f32 %v7000_v2, %v7000_v2  ;;  %v4137_v14 = vmul.f32 %v7003_v4, %v7003_v4 }
 0x300   : > { %v4146_v24 = vadd.f32 %v4145_v26, %v4122_v28  ;;  %v4165_v57 = vadd.f32 %v4164_v27, %v4123_v29  ;;  %v4184_v17 = vadd.f32 %v4183_v41, %v4124_v33  ;;  %v4203_v48 = vadd.f32 %v4202_v45, %v4125_v34 }
 0x301   : > { %v4149_v35 = vsel %vm3959_vm0, %v4134_v54, 0.0  ;;  %v4168_v51 = vsel %vm3959_vm0, %v4135_v63, 0.0  ;;  %v4187_v8 = vsel %vm3959_vm0, %v4136_v55, 0.0  ;;  %v4206_v3 = vsel %vm3959_vm0, %v4137_v14, 0.0 }
 0x302   : > { %v4147_v12 = vadd.f32 %v4146_v24, %v4126_v36  ;;  %v4166_v31 = vadd.f32 %v4165_v57, %v4127_v38  ;;  %v4185_v15 = vadd.f32 %v4184_v17, %v4128_v39  ;;  %v4204_v16 = vadd.f32 %v4203_v48, %v4129_v40 }
 0x304   : > { %v4148_v2 = vadd.f32 %v4147_v12, %v4130_v5  ;;  %v4167_v53 = vadd.f32 %v4166_v31, %v4131_v32  ;;  %v4186_v50 = vadd.f32 %v4185_v15, %v4132_v20  ;;  %v4205_v4 = vadd.f32 %v4204_v16, %v4133_v23 }
 0x306   : > { %v4150_v28 = vadd.f32 %v4149_v35, %v4148_v2  ;;  %v4169_v29 = vadd.f32 %v4168_v51, %v4167_v53  ;;  %v4188_v33 = vadd.f32 %v4187_v8, %v4186_v50  ;;  %v4207_v34 = vadd.f32 %v4206_v3, %v4205_v4  ;;  %v4276_v51 = vld [vmem:[%s7450_s3] sm:$0xf] }
 0x307   : > { %v4350_v8 = vld [vmem:[%s7451_s4] sm:$0xf] }
 0x308   : > { %v4151_v36 = vrot.slane %v4150_v28, 4  ;;  %v4170_v38 = vrot.slane %v4169_v29, 4  ;;  %v4189_v39 = vrot.slane %v4188_v33, 4  ;;  %v4208_v40 = vrot.slane %v4207_v34, 4 }
 0x30a   : > { %v4152_v26 = vadd.f32 %v4151_v36, %v4150_v28  ;;  %v4171_v27 = vadd.f32 %v4170_v38, %v4169_v29  ;;  %v4190_v41 = vadd.f32 %v4189_v39, %v4188_v33  ;;  %v4209_v45 = vadd.f32 %v4208_v40, %v4207_v34  ;;  %v7564_v28 = vld [vmem:[#allocation4_spill] sm:$0xff]  ;;  %v7565_v34 = vld [vmem:[#allocation5_spill] sm:$0xff]  ;;  %v7566_v38 = vld [vmem:[#allocation6_spill] sm:$0xff] }
 0x30b   : > { %v7120_v29 = vrot.slane %v4276_v51, %v7564_v28  ;;  %v7126_v36 = vrot.slane %v4276_v51, %v7565_v34  ;;  %v7129_v39 = vrot.slane %v4276_v51, %v7566_v38  ;;  %v7567_v40 = vld [vmem:[#allocation7_spill] sm:$0xff] }
 0x30c   : > { %v4153_v54 = vrot.slane %v4152_v26, 2  ;;  %v4172_v63 = vrot.slane %v4171_v27, 2  ;;  %v4191_v55 = vrot.slane %v4190_v41, 2  ;;  %v4210_v14 = vrot.slane %v4209_v45, 2 }
 0x30e   : > { %v4154_v5 = vadd.f32 %v4153_v54, %v4152_v26  ;;  %v4173_v32 = vadd.f32 %v4172_v63, %v4171_v27  ;;  %v4192_v20 = vadd.f32 %v4191_v55, %v4190_v41  ;;  %v4211_v23 = vadd.f32 %v4210_v14, %v4209_v45  ;;  %v7568_v63 = vld [vmem:[#allocation25_spill] sm:$0xff]  ;;  %v7569_v14 = vld [vmem:[#allocation26_spill] sm:$0xff] }
 0x30f   : > { %v7132_v26 = vrot.slane %v4276_v51, %v7567_v40  ;;  %v7135_v27 = vrot.slane %v4350_v8, %v7564_v28  ;;  %v7138_v41 = vrot.slane %v4350_v8, %v7565_v34  ;;  %v7141_v45 = vrot.slane %v4350_v8, %v7566_v38 }
 0x310   : > { %v4155_v2 = vrot.slane %v4154_v5, 1  ;;  %v4174_v53 = vrot.slane %v4173_v32, 1  ;;  %v4193_v50 = vrot.slane %v4192_v20, 1  ;;  %v4212_v4 = vrot.slane %v4211_v23, 1 }
 0x311   : > { %v7144_v54 = vrot.slane %v4350_v8, %v7567_v40 }
 0x312   : > { %v4156_v24 = vadd.f32 %v4155_v2, %v4154_v5  ;;  %v4175_v57 = vadd.f32 %v4174_v53, %v4173_v32  ;;  %v4194_v17 = vadd.f32 %v4193_v50, %v4192_v20  ;;  %v4213_v48 = vadd.f32 %v4212_v4, %v4211_v23  ;;  %v7570_v32 = vld [vmem:[#allocation27_spill] sm:$0xff]  ;;  %v7571_v23 = vld [vmem:[#allocation28_spill] sm:$0xff]  ;;  %v7572_v53 = vld [vmem:[#allocation29_spill] sm:$0xff] }
 0x313   : > { %v7573_v4 = vld [vmem:[#allocation30_spill] sm:$0xff] }
 0x314   : > { %v4214_v12 = vadd.f32 %v4175_v57, %v4156_v24  ;;  %v7574_v57 = vld [vmem:[#allocation31_spill] sm:$0xff] }
 0x316   : > { %v4215_v31 = vadd.f32 %v4214_v12, %v4194_v17 }
 0x318   : > { %v4216_v15 = vadd.f32 %v4215_v31, %v4213_v48  ;;  %v7575_v48 = vld [vmem:[#allocation32_spill] sm:$0xff] }
 0x31a   : > { %v4217_v16 = vmul.f32 0.0025510204, %v4216_v15 }
 0x31c   : > { %v4218_v35 = vadd.f32 1e-05, %v4217_v16 }
 0x31e   : > { %5990 = vrsqrt.f32 %v4218_v35 }
 0x328   : > { %v5991_v3 = vpop.eup %5990 }
 0x329   : > { %v7123_v33 = vrot.slane %v5991_v3, %v7564_v28 }
 0x32b   : > { %v4224_v55 = vmul.f32 %v7123_v33, %v7568_v63  ;;  %v4225_v5 = vmul.f32 %v7123_v33, %v7569_v14  ;;  %v4226_v20 = vmul.f32 %v7123_v33, %v7570_v32  ;;  %v4227_v2 = vmul.f32 %v7123_v33, %v7571_v23 }
 0x32c   : > { %v4228_v50 = vmul.f32 %v7123_v33, %v7572_v53  ;;  %v4229_v24 = vmul.f32 %v7123_v33, %v7573_v4  ;;  %v4230_v17 = vmul.f32 %v7123_v33, %v7574_v57  ;;  %v4231_v12 = vmul.f32 %v7123_v33, %v7575_v48 }
 0x32d   : > { %v4298_v31 = vmul.f32 %v7120_v29, %v4224_v55  ;;  %v4299_v15 = vmul.f32 %v7126_v36, %v4225_v5  ;;  %v4300_v16 = vmul.f32 %v7129_v39, %v4226_v20  ;;  %v4301_v35 = vmul.f32 %v7132_v26, %v4227_v2 }
 0x32e   : > { %v4302_v51 = vmul.f32 %v7120_v29, %v4228_v50  ;;  %v4303_v8 = vmul.f32 %v7126_v36, %v4229_v24  ;;  %v4304_v3 = vmul.f32 %v7129_v39, %v4230_v17  ;;  %v4305_v28 = vmul.f32 %v7132_v26, %v4231_v12  ;;  %v7576_v12 = vld [vmem:[#allocation33_spill] sm:$0xff] }
 0x32f   : > { %v4372_v34 = vadd.f32 %v7135_v27, %v4298_v31  ;;  %v4373_v38 = vadd.f32 %v7138_v41, %v4299_v15  ;;  %v4374_v40 = vadd.f32 %v7141_v45, %v4300_v16  ;;  %v4375_v63 = vadd.f32 %v7144_v54, %v4301_v35  ;;  %v7577_v15 = vld [vmem:[#allocation34_spill] sm:$0xff] }
 0x330   : > { %v4376_v55 = vadd.f32 %v7135_v27, %v4302_v51  ;;  %v4377_v14 = vadd.f32 %v7138_v41, %v4303_v8  ;;  %v4378_v5 = vadd.f32 %v7141_v45, %v4304_v3  ;;  %v4379_v32 = vadd.f32 %v7144_v54, %v4305_v28  ;;  %v7578_v8 = vld [vmem:[#allocation35_spill] sm:$0xff]  ;;  %v7579_v28 = vld [vmem:[#allocation36_spill] sm:$0xff] }
 0x331   : > { %v4424_v20 = vmax.f32 %v4372_v34, 0.0  ;;  %v4425_v23 = vmax.f32 %v4373_v38, 0.0  ;;  %v4426_v2 = vmax.f32 %v4374_v40, 0.0  ;;  %v4427_v53 = vmax.f32 %v4375_v63, 0.0  ;;  %v7580_v63 = vld [vmem:[#allocation37_spill] sm:$0xff] }
 0x332   : > { %v4428_v50 = vmax.f32 %v4376_v55, 0.0  ;;  %v4429_v4 = vmax.f32 %v4377_v14, 0.0  ;;  %v4430_v24 = vmax.f32 %v4378_v5, 0.0  ;;  %v4431_v57 = vmax.f32 %v4379_v32, 0.0  ;;  %v7581_v14 = vld [vmem:[#allocation38_spill] sm:$0xff] }
 0x333   : > { %v5209_v17 = vpack.c.bf16 %v4425_v23, %v4424_v20  ;;  %v5210_v48 = vpack.c.bf16 %v4427_v53, %v4426_v2  ;;  %v4232_v31 = vmul.f32 %v7123_v33, %v7576_v12  ;;  %v4233_v16 = vmul.f32 %v7123_v33, %v7577_v15  ;;  %v7582_v23 = vld [vmem:[#allocation39_spill] sm:$0xff]  ;;  %v7583_v53 = vld [vmem:[#allocation40_spill] sm:$0xff] }
 0x334   : > { %v5211_v35 = vpack.c.bf16 %v4429_v4, %v4428_v50  ;;  %v5212_v51 = vpack.c.bf16 %v4431_v57, %v4430_v24  ;;  %v4234_v3 = vmul.f32 %v7123_v33, %v7578_v8  ;;  %v4235_v34 = vmul.f32 %v7123_v33, %v7579_v28 }
 0x335   : > { %4636 = vst [vmem:[%s7452_s5] sm:$0xff] %v5209_v17  ;;  %4637 = vst [vmem:[%s7452_s5 + $0x8] sm:$0xff] %v5210_v48  ;;  %v4306_v38 = vmul.f32 %v7120_v29, %v4232_v31  ;;  %v4307_v40 = vmul.f32 %v7126_v36, %v4233_v16  ;;  %v4236_v55 = vmul.f32 %v7123_v33, %v7580_v63 }
 0x336   : > { %v4237_v5 = vmul.f32 %v7123_v33, %v7581_v14  ;;  %4638 = vst [vmem:[%s7452_s5 + $0x10] sm:$0xff] %v5211_v35  ;;  %4639 = vst [vmem:[%s7452_s5 + $0x18] sm:$0xff] %v5212_v51  ;;  %v4308_v32 = vmul.f32 %v7129_v39, %v4234_v3  ;;  %v4309_v20 = vmul.f32 %v7132_v26, %v4235_v34  ;;  %v7584_v14 = vld [vmem:[#allocation41_spill] sm:$0xff] }
 0x337   : > { %v4238_v2 = vmul.f32 %v7123_v33, %v7582_v23  ;;  %v4239_v50 = vmul.f32 %v7123_v33, %v7583_v53  ;;  %v4380_v4 = vadd.f32 %v7135_v27, %v4306_v38  ;;  %v4381_v24 = vadd.f32 %v7138_v41, %v4307_v40 }
 0x338   : > { %v4310_v57 = vmul.f32 %v7120_v29, %v4236_v55  ;;  %v4311_v17 = vmul.f32 %v7126_v36, %v4237_v5  ;;  %v4382_v48 = vadd.f32 %v7141_v45, %v4308_v32  ;;  %v4383_v12 = vadd.f32 %v7144_v54, %v4309_v20 }
 0x339   : > { %v4312_v31 = vmul.f32 %v7129_v39, %v4238_v2  ;;  %v4313_v15 = vmul.f32 %v7132_v26, %v4239_v50  ;;  %v4432_v16 = vmax.f32 %v4380_v4, 0.0  ;;  %v4433_v35 = vmax.f32 %v4381_v24, 0.0  ;;  %v7585_v2 = vld [vmem:[#allocation42_spill] sm:$0xff]  ;;  %v7586_v24 = vld [vmem:[#allocation43_spill] sm:$0xff] }
 0x33a   : > { %v4384_v51 = vadd.f32 %v7135_v27, %v4310_v57  ;;  %v4385_v8 = vadd.f32 %v7138_v41, %v4311_v17  ;;  %v4434_v3 = vmax.f32 %v4382_v48, 0.0  ;;  %v4435_v28 = vmax.f32 %v4383_v12, 0.0  ;;  %v7587_v17 = vld [vmem:[#allocation44_spill] sm:$0xff] }
 0x33b   : > { %v4386_v34 = vadd.f32 %v7141_v45, %v4312_v31  ;;  %v4387_v38 = vadd.f32 %v7144_v54, %v4313_v15  ;;  %v5213_v40 = vpack.c.bf16 %v4433_v35, %v4432_v16  ;;  %v4240_v5 = vmul.f32 %v7123_v33, %v7584_v14 }
 0x33c   : > { %v4436_v63 = vmax.f32 %v4384_v51, 0.0  ;;  %v4437_v55 = vmax.f32 %v4385_v8, 0.0  ;;  %v5214_v32 = vpack.c.bf16 %v4435_v28, %v4434_v3  ;;  %v4241_v53 = vmul.f32 %v7123_v33, %v7585_v2 }
 0x33d   : > { %v4438_v20 = vmax.f32 %v4386_v34, 0.0  ;;  %v4439_v23 = vmax.f32 %v4387_v38, 0.0  ;;  %4640 = vst [vmem:[%s7452_s5 + $0x20] sm:$0xff] %v5213_v40  ;;  %v4314_v4 = vmul.f32 %v7120_v29, %v4240_v5  ;;  %v4242_v57 = vmul.f32 %v7123_v33, %v7586_v24 }
 0x33e   : > { %v5215_v50 = vpack.c.bf16 %v4437_v55, %v4436_v63  ;;  %v4243_v48 = vmul.f32 %v7123_v33, %v7587_v17  ;;  %4641 = vst [vmem:[%s7452_s5 + $0x28] sm:$0xff] %v5214_v32  ;;  %v4315_v31 = vmul.f32 %v7126_v36, %v4241_v53  ;;  %v4244_v15 = vmul.f32 %v7123_v33, %v6910_v46 }
 0x33f   : > { %v5216_v12 = vpack.c.bf16 %v4439_v23, %v4438_v20  ;;  %v4245_v16 = vmul.f32 %v7123_v33, %v6913_v47  ;;  %v4388_v35 = vadd.f32 %v7135_v27, %v4314_v4  ;;  %v4316_v51 = vmul.f32 %v7129_v39, %v4242_v57 }
 0x340   : > { %4642 = vst [vmem:[%s7452_s5 + $0x30] sm:$0xff] %v5215_v50  ;;  %v4317_v8 = vmul.f32 %v7132_v26, %v4243_v48  ;;  %v4246_v3 = vmul.f32 %v7123_v33, %v6916_v62  ;;  %v4389_v46 = vadd.f32 %v7138_v41, %v4315_v31  ;;  %v4318_v47 = vmul.f32 %v7120_v29, %v4244_v15 }
 0x341   : > { %4643 = vst [vmem:[%s7452_s5 + $0x38] sm:$0xff] %v5216_v12  ;;  %v4319_v28 = vmul.f32 %v7126_v36, %v4245_v16  ;;  %v4247_v34 = vmul.f32 %v7123_v33, %v6919_v58  ;;  %v4440_v38 = vmax.f32 %v4388_v35, 0.0  ;;  %v4390_v40 = vadd.f32 %v7141_v45, %v4316_v51 }
 0x342   : > { %v4391_v63 = vadd.f32 %v7144_v54, %v4317_v8  ;;  %v4320_v62 = vmul.f32 %v7129_v39, %v4246_v3  ;;  %v4441_v55 = vmax.f32 %v4389_v46, 0.0  ;;  %v4392_v14 = vadd.f32 %v7135_v27, %v4318_v47 }
 0x343   : > { %v4393_v5 = vadd.f32 %v7138_v41, %v4319_v28  ;;  %v4321_v32 = vmul.f32 %v7132_v26, %v4247_v34  ;;  %v4442_v20 = vmax.f32 %v4390_v40, 0.0  ;;  %v4248_v58 = vmul.f32 %v7123_v33, %v6922_v21 }
 0x344   : > { %v4443_v23 = vmax.f32 %v4391_v63, 0.0  ;;  %v4394_v2 = vadd.f32 %v7141_v45, %v4320_v62  ;;  %v5217_v53 = vpack.c.bf16 %v4441_v55, %v4440_v38  ;;  %v4444_v50 = vmax.f32 %v4392_v14, 0.0 }
 0x345   : > { %v4445_v4 = vmax.f32 %v4393_v5, 0.0  ;;  %v4395_v24 = vadd.f32 %v7144_v54, %v4321_v32  ;;  %v4249_v48 = vmul.f32 %v7123_v33, %v6925_v52  ;;  %v4322_v12 = vmul.f32 %v7120_v29, %v4248_v58 }
 0x346   : > { %v5218_v57 = vpack.c.bf16 %v4443_v23, %v4442_v20  ;;  %v4446_v17 = vmax.f32 %v4394_v2, 0.0  ;;  %4644 = vst [vmem:[%s7452_s5 + $0x40] sm:$0xff] %v5217_v53  ;;  %v4250_v21 = vmul.f32 %v7123_v33, %v6928_v61  ;;  %v4251_v16 = vmul.f32 %v7123_v33, %v6931_v6 }
 0x347   : > { %v5219_v31 = vpack.c.bf16 %v4445_v4, %v4444_v50  ;;  %v4447_v15 = vmax.f32 %v4395_v24, 0.0  ;;  %v4323_v52 = vmul.f32 %v7126_v36, %v4249_v48  ;;  %v4396_v35 = vadd.f32 %v7135_v27, %v4322_v12 }
 0x348   : > { %4645 = vst [vmem:[%s7452_s5 + $0x48] sm:$0xff] %v5218_v57  ;;  %v4252_v51 = vmul.f32 %v7123_v33, %v6934_v9  ;;  %v4253_v8 = vmul.f32 %v7123_v33, %v6937_v1  ;;  %v4324_v6 = vmul.f32 %v7129_v39, %v4250_v21  ;;  %v4325_v3 = vmul.f32 %v7132_v26, %v4251_v16 }
 0x349   : > { %4646 = vst [vmem:[%s7452_s5 + $0x50] sm:$0xff] %v5219_v31  ;;  %v5220_v61 = vpack.c.bf16 %v4447_v15, %v4446_v17  ;;  %v4254_v46 = vmul.f32 %v7123_v33, %v6940_v7  ;;  %v4397_v47 = vadd.f32 %v7138_v41, %v4323_v52  ;;  %v4448_v28 = vmax.f32 %v4396_v35, 0.0 }
 0x34a   : > { %v4326_v9 = vmul.f32 %v7120_v29, %v4252_v51  ;;  %v4327_v34 = vmul.f32 %v7126_v36, %v4253_v8  ;;  %v4398_v1 = vadd.f32 %v7141_v45, %v4324_v6  ;;  %v4399_v38 = vadd.f32 %v7144_v54, %v4325_v3 }
 0x34b   : > { %4647 = vst [vmem:[%s7452_s5 + $0x58] sm:$0xff] %v5220_v61  ;;  %v4255_v40 = vmul.f32 %v7123_v33, %v6943_v10  ;;  %v4328_v7 = vmul.f32 %v7129_v39, %v4254_v46  ;;  %v4449_v63 = vmax.f32 %v4397_v47, 0.0  ;;  %v4256_v14 = vmul.f32 %v7123_v33, %v6946_v19 }
 0x34c   : > { %v4400_v62 = vadd.f32 %v7135_v27, %v4326_v9  ;;  %v4401_v55 = vadd.f32 %v7138_v41, %v4327_v34  ;;  %v4450_v5 = vmax.f32 %v4398_v1, 0.0  ;;  %v4451_v32 = vmax.f32 %v4399_v38, 0.0 }
 0x34d   : > { %v4329_v20 = vmul.f32 %v7132_v26, %v4255_v40  ;;  %v4402_v23 = vadd.f32 %v7141_v45, %v4328_v7  ;;  %v5221_v2 = vpack.c.bf16 %v4449_v63, %v4448_v28  ;;  %v4257_v10 = vmul.f32 %v7123_v33, %v6949_v11 }
 0x34e   : > { %v4452_v58 = vmax.f32 %v4400_v62, 0.0  ;;  %v4453_v53 = vmax.f32 %v4401_v55, 0.0  ;;  %v5222_v50 = vpack.c.bf16 %v4451_v32, %v4450_v5  ;;  %v4330_v57 = vmul.f32 %v7120_v29, %v4256_v14 }
 0x34f   : > { %v4403_v4 = vadd.f32 %v7144_v54, %v4329_v20  ;;  %v4454_v24 = vmax.f32 %v4402_v23, 0.0  ;;  %4648 = vst [vmem:[%s7452_s5 + $0x60] sm:$0xff] %v5221_v2  ;;  %v4331_v17 = vmul.f32 %v7126_v36, %v4257_v10  ;;  %v4258_v48 = vmul.f32 %v7123_v33, %v6952_v18 }
 0x350   : > { %v5223_v19 = vpack.c.bf16 %v4453_v53, %v4452_v58  ;;  %v4259_v12 = vmul.f32 %v7123_v33, %v6955_v42  ;;  %4649 = vst [vmem:[%s7452_s5 + $0x68] sm:$0xff] %v5222_v50  ;;  %v4404_v31 = vadd.f32 %v7135_v27, %v4330_v57  ;;  %v4260_v15 = vmul.f32 %v7123_v33, %v6958_v43 }
 0x351   : > { %v4455_v11 = vmax.f32 %v4403_v4, 0.0  ;;  %v4261_v21 = vmul.f32 %v7123_v33, %v6961_v44  ;;  %v4405_v18 = vadd.f32 %v7138_v41, %v4331_v17  ;;  %v4332_v42 = vmul.f32 %v7129_v39, %v4258_v48 }
 0x352   : > { %4650 = vst [vmem:[%s7452_s5 + $0x70] sm:$0xff] %v5223_v19  ;;  %v4333_v16 = vmul.f32 %v7132_v26, %v4259_v12  ;;  %v4262_v52 = vmul.f32 %v7123_v33, %v6964_v49  ;;  %v4456_v51 = vmax.f32 %v4404_v31, 0.0  ;;  %v4334_v43 = vmul.f32 %v7120_v29, %v4260_v15  ;;  %v7588_v31 = vld [vmem:[#allocation8_spill] sm:$0xff] }
 0x353   : > { %v5224_v35 = vpack.c.bf16 %v4455_v11, %v4454_v24  ;;  %v4335_v8 = vmul.f32 %v7126_v36, %v4261_v21  ;;  %v4457_v44 = vmax.f32 %v4405_v18, 0.0  ;;  %v4406_v61 = vadd.f32 %v7141_v45, %v4332_v42 }
 0x354   : > { %v4407_v6 = vadd.f32 %v7144_v54, %v4333_v16  ;;  %v4263_v3 = vmul.f32 %v7123_v33, %v6967_v25  ;;  %v4408_v49 = vadd.f32 %v7135_v27, %v4334_v43  ;;  %v4336_v47 = vmul.f32 %v7129_v39, %v4262_v52 }
 0x355   : > { %4651 = vst [vmem:[%s7452_s5 + $0x78] sm:$0xff] %v5224_v35  ;;  %v4409_v46 = vadd.f32 %v7138_v41, %v4335_v8  ;;  %v4264_v28 = vmul.f32 %v7123_v33, %v6970_v30  ;;  %v5225_v9 = vpack.c.bf16 %v4457_v44, %v4456_v51  ;;  %v4458_v34 = vmax.f32 %v4406_v61, 0.0  ;;  %v7589_v35 = vld [vmem:[#allocation9_spill] sm:$0xff] }
 0x356   : > { %v4459_v1 = vmax.f32 %v4407_v6, 0.0  ;;  %v4337_v38 = vmul.f32 %v7132_v26, %v4263_v3  ;;  %v4460_v40 = vmax.f32 %v4408_v49, 0.0  ;;  %v4410_v7 = vadd.f32 %v7141_v45, %v4336_v47  ;;  %v7590_v6 = vld [vmem:[#allocation10_spill] sm:$0xff] }
 0x357   : > { %v4461_v25 = vmax.f32 %v4409_v46, 0.0  ;;  %v4265_v63 = vmul.f32 %v7123_v33, %v6973_v59  ;;  %4652 = vst [vmem:[%s7452_s5 + $0x80] sm:$0xff] %v5225_v9  ;;  %v4338_v30 = vmul.f32 %v7120_v29, %v4264_v28  ;;  %v4266_v14 = vmul.f32 %v7123_v33, %v6976_v60  ;;  %v7591_v28 = vld [vmem:[#allocation11_spill] sm:$0xff] }
 0x358   : > { %v5226_v62 = vpack.c.bf16 %v4459_v1, %v4458_v34  ;;  %v4411_v55 = vadd.f32 %v7144_v54, %v4337_v38  ;;  %v4462_v32 = vmax.f32 %v4410_v7, 0.0  ;;  %v4267_v23 = vmul.f32 %v7123_v33, %v6979_v13 }
 0x359   : > { %v5227_v5 = vpack.c.bf16 %v4461_v25, %v4460_v40  ;;  %v4339_v20 = vmul.f32 %v7126_v36, %v4265_v63  ;;  %v4412_v2 = vadd.f32 %v7135_v27, %v4338_v30  ;;  %v4340_v58 = vmul.f32 %v7129_v39, %v4266_v14 }
 0x35a   : > { %4653 = vst [vmem:[%s7452_s5 + $0x88] sm:$0xff] %v5226_v62  ;;  %v4463_v59 = vmax.f32 %v4411_v55, 0.0  ;;  %v4268_v53 = vmul.f32 %v7123_v33, %v6982_v37  ;;  %v4341_v13 = vmul.f32 %v7132_v26, %v4267_v23  ;;  %v4269_v10 = vmul.f32 %v7123_v33, %v6985_v22 }
 0x35b   : > { %4654 = vst [vmem:[%s7452_s5 + $0x90] sm:$0xff] %v5227_v5  ;;  %v4413_v60 = vadd.f32 %v7138_v41, %v4339_v20  ;;  %v4270_v50 = vmul.f32 %v7123_v33, %v6988_v0  ;;  %v4464_v24 = vmax.f32 %v4412_v2, 0.0  ;;  %v4414_v57 = vadd.f32 %v7141_v45, %v4340_v58 }
 0x35c   : > { %v5228_v4 = vpack.c.bf16 %v4463_v59, %v4462_v32  ;;  %v4342_v37 = vmul.f32 %v7120_v29, %v4268_v53  ;;  %v4415_v17 = vadd.f32 %v7144_v54, %v4341_v13  ;;  %v4343_v48 = vmul.f32 %v7126_v36, %v4269_v10 }
 0x35d   : > { %v4465_v19 = vmax.f32 %v4413_v60, 0.0  ;;  %v4271_v12 = vmul.f32 %v7123_v33, %v6991_v56  ;;  %v4466_v22 = vmax.f32 %v4414_v57, 0.0  ;;  %v4344_v11 = vmul.f32 %v7129_v39, %v4270_v50 }
 0x35e   : > { %4655 = vst [vmem:[%s7452_s5 + $0x98] sm:$0xff] %v5228_v4  ;;  %v4416_v0 = vadd.f32 %v7135_v27, %v4342_v37  ;;  %v4272_v15 = vmul.f32 %v7123_v33, %v7588_v31  ;;  %v4467_v18 = vmax.f32 %v4415_v17, 0.0  ;;  %v4417_v42 = vadd.f32 %v7138_v41, %v4343_v48 }
 0x35f   : > { %v5229_v21 = vpack.c.bf16 %v4465_v19, %v4464_v24  ;;  %v4345_v16 = vmul.f32 %v7132_v26, %v4271_v12  ;;  %v4418_v56 = vadd.f32 %v7141_v45, %v4344_v11  ;;  %v4273_v51 = vmul.f32 %v7123_v33, %v7589_v35 }
 0x360   : > { %v4468_v52 = vmax.f32 %v4416_v0, 0.0  ;;  %v4346_v43 = vmul.f32 %v7120_v29, %v4272_v15  ;;  %v5230_v8 = vpack.c.bf16 %v4467_v18, %v4466_v22  ;;  %v4469_v44 = vmax.f32 %v4417_v42, 0.0 }
 0x361   : > { %4656 = vst [vmem:[%s7452_s5 + $0xa0] sm:$0xff] %v5229_v21  ;;  %v4419_v61 = vadd.f32 %v7144_v54, %v4345_v16  ;;  %v4274_v3 = vmul.f32 %v7123_v33, %v7590_v6  ;;  %v4470_v49 = vmax.f32 %v4418_v56, 0.0  ;;  %v4347_v46 = vmul.f32 %v7126_v36, %v4273_v51 }
 0x362   : > { %v4420_v47 = vadd.f32 %v7135_v27, %v4346_v43  ;;  %v4275_v9 = vmul.f32 %v7123_v33, %v7591_v28  ;;  %4657 = vst [vmem:[%s7452_s5 + $0xa8] sm:$0xff] %v5230_v8  ;;  %v5231_v29 = vpack.c.bf16 %v4469_v44, %v4468_v52 }
 0x363   : > { %v4471_v34 = vmax.f32 %v4419_v61, 0.0  ;;  %v4348_v1 = vmul.f32 %v7129_v39, %v4274_v3  ;;  %v4421_v38 = vadd.f32 %v7138_v41, %v4347_v46 }
 0x364   : > { %v4472_v40 = vmax.f32 %v4420_v47, 0.0  ;;  %v4349_v25 = vmul.f32 %v7132_v26, %v4275_v9  ;;  %4658 = vst [vmem:[%s7452_s5 + $0xb0] sm:$0xff] %v5231_v29 }
 0x365   : > { %v5232_v36 = vpack.c.bf16 %v4471_v34, %v4470_v49  ;;  %v4422_v33 = vadd.f32 %v7141_v45, %v4348_v1  ;;  %v4473_v27 = vmax.f32 %v4421_v38, 0.0 }
 0x366   : > { %v4423_v7 = vadd.f32 %v7144_v54, %v4349_v25 }
 0x367   : > { %4659 = vst [vmem:[%s7452_s5 + $0xb8] sm:$0xff] %v5232_v36  ;;  %v4474_v39 = vmax.f32 %v4422_v33, 0.0  ;;  %v5233_v63 = vpack.c.bf16 %v4473_v27, %v4472_v40 }
 0x368   : > { %v4475_v41 = vmax.f32 %v4423_v7, 0.0 }
 0x369   : > { %4660 = vst [vmem:[%s7452_s5 + $0xc0] sm:$0x11] %v5233_v63 }
 0x36a   : > { %v5234_v26 = vpack.c.bf16 %v4475_v41, %v4474_v39 }
 0x36c   : > { %4661 = vst [vmem:[%s7452_s5 + $0xc8] sm:$0x11] %v5234_v26 }
 0x36d PF: > { %s15_s22 = sadd.s32 1, %s6030_s22   ;;  %s7592_s18 = smov %s6018_s19 }
 0x36e   : > { %p12_p12 = scmp.ge.s32.totalorder %s15_s22, 4   ;;  %s7593_s19 = smov %s6099_s26 }
 0x36f   : > { %s7594_s20 = smov %s6026_s21  ;;  %s7595_s21 = smov %s7597_s23 }
 0x370   :  { %14 = sbr.rel (!%p12_p12) target bundleno = 3 (0x3), region = 127 }

// kernel: generator_forward.5
= control target key start
LH: loop header
LB: loop body
LE: loop exit
PB: predicated region body
PF: predicated region fallthrough
CT: control target
= control target key end

     0   :  { %v4568_v0 = vmov 0   ;;  %vm4570_vm0 = vmmov 0   ;;  %s5876_s1 = inlined_call_operand.vmem [shape: bf16[1152,128], index: 1, kind: input, shape index: {}]   ;;  %s5877_s0 = inlined_call_operand.vmem [shape: bf16[392,1152], index: 0, kind: input, shape index: {}]   ;;  %s5878_s2 = inlined_call_operand.vmem [shape: f32[392,128], index: 2, kind: output, shape index: {}]  }
   0x1   :  { %1969 = vmatprep.subr.bf16.mxu1 %v4568_v0  ;;  %2433 = vmatprep.subr.bf16.mxu0 %v4568_v0  ;;  %v4061_v1 = vld [vmem:[%s5876_s1] sm:$0xff]   ;;  %v4063_v3 = vld [vmem:[%s5876_s1 + $0x8] sm:$0xff]   ;;  %v4065_v5 = vld [vmem:[%s5876_s1 + $0x10] sm:$0xff]  }
   0x2   :  { %v4062_v2 = vld [vmem:[%s5876_s1 + $0x100] sm:$0xff]   ;;  %1970 = vmatpush1.bf16.msra.mxu1 %v4061_v1  ;;  %v4064_v4 = vld [vmem:[%s5876_s1 + $0x108] sm:$0xff]   ;;  %v4066_v6 = vld [vmem:[%s5876_s1 + $0x110] sm:$0xff]  }
   0x3   :  { %2434 = vmatpush1.bf16.msra.mxu0 %v4062_v2  ;;  %1971 = vmatprep.subr.bf16.mxu1 %v4568_v0  ;;  %v4067_v7 = vld [vmem:[%s5876_s1 + $0x18] sm:$0xff]   ;;  %v4069_v9 = vld [vmem:[%s5876_s1 + $0x20] sm:$0xff]   ;;  %v4071_v11 = vld [vmem:[%s5876_s1 + $0x28] sm:$0xff]  }
   0x4   :  { %2435 = vmatprep.subr.bf16.mxu0 %v4568_v0  ;;  %v4068_v8 = vld [vmem:[%s5876_s1 + $0x118] sm:$0xff]   ;;  %v4070_v10 = vld [vmem:[%s5876_s1 + $0x120] sm:$0xff]   ;;  %v4072_v12 = vld [vmem:[%s5876_s1 + $0x128] sm:$0xff]  }
   0x5   :  { %v4073_v13 = vld [vmem:[%s5876_s1 + $0x30] sm:$0xff]   ;;  %v4075_v15 = vld [vmem:[%s5876_s1 + $0x38] sm:$0xff]   ;;  %v4077_v17 = vld [vmem:[%s5876_s1 + $0x40] sm:$0xff]  }
   0x6   :  { %1972 = vmatpush1.bf16.msra.mxu1 %v4063_v3  ;;  %v4074_v14 = vld [vmem:[%s5876_s1 + $0x130] sm:$0xff]   ;;  %v4076_v16 = vld [vmem:[%s5876_s1 + $0x138] sm:$0xff]   ;;  %v4078_v18 = vld [vmem:[%s5876_s1 + $0x140] sm:$0xff]  }
   0x7   :  { %2436 = vmatpush1.bf16.msra.mxu0 %v4064_v4  ;;  %1973 = vmatprep.subr.bf16.mxu1 %v4568_v0  ;;  %v4095_v19 = vld [vmem:[%s5877_s0 + $0x4] ss:$36 sps:$4 sm:$0xff]   ;;  %v4098_v21 = vld [vmem:[%s5877_s0 + $0x14] ss:$36 sps:$4 sm:$0xff]   ;;  %v4100_v38 = vld [vmem:[%s5877_s0 + $0x4c] ss:$36 sps:$4 sm:$0xff]  }
   0x8   :  { %2437 = vmatprep.subr.bf16.mxu0 %v4568_v0  ;;  %v4079_v20 = vld [vmem:[%s5876_s1 + $0x48] sm:$0xff]   ;;  %2001 = vmatprep.mubr.bf16.mxu1 %v4095_v19  ;;  %v4081_v23 = vld [vmem:[%s5876_s1 + $0x50] sm:$0xff]   ;;  %v4083_v25 = vld [vmem:[%s5876_s1 + $0x58] sm:$0xff]  }
   0x9   :  { %v4080_v22 = vld [vmem:[%s5876_s1 + $0x148] sm:$0xff]   ;;  %2465 = vmatprep.mubr.bf16.mxu0 %v4098_v21  ;;  %v4082_v24 = vld [vmem:[%s5876_s1 + $0x150] sm:$0xff]   ;;  %v4084_v26 = vld [vmem:[%s5876_s1 + $0x158] sm:$0xff]  }
   0xa   :  { %1974 = vmatpush1.bf16.msra.mxu1 %v4065_v5  ;;  %v4085_v27 = vld [vmem:[%s5876_s1 + $0x60] sm:$0xff]   ;;  %v4087_v29 = vld [vmem:[%s5876_s1 + $0x68] sm:$0xff]   ;;  %v4089_v31 = vld [vmem:[%s5876_s1 + $0x70] sm:$0xff]  }
   0xb   :  { %2438 = vmatpush1.bf16.msra.mxu0 %v4066_v6  ;;  %1975 = vmatprep.subr.bf16.mxu1 %v4568_v0  ;;  %v4086_v28 = vld [vmem:[%s5876_s1 + $0x160] sm:$0xff]   ;;  %v4088_v30 = vld [vmem:[%s5876_s1 + $0x168] sm:$0xff]   ;;  %v4090_v32 = vld [vmem:[%s5876_s1 + $0x170] sm:$0xff]  }
   0xc   :  { %2439 = vmatprep.subr.bf16.mxu0 %v4568_v0  ;;  %v4091_v33 = vld [vmem:[%s5876_s1 + $0x78] sm:$0xff]   ;;  %v4093_v35 = vld [vmem:[%s5877_s0] ss:$36 sps:$4 sm:$0xff]   ;;  %v4096_v36 = vld [vmem:[%s5877_s0 + $0x10] ss:$36 sps:$4 sm:$0xff]  }
   0xd   :  { %v4092_v34 = vld [vmem:[%s5876_s1 + $0x178] sm:$0xff]   ;;  %v4099_v37 = vld [vmem:[%s5876_s1 + $0x180] sm:$0xff]   ;;  %v4106_v41 = vld [vmem:[%s5876_s1 + $0x188] sm:$0xff]  }
   0xe   :  { %1976 = vmatpush1.bf16.msra.mxu1 %v4067_v7  ;;  %v4102_v39 = vld [vmem:[%s5877_s0 + $0x5c] ss:$36 sps:$4 sm:$0xff]   ;;  %v4116_v42 = vld [vmem:[%s5876_s1 + $0x88] sm:$0xff]   ;;  %v4108_v45 = vld [vmem:[%s5876_s1 + $0x190] sm:$0xff]  }
   0xf   :  { %2440 = vmatpush1.bf16.msra.mxu0 %v4068_v8  ;;  %1977 = vmatprep.subr.bf16.mxu1 %v4568_v0  ;;  %v4107_v40 = vld [vmem:[%s5876_s1 + $0x80] sm:$0xff]   ;;  %v4104_v43 = vld [vmem:[%s5877_s0 + $0x48] ss:$36 sps:$4 sm:$0xff]   ;;  %v4105_v44 = vld [vmem:[%s5877_s0 + $0x58] ss:$36 sps:$4 sm:$0xff]  }
  0x10   :  { %2441 = vmatprep.subr.bf16.mxu0 %v4568_v0  ;;  %v4109_v46 = vld [vmem:[%s5877_s0 + $0x94] ss:$36 sps:$4 sm:$0xff]   ;;  %v4111_v47 = vld [vmem:[%s5877_s0 + $0xa4] ss:$36 sps:$4 sm:$0xff]   ;;  %v4117_v53 = vld [vmem:[%s5877_s0 + $0xdc] ss:$36 sps:$4 sm:$0xff]  }
  0x11   :  { %v4130_v48 = vld [vmem:[%s5876_s1 + $0x90] sm:$0xff]   ;;  %v4115_v50 = vld [vmem:[%s5876_s1 + $0x198] sm:$0xff]   ;;  %v4114_v52 = vld [vmem:[%s5877_s0 + $0xa0] ss:$36 sps:$4 sm:$0xff]  }
  0x12   :  { %1978 = vmatpush1.bf16.msra.mxu1 %v4069_v9  ;;  %v4113_v49 = vld [vmem:[%s5877_s0 + $0x90] ss:$36 sps:$4 sm:$0xff]   ;;  %v4141_v51 = vld [vmem:[%s5876_s1 + $0x98] sm:$0xff]   ;;  %v4123_v55 = vld [vmem:[%s5876_s1 + $0x1a0] sm:$0xff]  }
  0x13   :  { %2442 = vmatpush1.bf16.msra.mxu0 %v4070_v10  ;;  %1979 = vmatprep.subr.bf16.mxu1 %v4568_v0  ;;  %v4119_v54 = vld [vmem:[%s5877_s0 + $0xec] ss:$36 sps:$4 sm:$0xff]   ;;  %v4154_v56 = vld [vmem:[%s5876_s1 + $0xa0] sm:$0xff]   ;;  %v4121_v58 = vld [vmem:[%s5877_s0 + $0xd8] ss:$36 sps:$4 sm:$0xff]  }
  0x14   :  { %2443 = vmatprep.subr.bf16.mxu0 %v4568_v0  ;;  %v4131_v57 = vld [vmem:[%s5876_s1 + $0x1a8] sm:$0xff]   ;;  %v4126_v62 = vld [vmem:[%s5877_s0 + $0x134] ss:$36 sps:$4 sm:$0xff]   ;;  %v4128_v2 = vld [vmem:[%s5877_s0 + $0x120] ss:$36 sps:$4 sm:$0xff]  }
  0x15   :  { %v4122_v59 = vld [vmem:[%s5877_s0 + $0xe8] ss:$36 sps:$4 sm:$0xff]   ;;  %v4138_v63 = vld [vmem:[%s5876_s1 + $0x1b0] sm:$0xff]   ;;  %v4144_v3 = vld [vmem:[%s5876_s1 + $0x1b8] sm:$0xff]  }
  0x16   :  { %1980 = vmatpush1.bf16.msra.mxu1 %v4071_v11  ;;  %v4168_v60 = vld [vmem:[%s5876_s1 + $0xa8] sm:$0xff]   ;;  %v4178_v1 = vld [vmem:[%s5876_s1 + $0xb0] sm:$0xff]   ;;  %v4193_v5 = vld [vmem:[%s5876_s1 + $0xb8] sm:$0xff]  }
  0x17   :  { %2444 = vmatpush1.bf16.msra.mxu0 %v4072_v12  ;;  %1981 = vmatprep.subr.bf16.mxu1 %v4568_v0  ;;  %v4124_v61 = vld [vmem:[%s5877_s0 + $0x124] ss:$36 sps:$4 sm:$0xff]   ;;  %v4129_v4 = vld [vmem:[%s5877_s0 + $0x130] ss:$36 sps:$4 sm:$0xff]   ;;  %v4134_v7 = vld [vmem:[%s5877_s0 + $0x17c] ss:$36 sps:$4 sm:$0xff]  }
  0x18   :  { %2445 = vmatprep.subr.bf16.mxu0 %v4568_v0  ;;  %v4132_v6 = vld [vmem:[%s5877_s0 + $0x16c] ss:$36 sps:$4 sm:$0xff]   ;;  %v4147_v8 = vld [vmem:[%s5876_s1 + $0x1c0] sm:$0xff]   ;;  %v4137_v12 = vld [vmem:[%s5877_s0 + $0x178] ss:$36 sps:$4 sm:$0xff]  }
  0x19   :  { %v4202_v9 = vld [vmem:[%s5876_s1 + $0xc0] sm:$0xff]   ;;  %v4155_v10 = vld [vmem:[%s5876_s1 + $0x1c8] sm:$0xff]   ;;  %v4145_v19 = vld [vmem:[%s5877_s0 + $0x1b0] ss:$36 sps:$4 sm:$0xff]  }
  0x1a   :  { %1982 = vmatpush1.bf16.msra.mxu1 %v4073_v13  ;;  %v4136_v11 = vld [vmem:[%s5877_s0 + $0x168] ss:$36 sps:$4 sm:$0xff]   ;;  %v4148_v21 = vld [vmem:[%s5877_s0 + $0x1fc] ss:$36 sps:$4 sm:$0xff]  }
  0x1b   :  { %2446 = vmatpush1.bf16.msra.mxu0 %v4074_v14  ;;  %1983 = vmatprep.subr.bf16.mxu1 %v4568_v0  ;;  %v4215_v13 = vld [vmem:[%s5876_s1 + $0xc8] sm:$0xff]   ;;  %v4139_v14 = vld [vmem:[%s5877_s0 + $0x1b4] ss:$36 sps:$4 sm:$0xff]  }
  0x1c   :  { %2447 = vmatprep.subr.bf16.mxu0 %v4568_v0 }
  0x1e   :  { %1984 = vmatpush1.bf16.msra.mxu1 %v4075_v15  ;;  %v4142_v15 = vld [vmem:[%s5877_s0 + $0x1c4] ss:$36 sps:$4 sm:$0xff]  }
  0x1f   :  { %2448 = vmatpush1.bf16.msra.mxu0 %v4076_v16  ;;  %1985 = vmatprep.subr.bf16.mxu1 %v4568_v0  ;;  %v4162_v16 = vld [vmem:[%s5876_s1 + $0x1d0] sm:$0xff]  }
  0x20   :  { %2449 = vmatprep.subr.bf16.mxu0 %v4568_v0 }
  0x22   :  { %1986 = vmatpush1.bf16.msra.mxu1 %v4077_v17  ;;  %v4223_v17 = vld [vmem:[%s5876_s1 + $0xd0] sm:$0xff]  }
  0x23   :  { %2450 = vmatpush1.bf16.msra.mxu0 %v4078_v18  ;;  %1987 = vmatprep.subr.bf16.mxu1 %v4568_v0  ;;  %v4170_v18 = vld [vmem:[%s5876_s1 + $0x1d8] sm:$0xff]  }
  0x24   :  { %2451 = vmatprep.subr.bf16.mxu0 %v4568_v0 }
  0x26   :  { %1988 = vmatpush1.bf16.msra.mxu1 %v4079_v20  ;;  %v4146_v20 = vld [vmem:[%s5877_s0 + $0x1c0] ss:$36 sps:$4 sm:$0xff]  }
  0x27   :  { %2452 = vmatpush1.bf16.msra.mxu0 %v4080_v22  ;;  %1989 = vmatprep.subr.bf16.mxu1 %v4568_v0  ;;  %v4150_v22 = vld [vmem:[%s5877_s0 + $0x20c] ss:$36 sps:$4 sm:$0xff]  }
  0x28   :  { %2453 = vmatprep.subr.bf16.mxu0 %v4568_v0 }
  0x2a   :  { %1990 = vmatpush1.bf16.msra.mxu1 %v4081_v23  ;;  %v4175_v23 = vld [vmem:[%s5876_s1 + $0x1e0] sm:$0xff]  }
  0x2b   :  { %2454 = vmatpush1.bf16.msra.mxu0 %v4082_v24  ;;  %1991 = vmatprep.subr.bf16.mxu1 %v4568_v0  ;;  %v4236_v24 = vld [vmem:[%s5876_s1 + $0xd8] sm:$0xff]  }
  0x2c   :  { %2455 = vmatprep.subr.bf16.mxu0 %v4568_v0 }
  0x2e   :  { %1992 = vmatpush1.bf16.msra.mxu1 %v4083_v25  ;;  %v4152_v25 = vld [vmem:[%s5877_s0 + $0x1f8] ss:$36 sps:$4 sm:$0xff]  }
  0x2f   :  { %2456 = vmatpush1.bf16.msra.mxu0 %v4084_v26  ;;  %1993 = vmatprep.subr.bf16.mxu1 %v4568_v0  ;;  %v4179_v26 = vld [vmem:[%s5876_s1 + $0x1e8] sm:$0xff]  }
  0x30   :  { %2457 = vmatprep.subr.bf16.mxu0 %v4568_v0 }
  0x32   :  { %1994 = vmatpush1.bf16.msra.mxu1 %v4085_v27  ;;  %v4153_v27 = vld [vmem:[%s5877_s0 + $0x208] ss:$36 sps:$4 sm:$0xff]  }
  0x33   :  { %2458 = vmatpush1.bf16.msra.mxu0 %v4086_v28  ;;  %1995 = vmatprep.subr.bf16.mxu1 %v4568_v0  ;;  %v4156_v28 = vld [vmem:[%s5877_s0 + $0x244] ss:$36 sps:$4 sm:$0xff]  }
  0x34   :  { %2459 = vmatprep.subr.bf16.mxu0 %v4568_v0 }
  0x36   :  { %1996 = vmatpush1.bf16.msra.mxu1 %v4087_v29  ;;  %v4246_v29 = vld [vmem:[%s5876_s1 + $0xe0] sm:$0xff]  }
  0x37   :  { %2460 = vmatpush1.bf16.msra.mxu0 %v4088_v30  ;;  %1997 = vmatprep.subr.bf16.mxu1 %v4568_v0  ;;  %v4158_v30 = vld [vmem:[%s5877_s0 + $0x254] ss:$36 sps:$4 sm:$0xff]  }
  0x38   :  { %2461 = vmatprep.subr.bf16.mxu0 %v4568_v0 }
  0x3a   :  { %1998 = vmatpush1.bf16.msra.mxu1 %v4089_v31  ;;  %v4186_v31 = vld [vmem:[%s5876_s1 + $0x1f0] sm:$0xff]  }
  0x3b   :  { %2462 = vmatpush1.bf16.msra.mxu0 %v4090_v32  ;;  %1999 = vmatprep.subr.bf16.mxu1 %v4568_v0  ;;  %v4194_v32 = vld [vmem:[%s5876_s1 + $0x1f8] sm:$0xff]  }
  0x3c   :  { %2463 = vmatprep.subr.bf16.mxu0 %v4568_v0 }
  0x3e   :  { %2000 = vmatpush1.bf16.msra.mxu1 %v4091_v33  ;;  %v4257_v33 = vld [vmem:[%s5876_s1 + $0xe8] sm:$0xff]  }
  0x3f   :  { %2464 = vmatpush1.bf16.msra.mxu0 %v4092_v34  ;;  %2201 = vmatprep.subr.bf16.mxu1 %v4568_v0  ;;  %v4160_v34 = vld [vmem:[%s5877_s0 + $0x240] ss:$36 sps:$4 sm:$0xff]  }
  0x40   :  { %2665 = vmatprep.subr.bf16.mxu0 %v4568_v0 }
  0x41   :  { %2002 = vmatmul.mubr.bf16.vlgmr.msra.gmra.mrb[0].mxu1 %v4093_v35  ;;  %v4161_v35 = vld [vmem:[%s5877_s0 + $0x250] ss:$36 sps:$4 sm:$0xff]  }
  0x42   :  { %2466 = vmatmul.mubr.bf16.vlgmr.msra.gmra.mrb[0].mxu0 %v4096_v36  ;;  %2009 = vmatprep.mubr.bf16.mxu1 %v4100_v38  ;;  %v4163_v36 = vld [vmem:[%s5877_s0 + $0x28c] ss:$36 sps:$4 sm:$0xff]   ;;  %v4569_v38 = vmov 0.0  }
  0x43   :  { %2666 = vmatpush1.bf16.msra.mxu0 %v4099_v37  ;;  %2473 = vmatprep.mubr.bf16.mxu0 %v4102_v39  ;;  %v4165_v37 = vld [vmem:[%s5877_s0 + $0x29c] ss:$36 sps:$4 sm:$0xff]   ;;  %v4270_v39 = vld [vmem:[%s5876_s1 + $0xf0] sm:$0xff]  }
  0x44   :  { %2667 = vmatprep.subr.bf16.mxu0 %v4568_v0  ;;  %2202 = vmatpush1.bf16.msra.mxu1 %v4107_v40  ;;  %v4167_v40 = vld [vmem:[%s5877_s0 + $0x288] ss:$36 sps:$4 sm:$0xff]  }
  0x45   :  { %2203 = vmatprep.subr.bf16.mxu1 %v4568_v0 }
  0x47   :  { %2668 = vmatpush1.bf16.msra.mxu0 %v4106_v41  ;;  %v4277_v41 = vld [vmem:[%s5876_s1 + $0xf8] sm:$0xff]  }
  0x48   :  { %2669 = vmatprep.subr.bf16.mxu0 %v4568_v0  ;;  %2204 = vmatpush1.bf16.msra.mxu1 %v4116_v42  ;;  %v4169_v42 = vld [vmem:[%s5877_s0 + $0x298] ss:$36 sps:$4 sm:$0xff]  }
  0x49   :  { %2010 = vmatmul.mubr.bf16.gmra.mrb[4].mxu1 %v4104_v43  ;;  %2205 = vmatprep.subr.bf16.mxu1 %v4568_v0  ;;  %v4171_v43 = vld [vmem:[%s5877_s0 + $0x2d4] ss:$36 sps:$4 sm:$0xff]  }
  0x4a   :  { %2474 = vmatmul.mubr.bf16.gmra.mrb[4].mxu0 %v4105_v44  ;;  %2017 = vmatprep.mubr.bf16.mxu1 %v4109_v46  ;;  %v4173_v44 = vld [vmem:[%s5877_s0 + $0x2e4] ss:$36 sps:$4 sm:$0xff]  }
  0x4b   :  { %2670 = vmatpush1.bf16.msra.mxu0 %v4108_v45  ;;  %2481 = vmatprep.mubr.bf16.mxu0 %v4111_v47  ;;  %v4176_v45 = vld [vmem:[%s5877_s0 + $0x2d0] ss:$36 sps:$4 sm:$0xff]   ;;  %v4177_v46 = vld [vmem:[%s5877_s0 + $0x2e0] ss:$36 sps:$4 sm:$0xff]  }
  0x4c   :  { %2671 = vmatprep.subr.bf16.mxu0 %v4568_v0  ;;  %2206 = vmatpush1.bf16.msra.mxu1 %v4130_v48  ;;  %v4180_v47 = vld [vmem:[%s5877_s0 + $0x31c] ss:$36 sps:$4 sm:$0xff]   ;;  %v4182_v48 = vld [vmem:[%s5877_s0 + $0x32c] ss:$36 sps:$4 sm:$0xff]  }
  0x4d   :  { %2207 = vmatprep.subr.bf16.mxu1 %v4568_v0 }
  0x4f   :  { %2672 = vmatpush1.bf16.msra.mxu0 %v4115_v50  ;;  %v4185_v50 = vld [vmem:[%s5877_s0 + $0x328] ss:$36 sps:$4 sm:$0xff]  }
  0x50   :  { %2673 = vmatprep.subr.bf16.mxu0 %v4568_v0  ;;  %2208 = vmatpush1.bf16.msra.mxu1 %v4141_v51  ;;  %v4187_v51 = vld [vmem:[%s5877_s0 + $0x364] ss:$36 sps:$4 sm:$0xff]  }
  0x51   :  { %2018 = vmatmul.mubr.bf16.gmra.mrb[8].mxu1 %v4113_v49  ;;  %2209 = vmatprep.subr.bf16.mxu1 %v4568_v0  ;;  %v4184_v49 = vld [vmem:[%s5877_s0 + $0x318] ss:$36 sps:$4 sm:$0xff]  }
  0x52   :  { %2482 = vmatmul.mubr.bf16.gmra.mrb[8].mxu0 %v4114_v52  ;;  %2025 = vmatprep.mubr.bf16.mxu1 %v4117_v53  ;;  %v4189_v52 = vld [vmem:[%s5877_s0 + $0x374] ss:$36 sps:$4 sm:$0xff]   ;;  %v4191_v53 = vld [vmem:[%s5877_s0 + $0x360] ss:$36 sps:$4 sm:$0xff]  }
  0x53   :  { %2489 = vmatprep.mubr.bf16.mxu0 %v4119_v54  ;;  %2674 = vmatpush1.bf16.msra.mxu0 %v4123_v55  ;;  %v4192_v54 = vld [vmem:[%s5877_s0 + $0x370] ss:$36 sps:$4 sm:$0xff]  }
  0x54   :  { %2675 = vmatprep.subr.bf16.mxu0 %v4568_v0  ;;  %2210 = vmatpush1.bf16.msra.mxu1 %v4154_v56  ;;  %v4195_v55 = vld [vmem:[%s5877_s0 + $0x3ac] ss:$36 sps:$4 sm:$0xff]   ;;  %v4199_v56 = vld [vmem:[%s5877_s0 + $0x1c] ss:$36 sps:$4 sm:$0xff]  }
  0x55   :  { %2211 = vmatprep.subr.bf16.mxu1 %v4568_v0 }
  0x57   :  { %2676 = vmatpush1.bf16.msra.mxu0 %v4131_v57  ;;  %v4200_v57 = vld [vmem:[%s5877_s0 + $0x3a8] ss:$36 sps:$4 sm:$0xff]  }
  0x58   :  { %2677 = vmatprep.subr.bf16.mxu0 %v4568_v0  ;;  %2212 = vmatpush1.bf16.msra.mxu1 %v4168_v60  ;;  %v4201_v60 = vld [vmem:[%s5876_s1 + $0x200] sm:$0xff]  }
  0x59   :  { %2026 = vmatmul.mubr.bf16.gmra.mrb[12].mxu1 %v4121_v58  ;;  %2213 = vmatprep.subr.bf16.mxu1 %v4568_v0  ;;  %v4197_v58 = vld [vmem:[%s5877_s0 + $0x18] ss:$36 sps:$4 sm:$0xff]  }
  0x5a   :  { %2490 = vmatmul.mubr.bf16.gmra.mrb[12].mxu0 %v4122_v59  ;;  %2033 = vmatprep.mubr.bf16.mxu1 %v4124_v61  ;;  %v4203_v59 = vld [vmem:[%s5877_s0 + $0x3f4] ss:$36 sps:$4 sm:$0xff]   ;;  %v4205_v61 = vld [vmem:[%s5877_s0 + $0x64] ss:$36 sps:$4 sm:$0xff]  }
  0x5b   :  { %2497 = vmatprep.mubr.bf16.mxu0 %v4126_v62  ;;  %2678 = vmatpush1.bf16.msra.mxu0 %v4138_v63  ;;  %v4207_v62 = vld [vmem:[%s5877_s0 + $0x3f0] ss:$36 sps:$4 sm:$0xff]   ;;  %v4222_v63 = vld [vmem:[%s5876_s1 + $0x208] sm:$0xff]  }
  0x5c   :  { %2679 = vmatprep.subr.bf16.mxu0 %v4568_v0  ;;  %2214 = vmatpush1.bf16.msra.mxu1 %v4178_v1  ;;  %v4208_v1 = vld [vmem:[%s5877_s0 + $0x60] ss:$36 sps:$4 sm:$0xff]  }
  0x5d   :  { %2215 = vmatprep.subr.bf16.mxu1 %v4568_v0 }
  0x5f   :  { %2680 = vmatpush1.bf16.msra.mxu0 %v4144_v3  ;;  %v4211_v3 = vld [vmem:[%s5877_s0 + $0xac] ss:$36 sps:$4 sm:$0xff]  }
  0x60   :  { %2681 = vmatprep.subr.bf16.mxu0 %v4568_v0  ;;  %2216 = vmatpush1.bf16.msra.mxu1 %v4193_v5  ;;  %v4213_v5 = vld [vmem:[%s5877_s0 + $0x438] ss:$36 sps:$4 sm:$0xff]  }
  0x61   :  { %2034 = vmatmul.mubr.bf16.gmra.mrb[16].mxu1 %v4128_v2  ;;  %2217 = vmatprep.subr.bf16.mxu1 %v4568_v0  ;;  %v4209_v2 = vld [vmem:[%s5877_s0 + $0x43c] ss:$36 sps:$4 sm:$0xff]  }
  0x62   :  { %2498 = vmatmul.mubr.bf16.gmra.mrb[16].mxu0 %v4129_v4  ;;  %2041 = vmatprep.mubr.bf16.mxu1 %v4132_v6  ;;  %v4243_v4 = vld [vmem:[%s5876_s1 + $0x210] sm:$0xff]   ;;  %v4264_v6 = vld [vmem:[%s5876_s1 + $0x218] sm:$0xff]  }
  0x63   :  { %2505 = vmatprep.mubr.bf16.mxu0 %v4134_v7  ;;  %2682 = vmatpush1.bf16.msra.mxu0 %v4147_v8  ;;  %v4214_v7 = vld [vmem:[%s5877_s0 + $0xa8] ss:$36 sps:$4 sm:$0xff]  }
  0x64   :  { %2683 = vmatprep.subr.bf16.mxu0 %v4568_v0  ;;  %2218 = vmatpush1.bf16.msra.mxu1 %v4202_v9  ;;  %v4216_v8 = vld [vmem:[%s5877_s0 + $0x484] ss:$36 sps:$4 sm:$0xff]   ;;  %v4218_v9 = vld [vmem:[%s5877_s0 + $0xf4] ss:$36 sps:$4 sm:$0xff]  }
  0x65   :  { %2219 = vmatprep.subr.bf16.mxu1 %v4568_v0 }
  0x67   :  { %2684 = vmatpush1.bf16.msra.mxu0 %v4155_v10  ;;  %v4284_v10 = vld [vmem:[%s5876_s1 + $0x220] sm:$0xff]  }
  0x68   :  { %2685 = vmatprep.subr.bf16.mxu0 %v4568_v0  ;;  %2220 = vmatpush1.bf16.msra.mxu1 %v4215_v13  ;;  %v4221_v13 = vld [vmem:[%s5877_s0 + $0xf0] ss:$36 sps:$4 sm:$0xff]  }
  0x69   :  { %2042 = vmatmul.mubr.bf16.gmra.mrb[20].mxu1 %v4136_v11  ;;  %2221 = vmatprep.subr.bf16.mxu1 %v4568_v0  ;;  %v4220_v11 = vld [vmem:[%s5877_s0 + $0x480] ss:$36 sps:$4 sm:$0xff]  }
  0x6a   :  { %2506 = vmatmul.mubr.bf16.gmra.mrb[20].mxu0 %v4137_v12  ;;  %2049 = vmatprep.mubr.bf16.mxu1 %v4139_v14  ;;  %v4303_v12 = vld [vmem:[%s5876_s1 + $0x228] sm:$0xff]  }
  0x6b   :  { %2513 = vmatprep.mubr.bf16.mxu0 %v4142_v15  ;;  %2686 = vmatpush1.bf16.msra.mxu0 %v4162_v16  ;;  %v4224_v14 = vld [vmem:[%s5877_s0 + $0x4cc] ss:$36 sps:$4 sm:$0xff]   ;;  %v4226_v15 = vld [vmem:[%s5877_s0 + $0x13c] ss:$36 sps:$4 sm:$0xff]  }
  0x6c   :  { %2687 = vmatprep.subr.bf16.mxu0 %v4568_v0  ;;  %2222 = vmatpush1.bf16.msra.mxu1 %v4223_v17  ;;  %v4326_v16 = vld [vmem:[%s5876_s1 + $0x230] sm:$0xff]   ;;  %v4228_v17 = vld [vmem:[%s5877_s0 + $0x4c8] ss:$36 sps:$4 sm:$0xff]  }
  0x6d   :  { %2223 = vmatprep.subr.bf16.mxu1 %v4568_v0 }
  0x6f   :  { %2688 = vmatpush1.bf16.msra.mxu0 %v4170_v18  ;;  %v4229_v18 = vld [vmem:[%s5877_s0 + $0x138] ss:$36 sps:$4 sm:$0xff]  }
  0x70   :  { %2689 = vmatprep.subr.bf16.mxu0 %v4568_v0  ;;  %2224 = vmatpush1.bf16.msra.mxu1 %v4236_v24  ;;  %v4239_v24 = vld [vmem:[%s5877_s0 + $0x1cc] ss:$36 sps:$4 sm:$0xff]  }
  0x71   :  { %2050 = vmatmul.mubr.bf16.gmra.mrb[24].mxu1 %v4145_v19  ;;  %2225 = vmatprep.subr.bf16.mxu1 %v4568_v0  ;;  %v4230_v19 = vld [vmem:[%s5877_s0 + $0x514] ss:$36 sps:$4 sm:$0xff]  }
  0x72   :  { %2514 = vmatmul.mubr.bf16.gmra.mrb[24].mxu0 %v4146_v20  ;;  %2057 = vmatprep.mubr.bf16.mxu1 %v4148_v21  ;;  %v4232_v20 = vld [vmem:[%s5877_s0 + $0x184] ss:$36 sps:$4 sm:$0xff]   ;;  %v4234_v21 = vld [vmem:[%s5877_s0 + $0x510] ss:$36 sps:$4 sm:$0xff]  }
  0x73   :  { %2521 = vmatprep.mubr.bf16.mxu0 %v4150_v22  ;;  %2690 = vmatpush1.bf16.msra.mxu0 %v4175_v23  ;;  %v4235_v22 = vld [vmem:[%s5877_s0 + $0x180] ss:$36 sps:$4 sm:$0xff]  }
  0x74   :  { %2691 = vmatprep.subr.bf16.mxu0 %v4568_v0  ;;  %2226 = vmatpush1.bf16.msra.mxu1 %v4246_v29  ;;  %v4237_v23 = vld [vmem:[%s5877_s0 + $0x55c] ss:$36 sps:$4 sm:$0xff]  }
  0x75   :  { %2227 = vmatprep.subr.bf16.mxu1 %v4568_v0  ;;  %v4347_v29 = vld [vmem:[%s5876_s1 + $0x238] sm:$0xff]  }
  0x77   :  { %2692 = vmatpush1.bf16.msra.mxu0 %v4179_v26  ;;  %v4242_v26 = vld [vmem:[%s5877_s0 + $0x1c8] ss:$36 sps:$4 sm:$0xff]  }
  0x78   :  { %2693 = vmatprep.subr.bf16.mxu0 %v4568_v0  ;;  %2228 = vmatpush1.bf16.msra.mxu1 %v4257_v33  ;;  %v4253_v33 = vld [vmem:[%s5877_s0 + $0x25c] ss:$36 sps:$4 sm:$0xff]  }
  0x79   :  { %2058 = vmatmul.mubr.bf16.gmra.mrb[28].mxu1 %v4152_v25  ;;  %2229 = vmatprep.subr.bf16.mxu1 %v4568_v0  ;;  %v4241_v25 = vld [vmem:[%s5877_s0 + $0x558] ss:$36 sps:$4 sm:$0xff]  }
  0x7a   :  { %2522 = vmatmul.mubr.bf16.gmra.mrb[28].mxu0 %v4153_v27  ;;  %2065 = vmatprep.mubr.bf16.mxu1 %v4156_v28  ;;  %v4244_v27 = vld [vmem:[%s5877_s0 + $0x5a4] ss:$36 sps:$4 sm:$0xff]   ;;  %v4247_v28 = vld [vmem:[%s5877_s0 + $0x214] ss:$36 sps:$4 sm:$0xff]  }
  0x7b   :  { %2529 = vmatprep.mubr.bf16.mxu0 %v4158_v30  ;;  %2694 = vmatpush1.bf16.msra.mxu0 %v4186_v31  ;;  %v4249_v30 = vld [vmem:[%s5877_s0 + $0x5a0] ss:$36 sps:$4 sm:$0xff]   ;;  %v4250_v31 = vld [vmem:[%s5877_s0 + $0x210] ss:$36 sps:$4 sm:$0xff]  }
  0x7c   :  { %2695 = vmatprep.subr.bf16.mxu0 %v4568_v0  ;;  %2230 = vmatpush1.bf16.msra.mxu1 %v4270_v39  ;;  %v4262_v39 = vld [vmem:[%s5877_s0 + $0x630] ss:$36 sps:$4 sm:$0xff]  }
  0x7d   :  { %2231 = vmatprep.subr.bf16.mxu1 %v4568_v0 }
  0x7f   :  { %2696 = vmatpush1.bf16.msra.mxu0 %v4194_v32  ;;  %v4251_v32 = vld [vmem:[%s5877_s0 + $0x5ec] ss:$36 sps:$4 sm:$0xff]  }
  0x80   :  { %3561 = vmatprep.subr.bf16.mxu0 %v4569_v38  ;;  %2232 = vmatpush1.bf16.msra.mxu1 %v4277_v41  ;;  %v4265_v41 = vld [vmem:[%s5877_s0 + $0x67c] ss:$36 sps:$4 sm:$0xff]  }
  0x81   :  { %2066 = vmatmul.mubr.bf16.gmra.mrb[32].mxu1 %v4160_v34  ;;  %3677 = vmatprep.subr.bf16.mxu1 %v4568_v0  ;;  %v4255_v34 = vld [vmem:[%s5877_s0 + $0x5e8] ss:$36 sps:$4 sm:$0xff]  }
  0x82   :  { %2530 = vmatmul.mubr.bf16.gmra.mrb[32].mxu0 %v4161_v35  ;;  %2073 = vmatprep.mubr.bf16.mxu1 %v4163_v36  ;;  %v4256_v35 = vld [vmem:[%s5877_s0 + $0x258] ss:$36 sps:$4 sm:$0xff]  }
  0x83   :  { %2537 = vmatprep.mubr.bf16.mxu0 %v4165_v37  ;;  %v4258_v36 = vld [vmem:[%s5877_s0 + $0x634] ss:$36 sps:$4 sm:$0xff]   ;;  %v4260_v37 = vld [vmem:[%s5877_s0 + $0x2a4] ss:$36 sps:$4 sm:$0xff]  }
  0x89   :  { %2074 = vmatmul.mubr.bf16.gmra.mrb[36].mxu1 %v4167_v40  ;;  %v4263_v40 = vld [vmem:[%s5877_s0 + $0x2a0] ss:$36 sps:$4 sm:$0xff]  }
  0x8a   :  { %2538 = vmatmul.mubr.bf16.gmra.mrb[36].mxu0 %v4169_v42  ;;  %2081 = vmatprep.mubr.bf16.mxu1 %v4171_v43  ;;  %v4267_v42 = vld [vmem:[%s5877_s0 + $0x2ec] ss:$36 sps:$4 sm:$0xff]   ;;  %v252_v43 = vld [vmem:[%s5877_s0 + $0x6c0] sm:$0xff] }
  0x8b   :  { %2545 = vmatprep.mubr.bf16.mxu0 %v4173_v44  ;;  %v4269_v44 = vld [vmem:[%s5877_s0 + $0x678] ss:$36 sps:$4 sm:$0xff]  }
  0x91   :  { %2082 = vmatmul.mubr.bf16.gmra.mrb[40].mxu1 %v4176_v45  ;;  %v4271_v45 = vld [vmem:[%s5877_s0 + $0x2e8] ss:$36 sps:$4 sm:$0xff]  }
  0x92   :  { %2546 = vmatmul.mubr.bf16.gmra.mrb[40].mxu0 %v4177_v46  ;;  %2089 = vmatprep.mubr.bf16.mxu1 %v4180_v47  ;;  %v3448_v46 = vcombine.high %v252_v43, %v252_v43  ;;  %v4273_v47 = vld [vmem:[%s5877_s0 + $0x334] ss:$36 sps:$4 sm:$0xff]  }
  0x93   :  { %2553 = vmatprep.mubr.bf16.mxu0 %v4182_v48  ;;  %v3447_v48 = vcombine.low %v252_v43, %v252_v43  ;;  %v4341_v43 = vld [vmem:[%s5877_s0 + $0x2dc] ss:$36 sps:$4 sm:$0xff]  }
  0x99   :  { %2090 = vmatmul.mubr.bf16.gmra.mrb[44].mxu1 %v4184_v49  ;;  %v4276_v49 = vld [vmem:[%s5877_s0 + $0x330] ss:$36 sps:$4 sm:$0xff]  }
  0x9a   :  { %2554 = vmatmul.mubr.bf16.gmra.mrb[44].mxu0 %v4185_v50  ;;  %2097 = vmatprep.mubr.bf16.mxu1 %v4187_v51  ;;  %v4280_v50 = vld [vmem:[%s5877_s0 + $0xc] ss:$36 sps:$4 sm:$0xff]   ;;  %v4281_v51 = vld [vmem:[%s5877_s0 + $0x37c] ss:$36 sps:$4 sm:$0xff]  }
  0x9b   :  { %2561 = vmatprep.mubr.bf16.mxu0 %v4189_v52  ;;  %v4278_v52 = vld [vmem:[%s5877_s0 + $0x8] ss:$36 sps:$4 sm:$0xff]  }
  0xa1   :  { %2098 = vmatmul.mubr.bf16.gmra.mrb[48].mxu1 %v4191_v53  ;;  %v4283_v53 = vld [vmem:[%s5877_s0 + $0x378] ss:$36 sps:$4 sm:$0xff]  }
  0xa2   :  { %2562 = vmatmul.mubr.bf16.gmra.mrb[48].mxu0 %v4192_v54  ;;  %2105 = vmatprep.mubr.bf16.mxu1 %v4195_v55  ;;  %v4285_v54 = vld [vmem:[%s5877_s0 + $0x54] ss:$36 sps:$4 sm:$0xff]   ;;  %v4287_v55 = vld [vmem:[%s5877_s0 + $0x3c4] ss:$36 sps:$4 sm:$0xff]  }
  0xa3   :  { %2697 = vmatprep.mubr.bf16.mxu0 %v4199_v56  ;;  %v4552_v56 = vld [vmem:[%s5876_s1 + $0x100] sm:$0xff]  }
  0xa9   :  { %2106 = vmatmul.mubr.bf16.gmra.mrb[52].mxu1 %v4200_v57  ;;  %v4289_v57 = vld [vmem:[%s5877_s0 + $0x50] ss:$36 sps:$4 sm:$0xff]  }
  0xaa   :  { %2698 = vmatmul.mubr.bf16.vlgmr.msra.gmra.mrb[0].mxu0 %v4197_v58  ;;  %2113 = vmatprep.mubr.bf16.mxu1 %v4203_v59  ;;  %v4290_v58 = vld [vmem:[%s5877_s0 + $0x3c0] ss:$36 sps:$4 sm:$0xff]  }
  0xab   :  { %3562 = vmatpush3.bf16.msra.mxu0 %v4201_v60  ;;  %2705 = vmatprep.mubr.bf16.mxu0 %v4205_v61  ;;  %v4291_v59 = vld [vmem:[%s5877_s0 + $0x9c] ss:$36 sps:$4 sm:$0xff]   ;;  %v4293_v60 = vld [vmem:[%s5877_s0 + $0x40c] ss:$36 sps:$4 sm:$0xff]  }
  0xac   :  { %3563 = vmatprep.subr.bf16.mxu0 %v4569_v38  ;;  %v4553_v61 = vld [vmem:[%s5876_s1 + $0x108] sm:$0xff]  }
  0xaf   :  { %3564 = vmatpush3.bf16.msra.mxu0 %v4222_v63  ;;  %v4295_v63 = vld [vmem:[%s5877_s0 + $0x98] ss:$36 sps:$4 sm:$0xff]  }
  0xb0   :  { %3565 = vmatprep.subr.bf16.mxu0 %v4569_v38 }
  0xb1   :  { %2114 = vmatmul.mubr.bf16.gmra.mrb[56].mxu1 %v4207_v62  ;;  %v4554_v62 = vld [vmem:[%s5876_s1 + $0x110] sm:$0xff]  }
  0xb2   :  { %2706 = vmatmul.mubr.bf16.gmra.mrb[4].mxu0 %v4208_v1  ;;  %2121 = vmatprep.mubr.bf16.mxu1 %v4209_v2  ;;  %v4296_v1 = vld [vmem:[%s5877_s0 + $0x408] ss:$36 sps:$4 sm:$0xff]  }
  0xb3   :  { %2713 = vmatprep.mubr.bf16.mxu0 %v4211_v3  ;;  %3566 = vmatpush3.bf16.msra.mxu0 %v4243_v4  ;;  %v4297_v2 = vld [vmem:[%s5877_s0 + $0xe4] ss:$36 sps:$4 sm:$0xff]   ;;  %v4299_v3 = vld [vmem:[%s5877_s0 + $0x454] ss:$36 sps:$4 sm:$0xff]  }
  0xb4   :  { %3567 = vmatprep.subr.bf16.mxu0 %v4569_v38  ;;  %v4555_v4 = vld [vmem:[%s5876_s1 + $0x118] sm:$0xff]  }
  0xb7   :  { %3568 = vmatpush3.bf16.msra.mxu0 %v4264_v6  ;;  %v4301_v6 = vld [vmem:[%s5877_s0 + $0xe0] ss:$36 sps:$4 sm:$0xff]  }
  0xb8   :  { %3569 = vmatprep.subr.bf16.mxu0 %v4569_v38 }
  0xb9   :  { %2122 = vmatmul.mubr.bf16.gmra.mrb[60].mxu1 %v4213_v5  ;;  %v4556_v5 = vld [vmem:[%s5876_s1 + $0x120] sm:$0xff]  }
  0xba   :  { %2714 = vmatmul.mubr.bf16.gmra.mrb[8].mxu0 %v4214_v7  ;;  %2129 = vmatprep.mubr.bf16.mxu1 %v4216_v8  ;;  %v4302_v7 = vld [vmem:[%s5877_s0 + $0x450] ss:$36 sps:$4 sm:$0xff]  }
  0xbb   :  { %2721 = vmatprep.mubr.bf16.mxu0 %v4218_v9  ;;  %3570 = vmatpush3.bf16.msra.mxu0 %v4284_v10  ;;  %v4304_v8 = vld [vmem:[%s5877_s0 + $0x12c] ss:$36 sps:$4 sm:$0xff]   ;;  %v4306_v9 = vld [vmem:[%s5877_s0 + $0x49c] ss:$36 sps:$4 sm:$0xff]  }
  0xbc   :  { %3571 = vmatprep.subr.bf16.mxu0 %v4569_v38  ;;  %v4557_v10 = vld [vmem:[%s5876_s1 + $0x128] sm:$0xff]  }
  0xbf   :  { %3572 = vmatpush3.bf16.msra.mxu0 %v4303_v12  ;;  %v4308_v12 = vld [vmem:[%s5877_s0 + $0x128] ss:$36 sps:$4 sm:$0xff]  }
  0xc0   :  { %3573 = vmatprep.subr.bf16.mxu0 %v4569_v38 }
  0xc1   :  { %2130 = vmatmul.mubr.bf16.gmra.mrb[64].mxu1 %v4220_v11  ;;  %v4558_v11 = vld [vmem:[%s5876_s1 + $0x130] sm:$0xff]  }
  0xc2   :  { %2722 = vmatmul.mubr.bf16.gmra.mrb[12].mxu0 %v4221_v13  ;;  %2137 = vmatprep.mubr.bf16.mxu1 %v4224_v14  ;;  %v4309_v13 = vld [vmem:[%s5877_s0 + $0x498] ss:$36 sps:$4 sm:$0xff]  }
  0xc3   :  { %2729 = vmatprep.mubr.bf16.mxu0 %v4226_v15  ;;  %3574 = vmatpush3.bf16.msra.mxu0 %v4326_v16  ;;  %v4310_v14 = vld [vmem:[%s5877_s0 + $0x174] ss:$36 sps:$4 sm:$0xff]   ;;  %v4312_v15 = vld [vmem:[%s5877_s0 + $0x4e4] ss:$36 sps:$4 sm:$0xff]  }
  0xc4   :  { %3575 = vmatprep.subr.bf16.mxu0 %v4569_v38  ;;  %v4559_v16 = vld [vmem:[%s5876_s1 + $0x138] sm:$0xff]  }
  0xc7   :  { %3576 = vmatpush3.bf16.msra.mxu0 %v4347_v29  ;;  %v4564_v29 = vld [vmem:[%s5876_s1 + $0x160] sm:$0xff]  }
  0xc9   :  { %2138 = vmatmul.mubr.bf16.gmra.mrb[68].mxu1 %v4228_v17  ;;  %v4560_v17 = vld [vmem:[%s5876_s1 + $0x140] sm:$0xff]  }
  0xca   :  { %2730 = vmatmul.mubr.bf16.gmra.mrb[16].mxu0 %v4229_v18  ;;  %2145 = vmatprep.mubr.bf16.mxu1 %v4230_v19  ;;  %v4314_v18 = vld [vmem:[%s5877_s0 + $0x170] ss:$36 sps:$4 sm:$0xff]   ;;  %v4315_v19 = vld [vmem:[%s5877_s0 + $0x4e0] ss:$36 sps:$4 sm:$0xff]  }
  0xcb   :  { %2737 = vmatprep.mubr.bf16.mxu0 %v4232_v20  ;;  %v4316_v20 = vld [vmem:[%s5877_s0 + $0x1bc] ss:$36 sps:$4 sm:$0xff]  }
  0xd1   :  { %2146 = vmatmul.mubr.bf16.gmra.mrb[72].mxu1 %v4234_v21  ;;  %v4318_v21 = vld [vmem:[%s5877_s0 + $0x52c] ss:$36 sps:$4 sm:$0xff]  }
  0xd2   :  { %2738 = vmatmul.mubr.bf16.gmra.mrb[20].mxu0 %v4235_v22  ;;  %2153 = vmatprep.mubr.bf16.mxu1 %v4237_v23  ;;  %v4561_v22 = vld [vmem:[%s5876_s1 + $0x148] sm:$0xff]   ;;  %v4562_v23 = vld [vmem:[%s5876_s1 + $0x150] sm:$0xff]  }
  0xd3   :  { %2745 = vmatprep.mubr.bf16.mxu0 %v4239_v24  ;;  %v4320_v24 = vld [vmem:[%s5877_s0 + $0x1b8] ss:$36 sps:$4 sm:$0xff]  }
  0xd9   :  { %2154 = vmatmul.mubr.bf16.gmra.mrb[76].mxu1 %v4241_v25  ;;  %v4321_v25 = vld [vmem:[%s5877_s0 + $0x528] ss:$36 sps:$4 sm:$0xff]  }
  0xda   :  { %2746 = vmatmul.mubr.bf16.gmra.mrb[24].mxu0 %v4242_v26  ;;  %2161 = vmatprep.mubr.bf16.mxu1 %v4244_v27  ;;  %v4322_v26 = vld [vmem:[%s5877_s0 + $0x204] ss:$36 sps:$4 sm:$0xff]   ;;  %v4324_v27 = vld [vmem:[%s5877_s0 + $0x574] ss:$36 sps:$4 sm:$0xff]  }
  0xdb   :  { %2753 = vmatprep.mubr.bf16.mxu0 %v4247_v28  ;;  %v4563_v28 = vld [vmem:[%s5876_s1 + $0x158] sm:$0xff]  }
  0xe1   :  { %2162 = vmatmul.mubr.bf16.gmra.mrb[80].mxu1 %v4249_v30  ;;  %v4327_v30 = vld [vmem:[%s5877_s0 + $0x200] ss:$36 sps:$4 sm:$0xff]  }
  0xe2   :  { %2754 = vmatmul.mubr.bf16.gmra.mrb[28].mxu0 %v4250_v31  ;;  %2169 = vmatprep.mubr.bf16.mxu1 %v4251_v32  ;;  %v4328_v31 = vld [vmem:[%s5877_s0 + $0x570] ss:$36 sps:$4 sm:$0xff]  }
  0xe3   :  { %2761 = vmatprep.mubr.bf16.mxu0 %v4253_v33  ;;  %v4329_v32 = vld [vmem:[%s5877_s0 + $0x24c] ss:$36 sps:$4 sm:$0xff]   ;;  %v4331_v33 = vld [vmem:[%s5877_s0 + $0x5bc] ss:$36 sps:$4 sm:$0xff]  }
  0xe9   :  { %2170 = vmatmul.mubr.bf16.gmra.mrb[84].mxu1 %v4255_v34  ;;  %v4565_v34 = vld [vmem:[%s5876_s1 + $0x168] sm:$0xff]  }
  0xea   :  { %2762 = vmatmul.mubr.bf16.gmra.mrb[32].mxu0 %v4256_v35  ;;  %2177 = vmatprep.mubr.bf16.mxu1 %v4258_v36  ;;  %v4566_v35 = vld [vmem:[%s5876_s1 + $0x170] sm:$0xff]   ;;  %v4333_v36 = vld [vmem:[%s5877_s0 + $0x248] ss:$36 sps:$4 sm:$0xff]  }
  0xeb   :  { %2769 = vmatprep.mubr.bf16.mxu0 %v4260_v37  ;;  %v4334_v37 = vld [vmem:[%s5877_s0 + $0x5b8] ss:$36 sps:$4 sm:$0xff]  }
  0xf1   :  { %2178 = vmatmul.mubr.bf16.gmra.mrb[88].mxu1 %v4262_v39  ;;  %v4335_v39 = vld [vmem:[%s5877_s0 + $0x294] ss:$36 sps:$4 sm:$0xff]  }
  0xf2   :  { %2770 = vmatmul.mubr.bf16.gmra.mrb[36].mxu0 %v4263_v40  ;;  %2185 = vmatprep.mubr.bf16.mxu1 %v4265_v41  ;;  %v4337_v40 = vld [vmem:[%s5877_s0 + $0x604] ss:$36 sps:$4 sm:$0xff]   ;;  %v4339_v41 = vld [vmem:[%s5877_s0 + $0x290] ss:$36 sps:$4 sm:$0xff]  }
  0xf3   :  { %2777 = vmatprep.mubr.bf16.mxu0 %v4267_v42  ;;  %v4340_v42 = vld [vmem:[%s5877_s0 + $0x600] ss:$36 sps:$4 sm:$0xff]  }
  0xf9   :  { %2186 = vmatmul.mubr.bf16.gmra.mrb[92].mxu1 %v4269_v44  ;;  %v4343_v44 = vld [vmem:[%s5877_s0 + $0x64c] ss:$36 sps:$4 sm:$0xff]  }
  0xfa   :  { %2778 = vmatmul.mubr.bf16.gmra.mrb[40].mxu0 %v4271_v45  ;;  %2193 = vmatprep.mubr.bf16.mxu1 %v3448_v46  ;;  %v4345_v45 = vld [vmem:[%s5877_s0 + $0x2d8] ss:$36 sps:$4 sm:$0xff]   ;;  %v4346_v46 = vld [vmem:[%s5877_s0 + $0x648] ss:$36 sps:$4 sm:$0xff]  }
  0xfb   :  { %2785 = vmatprep.mubr.bf16.mxu0 %v4273_v47  ;;  %v4348_v47 = vld [vmem:[%s5877_s0 + $0x324] ss:$36 sps:$4 sm:$0xff]  }
 0x101   :  { %2194 = vmatmul.mubr.bf16.gmra.mrb[96].mxu1 %v3447_v48  ;;  %v4350_v48 = vld [vmem:[%s5877_s0 + $0x694] ss:$36 sps:$4 sm:$0xff]  }
 0x102   :  { %2786 = vmatmul.mubr.bf16.gmra.mrb[44].mxu0 %v4276_v49  ;;  %2233 = vmatprep.mubr.bf16.mxu1 %v4280_v50  ;;  %v255_v49 = vld [vmem:[%s5877_s0 + $0x6d8] sm:$0xff]  ;;  %v4352_v50 = vld [vmem:[%s5877_s0 + $0x320] ss:$36 sps:$4 sm:$0xff]  }
 0x103   :  { %2793 = vmatprep.mubr.bf16.mxu0 %v4281_v51  ;;  %v4353_v51 = vld [vmem:[%s5877_s0 + $0x690] ss:$36 sps:$4 sm:$0xff]  }
 0x109   :  { %2234 = vmatmul.mubr.bf16.vlgmr.msra.gmra.mrb[0].mxu1 %v4278_v52  ;;  %v4354_v52 = vld [vmem:[%s5877_s0 + $0x36c] ss:$36 sps:$4 sm:$0xff]  }
 0x10a   :  { %2794 = vmatmul.mubr.bf16.gmra.mrb[48].mxu0 %v4283_v53  ;;  %2241 = vmatprep.mubr.bf16.mxu1 %v4285_v54  ;;  %v3454_v53 = vcombine.high %v255_v49, %v255_v49  ;;  %v4357_v54 = vld [vmem:[%s5877_s0 + $0x368] ss:$36 sps:$4 sm:$0xff]  }
 0x10b   :  { %2801 = vmatprep.mubr.bf16.mxu0 %v4287_v55  ;;  %3693 = vmatpush1.bf16.msra.mxu1 %v4552_v56  ;;  %v3453_v55 = vcombine.low %v255_v49, %v255_v49  ;;  %v4359_v56 = vld [vmem:[%s5877_s0 + $0x3b4] ss:$36 sps:$4 sm:$0xff]   ;;  %v4422_v49 = vld [vmem:[%s5877_s0 + $0x4dc] ss:$36 sps:$4 sm:$0xff]  }
 0x10c   :  { %3678 = vmatprep.subr.bf16.mxu1 %v4568_v0 }
 0x10f   :  { %3694 = vmatpush1.bf16.msra.mxu1 %v4553_v61  ;;  %v4366_v61 = vld [vmem:[%s5877_s0 + $0x68] ss:$36 sps:$4 sm:$0xff]  }
 0x110   :  { %3679 = vmatprep.subr.bf16.mxu1 %v4568_v0 }
 0x111   :  { %2242 = vmatmul.mubr.bf16.gmra.mrb[4].mxu1 %v4289_v57  ;;  %v4361_v57 = vld [vmem:[%s5877_s0 + $0x3b0] ss:$36 sps:$4 sm:$0xff]  }
 0x112   :  { %2802 = vmatmul.mubr.bf16.gmra.mrb[52].mxu0 %v4290_v58  ;;  %2249 = vmatprep.mubr.bf16.mxu1 %v4291_v59  ;;  %v4362_v58 = vld [vmem:[%s5877_s0 + $0x20] ss:$36 sps:$4 sm:$0xff]  }
 0x113   :  { %2809 = vmatprep.mubr.bf16.mxu0 %v4293_v60  ;;  %3695 = vmatpush1.bf16.msra.mxu1 %v4554_v62  ;;  %v4363_v59 = vld [vmem:[%s5877_s0 + $0x3fc] ss:$36 sps:$4 sm:$0xff]   ;;  %v4367_v62 = vld [vmem:[%s5877_s0 + $0x444] ss:$36 sps:$4 sm:$0xff]  }
 0x114   :  { %3680 = vmatprep.subr.bf16.mxu1 %v4568_v0  ;;  %v4365_v60 = vld [vmem:[%s5877_s0 + $0x3f8] ss:$36 sps:$4 sm:$0xff]  }
 0x117   :  { %3696 = vmatpush1.bf16.msra.mxu1 %v4555_v4  ;;  %v4374_v4 = vld [vmem:[%s5877_s0 + $0xf8] ss:$36 sps:$4 sm:$0xff]  }
 0x118   :  { %3681 = vmatprep.subr.bf16.mxu1 %v4568_v0 }
 0x119   :  { %2250 = vmatmul.mubr.bf16.gmra.mrb[8].mxu1 %v4295_v63  ;;  %v4369_v63 = vld [vmem:[%s5877_s0 + $0x440] ss:$36 sps:$4 sm:$0xff]  }
 0x11a   :  { %2810 = vmatmul.mubr.bf16.gmra.mrb[56].mxu0 %v4296_v1  ;;  %2257 = vmatprep.mubr.bf16.mxu1 %v4297_v2  ;;  %v4370_v1 = vld [vmem:[%s5877_s0 + $0xb0] ss:$36 sps:$4 sm:$0xff]  }
 0x11b   :  { %2817 = vmatprep.mubr.bf16.mxu0 %v4299_v3  ;;  %3697 = vmatpush1.bf16.msra.mxu1 %v4556_v5  ;;  %v4371_v2 = vld [vmem:[%s5877_s0 + $0x48c] ss:$36 sps:$4 sm:$0xff]   ;;  %v4375_v5 = vld [vmem:[%s5877_s0 + $0x4d4] ss:$36 sps:$4 sm:$0xff]  }
 0x11c   :  { %3682 = vmatprep.subr.bf16.mxu1 %v4568_v0  ;;  %v4373_v3 = vld [vmem:[%s5877_s0 + $0x488] ss:$36 sps:$4 sm:$0xff]  }
 0x11f   :  { %3698 = vmatpush1.bf16.msra.mxu1 %v4557_v10  ;;  %v4382_v10 = vld [vmem:[%s5877_s0 + $0x188] ss:$36 sps:$4 sm:$0xff]  }
 0x120   :  { %3683 = vmatprep.subr.bf16.mxu1 %v4568_v0 }
 0x121   :  { %2258 = vmatmul.mubr.bf16.gmra.mrb[12].mxu1 %v4301_v6  ;;  %v4377_v6 = vld [vmem:[%s5877_s0 + $0x4d0] ss:$36 sps:$4 sm:$0xff]  }
 0x122   :  { %2818 = vmatmul.mubr.bf16.gmra.mrb[60].mxu0 %v4302_v7  ;;  %2265 = vmatprep.mubr.bf16.mxu1 %v4304_v8  ;;  %v4378_v7 = vld [vmem:[%s5877_s0 + $0x140] ss:$36 sps:$4 sm:$0xff]  }
 0x123   :  { %2825 = vmatprep.mubr.bf16.mxu0 %v4306_v9  ;;  %3699 = vmatpush1.bf16.msra.mxu1 %v4558_v11  ;;  %v4379_v8 = vld [vmem:[%s5877_s0 + $0x51c] ss:$36 sps:$4 sm:$0xff]   ;;  %v4383_v11 = vld [vmem:[%s5877_s0 + $0x564] ss:$36 sps:$4 sm:$0xff]  }
 0x124   :  { %3684 = vmatprep.subr.bf16.mxu1 %v4568_v0  ;;  %v4381_v9 = vld [vmem:[%s5877_s0 + $0x518] ss:$36 sps:$4 sm:$0xff]  }
 0x127   :  { %3700 = vmatpush1.bf16.msra.mxu1 %v4559_v16  ;;  %v4390_v16 = vld [vmem:[%s5877_s0 + $0x218] ss:$36 sps:$4 sm:$0xff]  }
 0x128   :  { %3685 = vmatprep.subr.bf16.mxu1 %v4568_v0 }
 0x129   :  { %2266 = vmatmul.mubr.bf16.gmra.mrb[16].mxu1 %v4308_v12  ;;  %v4385_v12 = vld [vmem:[%s5877_s0 + $0x560] ss:$36 sps:$4 sm:$0xff]  }
 0x12a   :  { %2826 = vmatmul.mubr.bf16.gmra.mrb[64].mxu0 %v4309_v13  ;;  %2273 = vmatprep.mubr.bf16.mxu1 %v4310_v14  ;;  %v4386_v13 = vld [vmem:[%s5877_s0 + $0x1d0] ss:$36 sps:$4 sm:$0xff]  }
 0x12b   :  { %2833 = vmatprep.mubr.bf16.mxu0 %v4312_v15  ;;  %3701 = vmatpush1.bf16.msra.mxu1 %v4560_v17  ;;  %v4387_v14 = vld [vmem:[%s5877_s0 + $0x5ac] ss:$36 sps:$4 sm:$0xff]   ;;  %v4391_v17 = vld [vmem:[%s5877_s0 + $0x5f4] ss:$36 sps:$4 sm:$0xff]  }
 0x12c   :  { %3686 = vmatprep.subr.bf16.mxu1 %v4568_v0  ;;  %v4389_v15 = vld [vmem:[%s5877_s0 + $0x5a8] ss:$36 sps:$4 sm:$0xff]  }
 0x12f   :  { %3702 = vmatpush1.bf16.msra.mxu1 %v4561_v22  ;;  %v4398_v22 = vld [vmem:[%s5877_s0 + $0x2a8] ss:$36 sps:$4 sm:$0xff]  }
 0x130   :  { %3687 = vmatprep.subr.bf16.mxu1 %v4568_v0 }
 0x131   :  { %2274 = vmatmul.mubr.bf16.gmra.mrb[20].mxu1 %v4314_v18  ;;  %v4393_v18 = vld [vmem:[%s5877_s0 + $0x5f0] ss:$36 sps:$4 sm:$0xff]  }
 0x132   :  { %2834 = vmatmul.mubr.bf16.gmra.mrb[68].mxu0 %v4315_v19  ;;  %2281 = vmatprep.mubr.bf16.mxu1 %v4316_v20  ;;  %v4394_v19 = vld [vmem:[%s5877_s0 + $0x260] ss:$36 sps:$4 sm:$0xff]  }
 0x133   :  { %2841 = vmatprep.mubr.bf16.mxu0 %v4318_v21  ;;  %3703 = vmatpush1.bf16.msra.mxu1 %v4562_v23  ;;  %v4395_v20 = vld [vmem:[%s5877_s0 + $0x63c] ss:$36 sps:$4 sm:$0xff]   ;;  %v4399_v23 = vld [vmem:[%s5877_s0 + $0x684] ss:$36 sps:$4 sm:$0xff]  }
 0x134   :  { %3688 = vmatprep.subr.bf16.mxu1 %v4568_v0  ;;  %v4397_v21 = vld [vmem:[%s5877_s0 + $0x638] ss:$36 sps:$4 sm:$0xff]  }
 0x137   :  { %3704 = vmatpush1.bf16.msra.mxu1 %v4563_v28 }
 0x138   :  { %3689 = vmatprep.subr.bf16.mxu1 %v4568_v0 }
 0x139   :  { %2282 = vmatmul.mubr.bf16.gmra.mrb[24].mxu1 %v4320_v24  ;;  %v253_v24 = vld [vmem:[%s5877_s0 + $0x6c8] sm:$0xff] }
 0x13a   :  { %2842 = vmatmul.mubr.bf16.gmra.mrb[72].mxu0 %v4321_v25  ;;  %2289 = vmatprep.mubr.bf16.mxu1 %v4322_v26  ;;  %v4401_v25 = vld [vmem:[%s5877_s0 + $0x680] ss:$36 sps:$4 sm:$0xff]   ;;  %v4402_v26 = vld [vmem:[%s5877_s0 + $0x2f0] ss:$36 sps:$4 sm:$0xff]   ;;  %v3449_v28 = vcombine.low %v253_v24, %v253_v24 }
 0x13b   :  { %2849 = vmatprep.mubr.bf16.mxu0 %v4324_v27  ;;  %3705 = vmatpush1.bf16.msra.mxu1 %v4564_v29  ;;  %v3450_v27 = vcombine.high %v253_v24, %v253_v24  ;;  %v4405_v29 = vld [vmem:[%s5877_s0 + $0x338] ss:$36 sps:$4 sm:$0xff]  }
 0x13c   :  { %3690 = vmatprep.subr.bf16.mxu1 %v4568_v0 }
 0x13f   :  { %3706 = vmatpush1.bf16.msra.mxu1 %v4565_v34  ;;  %v4412_v34 = vld [vmem:[%s5877_s0 + $0x400] ss:$36 sps:$4 sm:$0xff]  }
 0x140   :  { %3691 = vmatprep.subr.bf16.mxu1 %v4568_v0 }
 0x141   :  { %2290 = vmatmul.mubr.bf16.gmra.mrb[28].mxu1 %v4327_v30  ;;  %v4408_v30 = vld [vmem:[%s5877_s0 + $0x3bc] ss:$36 sps:$4 sm:$0xff]  }
 0x142   :  { %2850 = vmatmul.mubr.bf16.gmra.mrb[76].mxu0 %v4328_v31  ;;  %2297 = vmatprep.mubr.bf16.mxu1 %v4329_v32  ;;  %v4406_v31 = vld [vmem:[%s5877_s0 + $0x3b8] ss:$36 sps:$4 sm:$0xff]   ;;  %v4409_v32 = vld [vmem:[%s5877_s0 + $0x380] ss:$36 sps:$4 sm:$0xff]  }
 0x143   :  { %2857 = vmatprep.mubr.bf16.mxu0 %v4331_v33  ;;  %3707 = vmatpush1.bf16.msra.mxu1 %v4566_v35  ;;  %v4410_v33 = vld [vmem:[%s5877_s0 + $0x404] ss:$36 sps:$4 sm:$0xff]  }
 0x144   :  { %3692 = vmatprep.subr.bf16.mxu1 %v4568_v0  ;;  %v4567_v0 = vld [vmem:[%s5876_s1 + $0x178] sm:$0xff]   ;;  %v4413_v35 = vld [vmem:[%s5877_s0 + $0x3c8] ss:$36 sps:$4 sm:$0xff]  }
 0x147   :  { %3708 = vmatpush1.bf16.msra.mxu1 %v4567_v0 }
 0x149   :  { %2298 = vmatmul.mubr.bf16.gmra.mrb[32].mxu1 %v4333_v36  ;;  %v4414_v36 = vld [vmem:[%s5877_s0 + $0x44c] ss:$36 sps:$4 sm:$0xff]  }
 0x14a   :  { %2858 = vmatmul.mubr.bf16.gmra.mrb[80].mxu0 %v4334_v37  ;;  %2305 = vmatprep.mubr.bf16.mxu1 %v4335_v39 }
 0x14b   :  { %2865 = vmatprep.mubr.bf16.mxu0 %v4337_v40  ;;  %v4416_v40 = vld [vmem:[%s5877_s0 + $0x448] ss:$36 sps:$4 sm:$0xff]  }
 0x151   :  { %2306 = vmatmul.mubr.bf16.gmra.mrb[36].mxu1 %v4339_v41  ;;  %v4417_v41 = vld [vmem:[%s5877_s0 + $0x410] ss:$36 sps:$4 sm:$0xff]  }
 0x152   :  { %2866 = vmatmul.mubr.bf16.gmra.mrb[84].mxu0 %v4340_v42  ;;  %2313 = vmatprep.mubr.bf16.mxu1 %v4341_v43  ;;  %v4418_v42 = vld [vmem:[%s5877_s0 + $0x494] ss:$36 sps:$4 sm:$0xff]  }
 0x153   :  { %2873 = vmatprep.mubr.bf16.mxu0 %v4343_v44 }
 0x159   :  { %2314 = vmatmul.mubr.bf16.gmra.mrb[40].mxu1 %v4345_v45 }
 0x15a   :  { %2874 = vmatmul.mubr.bf16.gmra.mrb[88].mxu0 %v4346_v46  ;;  %2321 = vmatprep.mubr.bf16.mxu1 %v4348_v47  ;;  %v4420_v46 = vld [vmem:[%s5877_s0 + $0x490] ss:$36 sps:$4 sm:$0xff]  }
 0x15b   :  { %2881 = vmatprep.mubr.bf16.mxu0 %v4350_v48  ;;  %v4421_v48 = vld [vmem:[%s5877_s0 + $0x458] ss:$36 sps:$4 sm:$0xff]  }
 0x161   :  { %2322 = vmatmul.mubr.bf16.gmra.mrb[44].mxu1 %v4352_v50 }
 0x162   :  { %2882 = vmatmul.mubr.bf16.gmra.mrb[92].mxu0 %v4353_v51  ;;  %2329 = vmatprep.mubr.bf16.mxu1 %v4354_v52 }
 0x163   :  { %2889 = vmatprep.mubr.bf16.mxu0 %v3454_v53  ;;  %v4424_v53 = vld [vmem:[%s5877_s0 + $0x4d8] ss:$36 sps:$4 sm:$0xff]  }
 0x169   :  { %2330 = vmatmul.mubr.bf16.gmra.mrb[48].mxu1 %v4357_v54 }
 0x16a   :  { %2890 = vmatmul.mubr.bf16.gmra.mrb[96].mxu0 %v3453_v55  ;;  %2337 = vmatprep.mubr.bf16.mxu1 %v4359_v56  ;;  %v4425_v55 = vld [vmem:[%s5877_s0 + $0x4a0] ss:$36 sps:$4 sm:$0xff]  }
 0x16b   :  { %3577 = vmatprep.mubr.msk.bf16.mxu0 %vm4570_vm0, %v4569_v38  ;;  %v4426_v56 = vld [vmem:[%s5877_s0 + $0x524] ss:$36 sps:$4 sm:$0xff]  }
 0x171   :  { %2338 = vmatmul.mubr.bf16.gmra.mrb[52].mxu1 %v4361_v57 }
 0x172   :  { %3578 = vmatmul.mubr.bf16.vlgmr.msra.gmra.mrb[0].mxu0 %v4362_v58  ;;  %2345 = vmatprep.mubr.bf16.mxu1 %v4363_v59 }
 0x173   :  { %3581 = vmatprep.mubr.msk.bf16.mxu0 %vm4570_vm0, %v4569_v38 }
 0x179   :  { %2346 = vmatmul.mubr.bf16.gmra.mrb[56].mxu1 %v4365_v60  ;;  %v4428_v60 = vld [vmem:[%s5877_s0 + $0x520] ss:$36 sps:$4 sm:$0xff]  }
 0x17a   :  { %3582 = vmatmul.mubr.bf16.gmra.mrb[4].mxu0 %v4366_v61  ;;  %2353 = vmatprep.mubr.bf16.mxu1 %v4367_v62  ;;  %v4429_v62 = vld [vmem:[%s5877_s0 + $0x4e8] ss:$36 sps:$4 sm:$0xff]  }
 0x17b   :  { %3585 = vmatprep.mubr.msk.bf16.mxu0 %vm4570_vm0, %v4569_v38 }
 0x181   :  { %2354 = vmatmul.mubr.bf16.gmra.mrb[60].mxu1 %v4369_v63  ;;  %v4430_v63 = vld [vmem:[%s5877_s0 + $0x56c] ss:$36 sps:$4 sm:$0xff]  }
 0x182   :  { %3586 = vmatmul.mubr.bf16.gmra.mrb[8].mxu0 %v4370_v1  ;;  %2361 = vmatprep.mubr.bf16.mxu1 %v4371_v2 }
 0x183   :  { %3589 = vmatprep.mubr.msk.bf16.mxu0 %vm4570_vm0, %v4569_v38 }
 0x189   :  { %2362 = vmatmul.mubr.bf16.gmra.mrb[64].mxu1 %v4373_v3 }
 0x18a   :  { %3590 = vmatmul.mubr.bf16.gmra.mrb[12].mxu0 %v4374_v4  ;;  %2369 = vmatprep.mubr.bf16.mxu1 %v4375_v5  ;;  %v4432_v4 = vld [vmem:[%s5877_s0 + $0x568] ss:$36 sps:$4 sm:$0xff]  }
 0x18b   :  { %3593 = vmatprep.mubr.msk.bf16.mxu0 %vm4570_vm0, %v4569_v38 }
 0x191   :  { %2370 = vmatmul.mubr.bf16.gmra.mrb[68].mxu1 %v4377_v6  ;;  %v4433_v6 = vld [vmem:[%s5877_s0 + $0x530] ss:$36 sps:$4 sm:$0xff]  }
 0x192   :  { %3594 = vmatmul.mubr.bf16.gmra.mrb[16].mxu0 %v4378_v7  ;;  %2377 = vmatprep.mubr.bf16.mxu1 %v4379_v8  ;;  %v4434_v7 = vld [vmem:[%s5877_s0 + $0x5b4] ss:$36 sps:$4 sm:$0xff]  }
 0x193   :  { %3597 = vmatprep.mubr.msk.bf16.mxu0 %vm4570_vm0, %v4569_v38 }
 0x199   :  { %2378 = vmatmul.mubr.bf16.gmra.mrb[72].mxu1 %v4381_v9 }
 0x19a   :  { %3598 = vmatmul.mubr.bf16.gmra.mrb[20].mxu0 %v4382_v10  ;;  %2385 = vmatprep.mubr.bf16.mxu1 %v4383_v11  ;;  %v4436_v11 = vld [vmem:[%s5877_s0 + $0x5b0] ss:$36 sps:$4 sm:$0xff]  }
 0x19b   :  { %3601 = vmatprep.mubr.msk.bf16.mxu0 %vm4570_vm0, %v4569_v38 }
 0x1a1   :  { %2386 = vmatmul.mubr.bf16.gmra.mrb[76].mxu1 %v4385_v12 }
 0x1a2   :  { %3602 = vmatmul.mubr.bf16.gmra.mrb[24].mxu0 %v4386_v13  ;;  %2393 = vmatprep.mubr.bf16.mxu1 %v4387_v14  ;;  %v4437_v13 = vld [vmem:[%s5877_s0 + $0x578] ss:$36 sps:$4 sm:$0xff]  }
 0x1a3   :  { %3605 = vmatprep.mubr.msk.bf16.mxu0 %vm4570_vm0, %v4569_v38  ;;  %v4438_v14 = vld [vmem:[%s5877_s0 + $0x5fc] ss:$36 sps:$4 sm:$0xff]  }
 0x1a9   :  { %2394 = vmatmul.mubr.bf16.gmra.mrb[80].mxu1 %v4389_v15 }
 0x1aa   :  { %3606 = vmatmul.mubr.bf16.gmra.mrb[28].mxu0 %v4390_v16  ;;  %2401 = vmatprep.mubr.bf16.mxu1 %v4391_v17 }
 0x1ab   :  { %3609 = vmatprep.mubr.msk.bf16.mxu0 %vm4570_vm0, %v4569_v38 }
 0x1b1   :  { %2402 = vmatmul.mubr.bf16.gmra.mrb[84].mxu1 %v4393_v18  ;;  %v4440_v18 = vld [vmem:[%s5877_s0 + $0x5f8] ss:$36 sps:$4 sm:$0xff]  }
 0x1b2   :  { %3610 = vmatmul.mubr.bf16.gmra.mrb[32].mxu0 %v4394_v19  ;;  %2409 = vmatprep.mubr.bf16.mxu1 %v4395_v20  ;;  %v4441_v20 = vld [vmem:[%s5877_s0 + $0x5c0] ss:$36 sps:$4 sm:$0xff]  }
 0x1b3   :  { %3613 = vmatprep.mubr.msk.bf16.mxu0 %vm4570_vm0, %v4569_v38 }
 0x1b9   :  { %2410 = vmatmul.mubr.bf16.gmra.mrb[88].mxu1 %v4397_v21  ;;  %v4442_v21 = vld [vmem:[%s5877_s0 + $0x644] ss:$36 sps:$4 sm:$0xff]  }
 0x1ba   :  { %3614 = vmatmul.mubr.bf16.gmra.mrb[36].mxu0 %v4398_v22  ;;  %2417 = vmatprep.mubr.bf16.mxu1 %v4399_v23 }
 0x1bb   :  { %3617 = vmatprep.mubr.msk.bf16.mxu0 %vm4570_vm0, %v4569_v38 }
 0x1c1   :  { %2418 = vmatmul.mubr.bf16.gmra.mrb[92].mxu1 %v4401_v25  ;;  %v4444_v25 = vld [vmem:[%s5877_s0 + $0x640] ss:$36 sps:$4 sm:$0xff]  }
 0x1c2   :  { %3618 = vmatmul.mubr.bf16.gmra.mrb[40].mxu0 %v4402_v26  ;;  %2425 = vmatprep.mubr.bf16.mxu1 %v3450_v27  ;;  %v4445_v27 = vld [vmem:[%s5877_s0 + $0x608] ss:$36 sps:$4 sm:$0xff]  }
 0x1c3   :  { %3621 = vmatprep.mubr.msk.bf16.mxu0 %vm4570_vm0, %v4569_v38 }
 0x1c9   :  { %2426 = vmatmul.mubr.bf16.gmra.mrb[96].mxu1 %v3449_v28  ;;  %v4446_v28 = vld [vmem:[%s5877_s0 + $0x68c] ss:$36 sps:$4 sm:$0xff]  }
 0x1ca   :  { %3622 = vmatmul.mubr.bf16.gmra.mrb[44].mxu0 %v4405_v29  ;;  %2569 = vmatprep.mubr.bf16.mxu1 %v4408_v30  ;;  %v254_v30 = vld [vmem:[%s5877_s0 + $0x6d0] sm:$0xff] }
 0x1cb   :  { %3625 = vmatprep.mubr.msk.bf16.mxu0 %vm4570_vm0, %v4569_v38 }
 0x1d1   :  { %2570 = vmatmul.mubr.bf16.vlgmr.msra.gmra.mrb[52].mxu1 %v4406_v31 }
 0x1d2   :  { %3626 = vmatmul.mubr.bf16.gmra.mrb[48].mxu0 %v4409_v32  ;;  %2577 = vmatprep.mubr.bf16.mxu1 %v4410_v33  ;;  %v4448_v33 = vld [vmem:[%s5877_s0 + $0x688] ss:$36 sps:$4 sm:$0xff]  }
 0x1d3   :  { %3629 = vmatprep.mubr.msk.bf16.mxu0 %vm4570_vm0, %v4569_v38 }
 0x1d9   :  { %2578 = vmatmul.mubr.bf16.gmra.mrb[56].mxu1 %v4412_v34 }
 0x1da   :  { %3630 = vmatmul.mubr.bf16.gmra.mrb[52].mxu0 %v4413_v35  ;;  %2585 = vmatprep.mubr.bf16.mxu1 %v4414_v36  ;;  %v4449_v35 = vld [vmem:[%s5877_s0 + $0x650] ss:$36 sps:$4 sm:$0xff]   ;;  %v3452_v36 = vcombine.high %v254_v30, %v254_v30 }
 0x1db   :  { %3633 = vmatprep.mubr.msk.bf16.mxu0 %vm4570_vm0, %v4569_v38 }
 0x1dc   :  { %v5544_v37 = vpop.f32.mrb[0].mxu1 }
 0x1dd   :  { %v2237_v39 = vpop.f32.mrb[1].mxu1 }
 0x1de   :  { %v5549_v0 = vpop.f32.mrb[2].mxu1 }
 0x1df   :  { %v2240_v43 = vpop.f32.mrb[3].mxu1 }
 0x1e1   :  { %2586 = vmatmul.mubr.bf16.gmra.mrb[60].mxu1 %v4416_v40 }
 0x1e2   :  { %3634 = vmatmul.mubr.bf16.gmra.mrb[56].mxu0 %v4417_v41  ;;  %2593 = vmatprep.mubr.bf16.mxu1 %v4418_v42  ;;  %v3451_v42 = vcombine.low %v254_v30, %v254_v30 }
 0x1e3   :  { %3637 = vmatprep.mubr.msk.bf16.mxu0 %vm4570_vm0, %v4569_v38 }
 0x1e4   :  { %v5559_v44 = vpop.f32.mrb[4].mxu1 }
 0x1e5   :  { %v2245_v45 = vpop.f32.mrb[5].mxu1 }
 0x1e6   :  { %v5564_v47 = vpop.f32.mrb[6].mxu1  ;;  %v4452_v45 = vld [vmem:[%s5877_s0 + $0x698] ss:$36 sps:$4 sm:$0xff]  }
 0x1e7   :  { %v2248_v50 = vpop.f32.mrb[7].mxu1 }
 0x1e9   :  { %2594 = vmatmul.mubr.bf16.gmra.mrb[64].mxu1 %v4420_v46 }
 0x1ea   :  { %3638 = vmatmul.mubr.bf16.gmra.mrb[60].mxu0 %v4421_v48  ;;  %2601 = vmatprep.mubr.bf16.mxu1 %v4422_v49 }
 0x1eb   :  { %3641 = vmatprep.mubr.msk.bf16.mxu0 %vm4570_vm0, %v4569_v38 }
 0x1ec   :  { %v5574_v51 = vpop.f32.mrb[8].mxu1 }
 0x1ed   :  { %v2253_v52 = vpop.f32.mrb[9].mxu1 }
 0x1ee   :  { %v5579_v54 = vpop.f32.mrb[10].mxu1  ;;  %v4453_v52 = vld [vmem:[%s5877_s0 + $0x6e0] ss:$0 sps:$4 sm:$0xff]  }
 0x1ef   :  { %v2256_v57 = vpop.f32.mrb[11].mxu1 }
 0x1f1   :  { %2602 = vmatmul.mubr.bf16.gmra.mrb[68].mxu1 %v4424_v53 }
 0x1f2   :  { %3642 = vmatmul.mubr.bf16.gmra.mrb[64].mxu0 %v4425_v55  ;;  %2609 = vmatprep.mubr.bf16.mxu1 %v4426_v56 }
 0x1f3   :  { %3645 = vmatprep.mubr.msk.bf16.mxu0 %vm4570_vm0, %v4569_v38 }
 0x1f4   :  { %v5589_v58 = vpop.f32.mrb[12].mxu1 }
 0x1f5   :  { %v2261_v59 = vpop.f32.mrb[13].mxu1 }
 0x1f6   :  { %v5594_v61 = vpop.f32.mrb[14].mxu1 }
 0x1f7   :  { %v2264_v1 = vpop.f32.mrb[15].mxu1 }
 0x1f9   :  { %2610 = vmatmul.mubr.bf16.gmra.mrb[72].mxu1 %v4428_v60 }
 0x1fa   :  { %3646 = vmatmul.mubr.bf16.gmra.mrb[68].mxu0 %v4429_v62  ;;  %2617 = vmatprep.mubr.bf16.mxu1 %v4430_v63 }
 0x1fb   :  { %3649 = vmatprep.mubr.msk.bf16.mxu0 %vm4570_vm0, %v4569_v38 }
 0x1fc   :  { %v5604_v2 = vpop.f32.mrb[16].mxu1 }
 0x1fd   :  { %v2269_v3 = vpop.f32.mrb[17].mxu1 }
 0x1fe   :  { %v5609_v5 = vpop.f32.mrb[18].mxu1 }
 0x1ff   :  { %v2272_v8 = vpop.f32.mrb[19].mxu1 }
 0x201   :  { %2618 = vmatmul.mubr.bf16.gmra.mrb[76].mxu1 %v4432_v4 }
 0x202   :  { %3650 = vmatmul.mubr.bf16.gmra.mrb[72].mxu0 %v4433_v6  ;;  %2625 = vmatprep.mubr.bf16.mxu1 %v4434_v7 }
 0x203   :  { %3653 = vmatprep.mubr.msk.bf16.mxu0 %vm4570_vm0, %v4569_v38 }
 0x204   :  { %v5619_v9 = vpop.f32.mrb[20].mxu1 }
 0x205   :  { %v2277_v10 = vpop.f32.mrb[21].mxu1 }
 0x206   :  { %v5624_v12 = vpop.f32.mrb[22].mxu1 }
 0x207   :  { %v2280_v15 = vpop.f32.mrb[23].mxu1 }
 0x209   :  { %2626 = vmatmul.mubr.bf16.gmra.mrb[80].mxu1 %v4436_v11 }
 0x20a   :  { %3654 = vmatmul.mubr.bf16.gmra.mrb[76].mxu0 %v4437_v13  ;;  %2633 = vmatprep.mubr.bf16.mxu1 %v4438_v14 }
 0x20b   :  { %3657 = vmatprep.mubr.msk.bf16.mxu0 %vm4570_vm0, %v4569_v38 }
 0x20c   :  { %v5634_v16 = vpop.f32.mrb[24].mxu1 }
 0x20d   :  { %v2285_v17 = vpop.f32.mrb[25].mxu1 }
 0x20e   :  { %v5639_v19 = vpop.f32.mrb[26].mxu1 }
 0x20f   :  { %v2288_v22 = vpop.f32.mrb[27].mxu1 }
 0x211   :  { %2634 = vmatmul.mubr.bf16.gmra.mrb[84].mxu1 %v4440_v18 }
 0x212   :  { %3658 = vmatmul.mubr.bf16.gmra.mrb[80].mxu0 %v4441_v20  ;;  %2641 = vmatprep.mubr.bf16.mxu1 %v4442_v21 }
 0x213   :  { %3661 = vmatprep.mubr.msk.bf16.mxu0 %vm4570_vm0, %v4569_v38 }
 0x214   :  { %v5649_v23 = vpop.f32.mrb[28].mxu1 }
 0x215   :  { %v2293_v24 = vpop.f32.mrb[29].mxu1 }
 0x216   :  { %v5654_v26 = vpop.f32.mrb[30].mxu1 }
 0x217   :  { %v2296_v29 = vpop.f32.mrb[31].mxu1 }
 0x219   :  { %2642 = vmatmul.mubr.bf16.gmra.mrb[88].mxu1 %v4444_v25 }
 0x21a   :  { %3662 = vmatmul.mubr.bf16.gmra.mrb[84].mxu0 %v4445_v27  ;;  %2649 = vmatprep.mubr.bf16.mxu1 %v4446_v28 }
 0x21b   :  { %3665 = vmatprep.mubr.msk.bf16.mxu0 %vm4570_vm0, %v4569_v38 }
 0x21c   :  { %v5667_v31 = vpop.f32.mrb[32].mxu1 }
 0x21d   :  { %v2301_v32 = vpop.f32.mrb[33].mxu1 }
 0x21e   :  { %v5672_v34 = vpop.f32.mrb[34].mxu1 }
 0x21f   :  { %v2304_v39 = vpop.f32.mrb[35].mxu1 }
 0x221   :  { %2650 = vmatmul.mubr.bf16.gmra.mrb[92].mxu1 %v4448_v33 }
 0x222   :  { %3666 = vmatmul.mubr.bf16.gmra.mrb[88].mxu0 %v4449_v35  ;;  %2657 = vmatprep.mubr.bf16.mxu1 %v3452_v36 }
 0x223   :  { %3669 = vmatprep.mubr.msk.bf16.mxu0 %vm4570_vm0, %v4569_v38 }
 0x224   :  { %v5679_v40 = vpop.f32.mrb[36].mxu1 }
 0x225   :  { %v2309_v41 = vpop.f32.mrb[37].mxu1 }
 0x226   :  { %v5681_v43 = vpop.f32.mrb[38].mxu1 }
 0x227   :  { %v2312_v46 = vpop.f32.mrb[39].mxu1 }
 0x229   :  { %2658 = vmatmul.mubr.bf16.gmra.mrb[96].mxu1 %v3451_v42 }
 0x22a   :  { %3670 = vmatmul.mubr.bf16.gmra.mrb[92].mxu0 %v4452_v45 }
 0x22b   :  { %3673 = vmatprep.mubr.msk.bf16.mxu0 %vm4570_vm0, %v4569_v38 }
 0x22c   :  { %v5688_v48 = vpop.f32.mrb[40].mxu1 }
 0x22d   :  { %v2317_v49 = vpop.f32.mrb[41].mxu1 }
 0x22e   :  { %v5690_v50 = vpop.f32.mrb[42].mxu1 }
 0x22f   :  { %v2320_v53 = vpop.f32.mrb[43].mxu1 }
 0x232   :  { %3674 = vmatmul.mubr.bf16.gmra.mrb[96].mxu0 %v4453_v52 }
 0x234   :  { %v5695_v55 = vpop.f32.mrb[44].mxu1 }
 0x235   :  { %v2325_v56 = vpop.f32.mrb[45].mxu1 }
 0x236   :  { %v5697_v57 = vpop.f32.mrb[46].mxu1 }
 0x237   :  { %v2328_v59 = vpop.f32.mrb[47].mxu1 }
 0x23c   :  { %v5699_v60 = vpop.f32.mrb[48].mxu1 }
 0x23d   :  { %v2333_v38 = vpop.f32.mrb[49].mxu1 }
 0x23e   :  { %v5701_v62 = vpop.f32.mrb[50].mxu1 }
 0x23f   :  { %v2336_v63 = vpop.f32.mrb[51].mxu1 }
 0x245   :  { %v2931_v1 = vpop.f32.mrb[0].mxu0 }
 0x246   :  { %v3709_v3 = vadd.f32 %v2931_v1, %v5544_v37  ;;  %v3579_v4 = vpop.f32.mrb[1].mxu0 }
 0x247   :  { %v2934_v6 = vpop.f32.mrb[2].mxu0 }
 0x248   :  { %4454 = vtanh.f32 %v3709_v3  ;;  %v3710_v7 = vadd.f32 %v2934_v6, %v5549_v0  ;;  %v3580_v8 = vpop.f32.mrb[3].mxu0 }
 0x24a   :  { %4456 = vtanh.f32 %v3710_v7 }
 0x24d   :  { %v2939_v10 = vpop.f32.mrb[4].mxu0 }
 0x24e   :  { %v3711_v11 = vadd.f32 %v2939_v10, %v5559_v44  ;;  %v3583_v13 = vpop.f32.mrb[5].mxu0 }
 0x24f   :  { %v2942_v14 = vpop.f32.mrb[6].mxu0 }
 0x250   :  { %4458 = vtanh.f32 %v3711_v11  ;;  %v3712_v15 = vadd.f32 %v2942_v14, %v5564_v47  ;;  %v3584_v17 = vpop.f32.mrb[7].mxu0 }
 0x252   :  { %v4455_v18 = vpop.eup %4454  ;;  %4460 = vtanh.f32 %v3712_v15 }
 0x253   :  { %3178 = vst [vmem:[%s5878_s2] sm:$0xff] %v4455_v18 }
 0x254   :  { %v4457_v37 = vpop.eup %4456 }
 0x255   :  { %3179 = vst [vmem:[%s5878_s2 + $0x8] sm:$0xff] %v4457_v37  ;;  %v2947_v0 = vpop.f32.mrb[8].mxu0 }
 0x256   :  { %v3713_v44 = vadd.f32 %v2947_v0, %v5574_v51  ;;  %v3587_v20 = vpop.f32.mrb[9].mxu0 }
 0x257   :  { %v2950_v21 = vpop.f32.mrb[10].mxu0 }
 0x258   :  { %4462 = vtanh.f32 %v3713_v44  ;;  %v3714_v47 = vadd.f32 %v2950_v21, %v5579_v54  ;;  %v3588_v22 = vpop.f32.mrb[11].mxu0 }
 0x25a   :  { %v4459_v24 = vpop.eup %4458  ;;  %4464 = vtanh.f32 %v3714_v47 }
 0x25b   :  { %3180 = vst [vmem:[%s5878_s2 + $0x10] sm:$0xff] %v4459_v24 }
 0x25c   :  { %v4461_v25 = vpop.eup %4460 }
 0x25d   :  { %3181 = vst [vmem:[%s5878_s2 + $0x18] sm:$0xff] %v4461_v25  ;;  %v2955_v27 = vpop.f32.mrb[12].mxu0 }
 0x25e   :  { %v3715_v51 = vadd.f32 %v2955_v27, %v5589_v58  ;;  %v3591_v28 = vpop.f32.mrb[13].mxu0 }
 0x25f   :  { %v2958_v29 = vpop.f32.mrb[14].mxu0 }
 0x260   :  { %4466 = vtanh.f32 %v3715_v51  ;;  %v3716_v54 = vadd.f32 %v2958_v29, %v5594_v61  ;;  %v3592_v30 = vpop.f32.mrb[15].mxu0 }
 0x262   :  { %v4463_v32 = vpop.eup %4462  ;;  %4468 = vtanh.f32 %v3716_v54 }
 0x263   :  { %3182 = vst [vmem:[%s5878_s2 + $0x20] sm:$0xff] %v4463_v32 }
 0x264   :  { %v4465_v33 = vpop.eup %4464 }
 0x265   :  { %3183 = vst [vmem:[%s5878_s2 + $0x28] sm:$0xff] %v4465_v33  ;;  %v2963_v35 = vpop.f32.mrb[16].mxu0 }
 0x266   :  { %v3717_v58 = vadd.f32 %v2963_v35, %v5604_v2  ;;  %v3595_v36 = vpop.f32.mrb[17].mxu0 }
 0x267   :  { %v2966_v39 = vpop.f32.mrb[18].mxu0 }
 0x268   :  { %4470 = vtanh.f32 %v3717_v58  ;;  %v3718_v61 = vadd.f32 %v2966_v39, %v5609_v5  ;;  %v3596_v41 = vpop.f32.mrb[19].mxu0 }
 0x26a   :  { %v4467_v42 = vpop.eup %4466  ;;  %4472 = vtanh.f32 %v3718_v61 }
 0x26b   :  { %3184 = vst [vmem:[%s5878_s2 + $0x30] sm:$0xff] %v4467_v42 }
 0x26c   :  { %v4469_v45 = vpop.eup %4468 }
 0x26d   :  { %3185 = vst [vmem:[%s5878_s2 + $0x38] sm:$0xff] %v4469_v45  ;;  %v2971_v46 = vpop.f32.mrb[20].mxu0 }
 0x26e   :  { %v3719_v2 = vadd.f32 %v2971_v46, %v5619_v9  ;;  %v3599_v49 = vpop.f32.mrb[21].mxu0 }
 0x26f   :  { %v2974_v52 = vpop.f32.mrb[22].mxu0 }
 0x270   :  { %4474 = vtanh.f32 %v3719_v2  ;;  %v3720_v5 = vadd.f32 %v2974_v52, %v5624_v12  ;;  %v3600_v53 = vpop.f32.mrb[23].mxu0 }
 0x272   :  { %v4471_v56 = vpop.eup %4470  ;;  %4476 = vtanh.f32 %v3720_v5 }
 0x273   :  { %3186 = vst [vmem:[%s5878_s2 + $0x40] sm:$0xff] %v4471_v56 }
 0x274   :  { %v4473_v59 = vpop.eup %4472 }
 0x275   :  { %3187 = vst [vmem:[%s5878_s2 + $0x48] sm:$0xff] %v4473_v59  ;;  %v2979_v38 = vpop.f32.mrb[24].mxu0 }
 0x276   :  { %v3721_v9 = vadd.f32 %v2979_v38, %v5634_v16  ;;  %v3603_v63 = vpop.f32.mrb[25].mxu0 }
 0x277   :  { %v2982_v1 = vpop.f32.mrb[26].mxu0 }
 0x278   :  { %4478 = vtanh.f32 %v3721_v9  ;;  %v3722_v12 = vadd.f32 %v2982_v1, %v5639_v19  ;;  %v3604_v3 = vpop.f32.mrb[27].mxu0 }
 0x27a   :  { %v4475_v4 = vpop.eup %4474  ;;  %4480 = vtanh.f32 %v3722_v12 }
 0x27b   :  { %3188 = vst [vmem:[%s5878_s2 + $0x50] sm:$0xff] %v4475_v4 }
 0x27c   :  { %v4477_v6 = vpop.eup %4476 }
 0x27d   :  { %3189 = vst [vmem:[%s5878_s2 + $0x58] sm:$0xff] %v4477_v6  ;;  %v2987_v7 = vpop.f32.mrb[28].mxu0 }
 0x27e   :  { %v3723_v16 = vadd.f32 %v2987_v7, %v5649_v23  ;;  %v3607_v8 = vpop.f32.mrb[29].mxu0 }
 0x27f   :  { %v2990_v10 = vpop.f32.mrb[30].mxu0 }
 0x280   :  { %4482 = vtanh.f32 %v3723_v16  ;;  %v3724_v19 = vadd.f32 %v2990_v10, %v5654_v26  ;;  %v3608_v11 = vpop.f32.mrb[31].mxu0 }
 0x282   :  { %v4479_v13 = vpop.eup %4478  ;;  %4484 = vtanh.f32 %v3724_v19 }
 0x283   :  { %3190 = vst [vmem:[%s5878_s2 + $0x60] sm:$0xff] %v4479_v13 }
 0x284   :  { %v4481_v14 = vpop.eup %4480 }
 0x285   :  { %3191 = vst [vmem:[%s5878_s2 + $0x68] sm:$0xff] %v4481_v14  ;;  %v2995_v15 = vpop.f32.mrb[32].mxu0 }
 0x286   :  { %v3725_v23 = vadd.f32 %v2995_v15, %v5667_v31  ;;  %v3611_v17 = vpop.f32.mrb[33].mxu0 }
 0x287   :  { %v2998_v18 = vpop.f32.mrb[34].mxu0 }
 0x288   :  { %4486 = vtanh.f32 %v3725_v23  ;;  %v3726_v26 = vadd.f32 %v2998_v18, %v5672_v34  ;;  %v3612_v37 = vpop.f32.mrb[35].mxu0 }
 0x28a   :  { %v4483_v0 = vpop.eup %4482  ;;  %4488 = vtanh.f32 %v3726_v26 }
 0x28b   :  { %3192 = vst [vmem:[%s5878_s2 + $0x70] sm:$0xff] %v4483_v0 }
 0x28c   :  { %v4485_v44 = vpop.eup %4484 }
 0x28d   :  { %3193 = vst [vmem:[%s5878_s2 + $0x78] sm:$0xff] %v4485_v44  ;;  %v3003_v20 = vpop.f32.mrb[36].mxu0 }
 0x28e   :  { %v3727_v31 = vadd.f32 %v3003_v20, %v5679_v40  ;;  %v3615_v21 = vpop.f32.mrb[37].mxu0 }
 0x28f   :  { %v3006_v47 = vpop.f32.mrb[38].mxu0 }
 0x290   :  { %4490 = vtanh.f32 %v3727_v31  ;;  %v3728_v34 = vadd.f32 %v3006_v47, %v5681_v43  ;;  %v3616_v22 = vpop.f32.mrb[39].mxu0 }
 0x292   :  { %v4487_v24 = vpop.eup %4486  ;;  %4492 = vtanh.f32 %v3728_v34 }
 0x293   :  { %3194 = vst [vmem:[%s5878_s2 + $0x80] sm:$0xff] %v4487_v24 }
 0x294   :  { %v4489_v25 = vpop.eup %4488 }
 0x295   :  { %3195 = vst [vmem:[%s5878_s2 + $0x88] sm:$0xff] %v4489_v25  ;;  %v3011_v27 = vpop.f32.mrb[40].mxu0 }
 0x296   :  { %v3729_v40 = vadd.f32 %v3011_v27, %v5688_v48  ;;  %v3619_v51 = vpop.f32.mrb[41].mxu0 }
 0x297   :  { %v3014_v28 = vpop.f32.mrb[42].mxu0 }
 0x298   :  { %4494 = vtanh.f32 %v3729_v40  ;;  %v3730_v43 = vadd.f32 %v3014_v28, %v5690_v50  ;;  %v3620_v29 = vpop.f32.mrb[43].mxu0 }
 0x29a   :  { %v4491_v54 = vpop.eup %4490  ;;  %4496 = vtanh.f32 %v3730_v43 }
 0x29b   :  { %3196 = vst [vmem:[%s5878_s2 + $0x90] sm:$0xff] %v4491_v54 }
 0x29c   :  { %v4493_v30 = vpop.eup %4492 }
 0x29d   :  { %3197 = vst [vmem:[%s5878_s2 + $0x98] sm:$0xff] %v4493_v30  ;;  %v3019_v32 = vpop.f32.mrb[44].mxu0 }
 0x29e   :  { %v3731_v48 = vadd.f32 %v3019_v32, %v5695_v55  ;;  %v3623_v33 = vpop.f32.mrb[45].mxu0 }
 0x29f   :  { %v3022_v35 = vpop.f32.mrb[46].mxu0 }
 0x2a0   :  { %4498 = vtanh.f32 %v3731_v48  ;;  %v3732_v50 = vadd.f32 %v3022_v35, %v5697_v57  ;;  %v3624_v58 = vpop.f32.mrb[47].mxu0 }
 0x2a2   :  { %v4495_v36 = vpop.eup %4494  ;;  %4500 = vtanh.f32 %v3732_v50 }
 0x2a3   :  { %3198 = vst [vmem:[%s5878_s2 + $0xa0] sm:$0xff] %v4495_v36 }
 0x2a4   :  { %v4497_v39 = vpop.eup %4496  ;;  %v2571_v61 = vpop.f32.mrb[52].mxu1 }
 0x2a5   :  { %3199 = vst [vmem:[%s5878_s2 + $0xa8] sm:$0xff] %v4497_v39  ;;  %v3027_v41 = vpop.f32.mrb[48].mxu0  ;;  %v2573_v55 = vpop.f32.mrb[53].mxu1 }
 0x2a6   :  { %v3733_v42 = vadd.f32 %v3027_v41, %v5699_v60  ;;  %v3627_v45 = vpop.f32.mrb[49].mxu0  ;;  %v2574_v46 = vpop.f32.mrb[54].mxu1 }
 0x2a7   :  { %v3030_v57 = vpop.f32.mrb[50].mxu0  ;;  %v2576_v2 = vpop.f32.mrb[55].mxu1 }
 0x2a8   :  { %4502 = vtanh.f32 %v3733_v42  ;;  %v3734_v49 = vadd.f32 %v3030_v57, %v5701_v62  ;;  %v3628_v52 = vpop.f32.mrb[51].mxu0 }
 0x2aa   :  { %v4499_v5 = vpop.eup %4498  ;;  %4504 = vtanh.f32 %v3734_v49 }
 0x2ab   :  { %3200 = vst [vmem:[%s5878_s2 + $0xb0] sm:$0xff] %v4499_v5 }
 0x2ac   :  { %v4501_v53 = vpop.eup %4500  ;;  %v2579_v56 = vpop.f32.mrb[56].mxu1 }
 0x2ad   :  { %3201 = vst [vmem:[%s5878_s2 + $0xb8] sm:$0xff] %v4501_v53  ;;  %v3035_v60 = vpop.f32.mrb[52].mxu0  ;;  %v2581_v59 = vpop.f32.mrb[57].mxu1 }
 0x2ae   :  { %v3735_v38 = vadd.f32 %v3035_v60, %v2571_v61  ;;  %v3631_v9 = vpop.f32.mrb[53].mxu0  ;;  %v2582_v63 = vpop.f32.mrb[58].mxu1 }
 0x2af   :  { %v3038_v1 = vpop.f32.mrb[54].mxu0  ;;  %v2584_v62 = vpop.f32.mrb[59].mxu1 }
 0x2b0   :  { %4506 = vtanh.f32 %v3735_v38  ;;  %v3736_v12 = vadd.f32 %v3038_v1, %v2574_v46  ;;  %v3632_v3 = vpop.f32.mrb[55].mxu0 }
 0x2b2   :  { %v4503_v4 = vpop.eup %4502  ;;  %4508 = vtanh.f32 %v3736_v12 }
 0x2b3   :  { %3202 = vst [vmem:[%s5878_s2 + $0xc0] sm:$0xff] %v4503_v4 }
 0x2b4   :  { %v4505_v6 = vpop.eup %4504  ;;  %v2587_v7 = vpop.f32.mrb[60].mxu1 }
 0x2b5   :  { %3203 = vst [vmem:[%s5878_s2 + $0xc8] sm:$0xff] %v4505_v6  ;;  %v3043_v16 = vpop.f32.mrb[56].mxu0  ;;  %v2589_v8 = vpop.f32.mrb[61].mxu1 }
 0x2b6   :  { %v3737_v10 = vadd.f32 %v3043_v16, %v2579_v56  ;;  %v3635_v19 = vpop.f32.mrb[57].mxu0  ;;  %v2590_v11 = vpop.f32.mrb[62].mxu1 }
 0x2b7   :  { %v3046_v13 = vpop.f32.mrb[58].mxu0  ;;  %v2592_v14 = vpop.f32.mrb[63].mxu1 }
 0x2b8   :  { %4510 = vtanh.f32 %v3737_v10  ;;  %v3738_v15 = vadd.f32 %v3046_v13, %v2582_v63  ;;  %v3636_v23 = vpop.f32.mrb[59].mxu0 }
 0x2ba   :  { %v4507_v17 = vpop.eup %4506  ;;  %4512 = vtanh.f32 %v3738_v15 }
 0x2bb   :  { %3204 = vst [vmem:[%s5878_s2 + $0xd0] sm:$0xff] %v4507_v17 }
 0x2bc   :  { %v4509_v18 = vpop.eup %4508  ;;  %v2595_v26 = vpop.f32.mrb[64].mxu1 }
 0x2bd   :  { %3205 = vst [vmem:[%s5878_s2 + $0xd8] sm:$0xff] %v4509_v18  ;;  %v3051_v37 = vpop.f32.mrb[60].mxu0  ;;  %v2597_v0 = vpop.f32.mrb[65].mxu1 }
 0x2be   :  { %v3739_v44 = vadd.f32 %v3051_v37, %v2587_v7  ;;  %v3639_v20 = vpop.f32.mrb[61].mxu0  ;;  %v2598_v31 = vpop.f32.mrb[66].mxu1 }
 0x2bf   :  { %v3054_v21 = vpop.f32.mrb[62].mxu0  ;;  %v2600_v47 = vpop.f32.mrb[67].mxu1 }
 0x2c0   :  { %4514 = vtanh.f32 %v3739_v44  ;;  %v3740_v34 = vadd.f32 %v3054_v21, %v2590_v11  ;;  %v3640_v22 = vpop.f32.mrb[63].mxu0 }
 0x2c2   :  { %v4511_v24 = vpop.eup %4510  ;;  %4516 = vtanh.f32 %v3740_v34 }
 0x2c3   :  { %3206 = vst [vmem:[%s5878_s2 + $0xe0] sm:$0xff] %v4511_v24 }
 0x2c4   :  { %v4513_v25 = vpop.eup %4512  ;;  %v2603_v27 = vpop.f32.mrb[68].mxu1 }
 0x2c5   :  { %3207 = vst [vmem:[%s5878_s2 + $0xe8] sm:$0xff] %v4513_v25  ;;  %v3059_v40 = vpop.f32.mrb[64].mxu0  ;;  %v2605_v51 = vpop.f32.mrb[69].mxu1 }
 0x2c6   :  { %v3741_v28 = vadd.f32 %v3059_v40, %v2595_v26  ;;  %v3643_v43 = vpop.f32.mrb[65].mxu0  ;;  %v2606_v29 = vpop.f32.mrb[70].mxu1 }
 0x2c7   :  { %v3062_v54 = vpop.f32.mrb[66].mxu0  ;;  %v2608_v30 = vpop.f32.mrb[71].mxu1 }
 0x2c8   :  { %4518 = vtanh.f32 %v3741_v28  ;;  %v3742_v32 = vadd.f32 %v3062_v54, %v2598_v31  ;;  %v3644_v48 = vpop.f32.mrb[67].mxu0 }
 0x2ca   :  { %v4515_v33 = vpop.eup %4514  ;;  %4520 = vtanh.f32 %v3742_v32 }
 0x2cb   :  { %3208 = vst [vmem:[%s5878_s2 + $0xf0] sm:$0xff] %v4515_v33 }
 0x2cc   :  { %v4517_v35 = vpop.eup %4516  ;;  %v2611_v50 = vpop.f32.mrb[72].mxu1 }
 0x2cd   :  { %3209 = vst [vmem:[%s5878_s2 + $0xf8] sm:$0xff] %v4517_v35  ;;  %v3067_v58 = vpop.f32.mrb[68].mxu0  ;;  %v2613_v36 = vpop.f32.mrb[73].mxu1 }
 0x2ce   :  { %v3743_v39 = vadd.f32 %v3067_v58, %v2603_v27  ;;  %v3647_v61 = vpop.f32.mrb[69].mxu0  ;;  %v2614_v41 = vpop.f32.mrb[74].mxu1 }
 0x2cf   :  { %v3070_v55 = vpop.f32.mrb[70].mxu0  ;;  %v2616_v42 = vpop.f32.mrb[75].mxu1 }
 0x2d0   :  { %4522 = vtanh.f32 %v3743_v39  ;;  %v3744_v45 = vadd.f32 %v3070_v55, %v2606_v29  ;;  %v3648_v46 = vpop.f32.mrb[71].mxu0 }
 0x2d2   :  { %v4519_v57 = vpop.eup %4518  ;;  %4524 = vtanh.f32 %v3744_v45 }
 0x2d3   :  { %3210 = vst [vmem:[%s5878_s2 + $0x100] sm:$0xff] %v4519_v57 }
 0x2d4   :  { %v4521_v2 = vpop.eup %4520  ;;  %v2619_v49 = vpop.f32.mrb[76].mxu1 }
 0x2d5   :  { %3211 = vst [vmem:[%s5878_s2 + $0x108] sm:$0xff] %v4521_v2  ;;  %v3075_v52 = vpop.f32.mrb[72].mxu0  ;;  %v2621_v5 = vpop.f32.mrb[77].mxu1 }
 0x2d6   :  { %v3745_v53 = vadd.f32 %v3075_v52, %v2611_v50  ;;  %v3651_v56 = vpop.f32.mrb[73].mxu0  ;;  %v2622_v60 = vpop.f32.mrb[78].mxu1 }
 0x2d7   :  { %v3078_v59 = vpop.f32.mrb[74].mxu0  ;;  %v2624_v38 = vpop.f32.mrb[79].mxu1 }
 0x2d8   :  { %4526 = vtanh.f32 %v3745_v53  ;;  %v3746_v9 = vadd.f32 %v3078_v59, %v2614_v41  ;;  %v3652_v63 = vpop.f32.mrb[75].mxu0 }
 0x2da   :  { %v4523_v1 = vpop.eup %4522  ;;  %4528 = vtanh.f32 %v3746_v9 }
 0x2db   :  { %3212 = vst [vmem:[%s5878_s2 + $0x110] sm:$0xff] %v4523_v1 }
 0x2dc   :  { %v4525_v62 = vpop.eup %4524  ;;  %v2627_v12 = vpop.f32.mrb[80].mxu1 }
 0x2dd   :  { %3213 = vst [vmem:[%s5878_s2 + $0x118] sm:$0xff] %v4525_v62  ;;  %v3083_v3 = vpop.f32.mrb[76].mxu0  ;;  %v2629_v4 = vpop.f32.mrb[81].mxu1 }
 0x2de   :  { %v3747_v6 = vadd.f32 %v3083_v3, %v2619_v49  ;;  %v3655_v7 = vpop.f32.mrb[77].mxu0  ;;  %v2630_v16 = vpop.f32.mrb[82].mxu1 }
 0x2df   :  { %v3086_v8 = vpop.f32.mrb[78].mxu0  ;;  %v2632_v10 = vpop.f32.mrb[83].mxu1 }
 0x2e0   :  { %4530 = vtanh.f32 %v3747_v6  ;;  %v3748_v19 = vadd.f32 %v3086_v8, %v2622_v60  ;;  %v3656_v11 = vpop.f32.mrb[79].mxu0 }
 0x2e2   :  { %v4527_v13 = vpop.eup %4526  ;;  %4532 = vtanh.f32 %v3748_v19 }
 0x2e3   :  { %3214 = vst [vmem:[%s5878_s2 + $0x120] sm:$0xff] %v4527_v13 }
 0x2e4   :  { %v4529_v14 = vpop.eup %4528  ;;  %v2635_v15 = vpop.f32.mrb[84].mxu1 }
 0x2e5   :  { %3215 = vst [vmem:[%s5878_s2 + $0x128] sm:$0xff] %v4529_v14  ;;  %v3091_v23 = vpop.f32.mrb[80].mxu0  ;;  %v2637_v17 = vpop.f32.mrb[85].mxu1 }
 0x2e6   :  { %v3749_v18 = vadd.f32 %v3091_v23, %v2627_v12  ;;  %v3659_v26 = vpop.f32.mrb[81].mxu0  ;;  %v2638_v37 = vpop.f32.mrb[86].mxu1 }
 0x2e7   :  { %v3094_v0 = vpop.f32.mrb[82].mxu0  ;;  %v2640_v44 = vpop.f32.mrb[87].mxu1 }
 0x2e8   :  { %4534 = vtanh.f32 %v3749_v18  ;;  %v3750_v20 = vadd.f32 %v3094_v0, %v2630_v16  ;;  %v3660_v31 = vpop.f32.mrb[83].mxu0 }
 0x2ea   :  { %v4531_v21 = vpop.eup %4530  ;;  %4536 = vtanh.f32 %v3750_v20 }
 0x2eb   :  { %3216 = vst [vmem:[%s5878_s2 + $0x130] sm:$0xff] %v4531_v21 }
 0x2ec   :  { %v4533_v47 = vpop.eup %4532  ;;  %v2643_v34 = vpop.f32.mrb[88].mxu1 }
 0x2ed   :  { %3217 = vst [vmem:[%s5878_s2 + $0x138] sm:$0xff] %v4533_v47  ;;  %v3099_v22 = vpop.f32.mrb[84].mxu0  ;;  %v2645_v24 = vpop.f32.mrb[89].mxu1 }
 0x2ee   :  { %v3751_v25 = vadd.f32 %v3099_v22, %v2635_v15  ;;  %v3663_v27 = vpop.f32.mrb[85].mxu0  ;;  %v2646_v40 = vpop.f32.mrb[90].mxu1 }
 0x2ef   :  { %v3102_v51 = vpop.f32.mrb[86].mxu0  ;;  %v2648_v28 = vpop.f32.mrb[91].mxu1 }
 0x2f0   :  { %4538 = vtanh.f32 %v3751_v25  ;;  %v3752_v43 = vadd.f32 %v3102_v51, %v2638_v37  ;;  %v3664_v29 = vpop.f32.mrb[87].mxu0 }
 0x2f2   :  { %v4535_v54 = vpop.eup %4534  ;;  %4540 = vtanh.f32 %v3752_v43 }
 0x2f3   :  { %3218 = vst [vmem:[%s5878_s2 + $0x140] sm:$0xff] %v4535_v54 }
 0x2f4   :  { %v4537_v30 = vpop.eup %4536  ;;  %v2651_v32 = vpop.f32.mrb[92].mxu1 }
 0x2f5   :  { %3219 = vst [vmem:[%s5878_s2 + $0x148] sm:$0xff] %v4537_v30  ;;  %v3107_v48 = vpop.f32.mrb[88].mxu0  ;;  %v2653_v33 = vpop.f32.mrb[93].mxu1 }
 0x2f6   :  { %v3753_v35 = vadd.f32 %v3107_v48, %v2643_v34  ;;  %v3667_v50 = vpop.f32.mrb[89].mxu0  ;;  %v2654_v58 = vpop.f32.mrb[94].mxu1 }
 0x2f7   :  { %v3110_v36 = vpop.f32.mrb[90].mxu0  ;;  %v2656_v39 = vpop.f32.mrb[95].mxu1 }
 0x2f8   :  { %4542 = vtanh.f32 %v3753_v35  ;;  %v3754_v61 = vadd.f32 %v3110_v36, %v2646_v40  ;;  %v3668_v41 = vpop.f32.mrb[91].mxu0 }
 0x2fa   :  { %v4539_v55 = vpop.eup %4538  ;;  %4544 = vtanh.f32 %v3754_v61 }
 0x2fb   :  { %3220 = vst [vmem:[%s5878_s2 + $0x150] sm:$0xff] %v4539_v55 }
 0x2fc   :  { %v4541_v42 = vpop.eup %4540  ;;  %v2659_v45 = vpop.f32.mrb[96].mxu1 }
 0x2fd   :  { %3221 = vst [vmem:[%s5878_s2 + $0x158] sm:$0xff] %v4541_v42  ;;  %v3115_v46 = vpop.f32.mrb[92].mxu0  ;;  %v2661_v57 = vpop.f32.mrb[97].mxu1 }
 0x2fe   :  { %v3755_v2 = vadd.f32 %v3115_v46, %v2651_v32  ;;  %v3671_v49 = vpop.f32.mrb[93].mxu0  ;;  %v2662_v52 = vpop.f32.mrb[98].mxu1 }
 0x2ff   :  { %v3118_v5 = vpop.f32.mrb[94].mxu0  ;;  %v2663_v53 = vpop.f32.mrb[99].mxu1 }
 0x300   :  { %4546 = vtanh.f32 %v3755_v2  ;;  %v3756_v56 = vadd.f32 %v3118_v5, %v2654_v58  ;;  %v3672_v60 = vpop.f32.mrb[95].mxu0 }
 0x302   :  { %v4543_v59 = vpop.eup %4542  ;;  %4548 = vtanh.f32 %v3756_v56 }
 0x303   :  { %3222 = vst [vmem:[%s5878_s2 + $0x160] sm:$0xff] %v4543_v59 }
 0x304   :  { %v4545_v38 = vpop.eup %4544 }
 0x305   :  { %3223 = vst [vmem:[%s5878_s2 + $0x168] sm:$0xff] %v4545_v38  ;;  %v3123_v9 = vpop.f32.mrb[96].mxu0 }
 0x306   :  { %v3757_v63 = vadd.f32 %v3123_v9, %v2659_v45  ;;  %v3675_v1 = vpop.f32.mrb[97].mxu0 }
 0x307   :  { %v3126_v62 = vpop.f32.mrb[98].mxu0 }
 0x308   :  { %4550 = vtanh.f32 %v3757_v63  ;;  %v3676_v12 = vpop.f32.mrb[99].mxu0 }
 0x30a   :  { %v4547_v3 = vpop.eup %4546 }
 0x30b   :  { %3224 = vst [vmem:[%s5878_s2 + $0x170] sm:$0xff] %v4547_v3 }
 0x30c   :  { %v4549_v4 = vpop.eup %4548 }
 0x30d   :  { %3225 = vst [vmem:[%s5878_s2 + $0x178] sm:$0xff] %v4549_v4 }
 0x312   :  { %v4551_v6 = vpop.eup %4550 }
 0x313   :  { %3226 = vst [vmem:[%s5878_s2 + $0x180] sm:$0xff] %v4551_v6 }

</bundles_post_ra>
